<compile_context>
chip_gen: v7x
topology: tpu7x:2x2x1
jax: 0.10.0
libtpu: 0.0.40
codegen_flags: <defaults>
</compile_context>

<pallas_src>
import jax
import jax.numpy as jnp
from jax import lax
from jax.experimental import pallas as pl
from jax.experimental.pallas import tpu as pltpu


def basic_block_kernel(xpad_ref, w1_ref, w2_ref, b1_ref, b2_ref,
                       out_ref, mid_ref):
    """Fused conv3x3 -> bn1 -> relu -> conv3x3 -> bn2 -> +identity -> relu.

    xpad_ref : (BN, H+2, W+2, Cin)   zero-padded input block (NHWC)
    w1_ref   : (3, 3*Cin, Cout)      conv1 weight, BN1-scale folded, kh major
    w2_ref   : (3, 3*Cout, Cout)     conv2 weight, BN2-scale folded, kh major
    b1_ref   : (1, Cout)             BN1 bias   (beta - mean * scale)
    b2_ref   : (1, Cout)             BN2 bias
    out_ref  : (BN, H, W, Cout)
    mid_ref  : VMEM scratch (BN, H+2, W+2, Cout) — padded conv1 output staging.
    """
    BN, H, W, Cout = out_ref.shape
    Cin = xpad_ref.shape[3]
    M = BN * H * W

    def im2col_kh(ref, kh, c):
        # Concatenate the three kw shifts along channels (kw-major, c-minor,
        # matching w.reshape(3, 3*c, Cout)); then collapse (BN,H,W) into M.
        cols = jnp.concatenate(
            [ref[:, kh:kh + H, kw:kw + W, :] for kw in range(3)], axis=-1)
        return cols.reshape(M, 3 * c)

    # ---- conv1 (BN1 scale pre-folded into w1) : 3 matmuls, K = 3*Cin ----
    acc1 = jnp.broadcast_to(b1_ref[...], (M, Cout)).astype(jnp.float32)
    for kh in range(3):
        acc1 = acc1 + jnp.dot(im2col_kh(xpad_ref, kh, Cin), w1_ref[kh],
                              preferred_element_type=jnp.float32)
    out1 = jnp.maximum(acc1, 0.0)                       # bn1 bias + relu done

    # ---- stage conv1 output into padded scratch for conv2 ----
    # Only the 1-pixel border needs zeroing; the interior is fully overwritten
    # every grid step.  (Border is re-zeroed each step so it stays correct
    # regardless of how the "parallel" batch axis is split across cores.)
    zero_row = jnp.zeros((BN, 1, W + 2, Cout), jnp.float32)
    zero_col = jnp.zeros((BN, H, 1, Cout), jnp.float32)
    mid_ref[:, 0:1, :, :] = zero_row
    mid_ref[:, H + 1:H + 2, :, :] = zero_row
    mid_ref[:, 1:H + 1, 0:1, :] = zero_col
    mid_ref[:, 1:H + 1, W + 1:W + 2, :] = zero_col
    mid_ref[:, 1:H + 1, 1:W + 1, :] = out1.reshape(BN, H, W, Cout)

    # ---- conv2 (BN2 scale pre-folded into w2) : 3 matmuls, K = 3*Cout ----
    acc2 = jnp.broadcast_to(b2_ref[...], (M, Cout)).astype(jnp.float32)
    for kh in range(3):
        acc2 = acc2 + jnp.dot(im2col_kh(mid_ref, kh, Cout), w2_ref[kh],
                              preferred_element_type=jnp.float32)

    # ---- residual add + relu ----
    identity = xpad_ref[:, 1:H + 1, 1:W + 1, :].reshape(M, Cin)
    out = jnp.maximum(acc2 + identity, 0.0)
    out_ref[...] = out.reshape(BN, H, W, Cout).astype(out_ref.dtype)


def _bn_affine(gamma, beta, mean, var, eps=1e-5):
    scale = gamma / jnp.sqrt(var + eps)
    bias = beta - mean * scale
    return scale, bias


def _pick_block_n(n, h, w, c, budget_bytes=24 * 1024 * 1024):
    """Largest divisor of n whose per-step VMEM footprint fits a conservative
    budget (safe for v5e/v6e default scoped VMEM and v7x's 64 MiB physical)."""
    # ~ 2x double-buffered input + padded scratch + 2x output, f32 bytes.
    per_img = 4 * c * (3 * (h + 2) * (w + 2) + 2 * h * w)
    max_b = max(1, budget_bytes // max(per_img, 1))
    for b in range(min(n, max_b), 0, -1):
        if n % b == 0:
            return b
    return 1


def basic_block_forward(x_nchw, w1, w2, bn1, bn2, *, block_n=None):
    """x_nchw: (N, C, H, W).  w1/w2: HWIO (3,3,Cin,Cout).  bn*: (gamma, beta, mean, var)."""
    N, C, H, W = x_nchw.shape
    Cout = w1.shape[-1]
    # Residual add reuses the raw input: requires Cin == Cout, stride=1, no downsample.
    assert Cout == C, "BasicBlock without downsample requires inplanes == planes"
    assert w1.shape == (3, 3, C, Cout) and w2.shape == (3, 3, Cout, Cout)

    x = jnp.transpose(x_nchw, (0, 2, 3, 1)).astype(jnp.float32)        # NHWC
    xpad = jnp.pad(x, ((0, 0), (1, 1), (1, 1), (0, 0)))                # (N, H+2, W+2, C)

    s1, b1 = _bn_affine(*bn1)
    s2, b2 = _bn_affine(*bn2)
    # Fold BN scale into the conv output channels; reshape to (kh, kw*Cin, Cout)
    # so each kh tap is one K=3*Cin matmul inside the kernel.
    w1f = (w1 * s1.reshape(1, 1, 1, -1)).astype(jnp.float32).reshape(3, 3 * C, Cout)
    w2f = (w2 * s2.reshape(1, 1, 1, -1)).astype(jnp.float32).reshape(3, 3 * Cout, Cout)
    b1 = b1.reshape(1, Cout).astype(jnp.float32)
    b2 = b2.reshape(1, Cout).astype(jnp.float32)

    if block_n is None:
        block_n = _pick_block_n(N, H, W, C)
    assert N % block_n == 0

    out_nhwc = pl.pallas_call(
        basic_block_kernel,
        out_shape=jax.ShapeDtypeStruct((N, H, W, Cout), jnp.float32),
        grid=(N // block_n,),
        in_specs=[
            pl.BlockSpec((block_n, H + 2, W + 2, C), lambda i: (i, 0, 0, 0)),
            pl.BlockSpec((3, 3 * C, Cout), lambda i: (0, 0, 0)),
            pl.BlockSpec((3, 3 * Cout, Cout), lambda i: (0, 0, 0)),
            pl.BlockSpec((1, Cout), lambda i: (0, 0)),
            pl.BlockSpec((1, Cout), lambda i: (0, 0)),
        ],
        out_specs=pl.BlockSpec((block_n, H, W, Cout), lambda i: (i, 0, 0, 0)),
        scratch_shapes=[pltpu.VMEM((block_n, H + 2, W + 2, Cout), jnp.float32)],
        compiler_params=pltpu.CompilerParams(
            dimension_semantics=("parallel",)),   # batch images are independent
    )(xpad, w1f, w2f, b1, b2)

    return jnp.transpose(out_nhwc, (0, 3, 1, 2))                       # back to NCHW


def basic_block_reference(x_nchw, w1, w2, bn1, bn2):
    """Pure-JAX reference (eval-mode BN), for validating the kernel."""
    x = jnp.transpose(x_nchw, (0, 2, 3, 1))
    dn = ('NHWC', 'HWIO', 'NHWC')
    s1, b1 = _bn_affine(*bn1)
    s2, b2 = _bn_affine(*bn2)
    out = lax.conv_general_dilated(x, w1, (1, 1), ((1, 1), (1, 1)),
                                   dimension_numbers=dn)
    out = jnp.maximum(out * s1.reshape(1, 1, 1, -1) + b1.reshape(1, 1, 1, -1), 0.0)
    out = lax.conv_general_dilated(out, w2, (1, 1), ((1, 1), (1, 1)),
                                   dimension_numbers=dn)
    out = out * s2.reshape(1, 1, 1, -1) + b2.reshape(1, 1, 1, -1)
    out = jnp.maximum(out + x, 0.0)
    return jnp.transpose(out, (0, 3, 1, 2))


if __name__ == "__main__":
    # BasicBlock(inplanes=4, planes=4, stride=1, downsample=None)
    N, C, H, W = 2, 4, 16, 16
    key = jax.random.PRNGKey(0)
    ks = jax.random.split(key, 11)

    x = jax.random.normal(ks[0], (N, C, H, W), jnp.float32)

    # conv weights in HWIO (PyTorch stores OIHW; values are synthetic anyway).
    w1 = 0.1 * jax.random.normal(ks[1], (3, 3, C, C), jnp.float32)
    w2 = 0.1 * jax.random.normal(ks[2], (3, 3, C, C), jnp.float32)

    bn1 = (1.0 + 0.1 * jax.random.normal(ks[3], (C,), jnp.float32),       # gamma
           0.1 * jax.random.normal(ks[4], (C,), jnp.float32),             # beta
           0.1 * jax.random.normal(ks[5], (C,), jnp.float32),             # running_mean
           jnp.abs(jax.random.normal(ks[6], (C,), jnp.float32)) + 0.5)    # running_var
    bn2 = (1.0 + 0.1 * jax.random.normal(ks[7], (C,), jnp.float32),
           0.1 * jax.random.normal(ks[8], (C,), jnp.float32),
           0.1 * jax.random.normal(ks[9], (C,), jnp.float32),
           jnp.abs(jax.random.normal(ks[10], (C,), jnp.float32)) + 0.5)

    out = basic_block_forward(x, w1, w2, bn1, bn2)
    out = jax.block_until_ready(out)

    ref = basic_block_reference(x, w1, w2, bn1, bn2)
    assert out.shape == (N, C, H, W)
    assert jnp.allclose(out, ref, atol=1e-4, rtol=1e-4), "kernel mismatch vs reference"

    print("KERNEL_OK")
</pallas_src>

<mosaic_0001>
module attributes {stable_mosaic.version = 11 : i64} {
  func.func @basic_block_kernel(%arg0: i32, %arg1: memref<2x18x18x4xf32, #tpu.memory_space<vmem>>, %arg2: memref<3x12x4xf32, #tpu.memory_space<vmem>>, %arg3: memref<3x12x4xf32, #tpu.memory_space<vmem>>, %arg4: memref<1x4xf32, #tpu.memory_space<vmem>>, %arg5: memref<1x4xf32, #tpu.memory_space<vmem>>, %arg6: memref<2x16x16x4xf32, #tpu.memory_space<vmem>>, %arg7: memref<2x18x18x4xf32, #tpu.memory_space<vmem>>) attributes {dimension_semantics = [#tpu.dimension_semantics<parallel>], iteration_bounds = array<i64: 1>, scalar_prefetch = 0 : i64, scratch_operands = 1 : i64, tpu.core_type = #tpu.core_type<tc>, window_params = [{transform_indices = @transform_0, window_bounds = array<i64: 2, 18, 18, 4>}, {pipeline_mode = #tpu.pipeline_mode<synchronous>, transform_indices = @transform_1, window_bounds = array<i64: 3, 12, 4>}, {pipeline_mode = #tpu.pipeline_mode<synchronous>, transform_indices = @transform_2, window_bounds = array<i64: 3, 12, 4>}, {pipeline_mode = #tpu.pipeline_mode<synchronous>, transform_indices = @transform_3, window_bounds = array<i64: 1, 4>}, {pipeline_mode = #tpu.pipeline_mode<synchronous>, transform_indices = @transform_4, window_bounds = array<i64: 1, 4>}, {transform_indices = @transform_5, window_bounds = array<i64: 2, 16, 16, 4>}]} {
    %c0 = arith.constant 0 : index
    %c0_0 = arith.constant 0 : index
    %0 = vector.load %arg4[%c0, %c0_0] : memref<1x4xf32, #tpu.memory_space<vmem>>, vector<1x4xf32>
    %1 = vector.shape_cast %0 : vector<1x4xf32> to vector<1x4xf32>
    %2 = vector.broadcast %1 : vector<1x4xf32> to vector<512x4xf32>
    %c0_1 = arith.constant 0 : index
    %c0_2 = arith.constant 0 : index
    %c0_3 = arith.constant 0 : index
    %c0_4 = arith.constant 0 : index
    %3 = vector.load %arg1[%c0_1, %c0_2, %c0_3, %c0_4] : memref<2x18x18x4xf32, #tpu.memory_space<vmem>>, vector<2x16x16x4xf32>
    %c0_5 = arith.constant 0 : index
    %c0_6 = arith.constant 0 : index
    %c1 = arith.constant 1 : index
    %c0_7 = arith.constant 0 : index
    %4 = vector.load %arg1[%c0_5, %c0_6, %c1, %c0_7] : memref<2x18x18x4xf32, #tpu.memory_space<vmem>>, vector<2x16x16x4xf32>
    %c0_8 = arith.constant 0 : index
    %c0_9 = arith.constant 0 : index
    %c2 = arith.constant 2 : index
    %c0_10 = arith.constant 0 : index
    %5 = vector.load %arg1[%c0_8, %c0_9, %c2, %c0_10] : memref<2x18x18x4xf32, #tpu.memory_space<vmem>>, vector<2x16x16x4xf32>
    %6 = tpu.concatenate %3, %4, %5 in 3 : vector<2x16x16x4xf32>, vector<2x16x16x4xf32>, vector<2x16x16x4xf32> -> vector<2x16x16x12xf32>
    %7 = vector.shape_cast %6 : vector<2x16x16x12xf32> to vector<512x12xf32>
    %c0_11 = arith.constant 0 : index
    %c0_12 = arith.constant 0 : index
    %c0_13 = arith.constant 0 : index
    %8 = vector.load %arg2[%c0_11, %c0_12, %c0_13] : memref<3x12x4xf32, #tpu.memory_space<vmem>>, vector<1x12x4xf32>
    %9 = vector.shape_cast %8 : vector<1x12x4xf32> to vector<12x4xf32>
    %cst = arith.constant dense<0.000000e+00> : vector<512x4xf32>
    %10 = tpu.matmul %7, %9, %cst {dimension_numbers = #tpu.dot_dimension_numbers<[1], [0], [0], [1], [0, 0, 1, 1], [], []>} : vector<512x12xf32>, vector<12x4xf32>, vector<512x4xf32> -> vector<512x4xf32>
    %11 = arith.addf %2, %10 : vector<512x4xf32>
    %c0_14 = arith.constant 0 : index
    %c1_15 = arith.constant 1 : index
    %c0_16 = arith.constant 0 : index
    %c0_17 = arith.constant 0 : index
    %12 = vector.load %arg1[%c0_14, %c1_15, %c0_16, %c0_17] : memref<2x18x18x4xf32, #tpu.memory_space<vmem>>, vector<2x16x16x4xf32>
    %c0_18 = arith.constant 0 : index
    %c1_19 = arith.constant 1 : index
    %c1_20 = arith.constant 1 : index
    %c0_21 = arith.constant 0 : index
    %13 = vector.load %arg1[%c0_18, %c1_19, %c1_20, %c0_21] : memref<2x18x18x4xf32, #tpu.memory_space<vmem>>, vector<2x16x16x4xf32>
    %c0_22 = arith.constant 0 : index
    %c1_23 = arith.constant 1 : index
    %c2_24 = arith.constant 2 : index
    %c0_25 = arith.constant 0 : index
    %14 = vector.load %arg1[%c0_22, %c1_23, %c2_24, %c0_25] : memref<2x18x18x4xf32, #tpu.memory_space<vmem>>, vector<2x16x16x4xf32>
    %15 = tpu.concatenate %12, %13, %14 in 3 : vector<2x16x16x4xf32>, vector<2x16x16x4xf32>, vector<2x16x16x4xf32> -> vector<2x16x16x12xf32>
    %16 = vector.shape_cast %15 : vector<2x16x16x12xf32> to vector<512x12xf32>
    %c1_26 = arith.constant 1 : index
    %c0_27 = arith.constant 0 : index
    %c0_28 = arith.constant 0 : index
    %17 = vector.load %arg2[%c1_26, %c0_27, %c0_28] : memref<3x12x4xf32, #tpu.memory_space<vmem>>, vector<1x12x4xf32>
    %18 = vector.shape_cast %17 : vector<1x12x4xf32> to vector<12x4xf32>
    %cst_29 = arith.constant dense<0.000000e+00> : vector<512x4xf32>
    %19 = tpu.matmul %16, %18, %cst_29 {dimension_numbers = #tpu.dot_dimension_numbers<[1], [0], [0], [1], [0, 0, 1, 1], [], []>} : vector<512x12xf32>, vector<12x4xf32>, vector<512x4xf32> -> vector<512x4xf32>
    %20 = arith.addf %11, %19 : vector<512x4xf32>
    %c0_30 = arith.constant 0 : index
    %c2_31 = arith.constant 2 : index
    %c0_32 = arith.constant 0 : index
    %c0_33 = arith.constant 0 : index
    %21 = vector.load %arg1[%c0_30, %c2_31, %c0_32, %c0_33] : memref<2x18x18x4xf32, #tpu.memory_space<vmem>>, vector<2x16x16x4xf32>
    %c0_34 = arith.constant 0 : index
    %c2_35 = arith.constant 2 : index
    %c1_36 = arith.constant 1 : index
    %c0_37 = arith.constant 0 : index
    %22 = vector.load %arg1[%c0_34, %c2_35, %c1_36, %c0_37] : memref<2x18x18x4xf32, #tpu.memory_space<vmem>>, vector<2x16x16x4xf32>
    %c0_38 = arith.constant 0 : index
    %c2_39 = arith.constant 2 : index
    %c2_40 = arith.constant 2 : index
    %c0_41 = arith.constant 0 : index
    %23 = vector.load %arg1[%c0_38, %c2_39, %c2_40, %c0_41] : memref<2x18x18x4xf32, #tpu.memory_space<vmem>>, vector<2x16x16x4xf32>
    %24 = tpu.concatenate %21, %22, %23 in 3 : vector<2x16x16x4xf32>, vector<2x16x16x4xf32>, vector<2x16x16x4xf32> -> vector<2x16x16x12xf32>
    %25 = vector.shape_cast %24 : vector<2x16x16x12xf32> to vector<512x12xf32>
    %c2_42 = arith.constant 2 : index
    %c0_43 = arith.constant 0 : index
    %c0_44 = arith.constant 0 : index
    %26 = vector.load %arg2[%c2_42, %c0_43, %c0_44] : memref<3x12x4xf32, #tpu.memory_space<vmem>>, vector<1x12x4xf32>
    %27 = vector.shape_cast %26 : vector<1x12x4xf32> to vector<12x4xf32>
    %cst_45 = arith.constant dense<0.000000e+00> : vector<512x4xf32>
    %28 = tpu.matmul %25, %27, %cst_45 {dimension_numbers = #tpu.dot_dimension_numbers<[1], [0], [0], [1], [0, 0, 1, 1], [], []>} : vector<512x12xf32>, vector<12x4xf32>, vector<512x4xf32> -> vector<512x4xf32>
    %29 = arith.addf %20, %28 : vector<512x4xf32>
    %cst_46 = arith.constant 0.000000e+00 : f32
    %30 = vector.broadcast %cst_46 : f32 to vector<512x4xf32>
    %31 = arith.maximumf %29, %30 : vector<512x4xf32>
    %cst_47 = arith.constant 0.000000e+00 : f32
    %32 = vector.broadcast %cst_47 : f32 to vector<2x1x18x4xf32>
    %cst_48 = arith.constant 0.000000e+00 : f32
    %33 = vector.broadcast %cst_48 : f32 to vector<2x16x1x4xf32>
    %c0_49 = arith.constant 0 : index
    %c0_50 = arith.constant 0 : index
    %c0_51 = arith.constant 0 : index
    %c0_52 = arith.constant 0 : index
    %34 = vector.load %arg7[%c0_49, %c0_50, %c0_51, %c0_52] : memref<2x18x18x4xf32, #tpu.memory_space<vmem>>, vector<2x1x18x4xf32>
    tpu.vector_store %arg7[%c0_49, %c0_50, %c0_51, %c0_52], %32 {strides = array<i32>} : memref<2x18x18x4xf32, #tpu.memory_space<vmem>>, vector<2x1x18x4xf32>,
    %c0_53 = arith.constant 0 : index
    %c17 = arith.constant 17 : index
    %c0_54 = arith.constant 0 : index
    %c0_55 = arith.constant 0 : index
    %35 = vector.load %arg7[%c0_53, %c17, %c0_54, %c0_55] : memref<2x18x18x4xf32, #tpu.memory_space<vmem>>, vector<2x1x18x4xf32>
    tpu.vector_store %arg7[%c0_53, %c17, %c0_54, %c0_55], %32 {strides = array<i32>} : memref<2x18x18x4xf32, #tpu.memory_space<vmem>>, vector<2x1x18x4xf32>,
    %c0_56 = arith.constant 0 : index
    %c1_57 = arith.constant 1 : index
    %c0_58 = arith.constant 0 : index
    %c0_59 = arith.constant 0 : index
    %36 = vector.load %arg7[%c0_56, %c1_57, %c0_58, %c0_59] : memref<2x18x18x4xf32, #tpu.memory_space<vmem>>, vector<2x16x1x4xf32>
    tpu.vector_store %arg7[%c0_56, %c1_57, %c0_58, %c0_59], %33 {strides = array<i32>} : memref<2x18x18x4xf32, #tpu.memory_space<vmem>>, vector<2x16x1x4xf32>,
    %c0_60 = arith.constant 0 : index
    %c1_61 = arith.constant 1 : index
    %c17_62 = arith.constant 17 : index
    %c0_63 = arith.constant 0 : index
    %37 = vector.load %arg7[%c0_60, %c1_61, %c17_62, %c0_63] : memref<2x18x18x4xf32, #tpu.memory_space<vmem>>, vector<2x16x1x4xf32>
    tpu.vector_store %arg7[%c0_60, %c1_61, %c17_62, %c0_63], %33 {strides = array<i32>} : memref<2x18x18x4xf32, #tpu.memory_space<vmem>>, vector<2x16x1x4xf32>,
    %38 = vector.shape_cast %31 : vector<512x4xf32> to vector<2x16x16x4xf32>
    %c0_64 = arith.constant 0 : index
    %c1_65 = arith.constant 1 : index
    %c1_66 = arith.constant 1 : index
    %c0_67 = arith.constant 0 : index
    %39 = vector.load %arg7[%c0_64, %c1_65, %c1_66, %c0_67] : memref<2x18x18x4xf32, #tpu.memory_space<vmem>>, vector<2x16x16x4xf32>
    tpu.vector_store %arg7[%c0_64, %c1_65, %c1_66, %c0_67], %38 {strides = array<i32>} : memref<2x18x18x4xf32, #tpu.memory_space<vmem>>, vector<2x16x16x4xf32>,
    %c0_68 = arith.constant 0 : index
    %c0_69 = arith.constant 0 : index
    %40 = vector.load %arg5[%c0_68, %c0_69] : memref<1x4xf32, #tpu.memory_space<vmem>>, vector<1x4xf32>
    %41 = vector.shape_cast %40 : vector<1x4xf32> to vector<1x4xf32>
    %42 = vector.broadcast %41 : vector<1x4xf32> to vector<512x4xf32>
    %c0_70 = arith.constant 0 : index
    %c0_71 = arith.constant 0 : index
    %c0_72 = arith.constant 0 : index
    %c0_73 = arith.constant 0 : index
    %43 = vector.load %arg7[%c0_70, %c0_71, %c0_72, %c0_73] : memref<2x18x18x4xf32, #tpu.memory_space<vmem>>, vector<2x16x16x4xf32>
    %c0_74 = arith.constant 0 : index
    %c0_75 = arith.constant 0 : index
    %c1_76 = arith.constant 1 : index
    %c0_77 = arith.constant 0 : index
    %44 = vector.load %arg7[%c0_74, %c0_75, %c1_76, %c0_77] : memref<2x18x18x4xf32, #tpu.memory_space<vmem>>, vector<2x16x16x4xf32>
    %c0_78 = arith.constant 0 : index
    %c0_79 = arith.constant 0 : index
    %c2_80 = arith.constant 2 : index
    %c0_81 = arith.constant 0 : index
    %45 = vector.load %arg7[%c0_78, %c0_79, %c2_80, %c0_81] : memref<2x18x18x4xf32, #tpu.memory_space<vmem>>, vector<2x16x16x4xf32>
    %46 = tpu.concatenate %43, %44, %45 in 3 : vector<2x16x16x4xf32>, vector<2x16x16x4xf32>, vector<2x16x16x4xf32> -> vector<2x16x16x12xf32>
    %47 = vector.shape_cast %46 : vector<2x16x16x12xf32> to vector<512x12xf32>
    %c0_82 = arith.constant 0 : index
    %c0_83 = arith.constant 0 : index
    %c0_84 = arith.constant 0 : index
    %48 = vector.load %arg3[%c0_82, %c0_83, %c0_84] : memref<3x12x4xf32, #tpu.memory_space<vmem>>, vector<1x12x4xf32>
    %49 = vector.shape_cast %48 : vector<1x12x4xf32> to vector<12x4xf32>
    %cst_85 = arith.constant dense<0.000000e+00> : vector<512x4xf32>
    %50 = tpu.matmul %47, %49, %cst_85 {dimension_numbers = #tpu.dot_dimension_numbers<[1], [0], [0], [1], [0, 0, 1, 1], [], []>} : vector<512x12xf32>, vector<12x4xf32>, vector<512x4xf32> -> vector<512x4xf32>
    %51 = arith.addf %42, %50 : vector<512x4xf32>
    %c0_86 = arith.constant 0 : index
    %c1_87 = arith.constant 1 : index
    %c0_88 = arith.constant 0 : index
    %c0_89 = arith.constant 0 : index
    %52 = vector.load %arg7[%c0_86, %c1_87, %c0_88, %c0_89] : memref<2x18x18x4xf32, #tpu.memory_space<vmem>>, vector<2x16x16x4xf32>
    %c0_90 = arith.constant 0 : index
    %c1_91 = arith.constant 1 : index
    %c1_92 = arith.constant 1 : index
    %c0_93 = arith.constant 0 : index
    %53 = vector.load %arg7[%c0_90, %c1_91, %c1_92, %c0_93] : memref<2x18x18x4xf32, #tpu.memory_space<vmem>>, vector<2x16x16x4xf32>
    %c0_94 = arith.constant 0 : index
    %c1_95 = arith.constant 1 : index
    %c2_96 = arith.constant 2 : index
    %c0_97 = arith.constant 0 : index
    %54 = vector.load %arg7[%c0_94, %c1_95, %c2_96, %c0_97] : memref<2x18x18x4xf32, #tpu.memory_space<vmem>>, vector<2x16x16x4xf32>
    %55 = tpu.concatenate %52, %53, %54 in 3 : vector<2x16x16x4xf32>, vector<2x16x16x4xf32>, vector<2x16x16x4xf32> -> vector<2x16x16x12xf32>
    %56 = vector.shape_cast %55 : vector<2x16x16x12xf32> to vector<512x12xf32>
    %c1_98 = arith.constant 1 : index
    %c0_99 = arith.constant 0 : index
    %c0_100 = arith.constant 0 : index
    %57 = vector.load %arg3[%c1_98, %c0_99, %c0_100] : memref<3x12x4xf32, #tpu.memory_space<vmem>>, vector<1x12x4xf32>
    %58 = vector.shape_cast %57 : vector<1x12x4xf32> to vector<12x4xf32>
    %cst_101 = arith.constant dense<0.000000e+00> : vector<512x4xf32>
    %59 = tpu.matmul %56, %58, %cst_101 {dimension_numbers = #tpu.dot_dimension_numbers<[1], [0], [0], [1], [0, 0, 1, 1], [], []>} : vector<512x12xf32>, vector<12x4xf32>, vector<512x4xf32> -> vector<512x4xf32>
    %60 = arith.addf %51, %59 : vector<512x4xf32>
    %c0_102 = arith.constant 0 : index
    %c2_103 = arith.constant 2 : index
    %c0_104 = arith.constant 0 : index
    %c0_105 = arith.constant 0 : index
    %61 = vector.load %arg7[%c0_102, %c2_103, %c0_104, %c0_105] : memref<2x18x18x4xf32, #tpu.memory_space<vmem>>, vector<2x16x16x4xf32>
    %c0_106 = arith.constant 0 : index
    %c2_107 = arith.constant 2 : index
    %c1_108 = arith.constant 1 : index
    %c0_109 = arith.constant 0 : index
    %62 = vector.load %arg7[%c0_106, %c2_107, %c1_108, %c0_109] : memref<2x18x18x4xf32, #tpu.memory_space<vmem>>, vector<2x16x16x4xf32>
    %c0_110 = arith.constant 0 : index
    %c2_111 = arith.constant 2 : index
    %c2_112 = arith.constant 2 : index
    %c0_113 = arith.constant 0 : index
    %63 = vector.load %arg7[%c0_110, %c2_111, %c2_112, %c0_113] : memref<2x18x18x4xf32, #tpu.memory_space<vmem>>, vector<2x16x16x4xf32>
    %64 = tpu.concatenate %61, %62, %63 in 3 : vector<2x16x16x4xf32>, vector<2x16x16x4xf32>, vector<2x16x16x4xf32> -> vector<2x16x16x12xf32>
    %65 = vector.shape_cast %64 : vector<2x16x16x12xf32> to vector<512x12xf32>
    %c2_114 = arith.constant 2 : index
    %c0_115 = arith.constant 0 : index
    %c0_116 = arith.constant 0 : index
    %66 = vector.load %arg3[%c2_114, %c0_115, %c0_116] : memref<3x12x4xf32, #tpu.memory_space<vmem>>, vector<1x12x4xf32>
    %67 = vector.shape_cast %66 : vector<1x12x4xf32> to vector<12x4xf32>
    %cst_117 = arith.constant dense<0.000000e+00> : vector<512x4xf32>
    %68 = tpu.matmul %65, %67, %cst_117 {dimension_numbers = #tpu.dot_dimension_numbers<[1], [0], [0], [1], [0, 0, 1, 1], [], []>} : vector<512x12xf32>, vector<12x4xf32>, vector<512x4xf32> -> vector<512x4xf32>
    %69 = arith.addf %60, %68 : vector<512x4xf32>
    %c0_118 = arith.constant 0 : index
    %c1_119 = arith.constant 1 : index
    %c1_120 = arith.constant 1 : index
    %c0_121 = arith.constant 0 : index
    %70 = vector.load %arg1[%c0_118, %c1_119, %c1_120, %c0_121] : memref<2x18x18x4xf32, #tpu.memory_space<vmem>>, vector<2x16x16x4xf32>
    %71 = vector.shape_cast %70 : vector<2x16x16x4xf32> to vector<512x4xf32>
    %72 = arith.addf %69, %71 : vector<512x4xf32>
    %cst_122 = arith.constant 0.000000e+00 : f32
    %73 = vector.broadcast %cst_122 : f32 to vector<512x4xf32>
    %74 = arith.maximumf %72, %73 : vector<512x4xf32>
    %75 = vector.shape_cast %74 : vector<512x4xf32> to vector<2x16x16x4xf32>
    %c0_123 = arith.constant 0 : index
    %c0_124 = arith.constant 0 : index
    %c0_125 = arith.constant 0 : index
    %c0_126 = arith.constant 0 : index
    %76 = vector.load %arg6[%c0_123, %c0_124, %c0_125, %c0_126] : memref<2x16x16x4xf32, #tpu.memory_space<vmem>>, vector<2x16x16x4xf32>
    tpu.vector_store %arg6[%c0_123, %c0_124, %c0_125, %c0_126], %75 {strides = array<i32>} : memref<2x16x16x4xf32, #tpu.memory_space<vmem>>, vector<2x16x16x4xf32>,
    return
  }
  func.func @transform_0(%arg0: i32) -> (i32, i32, i32, i32) {
    %c0_i32 = arith.constant 0 : i32
    %c0_i32_0 = arith.constant 0 : i32
    %c0_i32_1 = arith.constant 0 : i32
    %c0_i32_2 = arith.constant 0 : i32
    return %arg0, %c0_i32, %c0_i32_0, %c0_i32_1 : i32, i32, i32, i32
  }
  func.func @transform_1(%arg0: i32) -> (i32, i32, i32) {
    %c0_i32 = arith.constant 0 : i32
    %c0_i32_0 = arith.constant 0 : i32
    %c0_i32_1 = arith.constant 0 : i32
    %c0_i32_2 = arith.constant 0 : i32
    return %c0_i32, %c0_i32_0, %c0_i32_1 : i32, i32, i32
  }
  func.func @transform_2(%arg0: i32) -> (i32, i32, i32) {
    %c0_i32 = arith.constant 0 : i32
    %c0_i32_0 = arith.constant 0 : i32
    %c0_i32_1 = arith.constant 0 : i32
    %c0_i32_2 = arith.constant 0 : i32
    return %c0_i32, %c0_i32_0, %c0_i32_1 : i32, i32, i32
  }
  func.func @transform_3(%arg0: i32) -> (i32, i32) {
    %c0_i32 = arith.constant 0 : i32
    %c0_i32_0 = arith.constant 0 : i32
    %c0_i32_1 = arith.constant 0 : i32
    return %c0_i32, %c0_i32_0 : i32, i32
  }
  func.func @transform_4(%arg0: i32) -> (i32, i32) {
    %c0_i32 = arith.constant 0 : i32
    %c0_i32_0 = arith.constant 0 : i32
    %c0_i32_1 = arith.constant 0 : i32
    return %c0_i32, %c0_i32_0 : i32, i32
  }
  func.func @transform_5(%arg0: i32) -> (i32, i32, i32, i32) {
    %c0_i32 = arith.constant 0 : i32
    %c0_i32_0 = arith.constant 0 : i32
    %c0_i32_1 = arith.constant 0 : i32
    %c0_i32_2 = arith.constant 0 : i32
    return %arg0, %c0_i32, %c0_i32_0, %c0_i32_1 : i32, i32, i32, i32
  }
}

</mosaic_0001>

<bundles_post_ra>
// kernel: tpu_custom_call.1
= control target key start
LH: loop header
LB: loop body
LE: loop exit
PB: predicated region body
PF: predicated region fallthrough
CT: control target
= control target key end

     0   :  { %s11655_s22 = smov 4   ;;  %vm1056_vm0 = vcmask 1043456   ;;  %vm11656_vm1 = vmmov 1   ;;  %v17022_v61 = vmov 0  ;;  %s11657_s10 = smov 8   ;;  %vm731_vm3 = vcmask 31744   ;;  %s17000_s0 = inlined_call_operand.vmem [shape: f32[2,18,18,4], index: 0, kind: input, shape index: {}]   ;;  %s17001_s1 = inlined_call_operand.vmem [shape: f32[3,12,4], index: 1, kind: input, shape index: {}]   ;;  %s17002_s3 = inlined_call_operand.vmem [shape: f32[1,4], index: 3, kind: input, shape index: {}]   ;;  %s17003_s2 = inlined_call_operand.vmem [shape: f32[3,12,4], index: 2, kind: input, shape index: {}]   ;;  %s17004_s4 = inlined_call_operand.vmem [shape: f32[1,4], index: 4, kind: input, shape index: {}]   ;;  %s17005_s5 = inlined_call_operand.vmem [shape: f32[2,16,16,4], index: 5, kind: output, shape index: {}]  }
   0x1   :  { %v11692_v0 = vld [vmem:[%s17000_s0 + $0x19] sm:$0xff]  ;;  %v91_v1 = vld [vmem:[%s17000_s0 + $0x1] sm:$0xff]  ;;  %v92_v3 = vld [vmem:[%s17000_s0 + $0x9] sm:$0xff]  ;;  %vm796_vm4 = vcmask 64512   ;;  %vm863_vm5 = vcmask 97280   ;;  %vm4535_vm6 = vcmask 25600  }
   0x2   :  { %287 = vrot.lane.b32.xlu1 %v11692_v0, %s11655_s22  ;;  %283 = vrot.lane.b32.xlu0 %v91_v1, %s11655_s22  ;;  %v11703_v2 = vld [vmem:[%s17000_s0 + $0x21] sm:$0xff]  ;;  %v11714_v4 = vld [vmem:[%s17000_s0 + $0x39] sm:$0xff]  ;;  %vm11963_vm2 = vmpackc.low %vm1056_vm0, %vm11656_vm1  ;;  %vm4548_vm7 = vcmask 24576  }
   0x3   :  { %v11719_v5 = vld [vmem:[%s17000_s0 + $0x31] sm:$0xff]  ;;  %v11733_v7 = vld [vmem:[%s17000_s0 + $0x49] sm:$0xff]  ;;  %v11747_v9 = vld [vmem:[%s17000_s0 + $0x61] sm:$0xff]  ;;  %v17023_v61 = vsel %vm11963_vm2, 4294967295, %v17022_v61 }
   0x4   :  { %v11728_v6 = vld [vmem:[%s17000_s0 + $0x51] sm:$0xff]  ;;  %v11742_v8 = vld [vmem:[%s17000_s0 + $0x69] sm:$0xff]  ;;  %v11756_v10 = vld [vmem:[%s17000_s0 + $0x81] sm:$0xff]  ;;  %17024 = vst [vmem:[#allocation3_spill] sm:$0xff] %v17023_v61 }
   0x5   :  { %v11761_v11 = vld [vmem:[%s17000_s0 + $0x79] sm:$0xff]  ;;  %v11775_v13 = vld [vmem:[%s17000_s0 + $0x91] sm:$0xff]  ;;  %v105_v15 = vld [vmem:[%s17000_s0 + $0xa9] sm:$0xff] }
   0x6   :  { %289 = vrot.lane.b32.xlu1 %v11703_v2, %s11655_s22  ;;  %285 = vrot.lane.b32.xlu0 %v92_v3, %s11655_s22  ;;  %v11770_v12 = vld [vmem:[%s17000_s0 + $0x99] sm:$0xff]  ;;  %v106_v14 = vld [vmem:[%s17000_s0 + $0xb1] sm:$0xff] }
   0x7   :  { %v108_v16 = vld [vmem:[%s17000_s0 + $0xc9] sm:$0xff]  ;;  %v107_v17 = vld [vmem:[%s17000_s0 + $0xc1] sm:$0xff]  ;;  %v109_v19 = vld [vmem:[%s17000_s0 + $0xd9] sm:$0xff] }
   0x8   :  { %v110_v18 = vld [vmem:[%s17000_s0 + $0xe1] sm:$0xff]  ;;  %v112_v20 = vld [vmem:[%s17000_s0 + $0xf9] sm:$0xff]  ;;  %v111_v21 = vld [vmem:[%s17000_s0 + $0xf1] sm:$0xff] }
   0x9   :  { %v114_v22 = vld [vmem:[%s17000_s0 + $0x111] sm:$0xff]  ;;  %v113_v23 = vld [vmem:[%s17000_s0 + $0x109] sm:$0xff]  ;;  %v115_v25 = vld [vmem:[%s17000_s0 + $0x121] sm:$0xff] }
   0xa   :  { %293 = vrot.lane.b32.xlu1 %v11714_v4, %s11655_s22  ;;  %291 = vrot.lane.b32.xlu0 %v11719_v5, %s11655_s22  ;;  %v116_v24 = vld [vmem:[%s17000_s0 + $0x129] sm:$0xff]  ;;  %v118_v26 = vld [vmem:[%s17000_s0 + $0x141] sm:$0xff] }
   0xb   :  { %v117_v27 = vld [vmem:[%s17000_s0 + $0x139] sm:$0xff]  ;;  %v119_v29 = vld [vmem:[%s17000_s0 + $0x151] sm:$0xff]  ;;  %v121_v31 = vld [vmem:[%s17000_s0 + $0x169] sm:$0xff] }
   0xc   :  { %v120_v28 = vld [vmem:[%s17000_s0 + $0x159] sm:$0xff]  ;;  %v122_v30 = vld [vmem:[%s17000_s0 + $0x171] sm:$0xff]  ;;  %v125_v35 = vld [vmem:[%s17000_s0 + $0x1c9] sm:$0xff] }
   0xd   :  { %v124_v32 = vld [vmem:[%s17000_s0 + $0x1b9] sm:$0xff]  ;;  %v123_v33 = vld [vmem:[%s17000_s0 + $0x1b1] sm:$0xff]  ;;  %v128_v36 = vld [vmem:[%s17000_s0 + $0x1e9] sm:$0xff] }
   0xe   :  { %297 = vrot.lane.b32.xlu1 %v11728_v6, %s11655_s22  ;;  %295 = vrot.lane.b32.xlu0 %v11733_v7, %s11655_s22  ;;  %v126_v34 = vld [vmem:[%s17000_s0 + $0x1d1] sm:$0xff]  ;;  %v127_v37 = vld [vmem:[%s17000_s0 + $0x1e1] sm:$0xff] }
   0xf   :  { %v130_v38 = vld [vmem:[%s17000_s0 + $0x201] sm:$0xff]  ;;  %v129_v39 = vld [vmem:[%s17000_s0 + $0x1f9] sm:$0xff]  ;;  %v131_v41 = vld [vmem:[%s17000_s0 + $0x211] sm:$0xff] }
  0x10   :  { %v132_v40 = vld [vmem:[%s17000_s0 + $0x219] sm:$0xff]  ;;  %v134_v42 = vld [vmem:[%s17000_s0 + $0x231] sm:$0xff]  ;;  %v133_v43 = vld [vmem:[%s17000_s0 + $0x229] sm:$0xff] }
  0x11   :  { %v136_v44 = vld [vmem:[%s17000_s0 + $0x249] sm:$0xff]  ;;  %v135_v45 = vld [vmem:[%s17000_s0 + $0x241] sm:$0xff]  ;;  %v137_v47 = vld [vmem:[%s17000_s0 + $0x259] sm:$0xff] }
  0x12   :  { %301 = vrot.lane.b32.xlu1 %v11742_v8, %s11655_s22  ;;  %299 = vrot.lane.b32.xlu0 %v11747_v9, %s11655_s22  ;;  %v138_v46 = vld [vmem:[%s17000_s0 + $0x261] sm:$0xff]  ;;  %v140_v48 = vld [vmem:[%s17000_s0 + $0x279] sm:$0xff] }
  0x13   :  { %v139_v49 = vld [vmem:[%s17000_s0 + $0x271] sm:$0xff]  ;;  %v141_v51 = vld [vmem:[%s17000_s0 + $0x289] sm:$0xff]  ;;  %v143_v53 = vld [vmem:[%s17000_s0 + $0x2a1] sm:$0xff] }
  0x14   :  { %v142_v50 = vld [vmem:[%s17000_s0 + $0x291] sm:$0xff]  ;;  %v144_v52 = vld [vmem:[%s17000_s0 + $0x2a9] sm:$0xff]  ;;  %v146_v54 = vld [vmem:[%s17000_s0 + $0x2c1] sm:$0xff] }
  0x15   :  { %v145_v55 = vld [vmem:[%s17000_s0 + $0x2b9] sm:$0xff]  ;;  %v147_v57 = vld [vmem:[%s17000_s0 + $0x2d1] sm:$0xff]  ;;  %v862_v59 = vld [vmem:[%s17001_s1 + $0x8] sm:$0xf] }
  0x16   :  { %305 = vrot.lane.b32.xlu1 %v11756_v10, %s11655_s22  ;;  %303 = vrot.lane.b32.xlu0 %v11761_v11, %s11655_s22  ;;  %v148_v56 = vld [vmem:[%s17000_s0 + $0x2d9] sm:$0xff]  ;;  %v150_v62 = vld [vmem:[%s17000_s0 + $0x2f1] sm:$0xff] }
  0x17   :  { %v861_v58 = vld [vmem:[%s17001_s1] sm:$0xff]  ;;  %v149_v63 = vld [vmem:[%s17000_s0 + $0x2e9] sm:$0xff] }
  0x18   :  { %v11225_v60 = vpack.c.bf16 %v862_v59, %v861_v58  ;;  %v174_v58 = vld [vmem:[%s17000_s0 + $0xe2] sm:$0xff]  ;;  %v173_v59 = vld [vmem:[%s17000_s0 + $0xda] sm:$0xff] }
  0x1a   :  { %309 = vrot.lane.b32.xlu1 %v11770_v12, %s11655_s22  ;;  %307 = vrot.lane.b32.xlu0 %v11775_v13, %s11655_s22 }
  0x1b   :  { %11227 = vmatprep.subr.msk.bf16.mxu0 %vm11963_vm2, %v11225_v60 }
  0x1c   :  { %11230 = vmatpush3.bf16.msk.msra.mxu0 %vm11963_vm2, %v11225_v60 }
  0x1e   :  { %313 = vrot.lane.b32.xlu1 %v106_v14, %s11655_s22  ;;  %311 = vrot.lane.b32.xlu0 %v105_v15, %s11655_s22  ;;  %v152_v14 = vld [vmem:[%s17000_s0 + $0x309] sm:$0xff]  ;;  %v151_v15 = vld [vmem:[%s17000_s0 + $0x301] sm:$0xff] }
  0x22   :  { %317 = vrot.lane.b32.xlu1 %v108_v16, %s11655_s22  ;;  %315 = vrot.lane.b32.xlu0 %v107_v17, %s11655_s22 }
  0x26   :  { %321 = vrot.lane.b32.xlu1 %v110_v18, %s11655_s22  ;;  %319 = vrot.lane.b32.xlu0 %v109_v19, %s11655_s22  ;;  %v154_v18 = vld [vmem:[%s17000_s0 + $0x321] sm:$0xff]  ;;  %v153_v19 = vld [vmem:[%s17000_s0 + $0x319] sm:$0xff] }
  0x2a   :  { %325 = vrot.lane.b32.xlu1 %v112_v20, %s11655_s22  ;;  %323 = vrot.lane.b32.xlu0 %v111_v21, %s11655_s22 }
  0x2e   :  { %329 = vrot.lane.b32.xlu1 %v114_v22, %s11655_s22  ;;  %327 = vrot.lane.b32.xlu0 %v113_v23, %s11655_s22  ;;  %v156_v22 = vld [vmem:[%s17000_s0 + $0xa] sm:$0xff]  ;;  %v155_v23 = vld [vmem:[%s17000_s0 + $0x2] sm:$0xff] }
  0x32   :  { %333 = vrot.lane.b32.xlu1 %v116_v24, %s11655_s22  ;;  %331 = vrot.lane.b32.xlu0 %v115_v25, %s11655_s22 }
  0x36   :  { %337 = vrot.lane.b32.xlu1 %v118_v26, %s11655_s22  ;;  %335 = vrot.lane.b32.xlu0 %v117_v27, %s11655_s22  ;;  %v158_v26 = vld [vmem:[%s17000_s0 + $0x22] sm:$0xff]  ;;  %v157_v27 = vld [vmem:[%s17000_s0 + $0x1a] sm:$0xff] }
  0x3a   :  { %341 = vrot.lane.b32.xlu1 %v120_v28, %s11655_s22  ;;  %339 = vrot.lane.b32.xlu0 %v119_v29, %s11655_s22 }
  0x3e   :  { %345 = vrot.lane.b32.xlu1 %v122_v30, %s11655_s22  ;;  %343 = vrot.lane.b32.xlu0 %v121_v31, %s11655_s22  ;;  %v160_v30 = vld [vmem:[%s17000_s0 + $0x3a] sm:$0xff]  ;;  %v159_v31 = vld [vmem:[%s17000_s0 + $0x32] sm:$0xff] }
  0x42   :  { %349 = vrot.lane.b32.xlu1 %v124_v32, %s11655_s22  ;;  %347 = vrot.lane.b32.xlu0 %v123_v33, %s11655_s22 }
  0x46   :  { %353 = vrot.lane.b32.xlu1 %v126_v34, %s11655_s22  ;;  %351 = vrot.lane.b32.xlu0 %v125_v35, %s11655_s22  ;;  %v162_v34 = vld [vmem:[%s17000_s0 + $0x52] sm:$0xff]  ;;  %v161_v35 = vld [vmem:[%s17000_s0 + $0x4a] sm:$0xff] }
  0x4a   :  { %357 = vrot.lane.b32.xlu1 %v128_v36, %s11655_s22  ;;  %355 = vrot.lane.b32.xlu0 %v127_v37, %s11655_s22 }
  0x4e   :  { %361 = vrot.lane.b32.xlu1 %v130_v38, %s11655_s22  ;;  %359 = vrot.lane.b32.xlu0 %v129_v39, %s11655_s22  ;;  %v164_v38 = vld [vmem:[%s17000_s0 + $0x6a] sm:$0xff]  ;;  %v163_v39 = vld [vmem:[%s17000_s0 + $0x62] sm:$0xff] }
  0x52   :  { %365 = vrot.lane.b32.xlu1 %v132_v40, %s11655_s22  ;;  %363 = vrot.lane.b32.xlu0 %v131_v41, %s11655_s22 }
  0x56   :  { %369 = vrot.lane.b32.xlu1 %v134_v42, %s11655_s22  ;;  %367 = vrot.lane.b32.xlu0 %v133_v43, %s11655_s22  ;;  %v166_v42 = vld [vmem:[%s17000_s0 + $0x82] sm:$0xff]  ;;  %v165_v43 = vld [vmem:[%s17000_s0 + $0x7a] sm:$0xff] }
  0x5a   :  { %373 = vrot.lane.b32.xlu1 %v136_v44, %s11655_s22  ;;  %371 = vrot.lane.b32.xlu0 %v135_v45, %s11655_s22 }
  0x5e   :  { %377 = vrot.lane.b32.xlu1 %v138_v46, %s11655_s22  ;;  %375 = vrot.lane.b32.xlu0 %v137_v47, %s11655_s22  ;;  %v168_v46 = vld [vmem:[%s17000_s0 + $0x9a] sm:$0xff]  ;;  %v167_v47 = vld [vmem:[%s17000_s0 + $0x92] sm:$0xff] }
  0x62   :  { %381 = vrot.lane.b32.xlu1 %v140_v48, %s11655_s22  ;;  %379 = vrot.lane.b32.xlu0 %v139_v49, %s11655_s22 }
  0x66   :  { %385 = vrot.lane.b32.xlu1 %v142_v50, %s11655_s22  ;;  %383 = vrot.lane.b32.xlu0 %v141_v51, %s11655_s22  ;;  %v170_v50 = vld [vmem:[%s17000_s0 + $0xb2] sm:$0xff]  ;;  %v169_v51 = vld [vmem:[%s17000_s0 + $0xaa] sm:$0xff] }
  0x6a   :  { %389 = vrot.lane.b32.xlu1 %v144_v52, %s11655_s22  ;;  %387 = vrot.lane.b32.xlu0 %v143_v53, %s11655_s22 }
  0x6e   :  { %393 = vrot.lane.b32.xlu1 %v146_v54, %s11655_s22  ;;  %391 = vrot.lane.b32.xlu0 %v145_v55, %s11655_s22  ;;  %v172_v54 = vld [vmem:[%s17000_s0 + $0xca] sm:$0xff]  ;;  %v171_v55 = vld [vmem:[%s17000_s0 + $0xc2] sm:$0xff] }
  0x72   :  { %397 = vrot.lane.b32.xlu1 %v148_v56, %s11655_s22  ;;  %395 = vrot.lane.b32.xlu0 %v147_v57, %s11655_s22 }
  0x74   :  { %v11973_v1 = vpop.permute.xlu1 %287  ;;  %v11975_v3 = vpop.permute.xlu0 %283 }
  0x76   :  { %401 = vrot.lane.b32.xlu1 %v150_v62, %s11655_s22  ;;  %399 = vrot.lane.b32.xlu0 %v149_v63, %s11655_s22  ;;  %v176_v63 = vld [vmem:[%s17000_s0 + $0xfa] sm:$0xff] }
  0x78   :  { %v11989_v16 = vpop.permute.xlu1 %289  ;;  %v11991_v17 = vpop.permute.xlu0 %285 }
  0x7a   :  { %405 = vrot.lane.b32.xlu1 %v152_v14, %s11655_s22  ;;  %403 = vrot.lane.b32.xlu0 %v151_v15, %s11655_s22  ;;  %v175_v14 = vld [vmem:[%s17000_s0 + $0xf2] sm:$0xff] }
  0x7c   :  { %v12001_v20 = vpop.permute.xlu1 %293  ;;  %v12003_v21 = vpop.permute.xlu0 %291 }
  0x7e   :  { %409 = vrot.lane.b32.xlu1 %v154_v18, %s11655_s22  ;;  %407 = vrot.lane.b32.xlu0 %v153_v19, %s11655_s22  ;;  %v178_v19 = vld [vmem:[%s17000_s0 + $0x112] sm:$0xff] }
  0x80   :  { %v12013_v24 = vpop.permute.xlu1 %297  ;;  %v12015_v25 = vpop.permute.xlu0 %295 }
  0x82   :  { %541 = vrot.lane.b32.xlu1 %v156_v22, %s11657_s10  ;;  %539 = vrot.lane.b32.xlu0 %v155_v23, %s11657_s10  ;;  %v177_v22 = vld [vmem:[%s17000_s0 + $0x10a] sm:$0xff] }
  0x84   :  { %v12025_v28 = vpop.permute.xlu1 %301  ;;  %v12027_v29 = vpop.permute.xlu0 %299 }
  0x86   :  { %545 = vrot.lane.b32.xlu1 %v158_v26, %s11657_s10  ;;  %543 = vrot.lane.b32.xlu0 %v157_v27, %s11657_s10  ;;  %v180_v27 = vld [vmem:[%s17000_s0 + $0x12a] sm:$0xff] }
  0x88   :  { %v12037_v32 = vpop.permute.xlu1 %305  ;;  %v12039_v33 = vpop.permute.xlu0 %303 }
  0x8a   :  { %549 = vrot.lane.b32.xlu1 %v160_v30, %s11657_s10  ;;  %547 = vrot.lane.b32.xlu0 %v159_v31, %s11657_s10  ;;  %v179_v30 = vld [vmem:[%s17000_s0 + $0x122] sm:$0xff] }
  0x8c   :  { %v12049_v36 = vpop.permute.xlu1 %309  ;;  %v12051_v37 = vpop.permute.xlu0 %307 }
  0x8e   :  { %553 = vrot.lane.b32.xlu1 %v162_v34, %s11657_s10  ;;  %551 = vrot.lane.b32.xlu0 %v161_v35, %s11657_s10  ;;  %v182_v35 = vld [vmem:[%s17000_s0 + $0x142] sm:$0xff] }
  0x90   :  { %v12061_v40 = vpop.permute.xlu1 %313  ;;  %v12063_v41 = vpop.permute.xlu0 %311 }
  0x92   :  { %557 = vrot.lane.b32.xlu1 %v164_v38, %s11657_s10  ;;  %555 = vrot.lane.b32.xlu0 %v163_v39, %s11657_s10  ;;  %v181_v38 = vld [vmem:[%s17000_s0 + $0x13a] sm:$0xff] }
  0x94   :  { %v12073_v44 = vpop.permute.xlu1 %317  ;;  %v12075_v45 = vpop.permute.xlu0 %315 }
  0x96   :  { %561 = vrot.lane.b32.xlu1 %v166_v42, %s11657_s10  ;;  %559 = vrot.lane.b32.xlu0 %v165_v43, %s11657_s10  ;;  %v184_v43 = vld [vmem:[%s17000_s0 + $0x15a] sm:$0xff] }
  0x98   :  { %v12085_v48 = vpop.permute.xlu1 %321  ;;  %v12087_v49 = vpop.permute.xlu0 %319 }
  0x9a   :  { %565 = vrot.lane.b32.xlu1 %v168_v46, %s11657_s10  ;;  %563 = vrot.lane.b32.xlu0 %v167_v47, %s11657_s10  ;;  %v183_v46 = vld [vmem:[%s17000_s0 + $0x152] sm:$0xff] }
  0x9c   :  { %v12097_v52 = vpop.permute.xlu1 %325  ;;  %v12099_v53 = vpop.permute.xlu0 %323 }
  0x9e   :  { %569 = vrot.lane.b32.xlu1 %v170_v50, %s11657_s10  ;;  %567 = vrot.lane.b32.xlu0 %v169_v51, %s11657_s10  ;;  %v186_v51 = vld [vmem:[%s17000_s0 + $0x172] sm:$0xff] }
  0xa0   :  { %v12109_v56 = vpop.permute.xlu1 %329  ;;  %v12111_v57 = vpop.permute.xlu0 %327 }
  0xa2   :  { %573 = vrot.lane.b32.xlu1 %v172_v54, %s11657_s10  ;;  %571 = vrot.lane.b32.xlu0 %v171_v55, %s11657_s10  ;;  %v185_v54 = vld [vmem:[%s17000_s0 + $0x16a] sm:$0xff] }
  0xa4   :  { %v12121_v60 = vpop.permute.xlu1 %333  ;;  %v12123_v62 = vpop.permute.xlu0 %331 }
  0xa6   :  { %577 = vrot.lane.b32.xlu1 %v174_v58, %s11657_s10  ;;  %575 = vrot.lane.b32.xlu0 %v173_v59, %s11657_s10  ;;  %v188_v59 = vld [vmem:[%s17000_s0 + $0x1ba] sm:$0xff] }
  0xa8   :  { %v12133_v15 = vpop.permute.xlu1 %337  ;;  %v12135_v18 = vpop.permute.xlu0 %335 }
  0xaa   :  { %581 = vrot.lane.b32.xlu1 %v176_v63, %s11657_s10  ;;  %579 = vrot.lane.b32.xlu0 %v175_v14, %s11657_s10  ;;  %v187_v63 = vld [vmem:[%s17000_s0 + $0x1b2] sm:$0xff] }
  0xac   :  { %v12145_v23 = vpop.permute.xlu1 %341  ;;  %v12147_v26 = vpop.permute.xlu0 %339 }
  0xae   :  { %585 = vrot.lane.b32.xlu1 %v178_v19, %s11657_s10  ;;  %583 = vrot.lane.b32.xlu0 %v177_v22, %s11657_s10  ;;  %v190_v22 = vld [vmem:[%s17000_s0 + $0x1d2] sm:$0xff] }
  0xb0   :  { %v12157_v31 = vpop.permute.xlu1 %345  ;;  %v12159_v34 = vpop.permute.xlu0 %343 }
  0xb2   :  { %589 = vrot.lane.b32.xlu1 %v180_v27, %s11657_s10  ;;  %587 = vrot.lane.b32.xlu0 %v179_v30, %s11657_s10  ;;  %v189_v27 = vld [vmem:[%s17000_s0 + $0x1ca] sm:$0xff] }
  0xb4   :  { %v12169_v39 = vpop.permute.xlu1 %349  ;;  %v12171_v42 = vpop.permute.xlu0 %347 }
  0xb6   :  { %593 = vrot.lane.b32.xlu1 %v182_v35, %s11657_s10  ;;  %591 = vrot.lane.b32.xlu0 %v181_v38, %s11657_s10  ;;  %v192_v38 = vld [vmem:[%s17000_s0 + $0x1ea] sm:$0xff] }
  0xb8   :  { %v12181_v47 = vpop.permute.xlu1 %353  ;;  %v12183_v50 = vpop.permute.xlu0 %351 }
  0xba   :  { %597 = vrot.lane.b32.xlu1 %v184_v43, %s11657_s10  ;;  %595 = vrot.lane.b32.xlu0 %v183_v46, %s11657_s10  ;;  %v191_v43 = vld [vmem:[%s17000_s0 + $0x1e2] sm:$0xff] }
  0xbc   :  { %v12193_v55 = vpop.permute.xlu1 %357  ;;  %v12195_v58 = vpop.permute.xlu0 %355 }
  0xbe   :  { %601 = vrot.lane.b32.xlu1 %v186_v51, %s11657_s10  ;;  %599 = vrot.lane.b32.xlu0 %v185_v54, %s11657_s10  ;;  %v194_v54 = vld [vmem:[%s17000_s0 + $0x202] sm:$0xff] }
  0xc0   :  { %v12205_v14 = vpop.permute.xlu1 %361  ;;  %v12207_v19 = vpop.permute.xlu0 %359 }
  0xc2   :  { %605 = vrot.lane.b32.xlu1 %v188_v59, %s11657_s10  ;;  %603 = vrot.lane.b32.xlu0 %v187_v63, %s11657_s10  ;;  %v193_v59 = vld [vmem:[%s17000_s0 + $0x1fa] sm:$0xff] }
  0xc4   :  { %v12217_v30 = vpop.permute.xlu1 %365  ;;  %v12219_v35 = vpop.permute.xlu0 %363 }
  0xc5   :  { %17025 = vst [vmem:[#allocation4_spill] sm:$0xff] %v12217_v30  ;;  %17026 = vst [vmem:[#allocation5_spill] sm:$0xff] %v12219_v35 }
  0xc6   :  { %609 = vrot.lane.b32.xlu1 %v190_v22, %s11657_s10  ;;  %607 = vrot.lane.b32.xlu0 %v189_v27, %s11657_s10  ;;  %v196_v27 = vld [vmem:[%s17000_s0 + $0x21a] sm:$0xff] }
  0xc8   :  { %v12229_v46 = vpop.permute.xlu1 %369  ;;  %v12231_v51 = vpop.permute.xlu0 %367 }
  0xc9   :  { %17027 = vst [vmem:[#allocation6_spill] sm:$0xff] %v12229_v46  ;;  %17028 = vst [vmem:[#allocation7_spill] sm:$0xff] %v12231_v51 }
  0xca   :  { %613 = vrot.lane.b32.xlu1 %v192_v38, %s11657_s10  ;;  %611 = vrot.lane.b32.xlu0 %v191_v43, %s11657_s10  ;;  %v195_v38 = vld [vmem:[%s17000_s0 + $0x212] sm:$0xff] }
  0xcc   :  { %v12241_v63 = vpop.permute.xlu1 %373  ;;  %v12243_v22 = vpop.permute.xlu0 %371 }
  0xcd   :  { %17029 = vst [vmem:[#allocation8_spill] sm:$0xff] %v12241_v63  ;;  %17030 = vst [vmem:[#allocation9_spill] sm:$0xff] %v12243_v22 }
  0xce   :  { %617 = vrot.lane.b32.xlu1 %v194_v54, %s11657_s10  ;;  %615 = vrot.lane.b32.xlu0 %v193_v59, %s11657_s10  ;;  %v198_v54 = vld [vmem:[%s17000_s0 + $0x232] sm:$0xff]  ;;  %v197_v59 = vld [vmem:[%s17000_s0 + $0x22a] sm:$0xff] }
  0xd0   :  { %v12253_v43 = vpop.permute.xlu1 %377  ;;  %v12255_v61 = vpop.permute.xlu0 %375 }
  0xd1   :  { %17031 = vst [vmem:[#allocation10_spill] sm:$0xff] %v12253_v43  ;;  %17032 = vst [vmem:[#allocation11_spill] sm:$0xff] %v12255_v61 }
  0xd2   :  { %621 = vrot.lane.b32.xlu1 %v196_v27, %s11657_s10  ;;  %619 = vrot.lane.b32.xlu0 %v195_v38, %s11657_s10  ;;  %v200_v27 = vld [vmem:[%s17000_s0 + $0x24a] sm:$0xff]  ;;  %v199_v38 = vld [vmem:[%s17000_s0 + $0x242] sm:$0xff] }
  0xd4   :  { %v12265_v22 = vpop.permute.xlu1 %381  ;;  %v12267_v63 = vpop.permute.xlu0 %379 }
  0xd5   :  { %17033 = vst [vmem:[#allocation12_spill] sm:$0xff] %v12265_v22  ;;  %17034 = vst [vmem:[#allocation13_spill] sm:$0xff] %v12267_v63 }
  0xd6   :  { %625 = vrot.lane.b32.xlu1 %v198_v54, %s11657_s10  ;;  %623 = vrot.lane.b32.xlu0 %v197_v59, %s11657_s10  ;;  %v202_v54 = vld [vmem:[%s17000_s0 + $0x262] sm:$0xff]  ;;  %v201_v59 = vld [vmem:[%s17000_s0 + $0x25a] sm:$0xff] }
  0xd8   :  { %v12277_v61 = vpop.permute.xlu1 %385  ;;  %v12279_v43 = vpop.permute.xlu0 %383 }
  0xd9   :  { %17035 = vst [vmem:[#allocation14_spill] sm:$0xff] %v12277_v61  ;;  %17036 = vst [vmem:[#allocation15_spill] sm:$0xff] %v12279_v43 }
  0xda   :  { %629 = vrot.lane.b32.xlu1 %v200_v27, %s11657_s10  ;;  %627 = vrot.lane.b32.xlu0 %v199_v38, %s11657_s10  ;;  %v204_v27 = vld [vmem:[%s17000_s0 + $0x27a] sm:$0xff]  ;;  %v203_v38 = vld [vmem:[%s17000_s0 + $0x272] sm:$0xff] }
  0xdc   :  { %v12289_v63 = vpop.permute.xlu1 %389  ;;  %v12291_v22 = vpop.permute.xlu0 %387 }
  0xdd   :  { %17037 = vst [vmem:[#allocation16_spill] sm:$0xff] %v12289_v63  ;;  %17038 = vst [vmem:[#allocation17_spill] sm:$0xff] %v12291_v22 }
  0xde   :  { %633 = vrot.lane.b32.xlu1 %v202_v54, %s11657_s10  ;;  %631 = vrot.lane.b32.xlu0 %v201_v59, %s11657_s10  ;;  %v206_v54 = vld [vmem:[%s17000_s0 + $0x292] sm:$0xff]  ;;  %v205_v59 = vld [vmem:[%s17000_s0 + $0x28a] sm:$0xff] }
  0xe0   :  { %v12301_v43 = vpop.permute.xlu1 %393  ;;  %v12303_v61 = vpop.permute.xlu0 %391 }
  0xe1   :  { %17039 = vst [vmem:[#allocation18_spill] sm:$0xff] %v12301_v43  ;;  %17040 = vst [vmem:[#allocation19_spill] sm:$0xff] %v12303_v61 }
  0xe2   :  { %637 = vrot.lane.b32.xlu1 %v204_v27, %s11657_s10  ;;  %635 = vrot.lane.b32.xlu0 %v203_v38, %s11657_s10  ;;  %v208_v27 = vld [vmem:[%s17000_s0 + $0x2aa] sm:$0xff]  ;;  %v207_v38 = vld [vmem:[%s17000_s0 + $0x2a2] sm:$0xff] }
  0xe4   :  { %v12313_v22 = vpop.permute.xlu1 %397  ;;  %v12315_v63 = vpop.permute.xlu0 %395 }
  0xe5   :  { %17041 = vst [vmem:[#allocation20_spill] sm:$0xff] %v12313_v22  ;;  %17042 = vst [vmem:[#allocation21_spill] sm:$0xff] %v12315_v63 }
  0xe6   :  { %641 = vrot.lane.b32.xlu1 %v206_v54, %s11657_s10  ;;  %639 = vrot.lane.b32.xlu0 %v205_v59, %s11657_s10  ;;  %v210_v54 = vld [vmem:[%s17000_s0 + $0x2c2] sm:$0xff]  ;;  %v209_v59 = vld [vmem:[%s17000_s0 + $0x2ba] sm:$0xff] }
  0xe8   :  { %v12325_v61 = vpop.permute.xlu1 %401  ;;  %v12327_v43 = vpop.permute.xlu0 %399 }
  0xe9   :  { %17043 = vst [vmem:[#allocation22_spill] sm:$0xff] %v12325_v61  ;;  %17044 = vst [vmem:[#allocation23_spill] sm:$0xff] %v12327_v43 }
  0xea   :  { %645 = vrot.lane.b32.xlu1 %v208_v27, %s11657_s10  ;;  %643 = vrot.lane.b32.xlu0 %v207_v38, %s11657_s10  ;;  %v212_v27 = vld [vmem:[%s17000_s0 + $0x2da] sm:$0xff]  ;;  %v211_v38 = vld [vmem:[%s17000_s0 + $0x2d2] sm:$0xff] }
  0xec   :  { %v12337_v63 = vpop.permute.xlu1 %405  ;;  %v12339_v22 = vpop.permute.xlu0 %403 }
  0xed   :  { %17045 = vst [vmem:[#allocation24_spill] sm:$0xff] %v12337_v63  ;;  %17046 = vst [vmem:[#allocation25_spill] sm:$0xff] %v12339_v22  ;;  %v27_v22 = vld [vmem:[%s17000_s0] sm:$0xff] }
  0xee   :  { %649 = vrot.lane.b32.xlu1 %v210_v54, %s11657_s10  ;;  %647 = vrot.lane.b32.xlu0 %v209_v59, %s11657_s10  ;;  %v28_v54 = vld [vmem:[%s17000_s0 + $0x8] sm:$0xff]  ;;  %v214_v59 = vld [vmem:[%s17000_s0 + $0x2f2] sm:$0xff] }
  0xef   :  { %v733_v63 = vsel %vm731_vm3, %v28_v54, %v11991_v17  ;;  %v215_v17 = vld [vmem:[%s17000_s0 + $0x302] sm:$0xff] }
  0xf0   :  { %v12349_v43 = vpop.permute.xlu1 %409  ;;  %v12351_v61 = vpop.permute.xlu0 %407 }
  0xf1   :  { %17047 = vst [vmem:[#allocation26_spill] sm:$0xff] %v12349_v43  ;;  %17048 = vst [vmem:[#allocation27_spill] sm:$0xff] %v12351_v61  ;;  %v213_v61 = vld [vmem:[%s17000_s0 + $0x2ea] sm:$0xff]  ;;  %v732_v43 = vsel %vm731_vm3, %v27_v22, %v11975_v3 }
  0xf2   :  { %653 = vrot.lane.b32.xlu1 %v212_v27, %s11657_s10  ;;  %651 = vrot.lane.b32.xlu0 %v211_v38, %s11657_s10  ;;  %v29_v27 = vld [vmem:[%s17000_s0 + $0x18] sm:$0xff]  ;;  %v30_v38 = vld [vmem:[%s17000_s0 + $0x20] sm:$0xff] }
  0xf3   :  { %v216_v3 = vld [vmem:[%s17000_s0 + $0x30a] sm:$0xff]  ;;  %v734_v22 = vsel %vm731_vm3, %v29_v27, %v11973_v1  ;;  %v218_v1 = vld [vmem:[%s17000_s0 + $0x322] sm:$0xff] }
  0xf4   :  { %v542_v51 = vpop.permute.xlu1 %541  ;;  %v540_v46 = vpop.permute.xlu0 %539 }
  0xf5   :  { %v798_v35 = vsel %vm796_vm4, %v733_v63, %v542_v51  ;;  %v797_v30 = vsel %vm796_vm4, %v732_v43, %v540_v46  ;;  %v735_v46 = vsel %vm731_vm3, %v30_v38, %v11989_v16  ;;  %v31_v63 = vld [vmem:[%s17000_s0 + $0x30] sm:$0xff]  ;;  %v217_v16 = vld [vmem:[%s17000_s0 + $0x31a] sm:$0xff] }
  0xf6   :  { %657 = vrot.lane.b32.xlu1 %v214_v59, %s11657_s10  ;;  %655 = vrot.lane.b32.xlu0 %v213_v61, %s11657_s10  ;;  %v736_v59 = vsel %vm731_vm3, %v31_v63, %v12003_v21  ;;  %v35_v63 = vld [vmem:[%s17000_s0 + $0x60] sm:$0xff] }
  0xf7   :  { %10629 = vmatprep.mubr.msk.f32.mxu0 %vm863_vm5, %v797_v30  ;;  %v32_v30 = vld [vmem:[%s17000_s0 + $0x38] sm:$0xff] }
  0xf8   :  { %10630 = vmatmul.mubr.msk.f32.vlgmr.msra.gmra.mrb[0].mxu0 %vm863_vm5, %v798_v35  ;;  %v546_v51 = vpop.permute.xlu1 %545  ;;  %v544_v61 = vpop.permute.xlu0 %543  ;;  %v737_v35 = vsel %vm731_vm3, %v32_v30, %v12001_v20  ;;  %v36_v30 = vld [vmem:[%s17000_s0 + $0x68] sm:$0xff] }
  0xf9   :  { %v800_v43 = vsel %vm796_vm4, %v735_v46, %v546_v51  ;;  %v799_v54 = vsel %vm796_vm4, %v734_v22, %v544_v61 }
  0xfa   :  { %661 = vrot.lane.b32.xlu1 %v216_v3, %s11657_s10  ;;  %659 = vrot.lane.b32.xlu0 %v215_v17, %s11657_s10  ;;  %v34_v3 = vld [vmem:[%s17000_s0 + $0x50] sm:$0xff]  ;;  %v33_v17 = vld [vmem:[%s17000_s0 + $0x48] sm:$0xff] }
  0xfb   :  { %10632 = vmatprep.mubr.msk.f32.mxu0 %vm863_vm5, %v799_v54  ;;  %v739_v20 = vsel %vm731_vm3, %v34_v3, %v12013_v24  ;;  %v738_v21 = vsel %vm731_vm3, %v33_v17, %v12015_v25  ;;  %v741_v24 = vsel %vm731_vm3, %v36_v30, %v12025_v28  ;;  %v740_v25 = vsel %vm731_vm3, %v35_v63, %v12027_v29  ;;  %v40_v3 = vld [vmem:[%s17000_s0 + $0x98] sm:$0xff]  ;;  %v44_v30 = vld [vmem:[%s17000_s0 + $0xc8] sm:$0xff] }
  0xfc   :  { %10633 = vmatmul.mubr.msk.f32.gmra.mrb[2].mxu0 %vm863_vm5, %v800_v43  ;;  %v550_v27 = vpop.permute.xlu1 %549  ;;  %v548_v38 = vpop.permute.xlu0 %547 }
  0xfd   :  { %v802_v22 = vsel %vm796_vm4, %v737_v35, %v550_v27  ;;  %v801_v46 = vsel %vm796_vm4, %v736_v59, %v548_v38  ;;  %v38_v35 = vld [vmem:[%s17000_s0 + $0x80] sm:$0xff] }
  0xfe   :  { %665 = vrot.lane.b32.xlu1 %v218_v1, %s11657_s10  ;;  %663 = vrot.lane.b32.xlu0 %v217_v16, %s11657_s10  ;;  %v743_v28 = vsel %vm731_vm3, %v38_v35, %v12037_v32  ;;  %v745_v32 = vsel %vm731_vm3, %v40_v3, %v12049_v36  ;;  %v48_v35 = vld [vmem:[%s17000_s0 + $0xf8] sm:$0xff]  ;;  %v50_v3 = vld [vmem:[%s17000_s0 + $0x110] sm:$0xff] }
  0xff   :  { %10635 = vmatprep.mubr.msk.f32.mxu0 %vm863_vm5, %v801_v46 }
 0x100   :  { %10636 = vmatmul.mubr.msk.f32.gmra.mrb[4].mxu0 %vm863_vm5, %v802_v22  ;;  %v554_v51 = vpop.permute.xlu1 %553  ;;  %v552_v61 = vpop.permute.xlu0 %551 }
 0x101   :  { %v804_v43 = vsel %vm796_vm4, %v739_v20, %v554_v51  ;;  %v803_v54 = vsel %vm796_vm4, %v738_v21, %v552_v61  ;;  %v42_v20 = vld [vmem:[%s17000_s0 + $0xb0] sm:$0xff] }
 0x102   :  { %1768 = vrot.lane.b32.xlu1 %v11703_v2, %s11655_s22  ;;  %1766 = vrot.lane.b32.xlu0 %v11692_v0, %s11655_s22  ;;  %v37_v0 = vld [vmem:[%s17000_s0 + $0x78] sm:$0xff]  ;;  %v747_v36 = vsel %vm731_vm3, %v42_v20, %v12061_v40  ;;  %v749_v40 = vsel %vm731_vm3, %v44_v30, %v12073_v44  ;;  %v52_v20 = vld [vmem:[%s17000_s0 + $0x128] sm:$0xff] }
 0x103   :  { %10638 = vmatprep.mubr.msk.f32.mxu0 %vm863_vm5, %v803_v54  ;;  %v742_v29 = vsel %vm731_vm3, %v37_v0, %v12039_v33  ;;  %v9524_v44 = vld [vmem:[%s17000_s0 + $0xb1] sm:$0xff]  ;;  %v54_v30 = vld [vmem:[%s17000_s0 + $0x140] sm:$0xff] }
 0x104   :  { %10639 = vmatmul.mubr.msk.f32.gmra.mrb[6].mxu0 %vm863_vm5, %v804_v43  ;;  %v558_v1 = vpop.permute.xlu1 %557  ;;  %v556_v16 = vpop.permute.xlu0 %555  ;;  %v47_v0 = vld [vmem:[%s17000_s0 + $0xf0] sm:$0xff] }
 0x105   :  { %v806_v2 = vsel %vm796_vm4, %v741_v24, %v558_v1  ;;  %v805_v59 = vsel %vm796_vm4, %v740_v25, %v556_v16  ;;  %v46_v24 = vld [vmem:[%s17000_s0 + $0xe0] sm:$0xff] }
 0x106   :  { %1772 = vrot.lane.b32.xlu1 %v11714_v4, %s11655_s22  ;;  %1770 = vrot.lane.b32.xlu0 %v11719_v5, %s11655_s22  ;;  %v39_v4 = vld [vmem:[%s17000_s0 + $0x90] sm:$0xff]  ;;  %v751_v1 = vsel %vm731_vm3, %v46_v24, %v12085_v48  ;;  %v56_v24 = vld [vmem:[%s17000_s0 + $0x158] sm:$0xff] }
 0x107   :  { %10641 = vmatprep.mubr.msk.f32.mxu0 %vm863_vm5, %v805_v59  ;;  %v744_v33 = vsel %vm731_vm3, %v39_v4, %v12051_v37  ;;  %v9526_v48 = vld [vmem:[%s17000_s0 + $0xc9] sm:$0xff] }
 0x108   :  { %10642 = vmatmul.mubr.msk.f32.gmra.mrb[8].mxu0 %vm863_vm5, %v806_v2  ;;  %v562_v27 = vpop.permute.xlu1 %561  ;;  %v560_v38 = vpop.permute.xlu0 %559  ;;  %v49_v4 = vld [vmem:[%s17000_s0 + $0x108] sm:$0xff] }
 0x109   :  { %v808_v5 = vsel %vm796_vm4, %v743_v28, %v562_v27  ;;  %v807_v17 = vsel %vm796_vm4, %v742_v29, %v560_v38  ;;  %v753_v28 = vsel %vm731_vm3, %v48_v35, %v12097_v52  ;;  %v752_v29 = vsel %vm731_vm3, %v47_v0, %v12099_v53  ;;  %v9528_v52 = vld [vmem:[%s17000_s0 + $0xe1] sm:$0xff]  ;;  %v9527_v53 = vld [vmem:[%s17000_s0 + $0xd9] sm:$0xff] }
 0x10a   :  { %1776 = vrot.lane.b32.xlu1 %v11728_v6, %s11655_s22  ;;  %1774 = vrot.lane.b32.xlu0 %v11733_v7, %s11655_s22  ;;  %v41_v6 = vld [vmem:[%s17000_s0 + $0xa8] sm:$0xff] }
 0x10b   :  { %10644 = vmatprep.mubr.msk.f32.mxu0 %vm863_vm5, %v807_v17  ;;  %v746_v37 = vsel %vm731_vm3, %v41_v6, %v12063_v41  ;;  %v51_v6 = vld [vmem:[%s17000_s0 + $0x120] sm:$0xff] }
 0x10c   :  { %10645 = vmatmul.mubr.msk.f32.gmra.mrb[10].mxu0 %vm863_vm5, %v808_v5  ;;  %v566_v22 = vpop.permute.xlu1 %565  ;;  %v564_v46 = vpop.permute.xlu0 %563 }
 0x10d   :  { %v810_v7 = vsel %vm796_vm4, %v745_v32, %v566_v22  ;;  %v809_v21 = vsel %vm796_vm4, %v744_v33, %v564_v46  ;;  %v755_v32 = vsel %vm731_vm3, %v50_v3, %v12109_v56  ;;  %v754_v33 = vsel %vm731_vm3, %v49_v4, %v12111_v57  ;;  %v9530_v56 = vld [vmem:[%s17000_s0 + $0xf9] sm:$0xff]  ;;  %v9529_v57 = vld [vmem:[%s17000_s0 + $0xf1] sm:$0xff] }
 0x10e   :  { %1780 = vrot.lane.b32.xlu1 %v11742_v8, %s11655_s22  ;;  %1778 = vrot.lane.b32.xlu0 %v11747_v9, %s11655_s22  ;;  %v43_v8 = vld [vmem:[%s17000_s0 + $0xc0] sm:$0xff] }
 0x10f   :  { %10647 = vmatprep.mubr.msk.f32.mxu0 %vm863_vm5, %v809_v21  ;;  %v748_v41 = vsel %vm731_vm3, %v43_v8, %v12075_v45  ;;  %v9523_v45 = vld [vmem:[%s17000_s0 + $0xa9] sm:$0xff]  ;;  %v53_v8 = vld [vmem:[%s17000_s0 + $0x138] sm:$0xff] }
 0x110   :  { %10648 = vmatmul.mubr.msk.f32.gmra.mrb[12].mxu0 %vm863_vm5, %v810_v7  ;;  %v570_v51 = vpop.permute.xlu1 %569  ;;  %v568_v61 = vpop.permute.xlu0 %567 }
 0x111   :  { %v812_v9 = vsel %vm796_vm4, %v747_v36, %v570_v51  ;;  %v811_v63 = vsel %vm796_vm4, %v746_v37, %v568_v61  ;;  %v757_v36 = vsel %vm731_vm3, %v52_v20, %v12121_v60  ;;  %v756_v37 = vsel %vm731_vm3, %v51_v6, %v12123_v62  ;;  %v9532_v60 = vld [vmem:[%s17000_s0 + $0x111] sm:$0xff]  ;;  %v9531_v62 = vld [vmem:[%s17000_s0 + $0x109] sm:$0xff] }
 0x112   :  { %1784 = vrot.lane.b32.xlu1 %v11756_v10, %s11655_s22  ;;  %1782 = vrot.lane.b32.xlu0 %v11761_v11, %s11655_s22  ;;  %v45_v10 = vld [vmem:[%s17000_s0 + $0xd8] sm:$0xff] }
 0x113   :  { %10650 = vmatprep.mubr.msk.f32.mxu0 %vm863_vm5, %v811_v63  ;;  %v750_v16 = vsel %vm731_vm3, %v45_v10, %v12087_v49  ;;  %v9525_v49 = vld [vmem:[%s17000_s0 + $0xc1] sm:$0xff]  ;;  %v55_v10 = vld [vmem:[%s17000_s0 + $0x150] sm:$0xff] }
 0x114   :  { %10651 = vmatmul.mubr.msk.f32.gmra.mrb[14].mxu0 %vm863_vm5, %v812_v9  ;;  %v574_v43 = vpop.permute.xlu1 %573  ;;  %v572_v54 = vpop.permute.xlu0 %571 }
 0x115   :  { %v814_v11 = vsel %vm796_vm4, %v749_v40, %v574_v43  ;;  %v813_v25 = vsel %vm796_vm4, %v748_v41, %v572_v54  ;;  %v759_v40 = vsel %vm731_vm3, %v54_v30, %v12133_v15  ;;  %v758_v41 = vsel %vm731_vm3, %v53_v8, %v12135_v18  ;;  %v9534_v15 = vld [vmem:[%s17000_s0 + $0x129] sm:$0xff]  ;;  %v9533_v18 = vld [vmem:[%s17000_s0 + $0x121] sm:$0xff]  ;;  %v65_v8 = vld [vmem:[%s17000_s0 + $0x1f8] sm:$0xff] }
 0x116   :  { %1788 = vrot.lane.b32.xlu1 %v11770_v12, %s11655_s22  ;;  %1786 = vrot.lane.b32.xlu0 %v11775_v13, %s11655_s22  ;;  %v66_v30 = vld [vmem:[%s17000_s0 + $0x200] sm:$0xff] }
 0x117   :  { %10653 = vmatprep.mubr.msk.f32.mxu0 %vm863_vm5, %v813_v25 }
 0x118   :  { %10654 = vmatmul.mubr.msk.f32.gmra.mrb[16].mxu0 %vm863_vm5, %v814_v11  ;;  %v578_v12 = vpop.permute.xlu1 %577  ;;  %v576_v13 = vpop.permute.xlu0 %575 }
 0x119   :  { %v816_v2 = vsel %vm796_vm4, %v751_v1, %v578_v12  ;;  %v815_v59 = vsel %vm796_vm4, %v750_v16, %v576_v13  ;;  %v58_v12 = vld [vmem:[%s17000_s0 + $0x170] sm:$0xff]  ;;  %v57_v13 = vld [vmem:[%s17000_s0 + $0x168] sm:$0xff] }
 0x11a   :  { %1792 = vrot.lane.b32.xlu1 %v9524_v44, %s11655_s22  ;;  %1790 = vrot.lane.b32.xlu0 %v9523_v45, %s11655_s22  ;;  %v761_v44 = vsel %vm731_vm3, %v56_v24, %v12145_v23  ;;  %v760_v45 = vsel %vm731_vm3, %v55_v10, %v12147_v26  ;;  %v9536_v23 = vld [vmem:[%s17000_s0 + $0x141] sm:$0xff]  ;;  %v9535_v26 = vld [vmem:[%s17000_s0 + $0x139] sm:$0xff] }
 0x11b   :  { %10656 = vmatprep.mubr.msk.f32.mxu0 %vm863_vm5, %v815_v59  ;;  %v762_v59 = vsel %vm731_vm3, %v57_v13, %v12159_v34  ;;  %v9537_v34 = vld [vmem:[%s17000_s0 + $0x151] sm:$0xff] }
 0x11c   :  { %10657 = vmatmul.mubr.msk.f32.gmra.mrb[18].mxu0 %vm863_vm5, %v816_v2  ;;  %v582_v27 = vpop.permute.xlu1 %581  ;;  %v580_v38 = vpop.permute.xlu0 %579  ;;  %v763_v2 = vsel %vm731_vm3, %v58_v12, %v12157_v31  ;;  %v9538_v31 = vld [vmem:[%s17000_s0 + $0x159] sm:$0xff] }
 0x11d   :  { %v818_v5 = vsel %vm796_vm4, %v753_v28, %v582_v27  ;;  %v817_v17 = vsel %vm796_vm4, %v752_v29, %v580_v38  ;;  %v60_v28 = vld [vmem:[%s17000_s0 + $0x1b8] sm:$0xff]  ;;  %v59_v29 = vld [vmem:[%s17000_s0 + $0x1b0] sm:$0xff] }
 0x11e   :  { %1796 = vrot.lane.b32.xlu1 %v9526_v48, %s11655_s22  ;;  %1794 = vrot.lane.b32.xlu0 %v9525_v49, %s11655_s22  ;;  %v765_v3 = vsel %vm731_vm3, %v60_v28, %v12169_v39  ;;  %v764_v4 = vsel %vm731_vm3, %v59_v29, %v12171_v42  ;;  %v9540_v39 = vld [vmem:[%s17000_s0 + $0x171] sm:$0xff]  ;;  %v9539_v42 = vld [vmem:[%s17000_s0 + $0x169] sm:$0xff] }
 0x11f   :  { %10659 = vmatprep.mubr.msk.f32.mxu0 %vm863_vm5, %v817_v17  ;;  %v72_v28 = vld [vmem:[%s17000_s0 + $0x248] sm:$0xff]  ;;  %v71_v29 = vld [vmem:[%s17000_s0 + $0x240] sm:$0xff] }
 0x120   :  { %10660 = vmatmul.mubr.msk.f32.gmra.mrb[20].mxu0 %vm863_vm5, %v818_v5  ;;  %v586_v22 = vpop.permute.xlu1 %585  ;;  %v584_v46 = vpop.permute.xlu0 %583 }
 0x121   :  { %v820_v7 = vsel %vm796_vm4, %v755_v32, %v586_v22  ;;  %v819_v21 = vsel %vm796_vm4, %v754_v33, %v584_v46 }
 0x122   :  { %1800 = vrot.lane.b32.xlu1 %v9528_v52, %s11655_s22  ;;  %1798 = vrot.lane.b32.xlu0 %v9527_v53, %s11655_s22  ;;  %v62_v52 = vld [vmem:[%s17000_s0 + $0x1d0] sm:$0xff]  ;;  %v61_v53 = vld [vmem:[%s17000_s0 + $0x1c8] sm:$0xff] }
 0x123   :  { %10662 = vmatprep.mubr.msk.f32.mxu0 %vm863_vm5, %v819_v21  ;;  %v767_v22 = vsel %vm731_vm3, %v62_v52, %v12181_v47  ;;  %v766_v46 = vsel %vm731_vm3, %v61_v53, %v12183_v50  ;;  %v63_v21 = vld [vmem:[%s17000_s0 + $0x1e0] sm:$0xff]  ;;  %v9542_v47 = vld [vmem:[%s17000_s0 + $0x189] sm:$0xff] }
 0x124   :  { %10663 = vmatmul.mubr.msk.f32.gmra.mrb[22].mxu0 %vm863_vm5, %v820_v7  ;;  %v590_v51 = vpop.permute.xlu1 %589  ;;  %v588_v61 = vpop.permute.xlu0 %587  ;;  %v64_v7 = vld [vmem:[%s17000_s0 + $0x1e8] sm:$0xff] }
 0x125   :  { %v822_v9 = vsel %vm796_vm4, %v757_v36, %v590_v51  ;;  %v821_v63 = vsel %vm796_vm4, %v756_v37, %v588_v61  ;;  %v9541_v50 = vld [vmem:[%s17000_s0 + $0x181] sm:$0xff]  ;;  %v769_v36 = vsel %vm731_vm3, %v64_v7, %v12193_v55  ;;  %v768_v37 = vsel %vm731_vm3, %v63_v21, %v12195_v58  ;;  %v9544_v55 = vld [vmem:[%s17000_s0 + $0x1d1] sm:$0xff]  ;;  %v9543_v58 = vld [vmem:[%s17000_s0 + $0x1c9] sm:$0xff] }
 0x126   :  { %1804 = vrot.lane.b32.xlu1 %v9530_v56, %s11655_s22  ;;  %1802 = vrot.lane.b32.xlu0 %v9529_v57, %s11655_s22  ;;  %v17056_v7 = vld [vmem:[#allocation11_spill] sm:$0xff] }
 0x127   :  { %10665 = vmatprep.mubr.msk.f32.mxu0 %vm863_vm5, %v821_v63 }
 0x128   :  { %10666 = vmatmul.mubr.msk.f32.gmra.mrb[24].mxu0 %vm863_vm5, %v822_v9  ;;  %v594_v43 = vpop.permute.xlu1 %593  ;;  %v592_v54 = vpop.permute.xlu0 %591 }
 0x129   :  { %v824_v11 = vsel %vm796_vm4, %v759_v40, %v594_v43  ;;  %v823_v25 = vsel %vm796_vm4, %v758_v41, %v592_v54  ;;  %v68_v43 = vld [vmem:[%s17000_s0 + $0x218] sm:$0xff]  ;;  %v67_v54 = vld [vmem:[%s17000_s0 + $0x210] sm:$0xff] }
 0x12a   :  { %1808 = vrot.lane.b32.xlu1 %v9532_v60, %s11655_s22  ;;  %1806 = vrot.lane.b32.xlu0 %v9531_v62, %s11655_s22  ;;  %v771_v60 = vsel %vm731_vm3, %v66_v30, %v12205_v14  ;;  %v770_v62 = vsel %vm731_vm3, %v65_v8, %v12207_v19  ;;  %v9546_v14 = vld [vmem:[%s17000_s0 + $0x1e9] sm:$0xff]  ;;  %v9545_v19 = vld [vmem:[%s17000_s0 + $0x1e1] sm:$0xff] }
 0x12b   :  { %10668 = vmatprep.mubr.msk.f32.mxu0 %vm863_vm5, %v823_v25  ;;  %v17057_v30 = vld [vmem:[#allocation12_spill] sm:$0xff] }
 0x12c   :  { %10669 = vmatmul.mubr.msk.f32.gmra.mrb[26].mxu0 %vm863_vm5, %v824_v11  ;;  %v598_v1 = vpop.permute.xlu1 %597  ;;  %v596_v16 = vpop.permute.xlu0 %595  ;;  %v17049_v11 = vld [vmem:[#allocation4_spill] sm:$0xff] }
 0x12d   :  { %v826_v35 = vsel %vm796_vm4, %v761_v44, %v598_v1  ;;  %v825_v0 = vsel %vm796_vm4, %v760_v45, %v596_v16  ;;  %v773_v25 = vsel %vm731_vm3, %v68_v43, %v17049_v11  ;;  %v70_v1 = vld [vmem:[%s17000_s0 + $0x230] sm:$0xff]  ;;  %v69_v16 = vld [vmem:[%s17000_s0 + $0x228] sm:$0xff] }
 0x12e   :  { %1812 = vrot.lane.b32.xlu1 %v9534_v15, %s11655_s22  ;;  %1810 = vrot.lane.b32.xlu0 %v9533_v18, %s11655_s22  ;;  %v17050_v15 = vld [vmem:[#allocation5_spill] sm:$0xff]  ;;  %v9556_v43 = vld [vmem:[%s17000_s0 + $0x261] sm:$0xff] }
 0x12f   :  { %10671 = vmatprep.mubr.msk.f32.mxu0 %vm863_vm5, %v825_v0  ;;  %v772_v18 = vsel %vm731_vm3, %v67_v54, %v17050_v15  ;;  %v9547_v0 = vld [vmem:[%s17000_s0 + $0x1f9] sm:$0xff]  ;;  %v80_v15 = vld [vmem:[%s17000_s0 + $0x2a8] sm:$0xff] }
 0x130   :  { %10672 = vmatmul.mubr.msk.f32.gmra.mrb[28].mxu0 %vm863_vm5, %v826_v35  ;;  %v602_v48 = vpop.permute.xlu1 %601  ;;  %v600_v49 = vpop.permute.xlu0 %599  ;;  %v9548_v35 = vld [vmem:[%s17000_s0 + $0x201] sm:$0xff]  ;;  %v9555_v54 = vld [vmem:[%s17000_s0 + $0x259] sm:$0xff] }
 0x131   :  { %v828_v27 = vsel %vm796_vm4, %v763_v2, %v602_v48  ;;  %v827_v38 = vsel %vm796_vm4, %v762_v59, %v600_v49  ;;  %v17052_v2 = vld [vmem:[#allocation7_spill] sm:$0xff] }
 0x132   :  { %1816 = vrot.lane.b32.xlu1 %v9536_v23, %s11655_s22  ;;  %1814 = vrot.lane.b32.xlu0 %v9535_v26, %s11655_s22  ;;  %v17051_v23 = vld [vmem:[#allocation6_spill] sm:$0xff]  ;;  %v774_v59 = vsel %vm731_vm3, %v69_v16, %v17052_v2  ;;  %v82_v2 = vld [vmem:[%s17000_s0 + $0x2c0] sm:$0xff] }
 0x133   :  { %10674 = vmatprep.mubr.msk.f32.mxu0 %vm863_vm5, %v827_v38  ;;  %v775_v26 = vsel %vm731_vm3, %v70_v1, %v17051_v23  ;;  %v9558_v1 = vld [vmem:[%s17000_s0 + $0x279] sm:$0xff]  ;;  %v9557_v16 = vld [vmem:[%s17000_s0 + $0x271] sm:$0xff] }
 0x134   :  { %10675 = vmatmul.mubr.msk.f32.gmra.mrb[30].mxu0 %vm863_vm5, %v828_v27  ;;  %v606_v5 = vpop.permute.xlu1 %605  ;;  %v604_v17 = vpop.permute.xlu0 %603 }
 0x135   :  { %v830_v32 = vsel %vm796_vm4, %v765_v3, %v606_v5  ;;  %v829_v33 = vsel %vm796_vm4, %v764_v4, %v604_v17  ;;  %v17053_v3 = vld [vmem:[#allocation8_spill] sm:$0xff]  ;;  %v17054_v5 = vld [vmem:[#allocation9_spill] sm:$0xff] }
 0x136   :  { %1820 = vrot.lane.b32.xlu1 %v9538_v31, %s11655_s22  ;;  %1818 = vrot.lane.b32.xlu0 %v9537_v34, %s11655_s22  ;;  %v9550_v31 = vld [vmem:[%s17000_s0 + $0x219] sm:$0xff]  ;;  %v9549_v34 = vld [vmem:[%s17000_s0 + $0x211] sm:$0xff]  ;;  %v777_v4 = vsel %vm731_vm3, %v72_v28, %v17053_v3  ;;  %v776_v17 = vsel %vm731_vm3, %v71_v29, %v17054_v5 }
 0x137   :  { %10677 = vmatprep.mubr.msk.f32.mxu0 %vm863_vm5, %v829_v33  ;;  %v73_v33 = vld [vmem:[%s17000_s0 + $0x258] sm:$0xff]  ;;  %v9559_v29 = vld [vmem:[%s17000_s0 + $0x289] sm:$0xff] }
 0x138   :  { %10678 = vmatmul.mubr.msk.f32.gmra.mrb[32].mxu0 %vm863_vm5, %v830_v32  ;;  %v610_v20 = vpop.permute.xlu1 %609  ;;  %v608_v6 = vpop.permute.xlu0 %607  ;;  %v74_v32 = vld [vmem:[%s17000_s0 + $0x260] sm:$0xff]  ;;  %v778_v21 = vsel %vm731_vm3, %v73_v33, %v17056_v7  ;;  %v9560_v28 = vld [vmem:[%s17000_s0 + $0x291] sm:$0xff] }
 0x139   :  { %v832_v56 = vsel %vm796_vm4, %v767_v22, %v610_v20  ;;  %v831_v57 = vsel %vm796_vm4, %v766_v46, %v608_v6  ;;  %v9552_v22 = vld [vmem:[%s17000_s0 + $0x231] sm:$0xff]  ;;  %v9551_v46 = vld [vmem:[%s17000_s0 + $0x229] sm:$0xff] }
 0x13a   :  { %1824 = vrot.lane.b32.xlu1 %v9540_v39, %s11655_s22  ;;  %1822 = vrot.lane.b32.xlu0 %v9539_v42, %s11655_s22  ;;  %v17055_v20 = vld [vmem:[#allocation10_spill] sm:$0xff] }
 0x13b   :  { %10680 = vmatprep.mubr.msk.f32.mxu0 %vm863_vm5, %v831_v57  ;;  %v779_v6 = vsel %vm731_vm3, %v74_v32, %v17055_v20  ;;  %v84_v3 = vld [vmem:[%s17000_s0 + $0x2d8] sm:$0xff]  ;;  %v9639_v32 = vld [vmem:[%s17001_s1 + $0x10] sm:$0xff] }
 0x13c   :  { %10681 = vmatmul.mubr.msk.f32.gmra.mrb[34].mxu0 %vm863_vm5, %v832_v56  ;;  %v614_v51 = vpop.permute.xlu1 %613  ;;  %v612_v61 = vpop.permute.xlu0 %611  ;;  %v9640_v33 = vld [vmem:[%s17001_s1 + $0x18] sm:$0xf] }
 0x13d   :  { %v834_v9 = vsel %vm796_vm4, %v769_v36, %v614_v51  ;;  %v833_v63 = vsel %vm796_vm4, %v768_v37, %v612_v61  ;;  %v9554_v51 = vld [vmem:[%s17000_s0 + $0x249] sm:$0xff]  ;;  %v9553_v61 = vld [vmem:[%s17000_s0 + $0x241] sm:$0xff] }
 0x13e   :  { %1828 = vrot.lane.b32.xlu1 %v9542_v47, %s11655_s22  ;;  %1826 = vrot.lane.b32.xlu0 %v9541_v50, %s11655_s22  ;;  %v76_v47 = vld [vmem:[%s17000_s0 + $0x278] sm:$0xff]  ;;  %v75_v50 = vld [vmem:[%s17000_s0 + $0x270] sm:$0xff] }
 0x13f   :  { %10683 = vmatprep.mubr.msk.f32.mxu0 %vm863_vm5, %v833_v63  ;;  %v781_v8 = vsel %vm731_vm3, %v76_v47, %v17057_v30  ;;  %v86_v47 = vld [vmem:[%s17000_s0 + $0x2f0] sm:$0xff]  ;;  %v17068_v30 = vld [vmem:[#allocation22_spill] sm:$0xff] }
 0x140   :  { %10684 = vmatmul.mubr.msk.f32.gmra.mrb[36].mxu0 %vm863_vm5, %v834_v9  ;;  %v618_v40 = vpop.permute.xlu1 %617  ;;  %v616_v41 = vpop.permute.xlu0 %615  ;;  %v17058_v9 = vld [vmem:[#allocation13_spill] sm:$0xff] }
 0x141   :  { %v836_v24 = vsel %vm796_vm4, %v771_v60, %v618_v40  ;;  %v835_v10 = vsel %vm796_vm4, %v770_v62, %v616_v41  ;;  %v780_v63 = vsel %vm731_vm3, %v75_v50, %v17058_v9  ;;  %v78_v60 = vld [vmem:[%s17000_s0 + $0x290] sm:$0xff]  ;;  %v77_v62 = vld [vmem:[%s17000_s0 + $0x288] sm:$0xff]  ;;  %v17069_v9 = vld [vmem:[#allocation23_spill] sm:$0xff] }
 0x142   :  { %1832 = vrot.lane.b32.xlu1 %v9544_v55, %s11655_s22  ;;  %1830 = vrot.lane.b32.xlu0 %v9543_v58, %s11655_s22  ;;  %v85_v50 = vld [vmem:[%s17000_s0 + $0x2e8] sm:$0xff] }
 0x143   :  { %10686 = vmatprep.mubr.msk.f32.mxu0 %vm863_vm5, %v835_v10 }
 0x144   :  { %10687 = vmatmul.mubr.msk.f32.gmra.mrb[38].mxu0 %vm863_vm5, %v836_v24  ;;  %v622_v44 = vpop.permute.xlu1 %621  ;;  %v620_v45 = vpop.permute.xlu0 %619  ;;  %v17059_v24 = vld [vmem:[#allocation14_spill] sm:$0xff] }
 0x145   :  { %v838_v12 = vsel %vm796_vm4, %v773_v25, %v622_v44  ;;  %v837_v13 = vsel %vm796_vm4, %v772_v18, %v620_v45  ;;  %v783_v10 = vsel %vm731_vm3, %v78_v60, %v17059_v24  ;;  %v79_v18 = vld [vmem:[%s17000_s0 + $0x2a0] sm:$0xff]  ;;  %v88_v60 = vld [vmem:[%s17000_s0 + $0x308] sm:$0xff] }
 0x146   :  { %1836 = vrot.lane.b32.xlu1 %v9546_v14, %s11655_s22  ;;  %1834 = vrot.lane.b32.xlu0 %v9545_v19, %s11655_s22  ;;  %v17060_v14 = vld [vmem:[#allocation15_spill] sm:$0xff]  ;;  %v17070_v24 = vld [vmem:[#allocation24_spill] sm:$0xff] }
 0x147   :  { %10689 = vmatprep.mubr.msk.f32.mxu0 %vm863_vm5, %v837_v13  ;;  %v782_v19 = vsel %vm731_vm3, %v77_v62, %v17060_v14  ;;  %v87_v62 = vld [vmem:[%s17000_s0 + $0x300] sm:$0xff]  ;;  %v17071_v14 = vld [vmem:[#allocation25_spill] sm:$0xff] }
 0x148   :  { %10690 = vmatmul.mubr.msk.f32.gmra.mrb[40].mxu0 %vm863_vm5, %v838_v12  ;;  %v626_v48 = vpop.permute.xlu1 %625  ;;  %v624_v49 = vpop.permute.xlu0 %623  ;;  %v17061_v12 = vld [vmem:[#allocation16_spill] sm:$0xff] }
 0x149   :  { %v840_v27 = vsel %vm796_vm4, %v775_v26, %v626_v48  ;;  %v839_v38 = vsel %vm796_vm4, %v774_v59, %v624_v49  ;;  %v785_v13 = vsel %vm731_vm3, %v80_v15, %v17061_v12  ;;  %v81_v59 = vld [vmem:[%s17000_s0 + $0x2b8] sm:$0xff]  ;;  %v90_v15 = vld [vmem:[%s17000_s0 + $0x320] sm:$0xff] }
 0x14a   :  { %1840 = vrot.lane.b32.xlu1 %v9548_v35, %s11655_s22  ;;  %1838 = vrot.lane.b32.xlu0 %v9547_v0, %s11655_s22  ;;  %v17062_v35 = vld [vmem:[#allocation17_spill] sm:$0xff]  ;;  %v17072_v12 = vld [vmem:[#allocation26_spill] sm:$0xff] }
 0x14b   :  { %10692 = vmatprep.mubr.msk.f32.mxu0 %vm863_vm5, %v839_v38  ;;  %v784_v0 = vsel %vm731_vm3, %v79_v18, %v17062_v35  ;;  %v89_v18 = vld [vmem:[%s17000_s0 + $0x318] sm:$0xff]  ;;  %v17073_v35 = vld [vmem:[#allocation27_spill] sm:$0xff] }
 0x14c   :  { %10693 = vmatmul.mubr.msk.f32.gmra.mrb[42].mxu0 %vm863_vm5, %v840_v27  ;;  %v630_v52 = vpop.permute.xlu1 %629  ;;  %v628_v53 = vpop.permute.xlu0 %627  ;;  %v17063_v27 = vld [vmem:[#allocation18_spill] sm:$0xff] }
 0x14d   :  { %v842_v39 = vsel %vm796_vm4, %v777_v4, %v630_v52  ;;  %v841_v42 = vsel %vm796_vm4, %v776_v17, %v628_v53  ;;  %v787_v38 = vsel %vm731_vm3, %v82_v2, %v17063_v27  ;;  %v83_v17 = vld [vmem:[%s17000_s0 + $0x2d0] sm:$0xff]  ;;  %v9572_v27 = vld [vmem:[%s17000_s0 + $0x321] sm:$0xff] }
 0x14e   :  { %1844 = vrot.lane.b32.xlu1 %v9550_v31, %s11655_s22  ;;  %1842 = vrot.lane.b32.xlu0 %v9549_v34, %s11655_s22  ;;  %v17064_v31 = vld [vmem:[#allocation19_spill] sm:$0xff] }
 0x14f   :  { %10695 = vmatprep.mubr.msk.f32.mxu0 %vm863_vm5, %v841_v42  ;;  %v786_v34 = vsel %vm731_vm3, %v81_v59, %v17064_v31  ;;  %v9562_v42 = vld [vmem:[%s17000_s0 + $0x2a9] sm:$0xff] }
 0x150   :  { %10696 = vmatmul.mubr.msk.f32.gmra.mrb[44].mxu0 %vm863_vm5, %v842_v39  ;;  %v634_v56 = vpop.permute.xlu1 %633  ;;  %v632_v57 = vpop.permute.xlu0 %631  ;;  %v11231_v39 = vpack.c.bf16 %v9640_v33, %v9639_v32 }
 0x151   :  { %v844_v36 = vsel %vm796_vm4, %v779_v6, %v634_v56  ;;  %v843_v37 = vsel %vm796_vm4, %v778_v21, %v632_v57  ;;  %v17066_v6 = vld [vmem:[#allocation21_spill] sm:$0xff] }
 0x152   :  { %1848 = vrot.lane.b32.xlu1 %v9552_v22, %s11655_s22  ;;  %1846 = vrot.lane.b32.xlu0 %v9551_v46, %s11655_s22  ;;  %v9561_v22 = vld [vmem:[%s17000_s0 + $0x2a1] sm:$0xff]  ;;  %v788_v7 = vsel %vm731_vm3, %v83_v17, %v17066_v6  ;;  %v9579_v6 = vld [vmem:[%s17000_s0 + $0x4a] sm:$0xff] }
 0x153   :  { %10698 = vmatprep.mubr.msk.f32.mxu0 %vm863_vm5, %v843_v37  ;;  %v17065_v46 = vld [vmem:[#allocation20_spill] sm:$0xff]  ;;  %11233 = vmatprep.subr.msk.bf16.mxu0 %vm11963_vm2, %v11231_v39 }
 0x154   :  { %10699 = vmatmul.mubr.msk.f32.gmra.mrb[46].mxu0 %vm863_vm5, %v844_v36  ;;  %v638_v55 = vpop.permute.xlu1 %637  ;;  %v636_v58 = vpop.permute.xlu0 %635  ;;  %v789_v20 = vsel %vm731_vm3, %v84_v3, %v17065_v46  ;;  %v9574_v3 = vld [vmem:[%s17000_s0 + $0x339] sm:$0xff] }
 0x155   :  { %v846_v40 = vsel %vm796_vm4, %v781_v8, %v638_v55  ;;  %v845_v41 = vsel %vm796_vm4, %v780_v63, %v636_v58  ;;  %11236 = vmatpush3.bf16.msk.msra.mxu0 %vm11963_vm2, %v11231_v39  ;;  %v791_v8 = vsel %vm731_vm3, %v86_v47, %v17068_v30  ;;  %v790_v63 = vsel %vm731_vm3, %v85_v50, %v17069_v9  ;;  %v9578_v39 = vld [vmem:[%s17000_s0 + $0x3a] sm:$0xff]  ;;  %v9581_v47 = vld [vmem:[%s17000_s0 + $0x62] sm:$0xff]  ;;  %v9585_v9 = vld [vmem:[%s17000_s0 + $0x92] sm:$0xff] }
 0x156   :  { %1852 = vrot.lane.b32.xlu1 %v9554_v51, %s11655_s22  ;;  %1850 = vrot.lane.b32.xlu0 %v9553_v61, %s11655_s22  ;;  %v9564_v51 = vld [vmem:[%s17000_s0 + $0x2c1] sm:$0xff]  ;;  %v9563_v61 = vld [vmem:[%s17000_s0 + $0x2b9] sm:$0xff] }
 0x157   :  { %10701 = vmatprep.mubr.msk.f32.mxu0 %vm863_vm5, %v845_v41 }
 0x158   :  { %10702 = vmatmul.mubr.msk.f32.gmra.mrb[48].mxu0 %vm863_vm5, %v846_v40  ;;  %v642_v11 = vpop.permute.xlu1 %641  ;;  %v640_v25 = vpop.permute.xlu0 %639 }
 0x159   :  { %v848_v44 = vsel %vm796_vm4, %v783_v10, %v642_v11  ;;  %v847_v45 = vsel %vm796_vm4, %v782_v19, %v640_v25  ;;  %v793_v10 = vsel %vm731_vm3, %v88_v60, %v17070_v24  ;;  %v792_v19 = vsel %vm731_vm3, %v87_v62, %v17071_v14  ;;  %v9587_v60 = vld [vmem:[%s17000_s0 + $0xaa] sm:$0xff]  ;;  %v9591_v14 = vld [vmem:[%s17000_s0 + $0xda] sm:$0xff] }
 0x15a   :  { %1856 = vrot.lane.b32.xlu1 %v9556_v43, %s11655_s22  ;;  %1854 = vrot.lane.b32.xlu0 %v9555_v54, %s11655_s22  ;;  %v9566_v43 = vld [vmem:[%s17000_s0 + $0x2d9] sm:$0xff]  ;;  %v9565_v54 = vld [vmem:[%s17000_s0 + $0x2d1] sm:$0xff] }
 0x15b   :  { %10704 = vmatprep.mubr.msk.f32.mxu0 %vm863_vm5, %v847_v45 }
 0x15c   :  { %10705 = vmatmul.mubr.msk.f32.gmra.mrb[50].mxu0 %vm863_vm5, %v848_v44  ;;  %v646_v23 = vpop.permute.xlu1 %645  ;;  %v644_v26 = vpop.permute.xlu0 %643 }
 0x15d   :  { %v850_v48 = vsel %vm796_vm4, %v785_v13, %v646_v23  ;;  %v849_v49 = vsel %vm796_vm4, %v784_v0, %v644_v26  ;;  %v795_v13 = vsel %vm731_vm3, %v90_v15, %v17072_v12  ;;  %v794_v0 = vsel %vm731_vm3, %v89_v18, %v17073_v35  ;;  %v9593_v15 = vld [vmem:[%s17000_s0 + $0xf2] sm:$0xff]  ;;  %v9597_v35 = vld [vmem:[%s17000_s0 + $0x122] sm:$0xff] }
 0x15e   :  { %1860 = vrot.lane.b32.xlu1 %v9558_v1, %s11655_s22  ;;  %1858 = vrot.lane.b32.xlu0 %v9557_v16, %s11655_s22  ;;  %v9568_v1 = vld [vmem:[%s17000_s0 + $0x2f1] sm:$0xff]  ;;  %v9567_v16 = vld [vmem:[%s17000_s0 + $0x2e9] sm:$0xff] }
 0x15f   :  { %10707 = vmatprep.mubr.msk.f32.mxu0 %vm863_vm5, %v849_v49  ;;  %v9569_v49 = vld [vmem:[%s17000_s0 + $0x301] sm:$0xff] }
 0x160   :  { %10708 = vmatmul.mubr.msk.f32.gmra.mrb[52].mxu0 %vm863_vm5, %v850_v48  ;;  %v650_v4 = vpop.permute.xlu1 %649  ;;  %v648_v5 = vpop.permute.xlu0 %647  ;;  %v9570_v48 = vld [vmem:[%s17000_s0 + $0x309] sm:$0xff] }
 0x161   :  { %v852_v52 = vsel %vm796_vm4, %v787_v38, %v650_v4  ;;  %v851_v53 = vsel %vm796_vm4, %v786_v34, %v648_v5  ;;  %v9571_v38 = vld [vmem:[%s17000_s0 + $0x319] sm:$0xff]  ;;  %v9573_v4 = vld [vmem:[%s17000_s0 + $0x331] sm:$0xff] }
 0x162   :  { %1864 = vrot.lane.b32.xlu1 %v9560_v28, %s11655_s22  ;;  %1862 = vrot.lane.b32.xlu0 %v9559_v29, %s11655_s22 }
 0x163   :  { %10710 = vmatprep.mubr.msk.f32.mxu0 %vm863_vm5, %v851_v53  ;;  %v9575_v53 = vld [vmem:[%s17000_s0 + $0x1a] sm:$0xff] }
 0x164   :  { %10711 = vmatmul.mubr.msk.f32.gmra.mrb[54].mxu0 %vm863_vm5, %v852_v52  ;;  %v654_v21 = vpop.permute.xlu1 %653  ;;  %v652_v56 = vpop.permute.xlu0 %651  ;;  %v9576_v52 = vld [vmem:[%s17000_s0 + $0x22] sm:$0xff] }
 0x165   :  { %v854_v36 = vsel %vm796_vm4, %v789_v20, %v654_v21  ;;  %v853_v37 = vsel %vm796_vm4, %v788_v7, %v652_v56  ;;  %v9580_v20 = vld [vmem:[%s17000_s0 + $0x52] sm:$0xff]  ;;  %v9582_v56 = vld [vmem:[%s17000_s0 + $0x6a] sm:$0xff] }
 0x166   :  { %1868 = vrot.lane.b32.xlu1 %v9562_v42, %s11655_s22  ;;  %1866 = vrot.lane.b32.xlu0 %v9561_v22, %s11655_s22  ;;  %v9577_v42 = vld [vmem:[%s17000_s0 + $0x32] sm:$0xff] }
 0x167   :  { %10713 = vmatprep.mubr.msk.f32.mxu0 %vm863_vm5, %v853_v37  ;;  %v9584_v37 = vld [vmem:[%s17000_s0 + $0x82] sm:$0xff] }
 0x168   :  { %10714 = vmatmul.mubr.msk.f32.gmra.mrb[56].mxu0 %vm863_vm5, %v854_v36  ;;  %v658_v55 = vpop.permute.xlu1 %657  ;;  %v656_v58 = vpop.permute.xlu0 %655 }
 0x169   :  { %v856_v40 = vsel %vm796_vm4, %v791_v8, %v658_v55  ;;  %v855_v41 = vsel %vm796_vm4, %v790_v63, %v656_v58  ;;  %v9586_v8 = vld [vmem:[%s17000_s0 + $0x9a] sm:$0xff]  ;;  %v9588_v58 = vld [vmem:[%s17000_s0 + $0xb2] sm:$0xff] }
 0x16a   :  { %1872 = vrot.lane.b32.xlu1 %v9564_v51, %s11655_s22  ;;  %1870 = vrot.lane.b32.xlu0 %v9563_v61, %s11655_s22  ;;  %v9583_v51 = vld [vmem:[%s17000_s0 + $0x7a] sm:$0xff] }
 0x16b   :  { %10716 = vmatprep.mubr.msk.f32.mxu0 %vm863_vm5, %v855_v41  ;;  %v9590_v41 = vld [vmem:[%s17000_s0 + $0xca] sm:$0xff] }
 0x16c   :  { %10717 = vmatmul.mubr.msk.f32.gmra.mrb[58].mxu0 %vm863_vm5, %v856_v40  ;;  %v662_v11 = vpop.permute.xlu1 %661  ;;  %v660_v25 = vpop.permute.xlu0 %659 }
 0x16d   :  { %v858_v44 = vsel %vm796_vm4, %v793_v10, %v662_v11  ;;  %v857_v45 = vsel %vm796_vm4, %v792_v19, %v660_v25  ;;  %v9592_v10 = vld [vmem:[%s17000_s0 + $0xe2] sm:$0xff]  ;;  %v9594_v25 = vld [vmem:[%s17000_s0 + $0xfa] sm:$0xff] }
 0x16e   :  { %1876 = vrot.lane.b32.xlu1 %v9566_v43, %s11655_s22  ;;  %1874 = vrot.lane.b32.xlu0 %v9565_v54, %s11655_s22  ;;  %v9589_v43 = vld [vmem:[%s17000_s0 + $0xc2] sm:$0xff] }
 0x16f   :  { %10719 = vmatprep.mubr.msk.f32.mxu0 %vm863_vm5, %v857_v45  ;;  %v9596_v45 = vld [vmem:[%s17000_s0 + $0x112] sm:$0xff] }
 0x170   :  { %10720 = vmatmul.mubr.msk.f32.gmra.mrb[60].mxu0 %vm863_vm5, %v858_v44  ;;  %v666_v23 = vpop.permute.xlu1 %665  ;;  %v664_v26 = vpop.permute.xlu0 %663 }
 0x171   :  { %v860_v2 = vsel %vm796_vm4, %v795_v13, %v666_v23  ;;  %v859_v59 = vsel %vm796_vm4, %v794_v0, %v664_v26  ;;  %v9598_v13 = vld [vmem:[%s17000_s0 + $0x12a] sm:$0xff]  ;;  %v9600_v26 = vld [vmem:[%s17000_s0 + $0x142] sm:$0xff] }
 0x172   :  { %1880 = vrot.lane.b32.xlu1 %v9568_v1, %s11655_s22  ;;  %1878 = vrot.lane.b32.xlu0 %v9567_v16, %s11655_s22  ;;  %v9595_v1 = vld [vmem:[%s17000_s0 + $0x10a] sm:$0xff] }
 0x173   :  { %10722 = vmatprep.mubr.msk.f32.mxu0 %vm863_vm5, %v859_v59 }
 0x174   :  { %10723 = vmatmul.mubr.msk.f32.gmra.mrb[62].mxu0 %vm863_vm5, %v860_v2  ;;  %v13051_v28 = vpop.permute.xlu1 %1768  ;;  %v13053_v29 = vpop.permute.xlu0 %1766  ;;  %v9599_v2 = vld [vmem:[%s17000_s0 + $0x13a] sm:$0xff] }
 0x176   :  { %1884 = vrot.lane.b32.xlu1 %v9570_v48, %s11655_s22  ;;  %1882 = vrot.lane.b32.xlu0 %v9569_v49, %s11655_s22  ;;  %v9602_v49 = vld [vmem:[%s17000_s0 + $0x15a] sm:$0xff] }
 0x178   :  { %v13063_v31 = vpop.permute.xlu1 %1772  ;;  %v13065_v34 = vpop.permute.xlu0 %1770 }
 0x17a   :  { %1888 = vrot.lane.b32.xlu1 %v9572_v27, %s11655_s22  ;;  %1886 = vrot.lane.b32.xlu0 %v9571_v38, %s11655_s22  ;;  %v9601_v27 = vld [vmem:[%s17000_s0 + $0x152] sm:$0xff] }
 0x17c   :  { %v13075_v5 = vpop.permute.xlu1 %1776  ;;  %v13077_v17 = vpop.permute.xlu0 %1774 }
 0x17e   :  { %1892 = vrot.lane.b32.xlu1 %v9574_v3, %s11655_s22  ;;  %1890 = vrot.lane.b32.xlu0 %v9573_v4, %s11655_s22  ;;  %v9604_v4 = vld [vmem:[%s17000_s0 + $0x172] sm:$0xff] }
 0x180   :  { %v13087_v32 = vpop.permute.xlu1 %1780  ;;  %v13089_v33 = vpop.permute.xlu0 %1778 }
 0x182   :  { %2024 = vrot.lane.b32.xlu1 %v9576_v52, %s11657_s10  ;;  %2022 = vrot.lane.b32.xlu0 %v9575_v53, %s11657_s10  ;;  %v9603_v52 = vld [vmem:[%s17000_s0 + $0x16a] sm:$0xff] }
 0x184   :  { %v13099_v22 = vpop.permute.xlu1 %1784  ;;  %v13101_v46 = vpop.permute.xlu0 %1782 }
 0x186   :  { %2028 = vrot.lane.b32.xlu1 %v9578_v39, %s11657_s10  ;;  %2026 = vrot.lane.b32.xlu0 %v9577_v42, %s11657_s10  ;;  %v9606_v42 = vld [vmem:[%s17000_s0 + $0x18a] sm:$0xff] }
 0x188   :  { %v13111_v7 = vpop.permute.xlu1 %1788  ;;  %v13113_v21 = vpop.permute.xlu0 %1786 }
 0x18a   :  { %2032 = vrot.lane.b32.xlu1 %v9580_v20, %s11657_s10  ;;  %2030 = vrot.lane.b32.xlu0 %v9579_v6, %s11657_s10  ;;  %v9605_v20 = vld [vmem:[%s17000_s0 + $0x182] sm:$0xff] }
 0x18c   :  { %v13123_v50 = vpop.permute.xlu1 %1792  ;;  %v13125_v36 = vpop.permute.xlu0 %1790 }
 0x18e   :  { %2036 = vrot.lane.b32.xlu1 %v9582_v56, %s11657_s10  ;;  %2034 = vrot.lane.b32.xlu0 %v9581_v47, %s11657_s10  ;;  %v9608_v47 = vld [vmem:[%s17000_s0 + $0x1d2] sm:$0xff] }
 0x190   :  { %v13135_v61 = vpop.permute.xlu1 %1796  ;;  %v13137_v30 = vpop.permute.xlu0 %1794 }
 0x192   :  { %2040 = vrot.lane.b32.xlu1 %v9584_v37, %s11657_s10  ;;  %2038 = vrot.lane.b32.xlu0 %v9583_v51, %s11657_s10  ;;  %v9607_v37 = vld [vmem:[%s17000_s0 + $0x1ca] sm:$0xff] }
 0x194   :  { %v13147_v63 = vpop.permute.xlu1 %1800  ;;  %v13149_v55 = vpop.permute.xlu0 %1798 }
 0x196   :  { %2044 = vrot.lane.b32.xlu1 %v9586_v8, %s11657_s10  ;;  %2042 = vrot.lane.b32.xlu0 %v9585_v9, %s11657_s10  ;;  %v9610_v9 = vld [vmem:[%s17000_s0 + $0x1ea] sm:$0xff] }
 0x198   :  { %v13159_v62 = vpop.permute.xlu1 %1804  ;;  %v13161_v40 = vpop.permute.xlu0 %1802 }
 0x19a   :  { %2048 = vrot.lane.b32.xlu1 %v9588_v58, %s11657_s10  ;;  %2046 = vrot.lane.b32.xlu0 %v9587_v60, %s11657_s10  ;;  %v9609_v58 = vld [vmem:[%s17000_s0 + $0x1e2] sm:$0xff] }
 0x19c   :  { %v13171_v54 = vpop.permute.xlu1 %1808  ;;  %v13173_v24 = vpop.permute.xlu0 %1806 }
 0x19e   :  { %2052 = vrot.lane.b32.xlu1 %v9590_v41, %s11657_s10  ;;  %2050 = vrot.lane.b32.xlu0 %v9589_v43, %s11657_s10  ;;  %v9612_v43 = vld [vmem:[%s17000_s0 + $0x202] sm:$0xff] }
 0x1a0   :  { %v13183_v19 = vpop.permute.xlu1 %1812  ;;  %v13185_v11 = vpop.permute.xlu0 %1810 }
 0x1a2   :  { %2056 = vrot.lane.b32.xlu1 %v9592_v10, %s11657_s10  ;;  %2054 = vrot.lane.b32.xlu0 %v9591_v14, %s11657_s10  ;;  %v9611_v10 = vld [vmem:[%s17000_s0 + $0x1fa] sm:$0xff] }
 0x1a4   :  { %v13195_v18 = vpop.permute.xlu1 %1816  ;;  %v13197_v44 = vpop.permute.xlu0 %1814 }
 0x1a6   :  { %2060 = vrot.lane.b32.xlu1 %v9594_v25, %s11657_s10  ;;  %2058 = vrot.lane.b32.xlu0 %v9593_v15, %s11657_s10  ;;  %v9614_v15 = vld [vmem:[%s17000_s0 + $0x21a] sm:$0xff] }
 0x1a8   :  { %v13207_v16 = vpop.permute.xlu1 %1820  ;;  %v13209_v12 = vpop.permute.xlu0 %1818 }
 0x1aa   :  { %2064 = vrot.lane.b32.xlu1 %v9596_v45, %s11657_s10  ;;  %2062 = vrot.lane.b32.xlu0 %v9595_v1, %s11657_s10  ;;  %v9613_v45 = vld [vmem:[%s17000_s0 + $0x212] sm:$0xff] }
 0x1ac   :  { %v13219_v0 = vpop.permute.xlu1 %1824  ;;  %v13221_v23 = vpop.permute.xlu0 %1822 }
 0x1ae   :  { %2068 = vrot.lane.b32.xlu1 %v9598_v13, %s11657_s10  ;;  %2066 = vrot.lane.b32.xlu0 %v9597_v35, %s11657_s10  ;;  %v9616_v35 = vld [vmem:[%s17000_s0 + $0x232] sm:$0xff] }
 0x1b0   :  { %v13231_v59 = vpop.permute.xlu1 %1828  ;;  %v13233_v48 = vpop.permute.xlu0 %1826 }
 0x1b2   :  { %2072 = vrot.lane.b32.xlu1 %v9600_v26, %s11657_s10  ;;  %2070 = vrot.lane.b32.xlu0 %v9599_v2, %s11657_s10  ;;  %v9615_v26 = vld [vmem:[%s17000_s0 + $0x22a] sm:$0xff] }
 0x1b4   :  { %v13243_v38 = vpop.permute.xlu1 %1832  ;;  %v13245_v3 = vpop.permute.xlu0 %1830 }
 0x1b6   :  { %2076 = vrot.lane.b32.xlu1 %v9602_v49, %s11657_s10  ;;  %2074 = vrot.lane.b32.xlu0 %v9601_v27, %s11657_s10  ;;  %v9618_v27 = vld [vmem:[%s17000_s0 + $0x24a] sm:$0xff] }
 0x1b8   :  { %v13255_v53 = vpop.permute.xlu1 %1836  ;;  %v13257_v39 = vpop.permute.xlu0 %1834 }
 0x1ba   :  { %2080 = vrot.lane.b32.xlu1 %v9604_v4, %s11657_s10  ;;  %2078 = vrot.lane.b32.xlu0 %v9603_v52, %s11657_s10  ;;  %v9617_v4 = vld [vmem:[%s17000_s0 + $0x242] sm:$0xff] }
 0x1bc   :  { %v13267_v6 = vpop.permute.xlu1 %1840  ;;  %v13269_v56 = vpop.permute.xlu0 %1838 }
 0x1be   :  { %2084 = vrot.lane.b32.xlu1 %v9606_v42, %s11657_s10  ;;  %2082 = vrot.lane.b32.xlu0 %v9605_v20, %s11657_s10  ;;  %v9620_v20 = vld [vmem:[%s17000_s0 + $0x262] sm:$0xff] }
 0x1c0   :  { %v13279_v51 = vpop.permute.xlu1 %1844  ;;  %v13281_v8 = vpop.permute.xlu0 %1842 }
 0x1c2   :  { %2088 = vrot.lane.b32.xlu1 %v9608_v47, %s11657_s10  ;;  %2086 = vrot.lane.b32.xlu0 %v9607_v37, %s11657_s10  ;;  %v9619_v47 = vld [vmem:[%s17000_s0 + $0x25a] sm:$0xff] }
 0x1c4   :  { %v13291_v60 = vpop.permute.xlu1 %1848  ;;  %v13293_v41 = vpop.permute.xlu0 %1846 }
 0x1c6   :  { %2092 = vrot.lane.b32.xlu1 %v9610_v9, %s11657_s10  ;;  %2090 = vrot.lane.b32.xlu0 %v9609_v58, %s11657_s10  ;;  %v9622_v58 = vld [vmem:[%s17000_s0 + $0x27a] sm:$0xff] }
 0x1c8   :  { %v13303_v14 = vpop.permute.xlu1 %1852  ;;  %v13305_v25 = vpop.permute.xlu0 %1850 }
 0x1ca   :  { %2096 = vrot.lane.b32.xlu1 %v9612_v43, %s11657_s10  ;;  %2094 = vrot.lane.b32.xlu0 %v9611_v10, %s11657_s10  ;;  %v9621_v43 = vld [vmem:[%s17000_s0 + $0x272] sm:$0xff] }
 0x1cc   :  { %v13315_v1 = vpop.permute.xlu1 %1856  ;;  %v13317_v13 = vpop.permute.xlu0 %1854 }
 0x1ce   :  { %2100 = vrot.lane.b32.xlu1 %v9614_v15, %s11657_s10  ;;  %2098 = vrot.lane.b32.xlu0 %v9613_v45, %s11657_s10  ;;  %v9624_v45 = vld [vmem:[%s17000_s0 + $0x292] sm:$0xff] }
 0x1d0   :  { %v13327_v2 = vpop.permute.xlu1 %1860  ;;  %v13329_v49 = vpop.permute.xlu0 %1858 }
 0x1d2   :  { %2104 = vrot.lane.b32.xlu1 %v9616_v35, %s11657_s10  ;;  %2102 = vrot.lane.b32.xlu0 %v9615_v26, %s11657_s10  ;;  %v9623_v35 = vld [vmem:[%s17000_s0 + $0x28a] sm:$0xff] }
 0x1d4   :  { %v13339_v52 = vpop.permute.xlu1 %1864  ;;  %v13341_v42 = vpop.permute.xlu0 %1862 }
 0x1d6   :  { %2108 = vrot.lane.b32.xlu1 %v9618_v27, %s11657_s10  ;;  %2106 = vrot.lane.b32.xlu0 %v9617_v4, %s11657_s10  ;;  %v9626_v4 = vld [vmem:[%s17000_s0 + $0x2aa] sm:$0xff] }
 0x1d8   :  { %v13351_v37 = vpop.permute.xlu1 %1868  ;;  %v13353_v9 = vpop.permute.xlu0 %1866 }
 0x1d9   :  { %17074 = vst [vmem:[#allocation4_spill] sm:$0xff] %v13351_v37  ;;  %17075 = vst [vmem:[#allocation5_spill] sm:$0xff] %v13353_v9 }
 0x1da   :  { %2112 = vrot.lane.b32.xlu1 %v9620_v20, %s11657_s10  ;;  %2110 = vrot.lane.b32.xlu0 %v9619_v47, %s11657_s10  ;;  %v9625_v20 = vld [vmem:[%s17000_s0 + $0x2a2] sm:$0xff] }
 0x1db   :  { %v9898_v47 = vld [vmem:[%s17001_s1 + $0x20] sm:$0xff] }
 0x1dc   :  { %v13363_v10 = vpop.permute.xlu1 %1872  ;;  %v13365_v15 = vpop.permute.xlu0 %1870 }
 0x1dd   :  { %17076 = vst [vmem:[#allocation6_spill] sm:$0xff] %v13363_v10  ;;  %17077 = vst [vmem:[#allocation7_spill] sm:$0xff] %v13365_v15 }
 0x1de   :  { %2116 = vrot.lane.b32.xlu1 %v9622_v58, %s11657_s10  ;;  %2114 = vrot.lane.b32.xlu0 %v9621_v43, %s11657_s10  ;;  %v9899_v58 = vld [vmem:[%s17001_s1 + $0x28] sm:$0xf] }
 0x1e0   :  { %v13375_v26 = vpop.permute.xlu1 %1876  ;;  %v13377_v27 = vpop.permute.xlu0 %1874 }
 0x1e1   :  { %17078 = vst [vmem:[#allocation8_spill] sm:$0xff] %v13375_v26  ;;  %17079 = vst [vmem:[#allocation9_spill] sm:$0xff] %v13377_v27  ;;  %v9628_v27 = vld [vmem:[%s17000_s0 + $0x2c2] sm:$0xff]  ;;  %v9627_v26 = vld [vmem:[%s17000_s0 + $0x2ba] sm:$0xff] }
 0x1e2   :  { %2120 = vrot.lane.b32.xlu1 %v9624_v45, %s11657_s10  ;;  %2118 = vrot.lane.b32.xlu0 %v9623_v35, %s11657_s10  ;;  %v11237_v35 = vpack.c.bf16 %v9899_v58, %v9898_v47 }
 0x1e4   :  { %v13393_v43 = vpop.permute.xlu1 %1880  ;;  %v13395_v45 = vpop.permute.xlu0 %1878  ;;  %11239 = vmatprep.subr.msk.bf16.mxu0 %vm11963_vm2, %v11237_v35 }
 0x1e5   :  { %17080 = vst [vmem:[#allocation10_spill] sm:$0xff] %v13393_v43  ;;  %17081 = vst [vmem:[#allocation11_spill] sm:$0xff] %v13395_v45 }
 0x1e6   :  { %2124 = vrot.lane.b32.xlu1 %v9626_v4, %s11657_s10  ;;  %2122 = vrot.lane.b32.xlu0 %v9625_v20, %s11657_s10  ;;  %v9630_v4 = vld [vmem:[%s17000_s0 + $0x2da] sm:$0xff]  ;;  %v9629_v20 = vld [vmem:[%s17000_s0 + $0x2d2] sm:$0xff] }
 0x1e8   :  { %v13407_v15 = vpop.permute.xlu1 %1884  ;;  %v13409_v43 = vpop.permute.xlu0 %1882 }
 0x1e9   :  { %17082 = vst [vmem:[#allocation12_spill] sm:$0xff] %v13407_v15  ;;  %17083 = vst [vmem:[#allocation13_spill] sm:$0xff] %v13409_v43 }
 0x1ea   :  { %2128 = vrot.lane.b32.xlu1 %v9628_v27, %s11657_s10  ;;  %2126 = vrot.lane.b32.xlu0 %v9627_v26, %s11657_s10  ;;  %v9632_v26 = vld [vmem:[%s17000_s0 + $0x2f2] sm:$0xff]  ;;  %v9631_v27 = vld [vmem:[%s17000_s0 + $0x2ea] sm:$0xff] }
 0x1ec   :  { %v13419_v47 = vpop.permute.xlu1 %1888  ;;  %v13421_v58 = vpop.permute.xlu0 %1886 }
 0x1ed   :  { %17084 = vst [vmem:[#allocation14_spill] sm:$0xff] %v13419_v47  ;;  %17085 = vst [vmem:[#allocation15_spill] sm:$0xff] %v13421_v58  ;;  %v9448_v58 = vld [vmem:[%s17000_s0 + $0x20] sm:$0xff] }
 0x1ee   :  { %2132 = vrot.lane.b32.xlu1 %v9630_v4, %s11657_s10  ;;  %2130 = vrot.lane.b32.xlu0 %v9629_v20, %s11657_s10  ;;  %v9447_v4 = vld [vmem:[%s17000_s0 + $0x18] sm:$0xff]  ;;  %v9634_v20 = vld [vmem:[%s17000_s0 + $0x30a] sm:$0xff] }
 0x1ef   :  { %v2214_v47 = vsel %vm731_vm3, %v9447_v4, %v13053_v29  ;;  %v9635_v29 = vld [vmem:[%s17000_s0 + $0x31a] sm:$0xff] }
 0x1f0   :  { %v13431_v43 = vpop.permute.xlu1 %1892  ;;  %v13433_v15 = vpop.permute.xlu0 %1890 }
 0x1f1   :  { %17086 = vst [vmem:[#allocation16_spill] sm:$0xff] %v13431_v43  ;;  %17087 = vst [vmem:[#allocation17_spill] sm:$0xff] %v13433_v15  ;;  %v9633_v15 = vld [vmem:[%s17000_s0 + $0x302] sm:$0xff]  ;;  %v2215_v43 = vsel %vm731_vm3, %v9448_v58, %v13051_v28 }
 0x1f2   :  { %2136 = vrot.lane.b32.xlu1 %v9632_v26, %s11657_s10  ;;  %2134 = vrot.lane.b32.xlu0 %v9631_v27, %s11657_s10  ;;  %v9450_v26 = vld [vmem:[%s17000_s0 + $0x38] sm:$0xff]  ;;  %v9449_v27 = vld [vmem:[%s17000_s0 + $0x30] sm:$0xff] }
 0x1f3   :  { %v9636_v28 = vld [vmem:[%s17000_s0 + $0x322] sm:$0xff]  ;;  %v2217_v58 = vsel %vm731_vm3, %v9450_v26, %v13063_v31  ;;  %v9638_v31 = vld [vmem:[%s17000_s0 + $0x33a] sm:$0xff] }
 0x1f4   :  { %v2025_v45 = vpop.permute.xlu1 %2024  ;;  %v2023_v10 = vpop.permute.xlu0 %2022 }
 0x1f5   :  { %v2279_v9 = vsel %vm796_vm4, %v2215_v43, %v2025_v45  ;;  %v2278_v37 = vsel %vm796_vm4, %v2214_v47, %v2023_v10  ;;  %v2216_v10 = vsel %vm731_vm3, %v9449_v27, %v13065_v34  ;;  %v9451_v45 = vld [vmem:[%s17000_s0 + $0x48] sm:$0xff]  ;;  %v9637_v34 = vld [vmem:[%s17000_s0 + $0x332] sm:$0xff] }
 0x1f6   :  { %2140 = vrot.lane.b32.xlu1 %v9634_v20, %s11657_s10  ;;  %2138 = vrot.lane.b32.xlu0 %v9633_v15, %s11657_s10  ;;  %v9454_v27 = vld [vmem:[%s17000_s0 + $0x68] sm:$0xff] }
 0x1f7   :  { %10729 = vmatprep.mubr.msk.f32.mxu0 %vm863_vm5, %v2278_v37  ;;  %v9452_v37 = vld [vmem:[%s17000_s0 + $0x50] sm:$0xff] }
 0x1f8   :  { %10730 = vmatmul.mubr.msk.f32.vlgmr.msra.gmra.mrb[0].mxu0 %vm863_vm5, %v2279_v9  ;;  %v2029_v43 = vpop.permute.xlu1 %2028  ;;  %v2027_v15 = vpop.permute.xlu0 %2026  ;;  %v2219_v9 = vsel %vm731_vm3, %v9452_v37, %v13075_v5  ;;  %v9771_v5 = vld [vmem:[%s17000_s0 + $0x39] sm:$0xff] }
 0x1f9   :  { %v2281_v47 = vsel %vm796_vm4, %v2217_v58, %v2029_v43  ;;  %v2280_v4 = vsel %vm796_vm4, %v2216_v10, %v2027_v15  ;;  %11242 = vmatpush3.bf16.msk.msra.mxu0 %vm11963_vm2, %v11237_v35  ;;  %v2218_v35 = vsel %vm731_vm3, %v9451_v45, %v13077_v17  ;;  %v9770_v17 = vld [vmem:[%s17000_s0 + $0x31] sm:$0xff]  ;;  %v2221_v10 = vsel %vm731_vm3, %v9454_v27, %v13087_v32  ;;  %v9456_v45 = vld [vmem:[%s17000_s0 + $0x80] sm:$0xff] }
 0x1fa   :  { %2144 = vrot.lane.b32.xlu1 %v9636_v28, %s11657_s10  ;;  %2142 = vrot.lane.b32.xlu0 %v9635_v29, %s11657_s10  ;;  %v9453_v28 = vld [vmem:[%s17000_s0 + $0x60] sm:$0xff]  ;;  %v9773_v32 = vld [vmem:[%s17000_s0 + $0x51] sm:$0xff] }
 0x1fb   :  { %10732 = vmatprep.mubr.msk.f32.mxu0 %vm863_vm5, %v2280_v4  ;;  %v2220_v43 = vsel %vm731_vm3, %v9453_v28, %v13089_v33  ;;  %v9772_v33 = vld [vmem:[%s17000_s0 + $0x49] sm:$0xff] }
 0x1fc   :  { %10733 = vmatmul.mubr.msk.f32.gmra.mrb[2].mxu0 %vm863_vm5, %v2281_v47  ;;  %v2033_v20 = vpop.permute.xlu1 %2032  ;;  %v2031_v26 = vpop.permute.xlu0 %2030  ;;  %v9455_v47 = vld [vmem:[%s17000_s0 + $0x78] sm:$0xff]  ;;  %v9457_v27 = vld [vmem:[%s17000_s0 + $0x90] sm:$0xff] }
 0x1fd   :  { %v2283_v29 = vsel %vm796_vm4, %v2219_v9, %v2033_v20  ;;  %v2282_v58 = vsel %vm796_vm4, %v2218_v35, %v2031_v26  ;;  %v2222_v9 = vsel %vm731_vm3, %v9455_v47, %v13101_v46  ;;  %v9458_v26 = vld [vmem:[%s17000_s0 + $0x98] sm:$0xff]  ;;  %v9774_v46 = vld [vmem:[%s17000_s0 + $0x61] sm:$0xff] }
 0x1fe   :  { %2148 = vrot.lane.b32.xlu1 %v9638_v31, %s11657_s10  ;;  %2146 = vrot.lane.b32.xlu0 %v9637_v34, %s11657_s10  ;;  %v2223_v34 = vsel %vm731_vm3, %v9456_v45, %v13099_v22  ;;  %v9775_v22 = vld [vmem:[%s17000_s0 + $0x69] sm:$0xff] }
 0x1ff   :  { %10735 = vmatprep.mubr.msk.f32.mxu0 %vm863_vm5, %v2282_v58  ;;  %v2225_v58 = vsel %vm731_vm3, %v9458_v26, %v13111_v7  ;;  %v9777_v7 = vld [vmem:[%s17000_s0 + $0x81] sm:$0xff] }
 0x200   :  { %10736 = vmatmul.mubr.msk.f32.gmra.mrb[4].mxu0 %vm863_vm5, %v2283_v29  ;;  %v2037_v15 = vpop.permute.xlu1 %2036  ;;  %v2035_v37 = vpop.permute.xlu0 %2034 }
 0x201   :  { %v2285_v4 = vsel %vm796_vm4, %v2221_v10, %v2037_v15  ;;  %v2284_v31 = vsel %vm796_vm4, %v2220_v43, %v2035_v37  ;;  %v9460_v43 = vld [vmem:[%s17000_s0 + $0xb0] sm:$0xff]  ;;  %v9459_v15 = vld [vmem:[%s17000_s0 + $0xa8] sm:$0xff] }
 0x202   :  { %3248 = vrot.lane.b32.xlu1 %v9771_v5, %s11655_s22  ;;  %3246 = vrot.lane.b32.xlu0 %v9770_v17, %s11655_s22  ;;  %v2224_v5 = vsel %vm731_vm3, %v9457_v27, %v13113_v21  ;;  %v9776_v21 = vld [vmem:[%s17000_s0 + $0x79] sm:$0xff]  ;;  %v2227_v47 = vsel %vm731_vm3, %v9460_v43, %v13123_v50 }
 0x203   :  { %10738 = vmatprep.mubr.msk.f32.mxu0 %vm863_vm5, %v2284_v31  ;;  %v9779_v50 = vld [vmem:[%s17000_s0 + $0x99] sm:$0xff] }
 0x204   :  { %10739 = vmatmul.mubr.msk.f32.gmra.mrb[6].mxu0 %vm863_vm5, %v2285_v4  ;;  %v2041_v35 = vpop.permute.xlu1 %2040  ;;  %v2039_v20 = vpop.permute.xlu0 %2038  ;;  %v2226_v4 = vsel %vm731_vm3, %v9459_v15, %v13125_v36  ;;  %v9778_v36 = vld [vmem:[%s17000_s0 + $0x91] sm:$0xff] }
 0x205   :  { %v2287_v28 = vsel %vm796_vm4, %v2223_v34, %v2041_v35  ;;  %v2286_v29 = vsel %vm796_vm4, %v2222_v9, %v2039_v20  ;;  %v9461_v34 = vld [vmem:[%s17000_s0 + $0xc0] sm:$0xff]  ;;  %v9466_v15 = vld [vmem:[%s17000_s0 + $0xf8] sm:$0xff] }
 0x206   :  { %3252 = vrot.lane.b32.xlu1 %v9773_v32, %s11655_s22  ;;  %3250 = vrot.lane.b32.xlu0 %v9772_v33, %s11655_s22  ;;  %v9462_v33 = vld [vmem:[%s17000_s0 + $0xc8] sm:$0xff]  ;;  %v2228_v26 = vsel %vm731_vm3, %v9461_v34, %v13137_v30 }
 0x207   :  { %10741 = vmatprep.mubr.msk.f32.mxu0 %vm863_vm5, %v2286_v29  ;;  %v2229_v20 = vsel %vm731_vm3, %v9462_v33, %v13135_v61  ;;  %v9464_v29 = vld [vmem:[%s17000_s0 + $0xe0] sm:$0xff]  ;;  %v9781_v61 = vld [vmem:[%s17000_s0 + $0xb1] sm:$0xff]  ;;  %v9780_v30 = vld [vmem:[%s17000_s0 + $0xa9] sm:$0xff] }
 0x208   :  { %10742 = vmatmul.mubr.msk.f32.gmra.mrb[8].mxu0 %vm863_vm5, %v2287_v28  ;;  %v2045_v17 = vpop.permute.xlu1 %2044  ;;  %v2043_v10 = vpop.permute.xlu0 %2042  ;;  %v9467_v33 = vld [vmem:[%s17000_s0 + $0x108] sm:$0xff] }
 0x209   :  { %v2289_v37 = vsel %vm796_vm4, %v2225_v58, %v2045_v17  ;;  %v2288_v45 = vsel %vm796_vm4, %v2224_v5, %v2043_v10  ;;  %v2231_v5 = vsel %vm731_vm3, %v9464_v29, %v13147_v63  ;;  %v9783_v63 = vld [vmem:[%s17000_s0 + $0xc9] sm:$0xff] }
 0x20a   :  { %3256 = vrot.lane.b32.xlu1 %v9775_v22, %s11655_s22  ;;  %3254 = vrot.lane.b32.xlu0 %v9774_v46, %s11655_s22  ;;  %v9463_v22 = vld [vmem:[%s17000_s0 + $0xd8] sm:$0xff] }
 0x20b   :  { %10744 = vmatprep.mubr.msk.f32.mxu0 %vm863_vm5, %v2288_v45  ;;  %v2230_v17 = vsel %vm731_vm3, %v9463_v22, %v13149_v55  ;;  %v9782_v55 = vld [vmem:[%s17000_s0 + $0xc1] sm:$0xff] }
 0x20c   :  { %10745 = vmatmul.mubr.msk.f32.gmra.mrb[10].mxu0 %vm863_vm5, %v2289_v37  ;;  %v2049_v31 = vpop.permute.xlu1 %2048  ;;  %v2047_v32 = vpop.permute.xlu0 %2046  ;;  %v9465_v37 = vld [vmem:[%s17000_s0 + $0xf0] sm:$0xff] }
 0x20d   :  { %v2291_v9 = vsel %vm796_vm4, %v2227_v47, %v2049_v31  ;;  %v2290_v35 = vsel %vm796_vm4, %v2226_v4, %v2047_v32  ;;  %v2232_v47 = vsel %vm731_vm3, %v9465_v37, %v13161_v40  ;;  %v9468_v32 = vld [vmem:[%s17000_s0 + $0x110] sm:$0xff]  ;;  %v9784_v40 = vld [vmem:[%s17000_s0 + $0xd9] sm:$0xff] }
 0x20e   :  { %3260 = vrot.lane.b32.xlu1 %v9777_v7, %s11655_s22  ;;  %3258 = vrot.lane.b32.xlu0 %v9776_v21, %s11655_s22  ;;  %v2233_v21 = vsel %vm731_vm3, %v9466_v15, %v13159_v62  ;;  %v9785_v62 = vld [vmem:[%s17000_s0 + $0xe1] sm:$0xff] }
 0x20f   :  { %10747 = vmatprep.mubr.msk.f32.mxu0 %vm863_vm5, %v2290_v35  ;;  %v2235_v35 = vsel %vm731_vm3, %v9468_v32, %v13171_v54  ;;  %v9787_v54 = vld [vmem:[%s17000_s0 + $0xf9] sm:$0xff] }
 0x210   :  { %10748 = vmatmul.mubr.msk.f32.gmra.mrb[12].mxu0 %vm863_vm5, %v2291_v9  ;;  %v2053_v27 = vpop.permute.xlu1 %2052  ;;  %v2051_v28 = vpop.permute.xlu0 %2050 }
 0x211   :  { %v2293_v46 = vsel %vm796_vm4, %v2229_v20, %v2053_v27  ;;  %v2292_v58 = vsel %vm796_vm4, %v2228_v26, %v2051_v28  ;;  %v9470_v26 = vld [vmem:[%s17000_s0 + $0x128] sm:$0xff]  ;;  %v9469_v27 = vld [vmem:[%s17000_s0 + $0x120] sm:$0xff] }
 0x212   :  { %3264 = vrot.lane.b32.xlu1 %v9779_v50, %s11655_s22  ;;  %3262 = vrot.lane.b32.xlu0 %v9778_v36, %s11655_s22  ;;  %v2234_v50 = vsel %vm731_vm3, %v9467_v33, %v13173_v24  ;;  %v9786_v24 = vld [vmem:[%s17000_s0 + $0xf1] sm:$0xff]  ;;  %v2237_v22 = vsel %vm731_vm3, %v9470_v26, %v13183_v19  ;;  %v9477_v26 = vld [vmem:[%s17000_s0 + $0x180] sm:$0xff] }
 0x213   :  { %10750 = vmatprep.mubr.msk.f32.mxu0 %vm863_vm5, %v2292_v58  ;;  %v9789_v19 = vld [vmem:[%s17000_s0 + $0x111] sm:$0xff] }
 0x214   :  { %10751 = vmatmul.mubr.msk.f32.gmra.mrb[14].mxu0 %vm863_vm5, %v2293_v46  ;;  %v2057_v10 = vpop.permute.xlu1 %2056  ;;  %v2055_v43 = vpop.permute.xlu0 %2054  ;;  %v2236_v46 = vsel %vm731_vm3, %v9469_v27, %v13185_v11  ;;  %v9788_v11 = vld [vmem:[%s17000_s0 + $0x109] sm:$0xff] }
 0x215   :  { %v2295_v45 = vsel %vm796_vm4, %v2231_v5, %v2057_v10  ;;  %v2294_v7 = vsel %vm796_vm4, %v2230_v17, %v2055_v43  ;;  %v9471_v5 = vld [vmem:[%s17000_s0 + $0x138] sm:$0xff]  ;;  %v9476_v33 = vld [vmem:[%s17000_s0 + $0x170] sm:$0xff] }
 0x216   :  { %3268 = vrot.lane.b32.xlu1 %v9781_v61, %s11655_s22  ;;  %3266 = vrot.lane.b32.xlu0 %v9780_v30, %s11655_s22  ;;  %v9472_v30 = vld [vmem:[%s17000_s0 + $0x140] sm:$0xff]  ;;  %v2238_v15 = vsel %vm731_vm3, %v9471_v5, %v13197_v44 }
 0x217   :  { %10753 = vmatprep.mubr.msk.f32.mxu0 %vm863_vm5, %v2294_v7  ;;  %v2239_v43 = vsel %vm731_vm3, %v9472_v30, %v13195_v18  ;;  %v9474_v7 = vld [vmem:[%s17000_s0 + $0x158] sm:$0xff]  ;;  %v9791_v18 = vld [vmem:[%s17000_s0 + $0x129] sm:$0xff]  ;;  %v9790_v44 = vld [vmem:[%s17000_s0 + $0x121] sm:$0xff] }
 0x218   :  { %10754 = vmatmul.mubr.msk.f32.gmra.mrb[16].mxu0 %vm863_vm5, %v2295_v45  ;;  %v2061_v4 = vpop.permute.xlu1 %2060  ;;  %v2059_v31 = vpop.permute.xlu0 %2058 }
 0x219   :  { %v2297_v34 = vsel %vm796_vm4, %v2233_v21, %v2061_v4  ;;  %v2296_v9 = vsel %vm796_vm4, %v2232_v47, %v2059_v31  ;;  %v2241_v47 = vsel %vm731_vm3, %v9474_v7, %v13207_v16  ;;  %v9793_v16 = vld [vmem:[%s17000_s0 + $0x141] sm:$0xff] }
 0x21a   :  { %3272 = vrot.lane.b32.xlu1 %v9783_v63, %s11655_s22  ;;  %3270 = vrot.lane.b32.xlu0 %v9782_v55, %s11655_s22  ;;  %v9473_v63 = vld [vmem:[%s17000_s0 + $0x150] sm:$0xff] }
 0x21b   :  { %10756 = vmatprep.mubr.msk.f32.mxu0 %vm863_vm5, %v2296_v9  ;;  %v2240_v4 = vsel %vm731_vm3, %v9473_v63, %v13209_v12  ;;  %v9792_v12 = vld [vmem:[%s17000_s0 + $0x139] sm:$0xff] }
 0x21c   :  { %10757 = vmatmul.mubr.msk.f32.gmra.mrb[18].mxu0 %vm863_vm5, %v2297_v34  ;;  %v2065_v36 = vpop.permute.xlu1 %2064  ;;  %v2063_v20 = vpop.permute.xlu0 %2062  ;;  %v9475_v34 = vld [vmem:[%s17000_s0 + $0x168] sm:$0xff] }
 0x21d   :  { %v2299_v28 = vsel %vm796_vm4, %v2235_v35, %v2065_v36  ;;  %v2298_v29 = vsel %vm796_vm4, %v2234_v50, %v2063_v20  ;;  %v2242_v35 = vsel %vm731_vm3, %v9475_v34, %v13221_v23  ;;  %v9478_v20 = vld [vmem:[%s17000_s0 + $0x188] sm:$0xff]  ;;  %v9794_v23 = vld [vmem:[%s17000_s0 + $0x151] sm:$0xff] }
 0x21e   :  { %3276 = vrot.lane.b32.xlu1 %v9785_v62, %s11655_s22  ;;  %3274 = vrot.lane.b32.xlu0 %v9784_v40, %s11655_s22  ;;  %v2243_v40 = vsel %vm731_vm3, %v9476_v33, %v13219_v0  ;;  %v9795_v0 = vld [vmem:[%s17000_s0 + $0x159] sm:$0xff] }
 0x21f   :  { %10759 = vmatprep.mubr.msk.f32.mxu0 %vm863_vm5, %v2298_v29  ;;  %v2245_v29 = vsel %vm731_vm3, %v9478_v20, %v13231_v59  ;;  %v9797_v59 = vld [vmem:[%s17000_s0 + $0x171] sm:$0xff]  ;;  %v9487_v20 = vld [vmem:[%s17000_s0 + $0x228] sm:$0xff] }
 0x220   :  { %10760 = vmatmul.mubr.msk.f32.gmra.mrb[20].mxu0 %vm863_vm5, %v2299_v28  ;;  %v2069_v58 = vpop.permute.xlu1 %2068  ;;  %v2067_v61 = vpop.permute.xlu0 %2066  ;;  %v9486_v34 = vld [vmem:[%s17000_s0 + $0x218] sm:$0xff] }
 0x221   :  { %v2301_v17 = vsel %vm796_vm4, %v2237_v22, %v2069_v58  ;;  %v2300_v10 = vsel %vm796_vm4, %v2236_v46, %v2067_v61  ;;  %v9480_v46 = vld [vmem:[%s17000_s0 + $0x1d0] sm:$0xff]  ;;  %v9479_v58 = vld [vmem:[%s17000_s0 + $0x1c8] sm:$0xff] }
 0x222   :  { %3280 = vrot.lane.b32.xlu1 %v9787_v54, %s11655_s22  ;;  %3278 = vrot.lane.b32.xlu0 %v9786_v24, %s11655_s22  ;;  %v2244_v54 = vsel %vm731_vm3, %v9477_v26, %v13233_v48  ;;  %v9796_v48 = vld [vmem:[%s17000_s0 + $0x169] sm:$0xff]  ;;  %v2247_v5 = vsel %vm731_vm3, %v9480_v46, %v13243_v38 }
 0x223   :  { %10762 = vmatprep.mubr.msk.f32.mxu0 %vm863_vm5, %v2300_v10  ;;  %v9799_v38 = vld [vmem:[%s17000_s0 + $0x189] sm:$0xff] }
 0x224   :  { %10763 = vmatmul.mubr.msk.f32.gmra.mrb[22].mxu0 %vm863_vm5, %v2301_v17  ;;  %v2073_v37 = vpop.permute.xlu1 %2072  ;;  %v2071_v45 = vpop.permute.xlu0 %2070  ;;  %v2246_v17 = vsel %vm731_vm3, %v9479_v58, %v13245_v3  ;;  %v9798_v3 = vld [vmem:[%s17000_s0 + $0x181] sm:$0xff] }
 0x225   :  { %v2303_v55 = vsel %vm796_vm4, %v2239_v43, %v2073_v37  ;;  %v2302_v21 = vsel %vm796_vm4, %v2238_v15, %v2071_v45  ;;  %v9481_v43 = vld [vmem:[%s17000_s0 + $0x1e0] sm:$0xff] }
 0x226   :  { %3284 = vrot.lane.b32.xlu1 %v9789_v19, %s11655_s22  ;;  %3282 = vrot.lane.b32.xlu0 %v9788_v11, %s11655_s22  ;;  %v9482_v11 = vld [vmem:[%s17000_s0 + $0x1e8] sm:$0xff]  ;;  %v2248_v7 = vsel %vm731_vm3, %v9481_v43, %v13257_v39  ;;  %v9800_v39 = vld [vmem:[%s17000_s0 + $0x199] sm:$0xff] }
 0x227   :  { %10765 = vmatprep.mubr.msk.f32.mxu0 %vm863_vm5, %v2302_v21  ;;  %v2249_v45 = vsel %vm731_vm3, %v9482_v11, %v13255_v53  ;;  %v9484_v21 = vld [vmem:[%s17000_s0 + $0x200] sm:$0xff] }
 0x228   :  { %10766 = vmatmul.mubr.msk.f32.gmra.mrb[24].mxu0 %vm863_vm5, %v2303_v55  ;;  %v2077_v31 = vpop.permute.xlu1 %2076  ;;  %v2075_v32 = vpop.permute.xlu0 %2074  ;;  %v9801_v53 = vld [vmem:[%s17000_s0 + $0x1a1] sm:$0xff] }
 0x229   :  { %v2305_v9 = vsel %vm796_vm4, %v2241_v47, %v2077_v31  ;;  %v2304_v62 = vsel %vm796_vm4, %v2240_v4, %v2075_v32  ;;  %v2251_v4 = vsel %vm731_vm3, %v9484_v21, %v13267_v6  ;;  %v9803_v6 = vld [vmem:[%s17000_s0 + $0x1e9] sm:$0xff] }
 0x22a   :  { %3288 = vrot.lane.b32.xlu1 %v9791_v18, %s11655_s22  ;;  %3286 = vrot.lane.b32.xlu0 %v9790_v44, %s11655_s22  ;;  %v9483_v18 = vld [vmem:[%s17000_s0 + $0x1f8] sm:$0xff] }
 0x22b   :  { %10768 = vmatprep.mubr.msk.f32.mxu0 %vm863_vm5, %v2304_v62  ;;  %v2250_v31 = vsel %vm731_vm3, %v9483_v18, %v13269_v56  ;;  %v9802_v56 = vld [vmem:[%s17000_s0 + $0x1e1] sm:$0xff]  ;;  %v9496_v18 = vld [vmem:[%s17000_s0 + $0x290] sm:$0xff] }
 0x22c   :  { %10769 = vmatmul.mubr.msk.f32.gmra.mrb[26].mxu0 %vm863_vm5, %v2305_v9  ;;  %v2081_v50 = vpop.permute.xlu1 %2080  ;;  %v2079_v36 = vpop.permute.xlu0 %2078  ;;  %v9485_v9 = vld [vmem:[%s17000_s0 + $0x210] sm:$0xff] }
 0x22d   :  { %v2307_v27 = vsel %vm796_vm4, %v2243_v40, %v2081_v50  ;;  %v2306_v28 = vsel %vm796_vm4, %v2242_v35, %v2079_v36  ;;  %v2252_v40 = vsel %vm731_vm3, %v9485_v9, %v13281_v8  ;;  %v9488_v36 = vld [vmem:[%s17000_s0 + $0x230] sm:$0xff]  ;;  %v9804_v8 = vld [vmem:[%s17000_s0 + $0x1f9] sm:$0xff] }
 0x22e   :  { %3292 = vrot.lane.b32.xlu1 %v9793_v16, %s11655_s22  ;;  %3290 = vrot.lane.b32.xlu0 %v9792_v12, %s11655_s22  ;;  %v2253_v12 = vsel %vm731_vm3, %v9486_v34, %v13279_v51  ;;  %v9805_v51 = vld [vmem:[%s17000_s0 + $0x201] sm:$0xff] }
 0x22f   :  { %10771 = vmatprep.mubr.msk.f32.mxu0 %vm863_vm5, %v2306_v28  ;;  %v2255_v28 = vsel %vm731_vm3, %v9488_v36, %v13291_v60  ;;  %v9807_v60 = vld [vmem:[%s17000_s0 + $0x219] sm:$0xff] }
 0x230   :  { %10772 = vmatmul.mubr.msk.f32.gmra.mrb[28].mxu0 %vm863_vm5, %v2307_v27  ;;  %v2085_v24 = vpop.permute.xlu1 %2084  ;;  %v2083_v22 = vpop.permute.xlu0 %2082  ;;  %v9497_v34 = vld [vmem:[%s17000_s0 + $0x2a0] sm:$0xff]  ;;  %v9499_v36 = vld [vmem:[%s17000_s0 + $0x2b8] sm:$0xff] }
 0x231   :  { %v2309_v61 = vsel %vm796_vm4, %v2245_v29, %v2085_v24  ;;  %v2308_v30 = vsel %vm796_vm4, %v2244_v54, %v2083_v22  ;;  %v9490_v54 = vld [vmem:[%s17000_s0 + $0x248] sm:$0xff]  ;;  %v9489_v24 = vld [vmem:[%s17000_s0 + $0x240] sm:$0xff] }
 0x232   :  { %3296 = vrot.lane.b32.xlu1 %v9795_v0, %s11655_s22  ;;  %3294 = vrot.lane.b32.xlu0 %v9794_v23, %s11655_s22  ;;  %v2254_v0 = vsel %vm731_vm3, %v9487_v20, %v13293_v41  ;;  %v9806_v41 = vld [vmem:[%s17000_s0 + $0x211] sm:$0xff]  ;;  %v2257_v58 = vsel %vm731_vm3, %v9490_v54, %v13303_v14 }
 0x233   :  { %10774 = vmatprep.mubr.msk.f32.mxu0 %vm863_vm5, %v2308_v30  ;;  %v9809_v14 = vld [vmem:[%s17000_s0 + $0x231] sm:$0xff] }
 0x234   :  { %10775 = vmatmul.mubr.msk.f32.gmra.mrb[30].mxu0 %vm863_vm5, %v2309_v61  ;;  %v2089_v10 = vpop.permute.xlu1 %2088  ;;  %v2087_v19 = vpop.permute.xlu0 %2086  ;;  %v2256_v61 = vsel %vm731_vm3, %v9489_v24, %v13305_v25  ;;  %v9808_v25 = vld [vmem:[%s17000_s0 + $0x229] sm:$0xff]  ;;  %v9502_v24 = vld [vmem:[%s17000_s0 + $0x2d8] sm:$0xff] }
 0x235   :  { %v2311_v15 = vsel %vm796_vm4, %v2247_v5, %v2089_v10  ;;  %v2310_v37 = vsel %vm796_vm4, %v2246_v17, %v2087_v19  ;;  %v9491_v5 = vld [vmem:[%s17000_s0 + $0x258] sm:$0xff] }
 0x236   :  { %3300 = vrot.lane.b32.xlu1 %v9797_v59, %s11655_s22  ;;  %3298 = vrot.lane.b32.xlu0 %v9796_v48, %s11655_s22  ;;  %v9492_v48 = vld [vmem:[%s17000_s0 + $0x260] sm:$0xff]  ;;  %v2258_v11 = vsel %vm731_vm3, %v9491_v5, %v13317_v13 }
 0x237   :  { %10777 = vmatprep.mubr.msk.f32.mxu0 %vm863_vm5, %v2310_v37  ;;  %v2259_v19 = vsel %vm731_vm3, %v9492_v48, %v13315_v1  ;;  %v9494_v37 = vld [vmem:[%s17000_s0 + $0x278] sm:$0xff]  ;;  %v9811_v1 = vld [vmem:[%s17000_s0 + $0x249] sm:$0xff]  ;;  %v9810_v13 = vld [vmem:[%s17000_s0 + $0x241] sm:$0xff] }
 0x238   :  { %10778 = vmatmul.mubr.msk.f32.gmra.mrb[32].mxu0 %vm863_vm5, %v2311_v15  ;;  %v2093_v63 = vpop.permute.xlu1 %2092  ;;  %v2091_v55 = vpop.permute.xlu0 %2090 }
 0x239   :  { %v2313_v44 = vsel %vm796_vm4, %v2249_v45, %v2093_v63  ;;  %v2312_v47 = vsel %vm796_vm4, %v2248_v7, %v2091_v55  ;;  %v2261_v7 = vsel %vm731_vm3, %v9494_v37, %v13327_v2  ;;  %v9835_v2 = vld [vmem:[%s17000_s0 + $0x3a] sm:$0xff] }
 0x23a   :  { %3304 = vrot.lane.b32.xlu1 %v9799_v38, %s11655_s22  ;;  %3302 = vrot.lane.b32.xlu0 %v9798_v3, %s11655_s22  ;;  %v9493_v38 = vld [vmem:[%s17000_s0 + $0x270] sm:$0xff] }
 0x23b   :  { %10780 = vmatprep.mubr.msk.f32.mxu0 %vm863_vm5, %v2312_v47  ;;  %v2260_v63 = vsel %vm731_vm3, %v9493_v38, %v13329_v49  ;;  %v9834_v49 = vld [vmem:[%s17000_s0 + $0x32] sm:$0xff]  ;;  %v17095_v38 = vld [vmem:[#allocation11_spill] sm:$0xff] }
 0x23c   :  { %10781 = vmatmul.mubr.msk.f32.gmra.mrb[34].mxu0 %vm863_vm5, %v2313_v44  ;;  %v2097_v32 = vpop.permute.xlu1 %2096  ;;  %v2095_v33 = vpop.permute.xlu0 %2094  ;;  %v9495_v44 = vld [vmem:[%s17000_s0 + $0x288] sm:$0xff] }
 0x23d   :  { %v2315_v62 = vsel %vm796_vm4, %v2251_v4, %v2097_v32  ;;  %v2314_v16 = vsel %vm796_vm4, %v2250_v31, %v2095_v33  ;;  %v2262_v4 = vsel %vm731_vm3, %v9495_v44, %v13341_v42  ;;  %v9498_v33 = vld [vmem:[%s17000_s0 + $0x2a8] sm:$0xff] }
 0x23e   :  { %3308 = vrot.lane.b32.xlu1 %v9801_v53, %s11655_s22  ;;  %3306 = vrot.lane.b32.xlu0 %v9800_v39, %s11655_s22  ;;  %v2263_v39 = vsel %vm731_vm3, %v9496_v18, %v13339_v52  ;;  %v9837_v52 = vld [vmem:[%s17000_s0 + $0x52] sm:$0xff]  ;;  %v9836_v42 = vld [vmem:[%s17000_s0 + $0x4a] sm:$0xff] }
 0x23f   :  { %10783 = vmatprep.mubr.msk.f32.mxu0 %vm863_vm5, %v2314_v16  ;;  %v17088_v16 = vld [vmem:[#allocation4_spill] sm:$0xff] }
 0x240   :  { %10784 = vmatmul.mubr.msk.f32.gmra.mrb[36].mxu0 %vm863_vm5, %v2315_v62  ;;  %v2101_v35 = vpop.permute.xlu1 %2100  ;;  %v2099_v50 = vpop.permute.xlu0 %2098  ;;  %v9844_v18 = vld [vmem:[%s17000_s0 + $0xaa] sm:$0xff] }
 0x241   :  { %v2317_v26 = vsel %vm796_vm4, %v2253_v12, %v2101_v35  ;;  %v2316_v27 = vsel %vm796_vm4, %v2252_v40, %v2099_v50  ;;  %v9500_v50 = vld [vmem:[%s17000_s0 + $0x2c0] sm:$0xff]  ;;  %v17096_v44 = vld [vmem:[#allocation12_spill] sm:$0xff] }
 0x242   :  { %3312 = vrot.lane.b32.xlu1 %v9803_v6, %s11655_s22  ;;  %3310 = vrot.lane.b32.xlu0 %v9802_v56, %s11655_s22  ;;  %v2265_v6 = vsel %vm731_vm3, %v9498_v33, %v17088_v16  ;;  %v17089_v56 = vld [vmem:[#allocation5_spill] sm:$0xff] }
 0x243   :  { %10786 = vmatprep.mubr.msk.f32.mxu0 %vm863_vm5, %v2316_v27  ;;  %v2264_v12 = vsel %vm731_vm3, %v9497_v34, %v17089_v56  ;;  %v9839_v27 = vld [vmem:[%s17000_s0 + $0x6a] sm:$0xff] }
 0x244   :  { %10787 = vmatmul.mubr.msk.f32.gmra.mrb[38].mxu0 %vm863_vm5, %v2317_v26  ;;  %v2105_v23 = vpop.permute.xlu1 %2104  ;;  %v2103_v29 = vpop.permute.xlu0 %2102  ;;  %v9847_v34 = vld [vmem:[%s17000_s0 + $0xca] sm:$0xff] }
 0x245   :  { %v2319_v22 = vsel %vm796_vm4, %v2255_v28, %v2105_v23  ;;  %v2318_v46 = vsel %vm796_vm4, %v2254_v0, %v2103_v29  ;;  %v17091_v0 = vld [vmem:[#allocation7_spill] sm:$0xff] }
 0x246   :  { %3316 = vrot.lane.b32.xlu1 %v9805_v51, %s11655_s22  ;;  %3314 = vrot.lane.b32.xlu0 %v9804_v8, %s11655_s22  ;;  %v9838_v51 = vld [vmem:[%s17000_s0 + $0x62] sm:$0xff]  ;;  %v17090_v8 = vld [vmem:[#allocation6_spill] sm:$0xff]  ;;  %v2266_v23 = vsel %vm731_vm3, %v9499_v36, %v17091_v0 }
 0x247   :  { %10789 = vmatprep.mubr.msk.f32.mxu0 %vm863_vm5, %v2318_v46  ;;  %v2267_v28 = vsel %vm731_vm3, %v9500_v50, %v17090_v8  ;;  %v9849_v36 = vld [vmem:[%s17000_s0 + $0xe2] sm:$0xff] }
 0x248   :  { %10790 = vmatmul.mubr.msk.f32.gmra.mrb[40].mxu0 %vm863_vm5, %v2319_v22  ;;  %v2109_v30 = vpop.permute.xlu1 %2108  ;;  %v2107_v59 = vpop.permute.xlu0 %2106  ;;  %v9501_v22 = vld [vmem:[%s17000_s0 + $0x2d0] sm:$0xff] }
 0x249   :  { %v2321_v17 = vsel %vm796_vm4, %v2257_v58, %v2109_v30  ;;  %v2320_v10 = vsel %vm796_vm4, %v2256_v61, %v2107_v59  ;;  %v9840_v58 = vld [vmem:[%s17000_s0 + $0x7a] sm:$0xff]  ;;  %v17092_v61 = vld [vmem:[#allocation8_spill] sm:$0xff]  ;;  %v17093_v59 = vld [vmem:[#allocation9_spill] sm:$0xff] }
 0x24a   :  { %3320 = vrot.lane.b32.xlu1 %v9807_v60, %s11655_s22  ;;  %3318 = vrot.lane.b32.xlu0 %v9806_v41, %s11655_s22  ;;  %v9841_v41 = vld [vmem:[%s17000_s0 + $0x82] sm:$0xff]  ;;  %v2269_v30 = vsel %vm731_vm3, %v9502_v24, %v17092_v61  ;;  %v2268_v48 = vsel %vm731_vm3, %v9501_v22, %v17093_v59  ;;  %v9850_v24 = vld [vmem:[%s17000_s0 + $0xf2] sm:$0xff] }
 0x24b   :  { %10792 = vmatprep.mubr.msk.f32.mxu0 %vm863_vm5, %v2320_v10  ;;  %v9504_v10 = vld [vmem:[%s17000_s0 + $0x2f0] sm:$0xff]  ;;  %v9854_v59 = vld [vmem:[%s17000_s0 + $0x122] sm:$0xff] }
 0x24c   :  { %10793 = vmatmul.mubr.msk.f32.gmra.mrb[42].mxu0 %vm863_vm5, %v2321_v17  ;;  %v2113_v43 = vpop.permute.xlu1 %2112  ;;  %v2111_v15 = vpop.permute.xlu0 %2110 }
 0x24d   :  { %v2323_v3 = vsel %vm796_vm4, %v2259_v19, %v2113_v43  ;;  %v2322_v45 = vsel %vm796_vm4, %v2258_v11, %v2111_v15  ;;  %v9843_v11 = vld [vmem:[%s17000_s0 + $0x9a] sm:$0xff]  ;;  %v9842_v43 = vld [vmem:[%s17000_s0 + $0x92] sm:$0xff] }
 0x24e   :  { %3324 = vrot.lane.b32.xlu1 %v9809_v14, %s11655_s22  ;;  %3322 = vrot.lane.b32.xlu0 %v9808_v25, %s11655_s22  ;;  %v9503_v14 = vld [vmem:[%s17000_s0 + $0x2e8] sm:$0xff]  ;;  %v17094_v15 = vld [vmem:[#allocation10_spill] sm:$0xff] }
 0x24f   :  { %10795 = vmatprep.mubr.msk.f32.mxu0 %vm863_vm5, %v2322_v45  ;;  %v2271_v37 = vsel %vm731_vm3, %v9504_v10, %v17094_v15  ;;  %v9856_v10 = vld [vmem:[%s17000_s0 + $0x13a] sm:$0xff] }
 0x250   :  { %10796 = vmatmul.mubr.msk.f32.gmra.mrb[44].mxu0 %vm863_vm5, %v2323_v3  ;;  %v2117_v55 = vpop.permute.xlu1 %2116  ;;  %v2115_v21 = vpop.permute.xlu0 %2114  ;;  %v2270_v3 = vsel %vm731_vm3, %v9503_v14, %v17095_v38  ;;  %v9860_v38 = vld [vmem:[%s17000_s0 + $0x16a] sm:$0xff] }
 0x251   :  { %v2325_v47 = vsel %vm796_vm4, %v2261_v7, %v2117_v55  ;;  %v2324_v53 = vsel %vm796_vm4, %v2260_v63, %v2115_v21  ;;  %v9505_v7 = vld [vmem:[%s17000_s0 + $0x300] sm:$0xff]  ;;  %v9845_v21 = vld [vmem:[%s17000_s0 + $0xb2] sm:$0xff] }
 0x252   :  { %3328 = vrot.lane.b32.xlu1 %v9811_v1, %s11655_s22  ;;  %3326 = vrot.lane.b32.xlu0 %v9810_v13, %s11655_s22  ;;  %v9506_v13 = vld [vmem:[%s17000_s0 + $0x308] sm:$0xff] }
 0x253   :  { %10798 = vmatprep.mubr.msk.f32.mxu0 %vm863_vm5, %v2324_v53  ;;  %v17097_v53 = vld [vmem:[#allocation13_spill] sm:$0xff] }
 0x254   :  { %10799 = vmatmul.mubr.msk.f32.gmra.mrb[46].mxu0 %vm863_vm5, %v2325_v47  ;;  %v2121_v31 = vpop.permute.xlu1 %2120  ;;  %v2119_v32 = vpop.permute.xlu0 %2118  ;;  %v2273_v47 = vsel %vm731_vm3, %v9506_v13, %v17096_v44  ;;  %v9862_v13 = vld [vmem:[%s17000_s0 + $0x182] sm:$0xff] }
 0x255   :  { %v2327_v9 = vsel %vm796_vm4, %v2263_v39, %v2121_v31  ;;  %v2326_v62 = vsel %vm796_vm4, %v2262_v4, %v2119_v32  ;;  %v9508_v4 = vld [vmem:[%s17000_s0 + $0x320] sm:$0xff]  ;;  %v9507_v31 = vld [vmem:[%s17000_s0 + $0x318] sm:$0xff] }
 0x256   :  { %3504 = vrot.lane.b32.xlu1 %v9835_v2, %s11657_s10  ;;  %3502 = vrot.lane.b32.xlu0 %v9834_v49, %s11657_s10  ;;  %v2272_v2 = vsel %vm731_vm3, %v9505_v7, %v17097_v53  ;;  %v9866_v53 = vld [vmem:[%s17000_s0 + $0x1e2] sm:$0xff] }
 0x257   :  { %10801 = vmatprep.mubr.msk.f32.mxu0 %vm863_vm5, %v2326_v62  ;;  %v17098_v62 = vld [vmem:[#allocation14_spill] sm:$0xff] }
 0x258   :  { %10802 = vmatmul.mubr.msk.f32.gmra.mrb[48].mxu0 %vm863_vm5, %v2327_v9  ;;  %v2125_v40 = vpop.permute.xlu1 %2124  ;;  %v2123_v35 = vpop.permute.xlu0 %2122  ;;  %v9846_v9 = vld [vmem:[%s17000_s0 + $0xc2] sm:$0xff] }
 0x259   :  { %v2329_v20 = vsel %vm796_vm4, %v2265_v6, %v2125_v40  ;;  %v2328_v26 = vsel %vm796_vm4, %v2264_v12, %v2123_v35  ;;  %v9510_v12 = vld [vmem:[%s17000_s0 + $0x338] sm:$0xff]  ;;  %v9509_v40 = vld [vmem:[%s17000_s0 + $0x330] sm:$0xff] }
 0x25a   :  { %3508 = vrot.lane.b32.xlu1 %v9837_v52, %s11657_s10  ;;  %3506 = vrot.lane.b32.xlu0 %v9836_v42, %s11657_s10  ;;  %v2275_v52 = vsel %vm731_vm3, %v9508_v4, %v17098_v62  ;;  %v17099_v42 = vld [vmem:[#allocation15_spill] sm:$0xff] }
 0x25b   :  { %10804 = vmatprep.mubr.msk.f32.mxu0 %vm863_vm5, %v2328_v26  ;;  %v2274_v16 = vsel %vm731_vm3, %v9507_v31, %v17099_v42  ;;  %v17100_v26 = vld [vmem:[#allocation16_spill] sm:$0xff]  ;;  %v9868_v4 = vld [vmem:[%s17000_s0 + $0x1fa] sm:$0xff] }
 0x25c   :  { %10805 = vmatmul.mubr.msk.f32.gmra.mrb[50].mxu0 %vm863_vm5, %v2329_v20  ;;  %v2129_v29 = vpop.permute.xlu1 %2128  ;;  %v2127_v54 = vpop.permute.xlu0 %2126  ;;  %v9848_v20 = vld [vmem:[%s17000_s0 + $0xda] sm:$0xff]  ;;  %v9872_v42 = vld [vmem:[%s17000_s0 + $0x22a] sm:$0xff] }
 0x25d   :  { %v2331_v46 = vsel %vm796_vm4, %v2267_v28, %v2129_v29  ;;  %v2330_v60 = vsel %vm796_vm4, %v2266_v23, %v2127_v54  ;;  %v9851_v54 = vld [vmem:[%s17000_s0 + $0xfa] sm:$0xff] }
 0x25e   :  { %3512 = vrot.lane.b32.xlu1 %v9839_v27, %s11657_s10  ;;  %3510 = vrot.lane.b32.xlu0 %v9838_v51, %s11657_s10  ;;  %v2277_v27 = vsel %vm731_vm3, %v9510_v12, %v17100_v26  ;;  %v17101_v51 = vld [vmem:[#allocation17_spill] sm:$0xff]  ;;  %v9874_v12 = vld [vmem:[%s17000_s0 + $0x242] sm:$0xff] }
 0x25f   :  { %10807 = vmatprep.mubr.msk.f32.mxu0 %vm863_vm5, %v2330_v60  ;;  %v2276_v8 = vsel %vm731_vm3, %v9509_v40, %v17101_v51  ;;  %v9853_v60 = vld [vmem:[%s17000_s0 + $0x112] sm:$0xff]  ;;  %v9876_v51 = vld [vmem:[%s17000_s0 + $0x25a] sm:$0xff] }
 0x260   :  { %10808 = vmatmul.mubr.msk.f32.gmra.mrb[52].mxu0 %vm863_vm5, %v2331_v46  ;;  %v2133_v5 = vpop.permute.xlu1 %2132  ;;  %v2131_v17 = vpop.permute.xlu0 %2130 }
 0x261   :  { %v2333_v25 = vsel %vm796_vm4, %v2269_v30, %v2133_v5  ;;  %v2332_v19 = vsel %vm796_vm4, %v2268_v48, %v2131_v17  ;;  %v9855_v30 = vld [vmem:[%s17000_s0 + $0x12a] sm:$0xff]  ;;  %v9857_v17 = vld [vmem:[%s17000_s0 + $0x142] sm:$0xff] }
 0x262   :  { %3516 = vrot.lane.b32.xlu1 %v9841_v41, %s11657_s10  ;;  %3514 = vrot.lane.b32.xlu0 %v9840_v58, %s11657_s10  ;;  %v9852_v41 = vld [vmem:[%s17000_s0 + $0x10a] sm:$0xff] }
 0x263   :  { %10810 = vmatprep.mubr.msk.f32.mxu0 %vm863_vm5, %v2332_v19  ;;  %v9859_v19 = vld [vmem:[%s17000_s0 + $0x15a] sm:$0xff] }
 0x264   :  { %10811 = vmatmul.mubr.msk.f32.gmra.mrb[54].mxu0 %vm863_vm5, %v2333_v25  ;;  %v2137_v45 = vpop.permute.xlu1 %2136  ;;  %v2135_v1 = vpop.permute.xlu0 %2134 }
 0x265   :  { %v2335_v63 = vsel %vm796_vm4, %v2271_v37, %v2137_v45  ;;  %v2334_v55 = vsel %vm796_vm4, %v2270_v3, %v2135_v1  ;;  %v9861_v37 = vld [vmem:[%s17000_s0 + $0x172] sm:$0xff]  ;;  %v9863_v1 = vld [vmem:[%s17000_s0 + $0x18a] sm:$0xff] }
 0x266   :  { %3520 = vrot.lane.b32.xlu1 %v9843_v11, %s11657_s10  ;;  %3518 = vrot.lane.b32.xlu0 %v9842_v43, %s11657_s10  ;;  %v9858_v11 = vld [vmem:[%s17000_s0 + $0x152] sm:$0xff] }
 0x267   :  { %10813 = vmatprep.mubr.msk.f32.mxu0 %vm863_vm5, %v2334_v55  ;;  %v9865_v55 = vld [vmem:[%s17000_s0 + $0x1a2] sm:$0xff] }
 0x268   :  { %10814 = vmatmul.mubr.msk.f32.gmra.mrb[56].mxu0 %vm863_vm5, %v2335_v63  ;;  %v2141_v49 = vpop.permute.xlu1 %2140  ;;  %v2139_v39 = vpop.permute.xlu0 %2138 }
 0x269   :  { %v2337_v32 = vsel %vm796_vm4, %v2273_v47, %v2141_v49  ;;  %v2336_v33 = vsel %vm796_vm4, %v2272_v2, %v2139_v39  ;;  %v9867_v47 = vld [vmem:[%s17000_s0 + $0x1ea] sm:$0xff]  ;;  %v9869_v39 = vld [vmem:[%s17000_s0 + $0x202] sm:$0xff] }
 0x26a   :  { %3524 = vrot.lane.b32.xlu1 %v9845_v21, %s11657_s10  ;;  %3522 = vrot.lane.b32.xlu0 %v9844_v18, %s11657_s10  ;;  %v9864_v21 = vld [vmem:[%s17000_s0 + $0x19a] sm:$0xff] }
 0x26b   :  { %10816 = vmatprep.mubr.msk.f32.mxu0 %vm863_vm5, %v2336_v33  ;;  %v9871_v33 = vld [vmem:[%s17000_s0 + $0x21a] sm:$0xff] }
 0x26c   :  { %10817 = vmatmul.mubr.msk.f32.gmra.mrb[58].mxu0 %vm863_vm5, %v2337_v32  ;;  %v2145_v6 = vpop.permute.xlu1 %2144  ;;  %v2143_v56 = vpop.permute.xlu0 %2142 }
 0x26d   :  { %v2339_v35 = vsel %vm796_vm4, %v2275_v52, %v2145_v6  ;;  %v2338_v50 = vsel %vm796_vm4, %v2274_v16, %v2143_v56  ;;  %v9873_v52 = vld [vmem:[%s17000_s0 + $0x232] sm:$0xff]  ;;  %v9875_v56 = vld [vmem:[%s17000_s0 + $0x24a] sm:$0xff] }
 0x26e   :  { %3528 = vrot.lane.b32.xlu1 %v9847_v34, %s11657_s10  ;;  %3526 = vrot.lane.b32.xlu0 %v9846_v9, %s11657_s10  ;;  %v9870_v34 = vld [vmem:[%s17000_s0 + $0x212] sm:$0xff] }
 0x26f   :  { %10819 = vmatprep.mubr.msk.f32.mxu0 %vm863_vm5, %v2338_v50  ;;  %v9813_v50 = vld [vmem:[%s17000_s0 + $0x261] sm:$0xff] }
 0x270   :  { %10820 = vmatmul.mubr.msk.f32.gmra.mrb[60].mxu0 %vm863_vm5, %v2339_v35  ;;  %v2149_v28 = vpop.permute.xlu1 %2148  ;;  %v2147_v0 = vpop.permute.xlu0 %2146 }
 0x271   :  { %v2341_v23 = vsel %vm796_vm4, %v2277_v27, %v2149_v28  ;;  %v2340_v29 = vsel %vm796_vm4, %v2276_v8, %v2147_v0  ;;  %v9877_v27 = vld [vmem:[%s17000_s0 + $0x262] sm:$0xff]  ;;  %v9815_v0 = vld [vmem:[%s17000_s0 + $0x279] sm:$0xff] }
 0x272   :  { %3532 = vrot.lane.b32.xlu1 %v9849_v36, %s11657_s10  ;;  %3530 = vrot.lane.b32.xlu0 %v9848_v20, %s11657_s10  ;;  %v9812_v36 = vld [vmem:[%s17000_s0 + $0x259] sm:$0xff] }
 0x273   :  { %10822 = vmatprep.mubr.msk.f32.mxu0 %vm863_vm5, %v2340_v29 }
 0x274   :  { %10823 = vmatmul.mubr.msk.f32.gmra.mrb[62].mxu0 %vm863_vm5, %v2341_v23  ;;  %v14149_v22 = vpop.permute.xlu1 %3248  ;;  %v14151_v46 = vpop.permute.xlu0 %3246  ;;  %v9814_v23 = vld [vmem:[%s17000_s0 + $0x271] sm:$0xff] }
 0x276   :  { %3536 = vrot.lane.b32.xlu1 %v9851_v54, %s11657_s10  ;;  %3534 = vrot.lane.b32.xlu0 %v9850_v24, %s11657_s10  ;;  %v9879_v24 = vld [vmem:[%s17000_s0 + $0x27a] sm:$0xff] }
 0x278   :  { %v14161_v58 = vpop.permute.xlu1 %3252  ;;  %v14163_v61 = vpop.permute.xlu0 %3250 }
 0x27a   :  { %3540 = vrot.lane.b32.xlu1 %v9853_v60, %s11657_s10  ;;  %3538 = vrot.lane.b32.xlu0 %v9852_v41, %s11657_s10  ;;  %v9878_v60 = vld [vmem:[%s17000_s0 + $0x272] sm:$0xff] }
 0x27c   :  { %v14173_v48 = vpop.permute.xlu1 %3256  ;;  %v14175_v5 = vpop.permute.xlu0 %3254 }
 0x27e   :  { %3544 = vrot.lane.b32.xlu1 %v9855_v30, %s11657_s10  ;;  %3542 = vrot.lane.b32.xlu0 %v9854_v59, %s11657_s10  ;;  %v9817_v59 = vld [vmem:[%s17000_s0 + $0x291] sm:$0xff] }
 0x280   :  { %v14185_v14 = vpop.permute.xlu1 %3260  ;;  %v14187_v25 = vpop.permute.xlu0 %3258 }
 0x282   :  { %3548 = vrot.lane.b32.xlu1 %v9857_v17, %s11657_s10  ;;  %3546 = vrot.lane.b32.xlu0 %v9856_v10, %s11657_s10  ;;  %v9816_v17 = vld [vmem:[%s17000_s0 + $0x289] sm:$0xff] }
 0x284   :  { %v14197_v43 = vpop.permute.xlu1 %3264  ;;  %v14199_v15 = vpop.permute.xlu0 %3262 }
 0x286   :  { %3552 = vrot.lane.b32.xlu1 %v9859_v19, %s11657_s10  ;;  %3550 = vrot.lane.b32.xlu0 %v9858_v11, %s11657_s10  ;;  %v9881_v11 = vld [vmem:[%s17000_s0 + $0x292] sm:$0xff] }
 0x288   :  { %v14209_v3 = vpop.permute.xlu1 %3268  ;;  %v14211_v45 = vpop.permute.xlu0 %3266 }
 0x28a   :  { %3556 = vrot.lane.b32.xlu1 %v9861_v37, %s11657_s10  ;;  %3554 = vrot.lane.b32.xlu0 %v9860_v38, %s11657_s10  ;;  %v9880_v37 = vld [vmem:[%s17000_s0 + $0x28a] sm:$0xff] }
 0x28c   :  { %v14221_v7 = vpop.permute.xlu1 %3272  ;;  %v14223_v63 = vpop.permute.xlu0 %3270 }
 0x28e   :  { %3560 = vrot.lane.b32.xlu1 %v9863_v1, %s11657_s10  ;;  %3558 = vrot.lane.b32.xlu0 %v9862_v13, %s11657_s10  ;;  %v9819_v13 = vld [vmem:[%s17000_s0 + $0x2a9] sm:$0xff] }
 0x290   :  { %v14233_v18 = vpop.permute.xlu1 %3276  ;;  %v14235_v44 = vpop.permute.xlu0 %3274 }
 0x292   :  { %3564 = vrot.lane.b32.xlu1 %v9865_v55, %s11657_s10  ;;  %3562 = vrot.lane.b32.xlu0 %v9864_v21, %s11657_s10  ;;  %v9818_v55 = vld [vmem:[%s17000_s0 + $0x2a1] sm:$0xff] }
 0x294   :  { %v14245_v2 = vpop.permute.xlu1 %3280  ;;  %v14247_v49 = vpop.permute.xlu0 %3278 }
 0x296   :  { %3568 = vrot.lane.b32.xlu1 %v9867_v47, %s11657_s10  ;;  %3566 = vrot.lane.b32.xlu0 %v9866_v53, %s11657_s10  ;;  %v9883_v53 = vld [vmem:[%s17000_s0 + $0x2aa] sm:$0xff] }
 0x298   :  { %v14257_v31 = vpop.permute.xlu1 %3284  ;;  %v14259_v32 = vpop.permute.xlu0 %3282 }
 0x29a   :  { %3572 = vrot.lane.b32.xlu1 %v9869_v39, %s11657_s10  ;;  %3570 = vrot.lane.b32.xlu0 %v9868_v4, %s11657_s10  ;;  %v9882_v39 = vld [vmem:[%s17000_s0 + $0x2a2] sm:$0xff] }
 0x29c   :  { %v14269_v9 = vpop.permute.xlu1 %3288  ;;  %v14271_v62 = vpop.permute.xlu0 %3286 }
 0x29e   :  { %3576 = vrot.lane.b32.xlu1 %v9871_v33, %s11657_s10  ;;  %3574 = vrot.lane.b32.xlu0 %v9870_v34, %s11657_s10  ;;  %v9707_v34 = vld [vmem:[%s17000_s0 + $0x38] sm:$0xff] }
 0x2a0   :  { %v14281_v16 = vpop.permute.xlu1 %3292  ;;  %v14283_v6 = vpop.permute.xlu0 %3290 }
 0x2a2   :  { %3580 = vrot.lane.b32.xlu1 %v9873_v52, %s11657_s10  ;;  %3578 = vrot.lane.b32.xlu0 %v9872_v42, %s11657_s10  ;;  %v9706_v52 = vld [vmem:[%s17000_s0 + $0x30] sm:$0xff]  ;;  %v9821_v42 = vld [vmem:[%s17000_s0 + $0x2c1] sm:$0xff] }
 0x2a4   :  { %v14293_v40 = vpop.permute.xlu1 %3296  ;;  %v14295_v35 = vpop.permute.xlu0 %3294 }
 0x2a6   :  { %3584 = vrot.lane.b32.xlu1 %v9875_v56, %s11657_s10  ;;  %3582 = vrot.lane.b32.xlu0 %v9874_v12, %s11657_s10  ;;  %v9820_v56 = vld [vmem:[%s17000_s0 + $0x2b9] sm:$0xff]  ;;  %v3695_v12 = vsel %vm731_vm3, %v9707_v34, %v14149_v22  ;;  %v9885_v22 = vld [vmem:[%s17000_s0 + $0x2c2] sm:$0xff] }
 0x2a8   :  { %v14305_v20 = vpop.permute.xlu1 %3300  ;;  %v14307_v26 = vpop.permute.xlu0 %3298 }
 0x2aa   :  { %3332 = vrot.lane.b32.xlu1 %v9813_v50, %s11655_s22  ;;  %3330 = vrot.lane.b32.xlu0 %v9812_v36, %s11655_s22  ;;  %v3694_v50 = vsel %vm731_vm3, %v9706_v52, %v14151_v46  ;;  %v9884_v46 = vld [vmem:[%s17000_s0 + $0x2ba] sm:$0xff] }
 0x2ac   :  { %v14317_v8 = vpop.permute.xlu1 %3304  ;;  %v14319_v28 = vpop.permute.xlu0 %3302 }
 0x2ae   :  { %3588 = vrot.lane.b32.xlu1 %v9877_v27, %s11657_s10  ;;  %3586 = vrot.lane.b32.xlu0 %v9876_v51, %s11657_s10  ;;  %v9709_v51 = vld [vmem:[%s17000_s0 + $0x50] sm:$0xff] }
 0x2b0   :  { %v14329_v29 = vpop.permute.xlu1 %3308  ;;  %v14331_v54 = vpop.permute.xlu0 %3306 }
 0x2b2   :  { %3336 = vrot.lane.b32.xlu1 %v9815_v0, %s11655_s22  ;;  %3334 = vrot.lane.b32.xlu0 %v9814_v23, %s11655_s22  ;;  %v9708_v0 = vld [vmem:[%s17000_s0 + $0x48] sm:$0xff] }
 0x2b4   :  { %v14341_v41 = vpop.permute.xlu1 %3312  ;;  %v14343_v30 = vpop.permute.xlu0 %3310 }
 0x2b6   :  { %3592 = vrot.lane.b32.xlu1 %v9879_v24, %s11657_s10  ;;  %3590 = vrot.lane.b32.xlu0 %v9878_v60, %s11657_s10  ;;  %v3697_v60 = vsel %vm731_vm3, %v9709_v51, %v14161_v58  ;;  %v9823_v58 = vld [vmem:[%s17000_s0 + $0x2d9] sm:$0xff] }
 0x2b8   :  { %v14353_v10 = vpop.permute.xlu1 %3316  ;;  %v14355_v19 = vpop.permute.xlu0 %3314 }
 0x2ba   :  { %3340 = vrot.lane.b32.xlu1 %v9817_v59, %s11655_s22  ;;  %3338 = vrot.lane.b32.xlu0 %v9816_v17, %s11655_s22  ;;  %v3696_v59 = vsel %vm731_vm3, %v9708_v0, %v14163_v61  ;;  %v9822_v61 = vld [vmem:[%s17000_s0 + $0x2d1] sm:$0xff] }
 0x2bc   :  { %v14365_v38 = vpop.permute.xlu1 %3320  ;;  %v14367_v1 = vpop.permute.xlu0 %3318 }
 0x2be   :  { %3596 = vrot.lane.b32.xlu1 %v9881_v11, %s11657_s10  ;;  %3594 = vrot.lane.b32.xlu0 %v9880_v37, %s11657_s10  ;;  %v9711_v37 = vld [vmem:[%s17000_s0 + $0x68] sm:$0xff] }
 0x2c0   :  { %v14377_v21 = vpop.permute.xlu1 %3324  ;;  %v14379_v47 = vpop.permute.xlu0 %3322 }
 0x2c2   :  { %3344 = vrot.lane.b32.xlu1 %v9819_v13, %s11655_s22  ;;  %3342 = vrot.lane.b32.xlu0 %v9818_v55, %s11655_s22  ;;  %v9710_v13 = vld [vmem:[%s17000_s0 + $0x60] sm:$0xff] }
 0x2c3   :  { %v3698_v34 = vsel %vm731_vm3, %v9710_v13, %v14175_v5  ;;  %v9886_v5 = vld [vmem:[%s17000_s0 + $0x2d2] sm:$0xff] }
 0x2c4   :  { %v14389_v4 = vpop.permute.xlu1 %3328  ;;  %v14391_v33 = vpop.permute.xlu0 %3326  ;;  %v9717_v13 = vld [vmem:[%s17000_s0 + $0xb0] sm:$0xff] }
 0x2c6   :  { %3600 = vrot.lane.b32.xlu1 %v9883_v53, %s11657_s10  ;;  %3598 = vrot.lane.b32.xlu0 %v9882_v39, %s11657_s10  ;;  %v3699_v39 = vsel %vm731_vm3, %v9711_v37, %v14173_v48  ;;  %v9887_v48 = vld [vmem:[%s17000_s0 + $0x2da] sm:$0xff]  ;;  %v9825_v37 = vld [vmem:[%s17000_s0 + $0x2f1] sm:$0xff] }
 0x2c8   :  { %v3505_v36 = vpop.permute.xlu1 %3504  ;;  %v3503_v27 = vpop.permute.xlu0 %3502 }
 0x2c9   :  { %v3759_v23 = vsel %vm796_vm4, %v3695_v12, %v3505_v36  ;;  %v3758_v24 = vsel %vm796_vm4, %v3694_v50, %v3503_v27  ;;  %v9712_v12 = vld [vmem:[%s17000_s0 + $0x78] sm:$0xff] }
 0x2ca   :  { %3348 = vrot.lane.b32.xlu1 %v9821_v42, %s11655_s22  ;;  %3346 = vrot.lane.b32.xlu0 %v9820_v56, %s11655_s22  ;;  %v9713_v56 = vld [vmem:[%s17000_s0 + $0x80] sm:$0xff]  ;;  %v3700_v51 = vsel %vm731_vm3, %v9712_v12, %v14187_v25 }
 0x2cb   :  { %10829 = vmatprep.mubr.msk.f32.mxu0 %vm863_vm5, %v3758_v24  ;;  %v3701_v27 = vsel %vm731_vm3, %v9713_v56, %v14185_v14  ;;  %v9715_v24 = vld [vmem:[%s17000_s0 + $0x98] sm:$0xff]  ;;  %v9824_v14 = vld [vmem:[%s17000_s0 + $0x2e9] sm:$0xff]  ;;  %v9718_v56 = vld [vmem:[%s17000_s0 + $0xc0] sm:$0xff] }
 0x2cc   :  { %10830 = vmatmul.mubr.msk.f32.vlgmr.msra.gmra.mrb[0].mxu0 %vm863_vm5, %v3759_v23  ;;  %v3509_v17 = vpop.permute.xlu1 %3508  ;;  %v3507_v11 = vpop.permute.xlu0 %3506  ;;  %v3703_v25 = vsel %vm731_vm3, %v9715_v24, %v14197_v43  ;;  %v9826_v12 = vld [vmem:[%s17000_s0 + $0x301] sm:$0xff] }
 0x2cd   :  { %v3761_v55 = vsel %vm796_vm4, %v3697_v60, %v3509_v17  ;;  %v3760_v53 = vsel %vm796_vm4, %v3696_v59, %v3507_v11 }
 0x2ce   :  { %3604 = vrot.lane.b32.xlu1 %v9885_v22, %s11657_s10  ;;  %3602 = vrot.lane.b32.xlu0 %v9884_v46, %s11657_s10  ;;  %v9714_v22 = vld [vmem:[%s17000_s0 + $0x90] sm:$0xff] }
 0x2cf   :  { %10832 = vmatprep.mubr.msk.f32.mxu0 %vm863_vm5, %v3760_v53  ;;  %v3702_v59 = vsel %vm731_vm3, %v9714_v22, %v14199_v15  ;;  %v9888_v53 = vld [vmem:[%s17000_s0 + $0x2ea] sm:$0xff] }
 0x2d0   :  { %10833 = vmatmul.mubr.msk.f32.gmra.mrb[2].mxu0 %vm863_vm5, %v3761_v55  ;;  %v3513_v52 = vpop.permute.xlu1 %3512  ;;  %v3511_v42 = vpop.permute.xlu0 %3510  ;;  %v9716_v55 = vld [vmem:[%s17000_s0 + $0xa8] sm:$0xff] }
 0x2d1   :  { %v3763_v50 = vsel %vm796_vm4, %v3699_v39, %v3513_v52  ;;  %v3762_v36 = vsel %vm796_vm4, %v3698_v34, %v3511_v42  ;;  %v9889_v52 = vld [vmem:[%s17000_s0 + $0x2f2] sm:$0xff]  ;;  %v9719_v42 = vld [vmem:[%s17000_s0 + $0xc8] sm:$0xff] }
 0x2d2   :  { %3352 = vrot.lane.b32.xlu1 %v9823_v58, %s11655_s22  ;;  %3350 = vrot.lane.b32.xlu0 %v9822_v61, %s11655_s22  ;;  %v3705_v58 = vsel %vm731_vm3, %v9717_v13, %v14209_v3  ;;  %v3704_v61 = vsel %vm731_vm3, %v9716_v55, %v14211_v45 }
 0x2d3   :  { %10835 = vmatprep.mubr.msk.f32.mxu0 %vm863_vm5, %v3762_v36  ;;  %v3706_v36 = vsel %vm731_vm3, %v9718_v56, %v14223_v63  ;;  %v9727_v56 = vld [vmem:[%s17000_s0 + $0x128] sm:$0xff] }
 0x2d4   :  { %10836 = vmatmul.mubr.msk.f32.gmra.mrb[4].mxu0 %vm863_vm5, %v3763_v50  ;;  %v3517_v0 = vpop.permute.xlu1 %3516  ;;  %v3515_v23 = vpop.permute.xlu0 %3514  ;;  %v3707_v50 = vsel %vm731_vm3, %v9719_v42, %v14221_v7  ;;  %v9893_v42 = vld [vmem:[%s17000_s0 + $0x322] sm:$0xff] }
 0x2d5   :  { %v3765_v46 = vsel %vm796_vm4, %v3701_v27, %v3517_v0  ;;  %v3764_v60 = vsel %vm796_vm4, %v3700_v51, %v3515_v23  ;;  %v9827_v27 = vld [vmem:[%s17000_s0 + $0x309] sm:$0xff]  ;;  %v9721_v51 = vld [vmem:[%s17000_s0 + $0xe0] sm:$0xff]  ;;  %v9720_v0 = vld [vmem:[%s17000_s0 + $0xd8] sm:$0xff] }
 0x2d6   :  { %3608 = vrot.lane.b32.xlu1 %v9887_v48, %s11657_s10  ;;  %3606 = vrot.lane.b32.xlu0 %v9886_v5, %s11657_s10  ;;  %v9890_v23 = vld [vmem:[%s17000_s0 + $0x302] sm:$0xff]  ;;  %v3709_v24 = vsel %vm731_vm3, %v9721_v51, %v14233_v18  ;;  %v3708_v22 = vsel %vm731_vm3, %v9720_v0, %v14235_v44  ;;  %v9728_v51 = vld [vmem:[%s17000_s0 + $0x138] sm:$0xff] }
 0x2d7   :  { %10838 = vmatprep.mubr.msk.f32.mxu0 %vm863_vm5, %v3764_v60  ;;  %v9894_v0 = vld [vmem:[%s17000_s0 + $0x332] sm:$0xff] }
 0x2d8   :  { %10839 = vmatmul.mubr.msk.f32.gmra.mrb[6].mxu0 %vm863_vm5, %v3765_v46  ;;  %v3521_v17 = vpop.permute.xlu1 %3520  ;;  %v3519_v11 = vpop.permute.xlu0 %3518 }
 0x2d9   :  { %v3767_v43 = vsel %vm796_vm4, %v3703_v25, %v3521_v17  ;;  %v3766_v15 = vsel %vm796_vm4, %v3702_v59, %v3519_v11  ;;  %v9723_v25 = vld [vmem:[%s17000_s0 + $0xf8] sm:$0xff]  ;;  %v9722_v59 = vld [vmem:[%s17000_s0 + $0xf0] sm:$0xff] }
 0x2da   :  { %3354 = vrot.lane.b32.xlu0 %v9824_v14, %s11655_s22  ;;  %10841 = vmatprep.mubr.msk.f32.mxu0 %vm863_vm5, %v3766_v15  ;;  %v9891_v14 = vld [vmem:[%s17000_s0 + $0x30a] sm:$0xff]  ;;  %v9828_v17 = vld [vmem:[%s17000_s0 + $0x319] sm:$0xff]  ;;  %v3711_v11 = vsel %vm731_vm3, %v9723_v25, %v14245_v2 }
 0x2db   :  { %3356 = vrot.lane.b32.xlu1 %v9825_v37, %s11655_s22  ;;  %v3710_v37 = vsel %vm731_vm3, %v9722_v59, %v14247_v49  ;;  %v9725_v15 = vld [vmem:[%s17000_s0 + $0x110] sm:$0xff] }
 0x2dc   :  { %10842 = vmatmul.mubr.msk.f32.gmra.mrb[8].mxu0 %vm863_vm5, %v3767_v43  ;;  %v3525_v39 = vpop.permute.xlu1 %3524  ;;  %v3523_v34 = vpop.permute.xlu0 %3522  ;;  %v9829_v43 = vld [vmem:[%s17000_s0 + $0x321] sm:$0xff] }
 0x2dd   :  { %v3769_v3 = vsel %vm796_vm4, %v3705_v58, %v3525_v39  ;;  %v3768_v45 = vsel %vm796_vm4, %v3704_v61, %v3523_v34  ;;  %v9892_v58 = vld [vmem:[%s17000_s0 + $0x31a] sm:$0xff]  ;;  %v3713_v61 = vsel %vm731_vm3, %v9725_v15, %v14257_v31 }
 0x2de   :  { %3610 = vrot.lane.b32.xlu0 %v9888_v53, %s11657_s10  ;;  %10844 = vmatprep.mubr.msk.f32.mxu0 %vm863_vm5, %v3768_v45  ;;  %v9724_v53 = vld [vmem:[%s17000_s0 + $0x108] sm:$0xff]  ;;  %v9830_v45 = vld [vmem:[%s17000_s0 + $0x331] sm:$0xff] }
 0x2df   :  { %3612 = vrot.lane.b32.xlu1 %v9889_v52, %s11657_s10  ;;  %v3712_v39 = vsel %vm731_vm3, %v9724_v53, %v14259_v32 }
 0x2e0   :  { %10845 = vmatmul.mubr.msk.f32.gmra.mrb[10].mxu0 %vm863_vm5, %v3769_v3  ;;  %v3529_v48 = vpop.permute.xlu1 %3528  ;;  %v3527_v5 = vpop.permute.xlu0 %3526  ;;  %v9726_v3 = vld [vmem:[%s17000_s0 + $0x120] sm:$0xff] }
 0x2e1   :  { %v3771_v7 = vsel %vm796_vm4, %v3707_v50, %v3529_v48  ;;  %v3770_v63 = vsel %vm796_vm4, %v3706_v36, %v3527_v5  ;;  %v3714_v50 = vsel %vm731_vm3, %v9726_v3, %v14271_v62  ;;  %v9831_v5 = vld [vmem:[%s17000_s0 + $0x339] sm:$0xff] }
 0x2e2   :  { %3358 = vrot.lane.b32.xlu0 %v9826_v12, %s11655_s22  ;;  %10847 = vmatprep.mubr.msk.f32.mxu0 %vm863_vm5, %v3770_v63  ;;  %v3715_v12 = vsel %vm731_vm3, %v9727_v56, %v14269_v9  ;;  %v3716_v63 = vsel %vm731_vm3, %v9728_v51, %v14283_v6  ;;  %v9736_v56 = vld [vmem:[%s17000_s0 + $0x198] sm:$0xff]  ;;  %v9741_v51 = vld [vmem:[%s17000_s0 + $0x200] sm:$0xff] }
 0x2e3   :  { %3360 = vrot.lane.b32.xlu1 %v9827_v27, %s11655_s22  ;;  %v9729_v27 = vld [vmem:[%s17000_s0 + $0x140] sm:$0xff] }
 0x2e4   :  { %10848 = vmatmul.mubr.msk.f32.gmra.mrb[12].mxu0 %vm863_vm5, %v3771_v7  ;;  %v3533_v46 = vpop.permute.xlu1 %3532  ;;  %v3531_v60 = vpop.permute.xlu0 %3530  ;;  %v3717_v7 = vsel %vm731_vm3, %v9729_v27, %v14281_v16 }
 0x2e5   :  { %v3773_v18 = vsel %vm796_vm4, %v3709_v24, %v3533_v46  ;;  %v3772_v44 = vsel %vm796_vm4, %v3708_v22, %v3531_v60  ;;  %v9895_v22 = vld [vmem:[%s17000_s0 + $0x33a] sm:$0xff]  ;;  %v9730_v60 = vld [vmem:[%s17000_s0 + $0x150] sm:$0xff] }
 0x2e6   :  { %3614 = vrot.lane.b32.xlu0 %v9890_v23, %s11657_s10  ;;  %10850 = vmatprep.mubr.msk.f32.mxu0 %vm863_vm5, %v3772_v44  ;;  %v9731_v46 = vld [vmem:[%s17000_s0 + $0x158] sm:$0xff]  ;;  %v3718_v59 = vsel %vm731_vm3, %v9730_v60, %v14295_v35 }
 0x2e7   :  { %3616 = vrot.lane.b32.xlu1 %v9891_v14, %s11657_s10  ;;  %v9832_v14 = vld [vmem:[%s17000_s0 + $0x349] sm:$0xff]  ;;  %v3719_v25 = vsel %vm731_vm3, %v9731_v46, %v14293_v40 }
 0x2e8   :  { %10851 = vmatmul.mubr.msk.f32.gmra.mrb[14].mxu0 %vm863_vm5, %v3773_v18  ;;  %v3537_v13 = vpop.permute.xlu1 %3536  ;;  %v3535_v55 = vpop.permute.xlu0 %3534 }
 0x2e9   :  { %v3775_v2 = vsel %vm796_vm4, %v3711_v11, %v3537_v13  ;;  %v3774_v49 = vsel %vm796_vm4, %v3710_v37, %v3535_v55  ;;  %v9733_v11 = vld [vmem:[%s17000_s0 + $0x170] sm:$0xff]  ;;  %v9732_v37 = vld [vmem:[%s17000_s0 + $0x168] sm:$0xff] }
 0x2ea   :  { %3362 = vrot.lane.b32.xlu0 %v9828_v17, %s11655_s22  ;;  %10853 = vmatprep.mubr.msk.f32.mxu0 %vm863_vm5, %v3774_v49  ;;  %v9833_v17 = vld [vmem:[%s17000_s0 + $0x351] sm:$0xff]  ;;  %v3721_v55 = vsel %vm731_vm3, %v9733_v11, %v14305_v20  ;;  %v9735_v49 = vld [vmem:[%s17000_s0 + $0x188] sm:$0xff]  ;;  %v9746_v11 = vld [vmem:[%s17000_s0 + $0x240] sm:$0xff] }
 0x2eb   :  { %3364 = vrot.lane.b32.xlu1 %v9829_v43, %s11655_s22  ;;  %v9896_v13 = vld [vmem:[%s17000_s0 + $0x34a] sm:$0xff]  ;;  %v3720_v43 = vsel %vm731_vm3, %v9732_v37, %v14307_v26 }
 0x2ec   :  { %10854 = vmatmul.mubr.msk.f32.gmra.mrb[16].mxu0 %vm863_vm5, %v3775_v2  ;;  %v3541_v34 = vpop.permute.xlu1 %3540  ;;  %v3539_v52 = vpop.permute.xlu0 %3538  ;;  %v9897_v2 = vld [vmem:[%s17000_s0 + $0x352] sm:$0xff] }
 0x2ed   :  { %v3777_v31 = vsel %vm796_vm4, %v3713_v61, %v3541_v34  ;;  %v3776_v32 = vsel %vm796_vm4, %v3712_v39, %v3539_v52  ;;  %v3723_v61 = vsel %vm731_vm3, %v9735_v49, %v14317_v8 }
 0x2ee   :  { %3618 = vrot.lane.b32.xlu0 %v9892_v58, %s11657_s10  ;;  %10856 = vmatprep.mubr.msk.f32.mxu0 %vm863_vm5, %v3776_v32  ;;  %v9734_v58 = vld [vmem:[%s17000_s0 + $0x180] sm:$0xff] }
 0x2ef   :  { %3620 = vrot.lane.b32.xlu1 %v9893_v42, %s11657_s10  ;;  %v3722_v39 = vsel %vm731_vm3, %v9734_v58, %v14319_v28  ;;  %v9737_v42 = vld [vmem:[%s17000_s0 + $0x1a0] sm:$0xff]  ;;  %v3724_v28 = vsel %vm731_vm3, %v9736_v56, %v14331_v54  ;;  %v9750_v56 = vld [vmem:[%s17000_s0 + $0x270] sm:$0xff] }
 0x2f0   :  { %10857 = vmatmul.mubr.msk.f32.gmra.mrb[18].mxu0 %vm863_vm5, %v3777_v31  ;;  %v3545_v36 = vpop.permute.xlu1 %3544  ;;  %v3543_v48 = vpop.permute.xlu0 %3542  ;;  %v3725_v8 = vsel %vm731_vm3, %v9737_v42, %v14329_v29  ;;  %v9751_v42 = vld [vmem:[%s17000_s0 + $0x278] sm:$0xff] }
 0x2f1   :  { %v3779_v9 = vsel %vm796_vm4, %v3715_v12, %v3545_v36  ;;  %v3778_v62 = vsel %vm796_vm4, %v3714_v50, %v3543_v48  ;;  %v9739_v12 = vld [vmem:[%s17000_s0 + $0x1e8] sm:$0xff]  ;;  %v9738_v50 = vld [vmem:[%s17000_s0 + $0x1e0] sm:$0xff] }
 0x2f2   :  { %3366 = vrot.lane.b32.xlu0 %v9830_v45, %s11655_s22  ;;  %10859 = vmatprep.mubr.msk.f32.mxu0 %vm863_vm5, %v3778_v62  ;;  %v3727_v29 = vsel %vm731_vm3, %v9739_v12, %v14341_v41  ;;  %v3726_v54 = vsel %vm731_vm3, %v9738_v50, %v14343_v30  ;;  %v3729_v41 = vsel %vm731_vm3, %v9741_v51, %v14353_v10 }
 0x2f3   :  { %3368 = vrot.lane.b32.xlu1 %v9831_v5, %s11655_s22 }
 0x2f4   :  { %10860 = vmatmul.mubr.msk.f32.gmra.mrb[20].mxu0 %vm863_vm5, %v3779_v9  ;;  %v3549_v23 = vpop.permute.xlu1 %3548  ;;  %v3547_v24 = vpop.permute.xlu0 %3546  ;;  %v9740_v9 = vld [vmem:[%s17000_s0 + $0x1f8] sm:$0xff] }
 0x2f5   :  { %v3781_v16 = vsel %vm796_vm4, %v3717_v7, %v3549_v23  ;;  %v3780_v6 = vsel %vm796_vm4, %v3716_v63, %v3547_v24  ;;  %v3728_v30 = vsel %vm731_vm3, %v9740_v9, %v14355_v19  ;;  %v9743_v23 = vld [vmem:[%s17000_s0 + $0x218] sm:$0xff]  ;;  %v9742_v24 = vld [vmem:[%s17000_s0 + $0x210] sm:$0xff] }
 0x2f6   :  { %3622 = vrot.lane.b32.xlu0 %v9894_v0, %s11657_s10  ;;  %10862 = vmatprep.mubr.msk.f32.mxu0 %vm863_vm5, %v3780_v6  ;;  %v3731_v10 = vsel %vm731_vm3, %v9743_v23, %v14365_v38  ;;  %v3730_v19 = vsel %vm731_vm3, %v9742_v24, %v14367_v1  ;;  %v9745_v6 = vld [vmem:[%s17000_s0 + $0x230] sm:$0xff] }
 0x2f7   :  { %3624 = vrot.lane.b32.xlu1 %v9895_v22, %s11657_s10  ;;  %v3733_v38 = vsel %vm731_vm3, %v9745_v6, %v14377_v21  ;;  %v9757_v6 = vld [vmem:[%s17000_s0 + $0x2c0] sm:$0xff] }
 0x2f8   :  { %10863 = vmatmul.mubr.msk.f32.gmra.mrb[22].mxu0 %vm863_vm5, %v3781_v16  ;;  %v3553_v18 = vpop.permute.xlu1 %3552  ;;  %v3551_v44 = vpop.permute.xlu0 %3550 }
 0x2f9   :  { %v3783_v40 = vsel %vm796_vm4, %v3719_v25, %v3553_v18  ;;  %v3782_v35 = vsel %vm796_vm4, %v3718_v59, %v3551_v44 }
 0x2fa   :  { %3370 = vrot.lane.b32.xlu0 %v9832_v14, %s11655_s22  ;;  %10865 = vmatprep.mubr.msk.f32.mxu0 %vm863_vm5, %v3782_v35  ;;  %v9744_v14 = vld [vmem:[%s17000_s0 + $0x228] sm:$0xff] }
 0x2fb   :  { %3372 = vrot.lane.b32.xlu1 %v9833_v17, %s11655_s22  ;;  %v3732_v1 = vsel %vm731_vm3, %v9744_v14, %v14379_v47  ;;  %v9747_v17 = vld [vmem:[%s17000_s0 + $0x248] sm:$0xff]  ;;  %v3734_v47 = vsel %vm731_vm3, %v9746_v11, %v14391_v33  ;;  %v9748_v33 = vld [vmem:[%s17000_s0 + $0x258] sm:$0xff] }
 0x2fc   :  { %10866 = vmatmul.mubr.msk.f32.gmra.mrb[24].mxu0 %vm863_vm5, %v3783_v40  ;;  %v3557_v15 = vpop.permute.xlu1 %3556  ;;  %v3555_v53 = vpop.permute.xlu0 %3554  ;;  %v3735_v21 = vsel %vm731_vm3, %v9747_v17, %v14389_v4  ;;  %v9749_v4 = vld [vmem:[%s17000_s0 + $0x260] sm:$0xff]  ;;  %v9756_v14 = vld [vmem:[%s17000_s0 + $0x2b8] sm:$0xff] }
 0x2fd   :  { %v3785_v20 = vsel %vm796_vm4, %v3721_v55, %v3557_v15  ;;  %v3784_v26 = vsel %vm796_vm4, %v3720_v43, %v3555_v53 }
 0x2fe   :  { %3626 = vrot.lane.b32.xlu0 %v9896_v13, %s11657_s10  ;;  %10868 = vmatprep.mubr.msk.f32.mxu0 %vm863_vm5, %v3784_v26  ;;  %v11658_v26 = vmov 0.0  }
 0x2ff   :  { %3628 = vrot.lane.b32.xlu1 %v9897_v2, %s11657_s10  ;;  %4534 = vst.msk [vmem:[#allocation2 + $0x8] sm:$0xff] %vm731_vm3, %v11658_v26  ;;  %4533 = vst.msk [vmem:[#allocation2] sm:$0xff] %vm731_vm3, %v11658_v26 }
 0x300   :  { %10869 = vmatmul.mubr.msk.f32.gmra.mrb[26].mxu0 %vm863_vm5, %v3785_v20  ;;  %v3561_v34 = vpop.permute.xlu1 %3560  ;;  %v3559_v52 = vpop.permute.xlu0 %3558  ;;  %4536 = vst.msk [vmem:[#allocation2 + $0x10] sm:$0x3] %vm4535_vm6, %v11658_v26  ;;  %4539 = vst.msk [vmem:[#allocation2 + $0x1c0] sm:$0x3] %vm4535_vm6, %v11658_v26 }
 0x301   :  { %v3787_v3 = vsel %vm796_vm4, %v3723_v61, %v3561_v34  ;;  %v3786_v31 = vsel %vm796_vm4, %v3722_v39, %v3559_v52  ;;  %4537 = vst.msk [vmem:[#allocation2 + $0x1b0] sm:$0xff] %vm731_vm3, %v11658_v26  ;;  %4538 = vst.msk [vmem:[#allocation2 + $0x1b8] sm:$0xff] %vm731_vm3, %v11658_v26 }
 0x302   :  { %10871 = vmatprep.mubr.msk.f32.mxu0 %vm863_vm5, %v3786_v31  ;;  %4541 = vst.msk [vmem:[#allocation2 + $0x198] sm:$0xff] %vm731_vm3, %v11658_v26  ;;  %4542 = vst.msk [vmem:[#allocation2 + $0x1a0] sm:$0xff] %vm731_vm3, %v11658_v26 }
 0x303   :  { %4543 = vst.msk [vmem:[#allocation2 + $0x1a8] sm:$0x3] %vm4535_vm6, %v11658_v26  ;;  %4546 = vst.msk [vmem:[#allocation2 + $0x358] sm:$0x3] %vm4535_vm6, %v11658_v26 }
 0x304   :  { %10872 = vmatmul.mubr.msk.f32.gmra.mrb[28].mxu0 %vm863_vm5, %v3787_v3  ;;  %v3565_v32 = vpop.permute.xlu1 %3564  ;;  %v3563_v45 = vpop.permute.xlu0 %3562  ;;  %4544 = vst.msk [vmem:[#allocation2 + $0x348] sm:$0xff] %vm731_vm3, %v11658_v26  ;;  %4545 = vst.msk [vmem:[#allocation2 + $0x350] sm:$0xff] %vm731_vm3, %v11658_v26 }
 0x305   :  { %v3789_v36 = vsel %vm796_vm4, %v3725_v8, %v3565_v32  ;;  %v3788_v48 = vsel %vm796_vm4, %v3724_v28, %v3563_v45  ;;  %4549 = vst.msk [vmem:[#allocation2 + $0x18] sm:$0x1] %vm4548_vm7, %v11658_v26  ;;  %4550 = vst.msk [vmem:[#allocation2 + $0x30] sm:$0x1] %vm4548_vm7, %v11658_v26 }
 0x306   :  { %10874 = vmatprep.mubr.msk.f32.mxu0 %vm863_vm5, %v3788_v48  ;;  %4551 = vst.msk [vmem:[#allocation2 + $0x48] sm:$0x1] %vm4548_vm7, %v11658_v26  ;;  %4552 = vst.msk [vmem:[#allocation2 + $0x60] sm:$0x1] %vm4548_vm7, %v11658_v26  ;;  %v4748_v45 = vld [vmem:[#allocation2 + $0x1] sm:$0xff] }
 0x307   :  { %4553 = vst.msk [vmem:[#allocation2 + $0x78] sm:$0x1] %vm4548_vm7, %v11658_v26  ;;  %4554 = vst.msk [vmem:[#allocation2 + $0x90] sm:$0x1] %vm4548_vm7, %v11658_v26  ;;  %v4749_v3 = vld [vmem:[#allocation2 + $0x9] sm:$0xff]  ;;  %4940 = vrot.lane.b32.xlu0 %v4748_v45, %s11655_s22  ;;  %v9764_v45 = vld [vmem:[%s17000_s0 + $0x318] sm:$0xff] }
 0x308   :  { %10875 = vmatmul.mubr.msk.f32.gmra.mrb[30].mxu0 %vm863_vm5, %v3789_v36  ;;  %v3569_v5 = vpop.permute.xlu1 %3568  ;;  %v3567_v27 = vpop.permute.xlu0 %3566  ;;  %4555 = vst.msk [vmem:[#allocation2 + $0xa8] sm:$0x1] %vm4548_vm7, %v11658_v26  ;;  %4556 = vst.msk [vmem:[#allocation2 + $0xc0] sm:$0x1] %vm4548_vm7, %v11658_v26  ;;  %4942 = vrot.lane.b32.xlu1 %v4749_v3, %s11655_s22 }
 0x309   :  { %v3791_v62 = vsel %vm796_vm4, %v3727_v29, %v3569_v5  ;;  %v3790_v0 = vsel %vm796_vm4, %v3726_v54, %v3567_v27  ;;  %4557 = vst.msk [vmem:[#allocation2 + $0xd8] sm:$0x1] %vm4548_vm7, %v11658_v26  ;;  %4558 = vst.msk [vmem:[#allocation2 + $0xf0] sm:$0x1] %vm4548_vm7, %v11658_v26  ;;  %v9753_v29 = vld [vmem:[%s17000_s0 + $0x290] sm:$0xff]  ;;  %v9752_v54 = vld [vmem:[%s17000_s0 + $0x288] sm:$0xff] }
 0x30a   :  { %10877 = vmatprep.mubr.msk.f32.mxu0 %vm863_vm5, %v3790_v0  ;;  %4559 = vst.msk [vmem:[#allocation2 + $0x108] sm:$0x1] %vm4548_vm7, %v11658_v26  ;;  %4560 = vst.msk [vmem:[#allocation2 + $0x120] sm:$0x1] %vm4548_vm7, %v11658_v26 }
 0x30b   :  { %4561 = vst.msk [vmem:[#allocation2 + $0x138] sm:$0x1] %vm4548_vm7, %v11658_v26  ;;  %4562 = vst.msk [vmem:[#allocation2 + $0x150] sm:$0x1] %vm4548_vm7, %v11658_v26 }
 0x30c   :  { %10878 = vmatmul.mubr.msk.f32.gmra.mrb[32].mxu0 %vm863_vm5, %v3791_v62  ;;  %v3573_v7 = vpop.permute.xlu1 %3572  ;;  %v3571_v63 = vpop.permute.xlu0 %3570  ;;  %4563 = vst.msk [vmem:[#allocation2 + $0x168] sm:$0x1] %vm4548_vm7, %v11658_v26  ;;  %4564 = vst.msk [vmem:[#allocation2 + $0x180] sm:$0x1] %vm4548_vm7, %v11658_v26 }
 0x30d   :  { %v3793_v22 = vsel %vm796_vm4, %v3729_v41, %v3573_v7  ;;  %v3792_v46 = vsel %vm796_vm4, %v3728_v30, %v3571_v63  ;;  %4565 = vst.msk [vmem:[#allocation2 + $0x1c8] sm:$0x1] %vm4548_vm7, %v11658_v26  ;;  %4566 = vst.msk [vmem:[#allocation2 + $0x1e0] sm:$0x1] %vm4548_vm7, %v11658_v26  ;;  %v9755_v7 = vld [vmem:[%s17000_s0 + $0x2a8] sm:$0xff]  ;;  %v9754_v63 = vld [vmem:[%s17000_s0 + $0x2a0] sm:$0xff] }
 0x30e   :  { %10880 = vmatprep.mubr.msk.f32.mxu0 %vm863_vm5, %v3792_v46  ;;  %4567 = vst.msk [vmem:[#allocation2 + $0x1f8] sm:$0x1] %vm4548_vm7, %v11658_v26  ;;  %4568 = vst.msk [vmem:[#allocation2 + $0x210] sm:$0x1] %vm4548_vm7, %v11658_v26 }
 0x30f   :  { %4569 = vst.msk [vmem:[#allocation2 + $0x228] sm:$0x1] %vm4548_vm7, %v11658_v26  ;;  %4570 = vst.msk [vmem:[#allocation2 + $0x240] sm:$0x1] %vm4548_vm7, %v11658_v26 }
 0x310   :  { %10881 = vmatmul.mubr.msk.f32.gmra.mrb[34].mxu0 %vm863_vm5, %v3793_v22  ;;  %v3577_v60 = vpop.permute.xlu1 %3576  ;;  %v3575_v16 = vpop.permute.xlu0 %3574  ;;  %4571 = vst.msk [vmem:[#allocation2 + $0x258] sm:$0x1] %vm4548_vm7, %v11658_v26  ;;  %4572 = vst.msk [vmem:[#allocation2 + $0x270] sm:$0x1] %vm4548_vm7, %v11658_v26 }
 0x311   :  { %v3795_v25 = vsel %vm796_vm4, %v3731_v10, %v3577_v60  ;;  %v3794_v59 = vsel %vm796_vm4, %v3730_v19, %v3575_v16  ;;  %4573 = vst.msk [vmem:[#allocation2 + $0x288] sm:$0x1] %vm4548_vm7, %v11658_v26  ;;  %4574 = vst.msk [vmem:[#allocation2 + $0x2a0] sm:$0x1] %vm4548_vm7, %v11658_v26 }
 0x312   :  { %10883 = vmatprep.mubr.msk.f32.mxu0 %vm863_vm5, %v3794_v59  ;;  %4575 = vst.msk [vmem:[#allocation2 + $0x2b8] sm:$0x1] %vm4548_vm7, %v11658_v26  ;;  %4576 = vst.msk [vmem:[#allocation2 + $0x2d0] sm:$0x1] %vm4548_vm7, %v11658_v26 }
 0x313   :  { %4577 = vst.msk [vmem:[#allocation2 + $0x2e8] sm:$0x1] %vm4548_vm7, %v11658_v26  ;;  %4578 = vst.msk [vmem:[#allocation2 + $0x300] sm:$0x1] %vm4548_vm7, %v11658_v26 }
 0x314   :  { %10884 = vmatmul.mubr.msk.f32.gmra.mrb[36].mxu0 %vm863_vm5, %v3795_v25  ;;  %v3581_v18 = vpop.permute.xlu1 %3580  ;;  %v3579_v44 = vpop.permute.xlu0 %3578  ;;  %4579 = vst.msk [vmem:[#allocation2 + $0x318] sm:$0x1] %vm4548_vm7, %v11658_v26  ;;  %4580 = vst.msk [vmem:[#allocation2 + $0x330] sm:$0x1] %vm4548_vm7, %v11658_v26 }
 0x315   :  { %v3797_v37 = vsel %vm796_vm4, %v3733_v38, %v3581_v18  ;;  %v3796_v40 = vsel %vm796_vm4, %v3732_v1, %v3579_v44  ;;  %4581 = vst.msk [vmem:[#allocation2 + $0x29] sm:$0x1] %vm4548_vm7, %v11658_v26  ;;  %4582 = vst.msk [vmem:[#allocation2 + $0x41] sm:$0x1] %vm4548_vm7, %v11658_v26 }
 0x316   :  { %10886 = vmatprep.mubr.msk.f32.mxu0 %vm863_vm5, %v3796_v40  ;;  %4583 = vst.msk [vmem:[#allocation2 + $0x59] sm:$0x1] %vm4548_vm7, %v11658_v26  ;;  %4584 = vst.msk [vmem:[#allocation2 + $0x71] sm:$0x1] %vm4548_vm7, %v11658_v26  ;;  %v9758_v40 = vld [vmem:[%s17000_s0 + $0x2d0] sm:$0xff] }
 0x317   :  { %4585 = vst.msk [vmem:[#allocation2 + $0x89] sm:$0x1] %vm4548_vm7, %v11658_v26  ;;  %4586 = vst.msk [vmem:[#allocation2 + $0xa1] sm:$0x1] %vm4548_vm7, %v11658_v26 }
 0x318   :  { %10887 = vmatmul.mubr.msk.f32.gmra.mrb[38].mxu0 %vm863_vm5, %v3797_v37  ;;  %v3585_v35 = vpop.permute.xlu1 %3584  ;;  %v3583_v13 = vpop.permute.xlu0 %3582  ;;  %4587 = vst.msk [vmem:[#allocation2 + $0xb9] sm:$0x1] %vm4548_vm7, %v11658_v26  ;;  %4588 = vst.msk [vmem:[#allocation2 + $0xd1] sm:$0x1] %vm4548_vm7, %v11658_v26  ;;  %v9759_v37 = vld [vmem:[%s17000_s0 + $0x2d8] sm:$0xff] }
 0x319   :  { %v3799_v55 = vsel %vm796_vm4, %v3735_v21, %v3585_v35  ;;  %v3798_v43 = vsel %vm796_vm4, %v3734_v47, %v3583_v13  ;;  %4589 = vst.msk [vmem:[#allocation2 + $0xe9] sm:$0x1] %vm4548_vm7, %v11658_v26  ;;  %4590 = vst.msk [vmem:[#allocation2 + $0x101] sm:$0x1] %vm4548_vm7, %v11658_v26 }
 0x31a   :  { %10889 = vmatprep.mubr.msk.f32.mxu0 %vm863_vm5, %v3798_v43  ;;  %4591 = vst.msk [vmem:[#allocation2 + $0x119] sm:$0x1] %vm4548_vm7, %v11658_v26  ;;  %4592 = vst.msk [vmem:[#allocation2 + $0x131] sm:$0x1] %vm4548_vm7, %v11658_v26 }
 0x31b   :  { %4593 = vst.msk [vmem:[#allocation2 + $0x149] sm:$0x1] %vm4548_vm7, %v11658_v26  ;;  %4594 = vst.msk [vmem:[#allocation2 + $0x161] sm:$0x1] %vm4548_vm7, %v11658_v26 }
 0x31c   :  { %10890 = vmatmul.mubr.msk.f32.gmra.mrb[40].mxu0 %vm863_vm5, %v3799_v55  ;;  %v3333_v15 = vpop.permute.xlu1 %3332  ;;  %v3331_v53 = vpop.permute.xlu0 %3330  ;;  %4595 = vst.msk [vmem:[#allocation2 + $0x179] sm:$0x1] %vm4548_vm7, %v11658_v26  ;;  %4596 = vst.msk [vmem:[#allocation2 + $0x191] sm:$0x1] %vm4548_vm7, %v11658_v26 }
 0x31d   :  { %v3737_v2 = vsel %vm731_vm3, %v9749_v4, %v3333_v15  ;;  %v3736_v49 = vsel %vm731_vm3, %v9748_v33, %v3331_v53  ;;  %4597 = vst.msk [vmem:[#allocation2 + $0x1d9] sm:$0x1] %vm4548_vm7, %v11658_v26  ;;  %4598 = vst.msk [vmem:[#allocation2 + $0x1f1] sm:$0x1] %vm4548_vm7, %v11658_v26  ;;  %v9760_v15 = vld [vmem:[%s17000_s0 + $0x2e8] sm:$0xff]  ;;  %v9761_v4 = vld [vmem:[%s17000_s0 + $0x2f0] sm:$0xff] }
 0x31e   :  { %4599 = vst.msk [vmem:[#allocation2 + $0x209] sm:$0x1] %vm4548_vm7, %v11658_v26  ;;  %4600 = vst.msk [vmem:[#allocation2 + $0x221] sm:$0x1] %vm4548_vm7, %v11658_v26 }
 0x31f   :  { %4601 = vst.msk [vmem:[#allocation2 + $0x239] sm:$0x1] %vm4548_vm7, %v11658_v26  ;;  %4602 = vst.msk [vmem:[#allocation2 + $0x251] sm:$0x1] %vm4548_vm7, %v11658_v26 }
 0x320   :  { %v3589_v58 = vpop.permute.xlu1 %3588  ;;  %v3587_v20 = vpop.permute.xlu0 %3586  ;;  %4603 = vst.msk [vmem:[#allocation2 + $0x269] sm:$0x1] %vm4548_vm7, %v11658_v26  ;;  %4604 = vst.msk [vmem:[#allocation2 + $0x281] sm:$0x1] %vm4548_vm7, %v11658_v26 }
 0x321   :  { %v3801_v61 = vsel %vm796_vm4, %v3737_v2, %v3589_v58  ;;  %v3800_v39 = vsel %vm796_vm4, %v3736_v49, %v3587_v20  ;;  %4605 = vst.msk [vmem:[#allocation2 + $0x299] sm:$0x1] %vm4548_vm7, %v11658_v26  ;;  %4606 = vst.msk [vmem:[#allocation2 + $0x2b1] sm:$0x1] %vm4548_vm7, %v11658_v26 }
 0x322   :  { %10892 = vmatprep.mubr.msk.f32.mxu0 %vm863_vm5, %v3800_v39  ;;  %4607 = vst.msk [vmem:[#allocation2 + $0x2c9] sm:$0x1] %vm4548_vm7, %v11658_v26  ;;  %4608 = vst.msk [vmem:[#allocation2 + $0x2e1] sm:$0x1] %vm4548_vm7, %v11658_v26  ;;  %v9762_v39 = vld [vmem:[%s17000_s0 + $0x300] sm:$0xff] }
 0x323   :  { %10893 = vmatmul.mubr.msk.f32.gmra.mrb[42].mxu0 %vm863_vm5, %v3801_v61  ;;  %4609 = vst.msk [vmem:[#allocation2 + $0x2f9] sm:$0x1] %vm4548_vm7, %v11658_v26  ;;  %4610 = vst.msk [vmem:[#allocation2 + $0x311] sm:$0x1] %vm4548_vm7, %v11658_v26 }
 0x324   :  { %v14837_v34 = vpop.permute.xlu1 %3336  ;;  %v14839_v52 = vpop.permute.xlu0 %3334  ;;  %4611 = vst.msk [vmem:[#allocation2 + $0x329] sm:$0x1] %vm4548_vm7, %v11658_v26  ;;  %4612 = vst.msk [vmem:[#allocation2 + $0x341] sm:$0x1] %vm4548_vm7, %v11658_v26 }
 0x325   :  { %v3739_v31 = vsel %vm731_vm3, %v9751_v42, %v14837_v34  ;;  %v3738_v8 = vsel %vm731_vm3, %v9750_v56, %v14839_v52  ;;  %v9763_v52 = vld [vmem:[%s17000_s0 + $0x308] sm:$0xff] }
 0x328   :  { %v3593_v28 = vpop.permute.xlu1 %3592  ;;  %v3591_v32 = vpop.permute.xlu0 %3590 }
 0x329   :  { %v3803_v12 = vsel %vm796_vm4, %v3739_v31, %v3593_v28  ;;  %v3802_v50 = vsel %vm796_vm4, %v3738_v8, %v3591_v32 }
 0x32a   :  { %10895 = vmatprep.mubr.msk.f32.mxu0 %vm863_vm5, %v3802_v50  ;;  %v9765_v50 = vld [vmem:[%s17000_s0 + $0x320] sm:$0xff] }
 0x32b   :  { %10896 = vmatmul.mubr.msk.f32.gmra.mrb[44].mxu0 %vm863_vm5, %v3803_v12 }
 0x32c   :  { %v3341_v36 = vpop.permute.xlu1 %3340  ;;  %v3339_v48 = vpop.permute.xlu0 %3338 }
 0x32d   :  { %v3741_v5 = vsel %vm731_vm3, %v9753_v29, %v3341_v36  ;;  %v3740_v27 = vsel %vm731_vm3, %v9752_v54, %v3339_v48 }
 0x330   :  { %v3597_v51 = vpop.permute.xlu1 %3596  ;;  %v3595_v9 = vpop.permute.xlu0 %3594 }
 0x331   :  { %v3805_v62 = vsel %vm796_vm4, %v3741_v5, %v3597_v51  ;;  %v3804_v0 = vsel %vm796_vm4, %v3740_v27, %v3595_v9  ;;  %v9766_v9 = vld [vmem:[%s17000_s0 + $0x330] sm:$0xff] }
 0x332   :  { %10898 = vmatprep.mubr.msk.f32.mxu0 %vm863_vm5, %v3804_v0  ;;  %v9767_v0 = vld [vmem:[%s17000_s0 + $0x338] sm:$0xff] }
 0x333   :  { %10899 = vmatmul.mubr.msk.f32.gmra.mrb[46].mxu0 %vm863_vm5, %v3805_v62 }
 0x334   :  { %v3345_v41 = vpop.permute.xlu1 %3344  ;;  %v3343_v30 = vpop.permute.xlu0 %3342 }
 0x335   :  { %v3743_v23 = vsel %vm731_vm3, %v9755_v7, %v3345_v41  ;;  %v3742_v24 = vsel %vm731_vm3, %v9754_v63, %v3343_v30 }
 0x338   :  { %v3601_v22 = vpop.permute.xlu1 %3600  ;;  %v3599_v46 = vpop.permute.xlu0 %3598 }
 0x339   :  { %v3807_v10 = vsel %vm796_vm4, %v3743_v23, %v3601_v22  ;;  %v3806_v19 = vsel %vm796_vm4, %v3742_v24, %v3599_v46  ;;  %v9768_v46 = vld [vmem:[%s17000_s0 + $0x348] sm:$0xff] }
 0x33a   :  { %10901 = vmatprep.mubr.msk.f32.mxu0 %vm863_vm5, %v3806_v19  ;;  %v9769_v19 = vld [vmem:[%s17000_s0 + $0x350] sm:$0xff] }
 0x33b   :  { %10902 = vmatmul.mubr.msk.f32.gmra.mrb[48].mxu0 %vm863_vm5, %v3807_v10 }
 0x33c   :  { %v3349_v60 = vpop.permute.xlu1 %3348  ;;  %v3347_v16 = vpop.permute.xlu0 %3346 }
 0x33d   :  { %v3745_v25 = vsel %vm731_vm3, %v9757_v6, %v3349_v60  ;;  %v3744_v59 = vsel %vm731_vm3, %v9756_v14, %v3347_v16 }
 0x340   :  { %v3605_v38 = vpop.permute.xlu1 %3604  ;;  %v3603_v1 = vpop.permute.xlu0 %3602 }
 0x341   :  { %v3809_v18 = vsel %vm796_vm4, %v3745_v25, %v3605_v38  ;;  %v3808_v44 = vsel %vm796_vm4, %v3744_v59, %v3603_v1  ;;  %v15096_v1 = vld [vmem:[%s17002_s3] ss:$0 sm:$0xff] }
 0x342   :  { %10904 = vmatprep.mubr.msk.f32.mxu0 %vm863_vm5, %v3808_v44 }
 0x343   :  { %10905 = vmatmul.mubr.msk.f32.gmra.mrb[50].mxu0 %vm863_vm5, %v3809_v18 }
 0x344   :  { %v3353_v17 = vpop.permute.xlu1 %3352  ;;  %v3351_v11 = vpop.permute.xlu0 %3350 }
 0x345   :  { %v3747_v21 = vsel %vm731_vm3, %v9759_v37, %v3353_v17  ;;  %v3746_v47 = vsel %vm731_vm3, %v9758_v40, %v3351_v11 }
 0x348   :  { %v3609_v35 = vpop.permute.xlu1 %3608  ;;  %v3607_v13 = vpop.permute.xlu0 %3606 }
 0x349   :  { %v3811_v55 = vsel %vm796_vm4, %v3747_v21, %v3609_v35  ;;  %v3810_v43 = vsel %vm796_vm4, %v3746_v47, %v3607_v13 }
 0x34a   :  { %10907 = vmatprep.mubr.msk.f32.mxu0 %vm863_vm5, %v3810_v43 }
 0x34b   :  { %10908 = vmatmul.mubr.msk.f32.gmra.mrb[52].mxu0 %vm863_vm5, %v3811_v55 }
 0x34c   :  { %v3355_v53 = vpop.permute.xlu0 %3354 }
 0x34d   :  { %v3357_v33 = vpop.permute.xlu1 %3356  ;;  %v3748_v2 = vsel %vm731_vm3, %v9760_v15, %v3355_v53 }
 0x34e   :  { %v3749_v49 = vsel %vm731_vm3, %v9761_v4, %v3357_v33 }
 0x350   :  { %v3611_v58 = vpop.permute.xlu0 %3610 }
 0x351   :  { %v3812_v20 = vsel %vm796_vm4, %v3748_v2, %v3611_v58  ;;  %v3613_v26 = vpop.permute.xlu1 %3612 }
 0x352   :  { %v3813_v61 = vsel %vm796_vm4, %v3749_v49, %v3613_v26  ;;  %10910 = vmatprep.mubr.msk.f32.mxu0 %vm863_vm5, %v3812_v20 }
 0x353   :  { %10911 = vmatmul.mubr.msk.f32.gmra.mrb[54].mxu0 %vm863_vm5, %v3813_v61 }
 0x354   :  { %v3359_v34 = vpop.permute.xlu0 %3358 }
 0x355   :  { %v3361_v42 = vpop.permute.xlu1 %3360  ;;  %v3750_v56 = vsel %vm731_vm3, %v9762_v39, %v3359_v34 }
 0x356   :  { %v3751_v3 = vsel %vm731_vm3, %v9763_v52, %v3361_v42 }
 0x358   :  { %v3615_v31 = vpop.permute.xlu0 %3614 }
 0x359   :  { %v3814_v8 = vsel %vm796_vm4, %v3750_v56, %v3615_v31  ;;  %v3617_v28 = vpop.permute.xlu1 %3616 }
 0x35a   :  { %v3815_v32 = vsel %vm796_vm4, %v3751_v3, %v3617_v28  ;;  %10913 = vmatprep.mubr.msk.f32.mxu0 %vm863_vm5, %v3814_v8 }
 0x35b   :  { %10914 = vmatmul.mubr.msk.f32.gmra.mrb[56].mxu0 %vm863_vm5, %v3815_v32 }
 0x35c   :  { %v3363_v12 = vpop.permute.xlu0 %3362 }
 0x35d   :  { %v3365_v36 = vpop.permute.xlu1 %3364  ;;  %v3752_v48 = vsel %vm731_vm3, %v9764_v45, %v3363_v12 }
 0x35e   :  { %v3753_v29 = vsel %vm731_vm3, %v9765_v50, %v3365_v36 }
 0x360   :  { %v3619_v54 = vpop.permute.xlu0 %3618 }
 0x361   :  { %v3816_v5 = vsel %vm796_vm4, %v3752_v48, %v3619_v54  ;;  %v3621_v27 = vpop.permute.xlu1 %3620 }
 0x362   :  { %v3817_v51 = vsel %vm796_vm4, %v3753_v29, %v3621_v27  ;;  %10916 = vmatprep.mubr.msk.f32.mxu0 %vm863_vm5, %v3816_v5 }
 0x363   :  { %10917 = vmatmul.mubr.msk.f32.gmra.mrb[58].mxu0 %vm863_vm5, %v3817_v51 }
 0x364   :  { %v3367_v62 = vpop.permute.xlu0 %3366 }
 0x365   :  { %v3369_v41 = vpop.permute.xlu1 %3368  ;;  %v3754_v30 = vsel %vm731_vm3, %v9766_v9, %v3367_v62 }
 0x366   :  { %v3755_v7 = vsel %vm731_vm3, %v9767_v0, %v3369_v41 }
 0x368   :  { %v3623_v63 = vpop.permute.xlu0 %3622 }
 0x369   :  { %v3818_v23 = vsel %vm796_vm4, %v3754_v30, %v3623_v63  ;;  %v3625_v24 = vpop.permute.xlu1 %3624 }
 0x36a   :  { %v3819_v22 = vsel %vm796_vm4, %v3755_v7, %v3625_v24  ;;  %10919 = vmatprep.mubr.msk.f32.mxu0 %vm863_vm5, %v3818_v23 }
 0x36b   :  { %10920 = vmatmul.mubr.msk.f32.gmra.mrb[60].mxu0 %vm863_vm5, %v3819_v22 }
 0x36c   :  { %v3371_v10 = vpop.permute.xlu0 %3370 }
 0x36d   :  { %v3373_v60 = vpop.permute.xlu1 %3372  ;;  %v3756_v16 = vsel %vm731_vm3, %v9768_v46, %v3371_v10 }
 0x36e   :  { %v3757_v6 = vsel %vm731_vm3, %v9769_v19, %v3373_v60 }
 0x370   :  { %v3627_v14 = vpop.permute.xlu0 %3626 }
 0x371   :  { %v3820_v25 = vsel %vm796_vm4, %v3756_v16, %v3627_v14  ;;  %v3629_v59 = vpop.permute.xlu1 %3628 }
 0x372   :  { %v3821_v38 = vsel %vm796_vm4, %v3757_v6, %v3629_v59  ;;  %10922 = vmatprep.mubr.msk.f32.mxu0 %vm863_vm5, %v3820_v25 }
 0x373   :  { %10923 = vmatmul.mubr.msk.f32.gmra.mrb[62].mxu0 %vm863_vm5, %v3821_v38 }
 0x39f   :  { %v10831_v18 = vpop.f32.mrb[0].mxu0 }
 0x3a0   :  { %v11261_v44 = vadd.f32 %v10831_v18, %v15096_v1  ;;  %v4086_v17 = vpop.f32.mrb[1].mxu0 }
 0x3a1   :  { %v11262_v11 = vadd.f32 %v15096_v1, %v4086_v17 }
 0x3a2   :  { %v4470_v37 = vmax.f32 %v11261_v44, 0.0 }
 0x3a3   :  { %v4469_v40 = vmax.f32 %v11262_v11, 0.0  ;;  %v10834_v21 = vpop.f32.mrb[2].mxu0 }
 0x3a4   :  { %4614 = vst.msk [vmem:[#allocation2 + $0x21] sm:$0xff] %vm731_vm3, %v4470_v37  ;;  %v11263_v47 = vadd.f32 %v10834_v21, %v15096_v1  ;;  %v4096_v35 = vpop.f32.mrb[3].mxu0 }
 0x3a5   :  { %4613 = vst.msk [vmem:[#allocation2 + $0x19] sm:$0xff] %vm731_vm3, %v4469_v40  ;;  %v11264_v13 = vadd.f32 %v15096_v1, %v4096_v35 }
 0x3a6   :  { %v4472_v55 = vmax.f32 %v11263_v47, 0.0 }
 0x3a7   :  { %v4471_v43 = vmax.f32 %v11264_v13, 0.0  ;;  %v10837_v15 = vpop.f32.mrb[4].mxu0 }
 0x3a8   :  { %4616 = vst.msk [vmem:[#allocation2 + $0x39] sm:$0xff] %vm731_vm3, %v4472_v55  ;;  %v11265_v53 = vadd.f32 %v10837_v15, %v15096_v1  ;;  %v4106_v4 = vpop.f32.mrb[5].mxu0 }
 0x3a9   :  { %4615 = vst.msk [vmem:[#allocation2 + $0x31] sm:$0xff] %vm731_vm3, %v4471_v43  ;;  %v11266_v33 = vadd.f32 %v15096_v1, %v4106_v4 }
 0x3aa   :  { %v4474_v2 = vmax.f32 %v11265_v53, 0.0 }
 0x3ab   :  { %v4473_v49 = vmax.f32 %v11266_v33, 0.0  ;;  %v10840_v58 = vpop.f32.mrb[6].mxu0  ;;  %v4751_v20 = vld [vmem:[#allocation2 + $0x21] sm:$0xff] }
 0x3ac   :  { %4618 = vst.msk [vmem:[#allocation2 + $0x51] sm:$0xff] %vm731_vm3, %v4474_v2  ;;  %v11267_v26 = vadd.f32 %v10840_v58, %v15096_v1  ;;  %4946 = vrot.lane.b32.xlu1 %v4751_v20, %s11655_s22  ;;  %v4116_v61 = vpop.f32.mrb[7].mxu0  ;;  %v4750_v39 = vld [vmem:[#allocation2 + $0x19] sm:$0xff] }
 0x3ad   :  { %4617 = vst.msk [vmem:[#allocation2 + $0x49] sm:$0xff] %vm731_vm3, %v4473_v49  ;;  %v11268_v34 = vadd.f32 %v15096_v1, %v4116_v61  ;;  %4944 = vrot.lane.b32.xlu0 %v4750_v39, %s11655_s22 }
 0x3ae   :  { %v4476_v52 = vmax.f32 %v11267_v26, 0.0 }
 0x3af   :  { %v4475_v42 = vmax.f32 %v11268_v34, 0.0  ;;  %v10843_v56 = vpop.f32.mrb[8].mxu0  ;;  %v4753_v3 = vld [vmem:[#allocation2 + $0x39] sm:$0xff] }
 0x3b0   :  { %4620 = vst.msk [vmem:[#allocation2 + $0x69] sm:$0xff] %vm731_vm3, %v4476_v52  ;;  %v11269_v31 = vadd.f32 %v10843_v56, %v15096_v1  ;;  %4950 = vrot.lane.b32.xlu1 %v4753_v3, %s11655_s22  ;;  %v4126_v8 = vpop.f32.mrb[9].mxu0  ;;  %v4752_v28 = vld [vmem:[#allocation2 + $0x31] sm:$0xff] }
 0x3b1   :  { %4619 = vst.msk [vmem:[#allocation2 + $0x61] sm:$0xff] %vm731_vm3, %v4475_v42  ;;  %v11270_v32 = vadd.f32 %v15096_v1, %v4126_v8  ;;  %4948 = vrot.lane.b32.xlu0 %v4752_v28, %s11655_s22 }
 0x3b2   :  { %v4478_v45 = vmax.f32 %v11269_v31, 0.0 }
 0x3b3   :  { %v4477_v12 = vmax.f32 %v11270_v32, 0.0  ;;  %v10846_v50 = vpop.f32.mrb[10].mxu0  ;;  %v4755_v36 = vld [vmem:[#allocation2 + $0x51] sm:$0xff] }
 0x3b4   :  { %4622 = vst.msk [vmem:[#allocation2 + $0x81] sm:$0xff] %vm731_vm3, %v4478_v45  ;;  %v11271_v48 = vadd.f32 %v10846_v50, %v15096_v1  ;;  %4954 = vrot.lane.b32.xlu1 %v4755_v36, %s11655_s22  ;;  %v4136_v29 = vpop.f32.mrb[11].mxu0  ;;  %v4754_v54 = vld [vmem:[#allocation2 + $0x49] sm:$0xff] }
 0x3b5   :  { %4621 = vst.msk [vmem:[#allocation2 + $0x79] sm:$0xff] %vm731_vm3, %v4477_v12  ;;  %v11272_v5 = vadd.f32 %v15096_v1, %v4136_v29  ;;  %4952 = vrot.lane.b32.xlu0 %v4754_v54, %s11655_s22 }
 0x3b6   :  { %v4480_v27 = vmax.f32 %v11271_v48, 0.0 }
 0x3b7   :  { %v4479_v51 = vmax.f32 %v11272_v5, 0.0  ;;  %v10849_v9 = vpop.f32.mrb[12].mxu0  ;;  %v4757_v62 = vld [vmem:[#allocation2 + $0x69] sm:$0xff] }
 0x3b8   :  { %4624 = vst.msk [vmem:[#allocation2 + $0x99] sm:$0xff] %vm731_vm3, %v4480_v27  ;;  %v11273_v0 = vadd.f32 %v10849_v9, %v15096_v1  ;;  %4958 = vrot.lane.b32.xlu1 %v4757_v62, %s11655_s22  ;;  %v4146_v41 = vpop.f32.mrb[13].mxu0  ;;  %v4756_v30 = vld [vmem:[#allocation2 + $0x61] sm:$0xff] }
 0x3b9   :  { %4623 = vst.msk [vmem:[#allocation2 + $0x91] sm:$0xff] %vm731_vm3, %v4479_v51  ;;  %v11274_v7 = vadd.f32 %v15096_v1, %v4146_v41  ;;  %4956 = vrot.lane.b32.xlu0 %v4756_v30, %s11655_s22 }
 0x3ba   :  { %v4482_v63 = vmax.f32 %v11273_v0, 0.0 }
 0x3bb   :  { %v4481_v23 = vmax.f32 %v11274_v7, 0.0  ;;  %v10852_v24 = vpop.f32.mrb[14].mxu0  ;;  %v4759_v22 = vld [vmem:[#allocation2 + $0x81] sm:$0xff] }
 0x3bc   :  { %4626 = vst.msk [vmem:[#allocation2 + $0xb1] sm:$0xff] %vm731_vm3, %v4482_v63  ;;  %v11275_v46 = vadd.f32 %v10852_v24, %v15096_v1  ;;  %4962 = vrot.lane.b32.xlu1 %v4759_v22, %s11655_s22  ;;  %v4156_v10 = vpop.f32.mrb[15].mxu0  ;;  %v4758_v19 = vld [vmem:[#allocation2 + $0x79] sm:$0xff] }
 0x3bd   :  { %4625 = vst.msk [vmem:[#allocation2 + $0xa9] sm:$0xff] %vm731_vm3, %v4481_v23  ;;  %v11276_v60 = vadd.f32 %v15096_v1, %v4156_v10  ;;  %4960 = vrot.lane.b32.xlu0 %v4758_v19, %s11655_s22 }
 0x3be   :  { %v4484_v16 = vmax.f32 %v11275_v46, 0.0 }
 0x3bf   :  { %v4483_v6 = vmax.f32 %v11276_v60, 0.0  ;;  %v10855_v14 = vpop.f32.mrb[16].mxu0  ;;  %v4761_v25 = vld [vmem:[#allocation2 + $0x99] sm:$0xff] }
 0x3c0   :  { %4628 = vst.msk [vmem:[#allocation2 + $0xc9] sm:$0xff] %vm731_vm3, %v4484_v16  ;;  %v11277_v59 = vadd.f32 %v10855_v14, %v15096_v1  ;;  %4966 = vrot.lane.b32.xlu1 %v4761_v25, %s11655_s22  ;;  %v4166_v38 = vpop.f32.mrb[17].mxu0  ;;  %v4760_v18 = vld [vmem:[#allocation2 + $0x91] sm:$0xff] }
 0x3c1   :  { %4627 = vst.msk [vmem:[#allocation2 + $0xc1] sm:$0xff] %vm731_vm3, %v4483_v6  ;;  %v11278_v44 = vadd.f32 %v15096_v1, %v4166_v38  ;;  %4964 = vrot.lane.b32.xlu0 %v4760_v18, %s11655_s22 }
 0x3c2   :  { %v4486_v17 = vmax.f32 %v11277_v59, 0.0 }
 0x3c3   :  { %v4485_v11 = vmax.f32 %v11278_v44, 0.0  ;;  %v10858_v37 = vpop.f32.mrb[18].mxu0  ;;  %v4763_v40 = vld [vmem:[#allocation2 + $0xb1] sm:$0xff] }
 0x3c4   :  { %4630 = vst.msk [vmem:[#allocation2 + $0xe1] sm:$0xff] %vm731_vm3, %v4486_v17  ;;  %v11279_v21 = vadd.f32 %v10858_v37, %v15096_v1  ;;  %4970 = vrot.lane.b32.xlu1 %v4763_v40, %s11655_s22  ;;  %v4176_v47 = vpop.f32.mrb[19].mxu0  ;;  %v4762_v35 = vld [vmem:[#allocation2 + $0xa9] sm:$0xff] }
 0x3c5   :  { %4629 = vst.msk [vmem:[#allocation2 + $0xd9] sm:$0xff] %vm731_vm3, %v4485_v11  ;;  %v11280_v13 = vadd.f32 %v15096_v1, %v4176_v47  ;;  %4968 = vrot.lane.b32.xlu0 %v4762_v35, %s11655_s22 }
 0x3c6   :  { %v4488_v55 = vmax.f32 %v11279_v21, 0.0 }
 0x3c7   :  { %v4487_v43 = vmax.f32 %v11280_v13, 0.0  ;;  %v10861_v15 = vpop.f32.mrb[20].mxu0  ;;  %v4765_v53 = vld [vmem:[#allocation2 + $0xc9] sm:$0xff] }
 0x3c8   :  { %4632 = vst.msk [vmem:[#allocation2 + $0xf9] sm:$0xff] %vm731_vm3, %v4488_v55  ;;  %v11281_v4 = vadd.f32 %v10861_v15, %v15096_v1  ;;  %4974 = vrot.lane.b32.xlu1 %v4765_v53, %s11655_s22  ;;  %v4186_v33 = vpop.f32.mrb[21].mxu0  ;;  %v4764_v2 = vld [vmem:[#allocation2 + $0xc1] sm:$0xff]  ;;  %v4781_v15 = vld [vmem:[#allocation2 + $0x1b9] sm:$0xff] }
 0x3c9   :  { %4631 = vst.msk [vmem:[#allocation2 + $0xf1] sm:$0xff] %vm731_vm3, %v4487_v43  ;;  %v11282_v49 = vadd.f32 %v15096_v1, %v4186_v33  ;;  %4972 = vrot.lane.b32.xlu0 %v4764_v2, %s11655_s22 }
 0x3ca   :  { %v4490_v58 = vmax.f32 %v11281_v4, 0.0  ;;  %v4780_v4 = vld [vmem:[#allocation2 + $0x1b1] sm:$0xff] }
 0x3cb   :  { %v4489_v20 = vmax.f32 %v11282_v49, 0.0  ;;  %v10864_v26 = vpop.f32.mrb[22].mxu0  ;;  %v4767_v61 = vld [vmem:[#allocation2 + $0xe1] sm:$0xff] }
 0x3cc   :  { %4634 = vst.msk [vmem:[#allocation2 + $0x111] sm:$0xff] %vm731_vm3, %v4490_v58  ;;  %v11283_v39 = vadd.f32 %v10864_v26, %v15096_v1  ;;  %4978 = vrot.lane.b32.xlu1 %v4767_v61, %s11655_s22  ;;  %v4196_v34 = vpop.f32.mrb[23].mxu0  ;;  %v4766_v52 = vld [vmem:[#allocation2 + $0xd9] sm:$0xff] }
 0x3cd   :  { %4633 = vst.msk [vmem:[#allocation2 + $0x109] sm:$0xff] %vm731_vm3, %v4489_v20  ;;  %v11284_v42 = vadd.f32 %v15096_v1, %v4196_v34  ;;  %4976 = vrot.lane.b32.xlu0 %v4766_v52, %s11655_s22 }
 0x3ce   :  { %v4492_v56 = vmax.f32 %v11283_v39, 0.0 }
 0x3cf   :  { %v4491_v3 = vmax.f32 %v11284_v42, 0.0  ;;  %v10867_v31 = vpop.f32.mrb[24].mxu0  ;;  %v4769_v8 = vld [vmem:[#allocation2 + $0xf9] sm:$0xff] }
 0x3d0   :  { %4636 = vst.msk [vmem:[#allocation2 + $0x129] sm:$0xff] %vm731_vm3, %v4492_v56  ;;  %v11285_v28 = vadd.f32 %v10867_v31, %v15096_v1  ;;  %4982 = vrot.lane.b32.xlu1 %v4769_v8, %s11655_s22  ;;  %v4206_v32 = vpop.f32.mrb[25].mxu0  ;;  %v4768_v45 = vld [vmem:[#allocation2 + $0xf1] sm:$0xff] }
 0x3d1   :  { %4635 = vst.msk [vmem:[#allocation2 + $0x121] sm:$0xff] %vm731_vm3, %v4491_v3  ;;  %v11286_v12 = vadd.f32 %v15096_v1, %v4206_v32  ;;  %4980 = vrot.lane.b32.xlu0 %v4768_v45, %s11655_s22 }
 0x3d2   :  { %v4494_v50 = vmax.f32 %v11285_v28, 0.0 }
 0x3d3   :  { %v4493_v36 = vmax.f32 %v11286_v12, 0.0  ;;  %v10870_v48 = vpop.f32.mrb[26].mxu0  ;;  %v4771_v29 = vld [vmem:[#allocation2 + $0x111] sm:$0xff] }
 0x3d4   :  { %4638 = vst.msk [vmem:[#allocation2 + $0x141] sm:$0xff] %vm731_vm3, %v4494_v50  ;;  %v11287_v54 = vadd.f32 %v10870_v48, %v15096_v1  ;;  %4986 = vrot.lane.b32.xlu1 %v4771_v29, %s11655_s22  ;;  %v4216_v5 = vpop.f32.mrb[27].mxu0  ;;  %v4770_v27 = vld [vmem:[#allocation2 + $0x109] sm:$0xff] }
 0x3d5   :  { %4637 = vst.msk [vmem:[#allocation2 + $0x139] sm:$0xff] %vm731_vm3, %v4493_v36  ;;  %v11288_v51 = vadd.f32 %v15096_v1, %v4216_v5  ;;  %4984 = vrot.lane.b32.xlu0 %v4770_v27, %s11655_s22 }
 0x3d6   :  { %v4496_v9 = vmax.f32 %v11287_v54, 0.0 }
 0x3d7   :  { %v4495_v62 = vmax.f32 %v11288_v51, 0.0  ;;  %v10873_v0 = vpop.f32.mrb[28].mxu0  ;;  %v4773_v41 = vld [vmem:[#allocation2 + $0x129] sm:$0xff] }
 0x3d8   :  { %4640 = vst.msk [vmem:[#allocation2 + $0x159] sm:$0xff] %vm731_vm3, %v4496_v9  ;;  %v11289_v30 = vadd.f32 %v10873_v0, %v15096_v1  ;;  %4990 = vrot.lane.b32.xlu1 %v4773_v41, %s11655_s22  ;;  %v4226_v7 = vpop.f32.mrb[29].mxu0  ;;  %v4772_v63 = vld [vmem:[#allocation2 + $0x121] sm:$0xff] }
 0x3d9   :  { %4639 = vst.msk [vmem:[#allocation2 + $0x151] sm:$0xff] %vm731_vm3, %v4495_v62  ;;  %v11290_v23 = vadd.f32 %v15096_v1, %v4226_v7  ;;  %4988 = vrot.lane.b32.xlu0 %v4772_v63, %s11655_s22 }
 0x3da   :  { %v4498_v24 = vmax.f32 %v11289_v30, 0.0 }
 0x3db   :  { %v4497_v22 = vmax.f32 %v11290_v23, 0.0  ;;  %v10876_v46 = vpop.f32.mrb[30].mxu0  ;;  %v4775_v10 = vld [vmem:[#allocation2 + $0x141] sm:$0xff] }
 0x3dc   :  { %4642 = vst.msk [vmem:[#allocation2 + $0x171] sm:$0xff] %vm731_vm3, %v4498_v24  ;;  %v11291_v19 = vadd.f32 %v10876_v46, %v15096_v1  ;;  %4994 = vrot.lane.b32.xlu1 %v4775_v10, %s11655_s22  ;;  %v4236_v60 = vpop.f32.mrb[31].mxu0  ;;  %v4774_v16 = vld [vmem:[#allocation2 + $0x139] sm:$0xff] }
 0x3dd   :  { %4641 = vst.msk [vmem:[#allocation2 + $0x169] sm:$0xff] %vm731_vm3, %v4497_v22  ;;  %v11292_v6 = vadd.f32 %v15096_v1, %v4236_v60  ;;  %4992 = vrot.lane.b32.xlu0 %v4774_v16, %s11655_s22 }
 0x3de   :  { %v4500_v14 = vmax.f32 %v11291_v19, 0.0 }
 0x3df   :  { %v4499_v25 = vmax.f32 %v11292_v6, 0.0  ;;  %v10879_v59 = vpop.f32.mrb[32].mxu0  ;;  %v4777_v38 = vld [vmem:[#allocation2 + $0x159] sm:$0xff] }
 0x3e0   :  { %4644 = vst.msk [vmem:[#allocation2 + $0x189] sm:$0xff] %vm731_vm3, %v4500_v14  ;;  %v11293_v18 = vadd.f32 %v10879_v59, %v15096_v1  ;;  %4998 = vrot.lane.b32.xlu1 %v4777_v38, %s11655_s22  ;;  %v4246_v44 = vpop.f32.mrb[33].mxu0  ;;  %v4776_v17 = vld [vmem:[#allocation2 + $0x151] sm:$0xff] }
 0x3e1   :  { %4643 = vst.msk [vmem:[#allocation2 + $0x181] sm:$0xff] %vm731_vm3, %v4499_v25  ;;  %v11294_v11 = vadd.f32 %v15096_v1, %v4246_v44  ;;  %4996 = vrot.lane.b32.xlu0 %v4776_v17, %s11655_s22 }
 0x3e2   :  { %v4502_v37 = vmax.f32 %v11293_v18, 0.0 }
 0x3e3   :  { %v4501_v40 = vmax.f32 %v11294_v11, 0.0  ;;  %v10882_v21 = vpop.f32.mrb[34].mxu0  ;;  %v4779_v47 = vld [vmem:[#allocation2 + $0x171] sm:$0xff] }
 0x3e4   :  { %4646 = vst.msk [vmem:[#allocation2 + $0x1d1] sm:$0xff] %vm731_vm3, %v4502_v37  ;;  %v11295_v35 = vadd.f32 %v10882_v21, %v15096_v1  ;;  %5002 = vrot.lane.b32.xlu1 %v4779_v47, %s11655_s22  ;;  %v4256_v13 = vpop.f32.mrb[35].mxu0  ;;  %v4778_v55 = vld [vmem:[#allocation2 + $0x169] sm:$0xff] }
 0x3e5   :  { %4645 = vst.msk [vmem:[#allocation2 + $0x1c9] sm:$0xff] %vm731_vm3, %v4501_v40  ;;  %v11296_v43 = vadd.f32 %v15096_v1, %v4256_v13  ;;  %5000 = vrot.lane.b32.xlu0 %v4778_v55, %s11655_s22 }
 0x3e6   :  { %v4504_v53 = vmax.f32 %v11295_v35, 0.0 }
 0x3e7   :  { %v4503_v33 = vmax.f32 %v11296_v43, 0.0  ;;  %v10885_v2 = vpop.f32.mrb[36].mxu0 }
 0x3e8   :  { %4648 = vst.msk [vmem:[#allocation2 + $0x1e9] sm:$0xff] %vm731_vm3, %v4504_v53  ;;  %v11297_v49 = vadd.f32 %v10885_v2, %v15096_v1  ;;  %5006 = vrot.lane.b32.xlu1 %v4781_v15, %s11655_s22  ;;  %v4266_v58 = vpop.f32.mrb[37].mxu0  ;;  %v15248_v2 = vpop.permute.xlu1 %4942 }
 0x3e9   :  { %4647 = vst.msk [vmem:[#allocation2 + $0x1e1] sm:$0xff] %vm731_vm3, %v4503_v33  ;;  %v11298_v20 = vadd.f32 %v15096_v1, %v4266_v58  ;;  %5004 = vrot.lane.b32.xlu0 %v4780_v4, %s11655_s22  ;;  %v15250_v58 = vpop.permute.xlu0 %4940 }
 0x3ea   :  { %v4506_v26 = vmax.f32 %v11297_v49, 0.0 }
 0x3eb   :  { %v4505_v61 = vmax.f32 %v11298_v20, 0.0  ;;  %v10888_v39 = vpop.f32.mrb[38].mxu0  ;;  %v4783_v34 = vld [vmem:[#allocation2 + $0x1d1] sm:$0xff] }
 0x3ec   :  { %4650 = vst.msk [vmem:[#allocation2 + $0x201] sm:$0xff] %vm731_vm3, %v4506_v26  ;;  %v11299_v52 = vadd.f32 %v10888_v39, %v15096_v1  ;;  %5010 = vrot.lane.b32.xlu1 %v4783_v34, %s11655_s22  ;;  %v4276_v42 = vpop.f32.mrb[39].mxu0  ;;  %v4782_v56 = vld [vmem:[#allocation2 + $0x1c9] sm:$0xff] }
 0x3ed   :  { %4649 = vst.msk [vmem:[#allocation2 + $0x1f9] sm:$0xff] %vm731_vm3, %v4505_v61  ;;  %v11300_v3 = vadd.f32 %v15096_v1, %v4276_v42  ;;  %5008 = vrot.lane.b32.xlu0 %v4782_v56, %s11655_s22 }
 0x3ee   :  { %v4508_v31 = vmax.f32 %v11299_v52, 0.0 }
 0x3ef   :  { %v4507_v8 = vmax.f32 %v11300_v3, 0.0  ;;  %v10891_v28 = vpop.f32.mrb[40].mxu0  ;;  %v4785_v32 = vld [vmem:[#allocation2 + $0x1e9] sm:$0xff]  ;;  %v5516_v3 = vld [vmem:[%s17003_s2] sm:$0xff] }
 0x3f0   :  { %4652 = vst.msk [vmem:[#allocation2 + $0x219] sm:$0xff] %vm731_vm3, %v4508_v31  ;;  %v11301_v45 = vadd.f32 %v10891_v28, %v15096_v1  ;;  %5014 = vrot.lane.b32.xlu1 %v4785_v32, %s11655_s22  ;;  %v4286_v12 = vpop.f32.mrb[41].mxu0  ;;  %v4784_v50 = vld [vmem:[#allocation2 + $0x1e1] sm:$0xff] }
 0x3f1   :  { %4651 = vst.msk [vmem:[#allocation2 + $0x211] sm:$0xff] %vm731_vm3, %v4507_v8  ;;  %v11302_v36 = vadd.f32 %v15096_v1, %v4286_v12  ;;  %5012 = vrot.lane.b32.xlu0 %v4784_v50, %s11655_s22  ;;  %v5517_v31 = vld [vmem:[%s17003_s2 + $0x8] sm:$0xf] }
 0x3f2   :  { %v4510_v48 = vmax.f32 %v11301_v45, 0.0  ;;  %v11243_v28 = vpack.c.bf16 %v5517_v31, %v5516_v3  ;;  %v6197_v57 = vld [vmem:[#allocation2 + $0x1e8] sm:$0xff] }
 0x3f3   :  { %v4509_v29 = vmax.f32 %v11302_v36, 0.0  ;;  %v4787_v54 = vld [vmem:[#allocation2 + $0x201] sm:$0xff] }
 0x3f4   :  { %4654 = vst.msk [vmem:[#allocation2 + $0x231] sm:$0xff] %vm731_vm3, %v4510_v48  ;;  %5018 = vrot.lane.b32.xlu1 %v4787_v54, %s11655_s22  ;;  %v4786_v5 = vld [vmem:[#allocation2 + $0x1f9] sm:$0xff]  ;;  %11245 = vmatprep.subr.msk.bf16.mxu1 %vm11963_vm2, %v11243_v28 }
 0x3f5   :  { %4653 = vst.msk [vmem:[#allocation2 + $0x229] sm:$0xff] %vm731_vm3, %v4509_v29  ;;  %5016 = vrot.lane.b32.xlu0 %v4786_v5, %s11655_s22  ;;  %11248 = vmatpush3.bf16.msk.msra.mxu1 %vm11963_vm2, %v11243_v28  ;;  %v4812_v29 = vld [vmem:[#allocation2 + $0x2] sm:$0xff] }
 0x3f6   :  { %v10894_v27 = vpop.f32.mrb[42].mxu0 }
 0x3f7   :  { %v11303_v51 = vadd.f32 %v10894_v27, %v15096_v1  ;;  %v4789_v9 = vld [vmem:[#allocation2 + $0x219] sm:$0xff]  ;;  %v4296_v62 = vpop.f32.mrb[43].mxu0 }
 0x3f8   :  { %5022 = vrot.lane.b32.xlu1 %v4789_v9, %s11655_s22  ;;  %v11304_v0 = vadd.f32 %v15096_v1, %v4296_v62  ;;  %v4788_v41 = vld [vmem:[#allocation2 + $0x211] sm:$0xff] }
 0x3f9   :  { %v4512_v30 = vmax.f32 %v11303_v51, 0.0  ;;  %5020 = vrot.lane.b32.xlu0 %v4788_v41, %s11655_s22 }
 0x3fa   :  { %v4511_v7 = vmax.f32 %v11304_v0, 0.0 }
 0x3fb   :  { %4656 = vst.msk [vmem:[#allocation2 + $0x249] sm:$0xff] %vm731_vm3, %v4512_v30  ;;  %v4791_v63 = vld [vmem:[#allocation2 + $0x231] sm:$0xff] }
 0x3fc   :  { %4655 = vst.msk [vmem:[#allocation2 + $0x241] sm:$0xff] %vm731_vm3, %v4511_v7  ;;  %5026 = vrot.lane.b32.xlu1 %v4791_v63, %s11655_s22  ;;  %v4790_v23 = vld [vmem:[#allocation2 + $0x229] sm:$0xff]  ;;  %v15289_v7 = vld [vmem:[#allocation2 + $0x1a] sm:$0xff] }
 0x3fd   :  { %5024 = vrot.lane.b32.xlu0 %v4790_v23, %s11655_s22 }
 0x3fe   :  { %v10897_v24 = vpop.f32.mrb[44].mxu0 }
 0x3ff   :  { %v11305_v22 = vadd.f32 %v10897_v24, %v15096_v1  ;;  %v4306_v46 = vpop.f32.mrb[45].mxu0  ;;  %v4813_v24 = vld [vmem:[#allocation2 + $0xa] sm:$0xff] }
 0x400   :  { %v11306_v10 = vadd.f32 %v15096_v1, %v4306_v46 }
 0x401   :  { %v4514_v19 = vmax.f32 %v11305_v22, 0.0 }
 0x402   :  { %v4513_v60 = vmax.f32 %v11306_v10, 0.0  ;;  %v4793_v16 = vld [vmem:[#allocation2 + $0x249] sm:$0xff]  ;;  %v15300_v10 = vld [vmem:[#allocation2 + $0x32] sm:$0xff] }
 0x403   :  { %4658 = vst.msk [vmem:[#allocation2 + $0x261] sm:$0xff] %vm731_vm3, %v4514_v19  ;;  %5030 = vrot.lane.b32.xlu1 %v4793_v16, %s11655_s22  ;;  %v4792_v6 = vld [vmem:[#allocation2 + $0x241] sm:$0xff] }
 0x404   :  { %4657 = vst.msk [vmem:[#allocation2 + $0x259] sm:$0xff] %vm731_vm3, %v4513_v60  ;;  %5028 = vrot.lane.b32.xlu0 %v4792_v6, %s11655_s22 }
 0x406   :  { %v10900_v14 = vpop.f32.mrb[46].mxu0 }
 0x407   :  { %v11307_v25 = vadd.f32 %v10900_v14, %v15096_v1  ;;  %v4316_v59 = vpop.f32.mrb[47].mxu0 }
 0x408   :  { %v11308_v38 = vadd.f32 %v15096_v1, %v4316_v59 }
 0x409   :  { %v4516_v18 = vmax.f32 %v11307_v25, 0.0 }
 0x40a   :  { %v4515_v44 = vmax.f32 %v11308_v38, 0.0  ;;  %v4795_v17 = vld [vmem:[#allocation2 + $0x261] sm:$0xff]  ;;  %v15311_v38 = vld [vmem:[#allocation2 + $0x4a] sm:$0xff] }
 0x40b   :  { %4660 = vst.msk [vmem:[#allocation2 + $0x279] sm:$0xff] %vm731_vm3, %v4516_v18  ;;  %5034 = vrot.lane.b32.xlu1 %v4795_v17, %s11655_s22  ;;  %v4794_v11 = vld [vmem:[#allocation2 + $0x259] sm:$0xff] }
 0x40c   :  { %4659 = vst.msk [vmem:[#allocation2 + $0x271] sm:$0xff] %vm731_vm3, %v4515_v44  ;;  %5032 = vrot.lane.b32.xlu0 %v4794_v11, %s11655_s22  ;;  %v15318_v44 = vld [vmem:[#allocation2 + $0x22] sm:$0xff] }
 0x40e   :  { %v10903_v37 = vpop.f32.mrb[48].mxu0 }
 0x40f   :  { %v11309_v40 = vadd.f32 %v10903_v37, %v15096_v1  ;;  %v4326_v21 = vpop.f32.mrb[49].mxu0  ;;  %v15325_v37 = vld [vmem:[#allocation2 + $0x62] sm:$0xff] }
 0x410   :  { %v11310_v47 = vadd.f32 %v15096_v1, %v4326_v21 }
 0x411   :  { %v4518_v35 = vmax.f32 %v11309_v40, 0.0 }
 0x412   :  { %v4517_v13 = vmax.f32 %v11310_v47, 0.0  ;;  %v4797_v55 = vld [vmem:[#allocation2 + $0x279] sm:$0xff] }
 0x413   :  { %4662 = vst.msk [vmem:[#allocation2 + $0x291] sm:$0xff] %vm731_vm3, %v4518_v35  ;;  %5038 = vrot.lane.b32.xlu1 %v4797_v55, %s11655_s22  ;;  %v4796_v43 = vld [vmem:[#allocation2 + $0x271] sm:$0xff]  ;;  %v15332_v35 = vld [vmem:[#allocation2 + $0x3a] sm:$0xff] }
 0x414   :  { %4661 = vst.msk [vmem:[#allocation2 + $0x289] sm:$0xff] %vm731_vm3, %v4517_v13  ;;  %5036 = vrot.lane.b32.xlu0 %v4796_v43, %s11655_s22 }
 0x416   :  { %v10906_v15 = vpop.f32.mrb[50].mxu0 }
 0x417   :  { %v11311_v53 = vadd.f32 %v10906_v15, %v15096_v1  ;;  %v4336_v4 = vpop.f32.mrb[51].mxu0 }
 0x418   :  { %v11312_v33 = vadd.f32 %v15096_v1, %v4336_v4 }
 0x419   :  { %v4520_v49 = vmax.f32 %v11311_v53, 0.0  ;;  %v15339_v53 = vld [vmem:[#allocation2 + $0x7a] sm:$0xff] }
 0x41a   :  { %v4519_v20 = vmax.f32 %v11312_v33, 0.0  ;;  %v4799_v26 = vld [vmem:[#allocation2 + $0x291] sm:$0xff] }
 0x41b   :  { %4664 = vst.msk [vmem:[#allocation2 + $0x2a9] sm:$0xff] %vm731_vm3, %v4520_v49  ;;  %5042 = vrot.lane.b32.xlu1 %v4799_v26, %s11655_s22  ;;  %v4798_v61 = vld [vmem:[#allocation2 + $0x289] sm:$0xff]  ;;  %v15346_v33 = vld [vmem:[#allocation2 + $0x52] sm:$0xff] }
 0x41c   :  { %4663 = vst.msk [vmem:[#allocation2 + $0x2a1] sm:$0xff] %vm731_vm3, %v4519_v20  ;;  %5040 = vrot.lane.b32.xlu0 %v4798_v61, %s11655_s22  ;;  %v15353_v26 = vld [vmem:[#allocation2 + $0x92] sm:$0xff] }
 0x41e   :  { %v15256_v39 = vpop.permute.xlu1 %4946  ;;  %v10909_v34 = vpop.f32.mrb[52].mxu0 }
 0x41f   :  { %v15258_v52 = vpop.permute.xlu0 %4944  ;;  %v11313_v42 = vadd.f32 %v10909_v34, %v15096_v1  ;;  %v4346_v56 = vpop.f32.mrb[53].mxu0 }
 0x420   :  { %v11314_v8 = vadd.f32 %v15096_v1, %v4346_v56  ;;  %v15360_v56 = vld [vmem:[#allocation2 + $0x6a] sm:$0xff] }
 0x421   :  { %v4522_v32 = vmax.f32 %v11313_v42, 0.0 }
 0x422   :  { %v4521_v45 = vmax.f32 %v11314_v8, 0.0  ;;  %v15268_v12 = vpop.permute.xlu1 %4950  ;;  %v4801_v50 = vld [vmem:[#allocation2 + $0x2a9] sm:$0xff] }
 0x423   :  { %4666 = vst.msk [vmem:[#allocation2 + $0x2c1] sm:$0xff] %vm731_vm3, %v4522_v32  ;;  %v15273_v36 = vpop.permute.xlu0 %4948  ;;  %5046 = vrot.lane.b32.xlu1 %v4801_v50, %s11655_s22  ;;  %v4800_v48 = vld [vmem:[#allocation2 + $0x2a1] sm:$0xff]  ;;  %v15367_v32 = vld [vmem:[#allocation2 + $0xaa] sm:$0xff] }
 0x424   :  { %4665 = vst.msk [vmem:[#allocation2 + $0x2b9] sm:$0xff] %vm731_vm3, %v4521_v45  ;;  %5044 = vrot.lane.b32.xlu0 %v4800_v48, %s11655_s22  ;;  %17102 = vst [vmem:[#allocation18_spill] sm:$0xff] %v15367_v32  ;;  %v15372_v45 = vld [vmem:[#allocation2 + $0x82] sm:$0xff] }
 0x426   :  { %v15280_v54 = vpop.permute.xlu1 %4954  ;;  %v10912_v5 = vpop.f32.mrb[54].mxu0 }
 0x427   :  { %v15282_v27 = vpop.permute.xlu0 %4952  ;;  %v11315_v51 = vadd.f32 %v10912_v5, %v15096_v1  ;;  %5196 = vrot.lane.b32.xlu1 %v4812_v29, %s11657_s10  ;;  %v4356_v9 = vpop.f32.mrb[55].mxu0  ;;  %v15381_v5 = vld [vmem:[#allocation2 + $0xc2] sm:$0xff] }
 0x428   :  { %v11316_v62 = vadd.f32 %v15096_v1, %v4356_v9  ;;  %17103 = vst [vmem:[#allocation19_spill] sm:$0xff] %v15381_v5 }
 0x429   :  { %v4524_v0 = vmax.f32 %v11315_v51, 0.0 }
 0x42a   :  { %v4523_v41 = vmax.f32 %v11316_v62, 0.0  ;;  %v15287_v30 = vpop.permute.xlu1 %4958  ;;  %v15386_v62 = vld [vmem:[#allocation2 + $0x9a] sm:$0xff] }
 0x42b   :  { %4668 = vst.msk [vmem:[#allocation2 + $0x2d9] sm:$0xff] %vm731_vm3, %v4524_v0  ;;  %v15292_v63 = vpop.permute.xlu0 %4956  ;;  %5200 = vrot.lane.b32.xlu1 %v15289_v7, %s11657_s10  ;;  %v4802_v23 = vld [vmem:[#allocation2 + $0x2b9] sm:$0xff] }
 0x42c   :  { %4667 = vst.msk [vmem:[#allocation2 + $0x2d1] sm:$0xff] %vm731_vm3, %v4523_v41  ;;  %5048 = vrot.lane.b32.xlu0 %v4802_v23, %s11655_s22 }
 0x42e   :  { %v15298_v22 = vpop.permute.xlu1 %4962  ;;  %v10915_v46 = vpop.f32.mrb[56].mxu0 }
 0x42f   :  { %v15302_v19 = vpop.permute.xlu0 %4960  ;;  %v11317_v60 = vadd.f32 %v10915_v46, %v15096_v1  ;;  %5204 = vrot.lane.b32.xlu1 %v15300_v10, %s11657_s10  ;;  %v4366_v16 = vpop.f32.mrb[57].mxu0  ;;  %v15393_v46 = vld [vmem:[#allocation2 + $0xda] sm:$0xff] }
 0x430   :  { %v11318_v6 = vadd.f32 %v15096_v1, %v4366_v16  ;;  %5198 = vrot.lane.b32.xlu0 %v4813_v24, %s11657_s10  ;;  %17104 = vst [vmem:[#allocation20_spill] sm:$0xff] %v15393_v46  ;;  %v15400_v16 = vld [vmem:[#allocation2 + $0xb2] sm:$0xff] }
 0x431   :  { %v4526_v14 = vmax.f32 %v11317_v60, 0.0  ;;  %17105 = vst [vmem:[#allocation21_spill] sm:$0xff] %v15400_v16 }
 0x432   :  { %v4525_v25 = vmax.f32 %v11318_v6, 0.0  ;;  %v15309_v59 = vpop.permute.xlu1 %4966  ;;  %v15409_v6 = vld [vmem:[#allocation2 + $0xca] sm:$0xff] }
 0x433   :  { %4670 = vst.msk [vmem:[#allocation2 + $0x2f1] sm:$0xff] %vm731_vm3, %v4526_v14  ;;  %v15314_v18 = vpop.permute.xlu0 %4964  ;;  %5208 = vrot.lane.b32.xlu1 %v15311_v38, %s11657_s10  ;;  %17107 = vst [vmem:[#allocation22_spill] sm:$0xff] %v15409_v6 }
 0x434   :  { %4669 = vst.msk [vmem:[#allocation2 + $0x2e9] sm:$0xff] %vm731_vm3, %v4525_v25  ;;  %5202 = vrot.lane.b32.xlu0 %v15318_v44, %s11657_s10 }
 0x436   :  { %v15323_v17 = vpop.permute.xlu1 %4970  ;;  %v10918_v11 = vpop.f32.mrb[58].mxu0 }
 0x437   :  { %v15327_v40 = vpop.permute.xlu0 %4968  ;;  %v11319_v21 = vadd.f32 %v10918_v11, %v15096_v1  ;;  %5212 = vrot.lane.b32.xlu1 %v15325_v37, %s11657_s10  ;;  %v4376_v47 = vpop.f32.mrb[59].mxu0  ;;  %v15417_v11 = vld [vmem:[#allocation2 + $0x10a] sm:$0xff] }
 0x438   :  { %v11320_v13 = vadd.f32 %v15096_v1, %v4376_v47  ;;  %5206 = vrot.lane.b32.xlu0 %v15332_v35, %s11657_s10  ;;  %17108 = vst [vmem:[#allocation23_spill] sm:$0xff] %v15417_v11 }
 0x439   :  { %v4528_v55 = vmax.f32 %v11319_v21, 0.0  ;;  %v15421_v21 = vld [vmem:[#allocation2 + $0xe2] sm:$0xff] }
 0x43a   :  { %v4527_v43 = vmax.f32 %v11320_v13, 0.0  ;;  %v15337_v15 = vpop.permute.xlu1 %4974  ;;  %17109 = vst [vmem:[#allocation24_spill] sm:$0xff] %v15421_v21  ;;  %v15427_v13 = vld [vmem:[#allocation2 + $0x122] sm:$0xff] }
 0x43b   :  { %4672 = vst.msk [vmem:[#allocation2 + $0x309] sm:$0xff] %vm731_vm3, %v4528_v55  ;;  %v15342_v4 = vpop.permute.xlu0 %4972  ;;  %5216 = vrot.lane.b32.xlu1 %v15339_v53, %s11657_s10  ;;  %17110 = vst [vmem:[#allocation25_spill] sm:$0xff] %v15427_v13 }
 0x43c   :  { %4671 = vst.msk [vmem:[#allocation2 + $0x301] sm:$0xff] %vm731_vm3, %v4527_v43  ;;  %5210 = vrot.lane.b32.xlu0 %v15346_v33, %s11657_s10  ;;  %v15433_v43 = vld [vmem:[#allocation2 + $0xfa] sm:$0xff] }
 0x43d   :  { %17111 = vst [vmem:[#allocation26_spill] sm:$0xff] %v15433_v43 }
 0x43e   :  { %v15351_v49 = vpop.permute.xlu1 %4978  ;;  %v10921_v20 = vpop.f32.mrb[60].mxu0 }
 0x43f   :  { %v15355_v61 = vpop.permute.xlu0 %4976  ;;  %v11321_v34 = vadd.f32 %v10921_v20, %v15096_v1  ;;  %5220 = vrot.lane.b32.xlu1 %v15353_v26, %s11657_s10  ;;  %v4386_v42 = vpop.f32.mrb[61].mxu0  ;;  %v4838_v20 = vld [vmem:[#allocation2 + $0x13a] sm:$0xff] }
 0x440   :  { %v11322_v3 = vadd.f32 %v15096_v1, %v4386_v42  ;;  %5214 = vrot.lane.b32.xlu0 %v15360_v56, %s11657_s10 }
 0x441   :  { %v4530_v31 = vmax.f32 %v11321_v34, 0.0  ;;  %v15438_v34 = vld [vmem:[#allocation2 + $0x112] sm:$0xff] }
 0x442   :  { %v4529_v8 = vmax.f32 %v11322_v3, 0.0  ;;  %v15365_v28 = vpop.permute.xlu1 %4982  ;;  %17112 = vst [vmem:[#allocation27_spill] sm:$0xff] %v15438_v34 }
 0x443   :  { %4674 = vst.msk [vmem:[#allocation2 + $0x321] sm:$0xff] %vm731_vm3, %v4530_v31  ;;  %5224 = vrot.lane.b32.xlu1 %v15367_v32, %s11657_s10  ;;  %v15375_v50 = vpop.permute.xlu0 %4980  ;;  %v4840_v31 = vld [vmem:[#allocation2 + $0x152] sm:$0xff] }
 0x444   :  { %4673 = vst.msk [vmem:[#allocation2 + $0x319] sm:$0xff] %vm731_vm3, %v4529_v8  ;;  %5218 = vrot.lane.b32.xlu0 %v15372_v45, %s11657_s10  ;;  %v15447_v8 = vld [vmem:[#allocation2 + $0x12a] sm:$0xff] }
 0x445   :  { %17113 = vst [vmem:[#allocation4_spill] sm:$0xff] %v15447_v8 }
 0x446   :  { %v15379_v48 = vpop.permute.xlu1 %4986  ;;  %v10924_v29 = vpop.f32.mrb[62].mxu0 }
 0x447   :  { %v11323_v51 = vadd.f32 %v10924_v29, %v15096_v1  ;;  %5228 = vrot.lane.b32.xlu1 %v15381_v5, %s11657_s10  ;;  %v4396_v9 = vpop.f32.mrb[63].mxu0  ;;  %v15391_v23 = vpop.permute.xlu0 %4984 }
 0x448   :  { %v11324_v0 = vadd.f32 %v15096_v1, %v4396_v9  ;;  %5222 = vrot.lane.b32.xlu0 %v15386_v62, %s11657_s10  ;;  %v15405_v1 = vld [vmem:[#allocation2 + $0xf2] sm:$0xff] }
 0x449   :  { %v4532_v41 = vmax.f32 %v11323_v51, 0.0  ;;  %17106 = vst [vmem:[#allocation3_spill] sm:$0xff] %v15405_v1  ;;  %v4842_v51 = vld [vmem:[#allocation2 + $0x16a] sm:$0xff] }
 0x44a   :  { %v4531_v24 = vmax.f32 %v11324_v0, 0.0  ;;  %v15396_v60 = vpop.permute.xlu1 %4990  ;;  %v15456_v0 = vld [vmem:[#allocation2 + $0x142] sm:$0xff] }
 0x44b   :  { %4676 = vst.msk [vmem:[#allocation2 + $0x339] sm:$0xff] %vm731_vm3, %v4532_v41  ;;  %5232 = vrot.lane.b32.xlu1 %v15393_v46, %s11657_s10  ;;  %v15411_v14 = vpop.permute.xlu0 %4988  ;;  %17114 = vst [vmem:[#allocation5_spill] sm:$0xff] %v15456_v0  ;;  %v4844_v41 = vld [vmem:[#allocation2 + $0x1b2] sm:$0xff] }
 0x44c   :  { %4675 = vst.msk [vmem:[#allocation2 + $0x331] sm:$0xff] %vm731_vm3, %v4531_v24  ;;  %5226 = vrot.lane.b32.xlu0 %v15400_v16, %s11657_s10  ;;  %v15461_v24 = vld [vmem:[#allocation2 + $0x15a] sm:$0xff]  ;;  %v4867_v16 = vld [vmem:[#allocation2 + $0x2c2] sm:$0xff] }
 0x44d   :  { %17115 = vst [vmem:[#allocation6_spill] sm:$0xff] %v15461_v24 }
 0x44e   :  { %v15415_v25 = vpop.permute.xlu1 %4994 }
 0x44f   :  { %5236 = vrot.lane.b32.xlu1 %v15405_v1, %s11657_s10  ;;  %v15425_v47 = vpop.permute.xlu0 %4992 }
 0x450   :  { %5230 = vrot.lane.b32.xlu0 %v15409_v6, %s11657_s10  ;;  %v4855_v6 = vld [vmem:[#allocation2 + $0x232] sm:$0xff] }
 0x452   :  { %v15429_v55 = vpop.permute.xlu1 %4998 }
 0x453   :  { %5240 = vrot.lane.b32.xlu1 %v15417_v11, %s11657_s10  ;;  %v15440_v42 = vpop.permute.xlu0 %4996  ;;  %v4848_v11 = vld [vmem:[#allocation2 + $0x1e2] sm:$0xff] }
 0x454   :  { %5234 = vrot.lane.b32.xlu0 %v15421_v21, %s11657_s10  ;;  %v4856_v21 = vld [vmem:[#allocation2 + $0x242] sm:$0xff] }
 0x456   :  { %v15444_v3 = vpop.permute.xlu1 %5002 }
 0x457   :  { %5244 = vrot.lane.b32.xlu1 %v15427_v13, %s11657_s10  ;;  %v15451_v29 = vpop.permute.xlu0 %5000  ;;  %v4846_v13 = vld [vmem:[#allocation2 + $0x1ca] sm:$0xff] }
 0x458   :  { %5238 = vrot.lane.b32.xlu0 %v15433_v43, %s11657_s10  ;;  %v4849_v43 = vld [vmem:[#allocation2 + $0x1ea] sm:$0xff] }
 0x45a   :  { %v15453_v9 = vpop.permute.xlu1 %5006 }
 0x45b   :  { %5248 = vrot.lane.b32.xlu1 %v4838_v20, %s11657_s10  ;;  %v15463_v20 = vpop.permute.xlu0 %5004 }
 0x45c   :  { %5242 = vrot.lane.b32.xlu0 %v15438_v34, %s11657_s10  ;;  %v4850_v34 = vld [vmem:[#allocation2 + $0x1fa] sm:$0xff] }
 0x45f   :  { %5252 = vrot.lane.b32.xlu1 %v4840_v31, %s11657_s10  ;;  %v15467_v31 = vpop.permute.xlu1 %5010 }
 0x460   :  { %5246 = vrot.lane.b32.xlu0 %v15447_v8, %s11657_s10  ;;  %v4845_v8 = vld [vmem:[#allocation2 + $0x1ba] sm:$0xff] }
 0x463   :  { %5256 = vrot.lane.b32.xlu1 %v4842_v51, %s11657_s10  ;;  %v4843_v51 = vld [vmem:[#allocation2 + $0x172] sm:$0xff] }
 0x464   :  { %5250 = vrot.lane.b32.xlu0 %v15456_v0, %s11657_s10  ;;  %v15471_v0 = vpop.permute.xlu0 %5008 }
 0x467   :  { %5260 = vrot.lane.b32.xlu1 %v4844_v41, %s11657_s10  ;;  %v15473_v41 = vpop.permute.xlu1 %5014 }
 0x468   :  { %5254 = vrot.lane.b32.xlu0 %v15461_v24, %s11657_s10  ;;  %v4847_v24 = vld [vmem:[#allocation2 + $0x1d2] sm:$0xff]  ;;  %v15478_v1 = vpop.permute.xlu0 %5012 }
 0x46b   :  { %5264 = vrot.lane.b32.xlu1 %v4846_v13, %s11657_s10  ;;  %v15481_v13 = vpop.permute.xlu1 %5018 }
 0x46c   :  { %5258 = vrot.lane.b32.xlu0 %v4843_v51, %s11657_s10  ;;  %17116 = vst [vmem:[#allocation7_spill] sm:$0xff] %v15481_v13  ;;  %v4852_v51 = vld [vmem:[#allocation2 + $0x212] sm:$0xff]  ;;  %v15485_v46 = vpop.permute.xlu0 %5016 }
 0x46f   :  { %5268 = vrot.lane.b32.xlu1 %v4848_v11, %s11657_s10  ;;  %v4854_v11 = vld [vmem:[#allocation2 + $0x22a] sm:$0xff] }
 0x470   :  { %5262 = vrot.lane.b32.xlu0 %v4845_v8, %s11657_s10  ;;  %v15487_v8 = vpop.permute.xlu1 %5022  ;;  %v15492_v5 = vpop.permute.xlu0 %5020 }
 0x471   :  { %17117 = vst [vmem:[#allocation8_spill] sm:$0xff] %v15487_v8  ;;  %17118 = vst [vmem:[#allocation9_spill] sm:$0xff] %v15492_v5  ;;  %v4685_v5 = vld [vmem:[#allocation2 + $0x8] sm:$0xff] }
 0x473   :  { %5272 = vrot.lane.b32.xlu1 %v4850_v34, %s11657_s10  ;;  %v4851_v34 = vld [vmem:[#allocation2 + $0x202] sm:$0xff] }
 0x474   :  { %5266 = vrot.lane.b32.xlu0 %v4847_v24, %s11657_s10  ;;  %v4853_v24 = vld [vmem:[#allocation2 + $0x21a] sm:$0xff]  ;;  %v15501_v32 = vpop.permute.xlu0 %5024 }
 0x475   :  { %17121 = vst [vmem:[#allocation12_spill] sm:$0xff] %v15501_v32  ;;  %v4864_v32 = vld [vmem:[#allocation2 + $0x2a2] sm:$0xff] }
 0x477   :  { %5276 = vrot.lane.b32.xlu1 %v4852_v51, %s11657_s10  ;;  %v15495_v51 = vpop.permute.xlu1 %5026 }
 0x478   :  { %5270 = vrot.lane.b32.xlu0 %v4849_v43, %s11657_s10  ;;  %17119 = vst [vmem:[#allocation10_spill] sm:$0xff] %v15495_v51  ;;  %v4858_v43 = vld [vmem:[#allocation2 + $0x25a] sm:$0xff]  ;;  %v4862_v51 = vld [vmem:[#allocation2 + $0x28a] sm:$0xff] }
 0x47b   :  { %5280 = vrot.lane.b32.xlu1 %v4854_v11, %s11657_s10  ;;  %v15499_v11 = vpop.permute.xlu1 %5030 }
 0x47c   :  { %5274 = vrot.lane.b32.xlu0 %v4851_v34, %s11657_s10  ;;  %17120 = vst [vmem:[#allocation11_spill] sm:$0xff] %v15499_v11  ;;  %v4860_v34 = vld [vmem:[#allocation2 + $0x272] sm:$0xff] }
 0x47f   :  { %5284 = vrot.lane.b32.xlu1 %v4856_v21, %s11657_s10  ;;  %v4857_v21 = vld [vmem:[#allocation2 + $0x24a] sm:$0xff]  ;;  %v15505_v8 = vpop.permute.xlu1 %5034 }
 0x480   :  { %5278 = vrot.lane.b32.xlu0 %v4853_v24, %s11657_s10  ;;  %17122 = vst [vmem:[#allocation13_spill] sm:$0xff] %v15505_v8  ;;  %v15507_v24 = vpop.permute.xlu0 %5028 }
 0x481   :  { %17123 = vst [vmem:[#allocation14_spill] sm:$0xff] %v15507_v24  ;;  %v4803_v24 = vld [vmem:[#allocation2 + $0x2c1] sm:$0xff] }
 0x483   :  { %5288 = vrot.lane.b32.xlu1 %v4858_v43, %s11657_s10  ;;  %v4859_v43 = vld [vmem:[#allocation2 + $0x262] sm:$0xff] }
 0x484   :  { %5282 = vrot.lane.b32.xlu0 %v4855_v6, %s11657_s10  ;;  %v15513_v11 = vpop.permute.xlu0 %5032 }
 0x485   :  { %v15511_v6 = vpop.permute.xlu1 %5038  ;;  %17125 = vst [vmem:[#allocation16_spill] sm:$0xff] %v15513_v11 }
 0x486   :  { %17124 = vst [vmem:[#allocation15_spill] sm:$0xff] %v15511_v6  ;;  %v4684_v6 = vld [vmem:[#allocation2] sm:$0xff] }
 0x487   :  { %5292 = vrot.lane.b32.xlu1 %v4860_v34, %s11657_s10  ;;  %v4861_v34 = vld [vmem:[#allocation2 + $0x27a] sm:$0xff] }
 0x488   :  { %5286 = vrot.lane.b32.xlu0 %v4857_v21, %s11657_s10  ;;  %v15519_v8 = vpop.permute.xlu0 %5036 }
 0x489   :  { %17127 = vst [vmem:[#allocation28_spill] sm:$0xff] %v15519_v8 }
 0x48b   :  { %5296 = vrot.lane.b32.xlu1 %v4862_v51, %s11657_s10  ;;  %v4863_v51 = vld [vmem:[#allocation2 + $0x292] sm:$0xff] }
 0x48c   :  { %5290 = vrot.lane.b32.xlu0 %v4859_v43, %s11657_s10 }
 0x48d   :  { %v15517_v21 = vpop.permute.xlu1 %5042 }
 0x48e   :  { %17126 = vst [vmem:[#allocation17_spill] sm:$0xff] %v15517_v21  ;;  %v15525_v11 = vpop.permute.xlu0 %5040 }
 0x48f   :  { %5300 = vrot.lane.b32.xlu1 %v4864_v32, %s11657_s10  ;;  %17129 = vst [vmem:[#allocation30_spill] sm:$0xff] %v15525_v11  ;;  %v4865_v32 = vld [vmem:[#allocation2 + $0x2aa] sm:$0xff] }
 0x490   :  { %5294 = vrot.lane.b32.xlu0 %v4861_v34, %s11657_s10  ;;  %v5388_v34 = vsel %vm731_vm3, %v4684_v6, %v15250_v58  ;;  %v4804_v58 = vld [vmem:[#allocation2 + $0x2d1] sm:$0xff] }
 0x493   :  { %5050 = vrot.lane.b32.xlu1 %v4803_v24, %s11655_s22 }
 0x494   :  { %5298 = vrot.lane.b32.xlu0 %v4863_v51, %s11657_s10  ;;  %v4805_v51 = vld [vmem:[#allocation2 + $0x2d9] sm:$0xff] }
 0x495   :  { %v15523_v43 = vpop.permute.xlu1 %5046 }
 0x496   :  { %17128 = vst [vmem:[#allocation29_spill] sm:$0xff] %v15523_v43  ;;  %v15531_v8 = vpop.permute.xlu0 %5044  ;;  %v4866_v43 = vld [vmem:[#allocation2 + $0x2ba] sm:$0xff] }
 0x497   :  { %5306 = vrot.lane.b32.xlu1 %v4867_v16, %s11657_s10  ;;  %17130 = vst [vmem:[#allocation31_spill] sm:$0xff] %v15531_v8 }
 0x498   :  { %5302 = vrot.lane.b32.xlu0 %v4865_v32, %s11657_s10  ;;  %v4869_v32 = vld [vmem:[#allocation2 + $0x2da] sm:$0xff] }
 0x499   :  { %v5197_v21 = vpop.permute.xlu1 %5196 }
 0x49a   :  { %v5452_v24 = vsel %vm796_vm4, %v5388_v34, %v5197_v21  ;;  %v5389_v21 = vsel %vm731_vm3, %v4685_v5, %v15248_v2  ;;  %v4686_v34 = vld [vmem:[#allocation2 + $0x18] sm:$0xff]  ;;  %v4688_v5 = vld [vmem:[#allocation2 + $0x30] sm:$0xff] }
 0x49b   :  { %10929 = vmatprep.mubr.msk.f32.mxu1 %vm863_vm5, %v5452_v24  ;;  %5054 = vrot.lane.b32.xlu1 %v4805_v51, %s11655_s22  ;;  %v4807_v51 = vld [vmem:[#allocation2 + $0x2f1] sm:$0xff] }
 0x49c   :  { %5304 = vrot.lane.b32.xlu0 %v4866_v43, %s11657_s10  ;;  %v5390_v43 = vsel %vm731_vm3, %v4686_v34, %v15258_v52  ;;  %v4871_v34 = vld [vmem:[#allocation2 + $0x2f2] sm:$0xff] }
 0x49d   :  { %v5201_v16 = vpop.permute.xlu1 %5200 }
 0x49e   :  { %v15537_v11 = vpop.permute.xlu0 %5048 }
 0x49f   :  { %17131 = vst [vmem:[#allocation32_spill] sm:$0xff] %v15537_v11  ;;  %5310 = vrot.lane.b32.xlu1 %v4869_v32, %s11657_s10  ;;  %v4868_v11 = vld [vmem:[#allocation2 + $0x2d2] sm:$0xff]  ;;  %v5454_v32 = vsel %vm796_vm4, %v5390_v43, %v5201_v16  ;;  %v4690_v43 = vld [vmem:[#allocation2 + $0x48] sm:$0xff] }
 0x4a0   :  { %5052 = vrot.lane.b32.xlu0 %v4804_v58, %s11655_s22  ;;  %v4687_v58 = vld [vmem:[#allocation2 + $0x20] sm:$0xff]  ;;  %v4689_v16 = vld [vmem:[#allocation2 + $0x38] sm:$0xff] }
 0x4a1   :  { %v5205_v6 = vpop.permute.xlu1 %5204  ;;  %v5391_v2 = vsel %vm731_vm3, %v4687_v58, %v15256_v39  ;;  %v5393_v39 = vsel %vm731_vm3, %v4689_v16, %v15268_v12  ;;  %v5394_v58 = vsel %vm731_vm3, %v4690_v43, %v15282_v27 }
 0x4a2   :  { %v5199_v24 = vpop.permute.xlu0 %5198 }
 0x4a3   :  { %v5453_v8 = vsel %vm796_vm4, %v5389_v21, %v5199_v24  ;;  %5058 = vrot.lane.b32.xlu1 %v4807_v51, %s11655_s22  ;;  %v5392_v21 = vsel %vm731_vm3, %v4688_v5, %v15273_v36 }
 0x4a4   :  { %10930 = vmatmul.mubr.msk.f32.vlgmr.msra.gmra.mrb[0].mxu1 %vm863_vm5, %v5453_v8  ;;  %5308 = vrot.lane.b32.xlu0 %v4868_v11, %s11657_s10  ;;  %v4806_v8 = vld [vmem:[#allocation2 + $0x2e9] sm:$0xff]  ;;  %v5456_v11 = vsel %vm796_vm4, %v5392_v21, %v5205_v6  ;;  %v4692_v21 = vld [vmem:[#allocation2 + $0x60] sm:$0xff] }
 0x4a5   :  { %v5209_v13 = vpop.permute.xlu1 %5208  ;;  %10932 = vmatprep.mubr.msk.f32.mxu1 %vm863_vm5, %v5454_v32  ;;  %v4809_v32 = vld [vmem:[#allocation2 + $0x309] sm:$0xff] }
 0x4a6   :  { %v5203_v52 = vpop.permute.xlu0 %5202  ;;  %v4870_v6 = vld [vmem:[#allocation2 + $0x2ea] sm:$0xff]  ;;  %v5458_v5 = vsel %vm796_vm4, %v5394_v58, %v5209_v13  ;;  %v4808_v13 = vld [vmem:[#allocation2 + $0x301] sm:$0xff] }
 0x4a7   :  { %v5455_v24 = vsel %vm796_vm4, %v5391_v2, %v5203_v52  ;;  %5314 = vrot.lane.b32.xlu1 %v4871_v34, %s11657_s10  ;;  %v4691_v52 = vld [vmem:[#allocation2 + $0x50] sm:$0xff] }
 0x4a8   :  { %10933 = vmatmul.mubr.msk.f32.gmra.mrb[2].mxu1 %vm863_vm5, %v5455_v24  ;;  %5056 = vrot.lane.b32.xlu0 %v4806_v8, %s11655_s22  ;;  %v5395_v12 = vsel %vm731_vm3, %v4691_v52, %v15280_v54  ;;  %v4873_v24 = vld [vmem:[#allocation2 + $0x30a] sm:$0xff]  ;;  %v5396_v8 = vsel %vm731_vm3, %v4692_v21, %v15292_v63 }
 0x4a9   :  { %v5213_v51 = vpop.permute.xlu1 %5212  ;;  %10935 = vmatprep.mubr.msk.f32.mxu1 %vm863_vm5, %v5456_v11  ;;  %v4696_v21 = vld [vmem:[#allocation2 + $0x90] sm:$0xff] }
 0x4aa   :  { %v5207_v36 = vpop.permute.xlu0 %5206  ;;  %v5460_v16 = vsel %vm796_vm4, %v5396_v8, %v5213_v51  ;;  %v4872_v51 = vld [vmem:[#allocation2 + $0x302] sm:$0xff]  ;;  %v5400_v8 = vsel %vm731_vm3, %v4696_v21, %v15314_v18 }
 0x4ab   :  { %v5457_v2 = vsel %vm796_vm4, %v5393_v39, %v5207_v36  ;;  %5062 = vrot.lane.b32.xlu1 %v4809_v32, %s11655_s22  ;;  %v4693_v39 = vld [vmem:[#allocation2 + $0x68] sm:$0xff]  ;;  %v4694_v36 = vld [vmem:[#allocation2 + $0x78] sm:$0xff] }
 0x4ac   :  { %10936 = vmatmul.mubr.msk.f32.gmra.mrb[4].mxu1 %vm863_vm5, %v5457_v2  ;;  %5312 = vrot.lane.b32.xlu0 %v4870_v6, %s11657_s10  ;;  %v5397_v54 = vsel %vm731_vm3, %v4693_v39, %v15287_v30  ;;  %v4811_v32 = vld [vmem:[#allocation2 + $0x321] sm:$0xff]  ;;  %v5398_v58 = vsel %vm731_vm3, %v4694_v36, %v15302_v19  ;;  %v10031_v30 = vld [vmem:[%s17003_s2 + $0x10] sm:$0xff] }
 0x4ad   :  { %v5217_v34 = vpop.permute.xlu1 %5216  ;;  %10938 = vmatprep.mubr.msk.f32.mxu1 %vm863_vm5, %v5458_v5  ;;  %v10032_v5 = vld [vmem:[%s17003_s2 + $0x18] sm:$0xf]  ;;  %v4695_v19 = vld [vmem:[#allocation2 + $0x80] sm:$0xff] }
 0x4ae   :  { %v5211_v27 = vpop.permute.xlu0 %5210  ;;  %v5462_v6 = vsel %vm796_vm4, %v5398_v58, %v5217_v34  ;;  %v5399_v34 = vsel %vm731_vm3, %v4695_v19, %v15298_v22  ;;  %v4697_v22 = vld [vmem:[#allocation2 + $0x98] sm:$0xff] }
 0x4af   :  { %v5459_v11 = vsel %vm796_vm4, %v5395_v12, %v5211_v27  ;;  %5318 = vrot.lane.b32.xlu1 %v4873_v24, %s11657_s10  ;;  %v11249_v12 = vpack.c.bf16 %v10032_v5, %v10031_v30  ;;  %v4875_v24 = vld [vmem:[#allocation2 + $0x322] sm:$0xff]  ;;  %v5401_v18 = vsel %vm731_vm3, %v4697_v22, %v15309_v59  ;;  %v4874_v58 = vld [vmem:[#allocation2 + $0x31a] sm:$0xff]  ;;  %v4704_v22 = vld [vmem:[#allocation2 + $0xf0] sm:$0xff] }
 0x4b0   :  { %10939 = vmatmul.mubr.msk.f32.gmra.mrb[6].mxu1 %vm863_vm5, %v5459_v11  ;;  %5060 = vrot.lane.b32.xlu0 %v4808_v13, %s11655_s22  ;;  %v4810_v13 = vld [vmem:[#allocation2 + $0x319] sm:$0xff] }
 0x4b1   :  { %v5221_v43 = vpop.permute.xlu1 %5220  ;;  %10941 = vmatprep.mubr.msk.f32.mxu1 %vm863_vm5, %v5460_v16  ;;  %11251 = vmatprep.subr.msk.bf16.mxu1 %vm11963_vm2, %v11249_v12  ;;  %v4700_v30 = vld [vmem:[#allocation2 + $0xc0] sm:$0xff] }
 0x4b2   :  { %v5215_v63 = vpop.permute.xlu0 %5214  ;;  %v5464_v16 = vsel %vm796_vm4, %v5400_v8, %v5221_v43  ;;  %11254 = vmatpush3.bf16.msk.msra.mxu1 %vm11963_vm2, %v11249_v12  ;;  %v5404_v5 = vsel %vm731_vm3, %v4700_v30, %v15342_v4  ;;  %v4702_v4 = vld [vmem:[#allocation2 + $0xd8] sm:$0xff] }
 0x4b3   :  { %v5461_v2 = vsel %vm796_vm4, %v5397_v54, %v5215_v63  ;;  %5066 = vrot.lane.b32.xlu1 %v4811_v32, %s11655_s22  ;;  %v4698_v54 = vld [vmem:[#allocation2 + $0xa8] sm:$0xff] }
 0x4b4   :  { %10942 = vmatmul.mubr.msk.f32.gmra.mrb[8].mxu1 %vm863_vm5, %v5461_v2  ;;  %5316 = vrot.lane.b32.xlu0 %v4872_v51, %s11657_s10  ;;  %v6227_v63 = vld [vmem:[#allocation2 + $0x21] sm:$0xff]  ;;  %v5402_v43 = vsel %vm731_vm3, %v4698_v54, %v15327_v40  ;;  %v4699_v51 = vld [vmem:[#allocation2 + $0xb0] sm:$0xff] }
 0x4b5   :  { %v5225_v52 = vpop.permute.xlu1 %5224  ;;  %10944 = vmatprep.mubr.msk.f32.mxu1 %vm863_vm5, %v5462_v6  ;;  %v5403_v59 = vsel %vm731_vm3, %v4699_v51, %v15323_v17  ;;  %v6228_v54 = vld [vmem:[#allocation2 + $0x31] sm:$0xff] }
 0x4b6   :  { %v5219_v27 = vpop.permute.xlu0 %5218  ;;  %v5466_v2 = vsel %vm796_vm4, %v5402_v43, %v5225_v52  ;;  %v6226_v52 = vld [vmem:[#allocation2 + $0x19] sm:$0xff]  ;;  %v4707_v51 = vld [vmem:[#allocation2 + $0x110] sm:$0xff] }
 0x4b7   :  { %v5463_v11 = vsel %vm796_vm4, %v5399_v34, %v5219_v27  ;;  %5322 = vrot.lane.b32.xlu1 %v4875_v24, %s11657_s10  ;;  %v4701_v34 = vld [vmem:[#allocation2 + $0xc8] sm:$0xff]  ;;  %v6229_v24 = vld [vmem:[#allocation2 + $0x39] sm:$0xff] }
 0x4b8   :  { %10945 = vmatmul.mubr.msk.f32.gmra.mrb[10].mxu1 %vm863_vm5, %v5463_v11  ;;  %5064 = vrot.lane.b32.xlu0 %v4810_v13, %s11655_s22  ;;  %v5405_v17 = vsel %vm731_vm3, %v4701_v34, %v15337_v15  ;;  %v4703_v13 = vld [vmem:[#allocation2 + $0xe0] sm:$0xff]  ;;  %v6233_v34 = vld [vmem:[#allocation2 + $0x69] sm:$0xff] }
 0x4b9   :  { %v5229_v39 = vpop.permute.xlu1 %5228  ;;  %10947 = vmatprep.mubr.msk.f32.mxu1 %vm863_vm5, %v5464_v16  ;;  %v5407_v15 = vsel %vm731_vm3, %v4703_v13, %v15351_v49  ;;  %v4713_v13 = vld [vmem:[#allocation2 + $0x158] sm:$0xff] }
 0x4ba   :  { %v5223_v36 = vpop.permute.xlu0 %5222  ;;  %v5468_v12 = vsel %vm796_vm4, %v5404_v5, %v5229_v39  ;;  %v5408_v39 = vsel %vm731_vm3, %v4704_v22, %v15375_v50  ;;  %v4706_v50 = vld [vmem:[#allocation2 + $0x108] sm:$0xff] }
 0x4bb   :  { %v5465_v32 = vsel %vm796_vm4, %v5401_v18, %v5223_v36  ;;  %6420 = vrot.lane.b32.xlu1 %v6227_v63, %s11655_s22  ;;  %v4705_v36 = vld [vmem:[#allocation2 + $0xf8] sm:$0xff]  ;;  %v6230_v5 = vld [vmem:[#allocation2 + $0x49] sm:$0xff]  ;;  %v6235_v22 = vld [vmem:[#allocation2 + $0x81] sm:$0xff] }
 0x4bc   :  { %10948 = vmatmul.mubr.msk.f32.gmra.mrb[12].mxu1 %vm863_vm5, %v5465_v32  ;;  %5320 = vrot.lane.b32.xlu0 %v4874_v58, %s11657_s10  ;;  %v5409_v49 = vsel %vm731_vm3, %v4705_v36, %v15365_v28  ;;  %v6231_v32 = vld [vmem:[#allocation2 + $0x51] sm:$0xff]  ;;  %v5411_v28 = vsel %vm731_vm3, %v4707_v51, %v15379_v48 }
 0x4bd   :  { %v5233_v6 = vpop.permute.xlu1 %5232  ;;  %10950 = vmatprep.mubr.msk.f32.mxu1 %vm863_vm5, %v5466_v2  ;;  %v4717_v36 = vld [vmem:[#allocation2 + $0x1b8] sm:$0xff]  ;;  %v4719_v51 = vld [vmem:[#allocation2 + $0x1d0] sm:$0xff] }
 0x4be   :  { %v5227_v40 = vpop.permute.xlu0 %5226 }
 0x4bf   :  { %v5467_v19 = vsel %vm796_vm4, %v5403_v59, %v5227_v40  ;;  %6676 = vrot.lane.b32.xlu1 %v15318_v44, %s11657_s10  ;;  %v5406_v44 = vsel %vm731_vm3, %v4702_v4, %v15355_v61  ;;  %v4708_v59 = vld [vmem:[#allocation2 + $0x120] sm:$0xff] }
 0x4c0   :  { %10951 = vmatmul.mubr.msk.f32.gmra.mrb[14].mxu1 %vm863_vm5, %v5467_v19  ;;  %6418 = vrot.lane.b32.xlu0 %v6226_v52, %s11655_s22  ;;  %v5470_v11 = vsel %vm796_vm4, %v5406_v44, %v5233_v6  ;;  %v5412_v30 = vsel %vm731_vm3, %v4708_v59, %v15411_v14  ;;  %v4709_v19 = vld [vmem:[#allocation2 + $0x128] sm:$0xff]  ;;  %v4710_v14 = vld [vmem:[#allocation2 + $0x138] sm:$0xff]  ;;  %v4711_v4 = vld [vmem:[#allocation2 + $0x140] sm:$0xff] }
 0x4c1   :  { %v5237_v21 = vpop.permute.xlu1 %5236  ;;  %10953 = vmatprep.mubr.msk.f32.mxu1 %vm863_vm5, %v5468_v12  ;;  %v5413_v48 = vsel %vm731_vm3, %v4709_v19, %v15396_v60  ;;  %v5415_v60 = vsel %vm731_vm3, %v4711_v4, %v15415_v25  ;;  %v5417_v25 = vsel %vm731_vm3, %v4713_v13, %v15429_v55  ;;  %v6239_v19 = vld [vmem:[#allocation2 + $0xb1] sm:$0xff]  ;;  %v6241_v13 = vld [vmem:[#allocation2 + $0xc9] sm:$0xff] }
 0x4c2   :  { %v5231_v27 = vpop.permute.xlu0 %5230 }
 0x4c3   :  { %v5469_v8 = vsel %vm796_vm4, %v5405_v17, %v5231_v27  ;;  %6424 = vrot.lane.b32.xlu1 %v6229_v24, %s11655_s22  ;;  %v4712_v24 = vld [vmem:[#allocation2 + $0x150] sm:$0xff] }
 0x4c4   :  { %10954 = vmatmul.mubr.msk.f32.gmra.mrb[16].mxu1 %vm863_vm5, %v5469_v8  ;;  %6674 = vrot.lane.b32.xlu0 %v15289_v7, %s11657_s10  ;;  %v5472_v7 = vsel %vm796_vm4, %v5408_v39, %v5237_v21  ;;  %v5416_v44 = vsel %vm731_vm3, %v4712_v24, %v15440_v42  ;;  %v4714_v42 = vld [vmem:[#allocation2 + $0x168] sm:$0xff]  ;;  %v4716_v39 = vld [vmem:[#allocation2 + $0x1b0] sm:$0xff]  ;;  %v4725_v24 = vld [vmem:[#allocation2 + $0x218] sm:$0xff] }
 0x4c5   :  { %v5241_v16 = vpop.permute.xlu1 %5240  ;;  %10956 = vmatprep.mubr.msk.f32.mxu1 %vm863_vm5, %v5470_v11  ;;  %v6232_v11 = vld [vmem:[#allocation2 + $0x61] sm:$0xff] }
 0x4c6   :  { %v5235_v61 = vpop.permute.xlu0 %5234 }
 0x4c7   :  { %v5471_v18 = vsel %vm796_vm4, %v5407_v15, %v5235_v61  ;;  %6680 = vrot.lane.b32.xlu1 %v15332_v35, %s11657_s10  ;;  %v5410_v35 = vsel %vm731_vm3, %v4706_v50, %v15391_v23  ;;  %v6234_v50 = vld [vmem:[#allocation2 + $0x79] sm:$0xff] }
 0x4c8   :  { %10957 = vmatmul.mubr.msk.f32.gmra.mrb[18].mxu1 %vm863_vm5, %v5471_v18  ;;  %6422 = vrot.lane.b32.xlu0 %v6228_v54, %s11655_s22  ;;  %v5474_v2 = vsel %vm796_vm4, %v5410_v35, %v5241_v16  ;;  %v4715_v54 = vld [vmem:[#allocation2 + $0x170] sm:$0xff]  ;;  %v6237_v35 = vld [vmem:[#allocation2 + $0x99] sm:$0xff] }
 0x4c9   :  { %v5245_v63 = vpop.permute.xlu1 %5244  ;;  %10959 = vmatprep.mubr.msk.f32.mxu1 %vm863_vm5, %v5472_v7  ;;  %v5419_v7 = vsel %vm731_vm3, %v4715_v54, %v15444_v3  ;;  %v5421_v3 = vsel %vm731_vm3, %v4717_v36, %v15453_v9  ;;  %v5423_v9 = vsel %vm731_vm3, %v4719_v51, %v15467_v31  ;;  %v4728_v54 = vld [vmem:[#allocation2 + $0x240] sm:$0xff] }
 0x4ca   :  { %v5239_v43 = vpop.permute.xlu0 %5238 }
 0x4cb   :  { %v5473_v58 = vsel %vm796_vm4, %v5409_v49, %v5239_v43  ;;  %6428 = vrot.lane.b32.xlu1 %v6231_v32, %s11655_s22  ;;  %v4718_v32 = vld [vmem:[#allocation2 + $0x1c8] sm:$0xff] }
 0x4cc   :  { %10960 = vmatmul.mubr.msk.f32.gmra.mrb[20].mxu1 %vm863_vm5, %v5473_v58  ;;  %6678 = vrot.lane.b32.xlu0 %v15300_v10, %s11657_s10  ;;  %v5476_v10 = vsel %vm796_vm4, %v5412_v30, %v5245_v63  ;;  %v5420_v63 = vsel %vm731_vm3, %v4716_v39, %v15463_v20  ;;  %v5422_v58 = vsel %vm731_vm3, %v4718_v32, %v15471_v0  ;;  %v6236_v30 = vld [vmem:[#allocation2 + $0x91] sm:$0xff] }
 0x4cd   :  { %v5249_v6 = vpop.permute.xlu1 %5248  ;;  %10962 = vmatprep.mubr.msk.f32.mxu1 %vm863_vm5, %v5474_v2  ;;  %v17138_v39 = vld [vmem:[#allocation10_spill] sm:$0xff] }
 0x4ce   :  { %v5243_v23 = vpop.permute.xlu0 %5242 }
 0x4cf   :  { %v5475_v40 = vsel %vm796_vm4, %v5411_v28, %v5243_v23  ;;  %6684 = vrot.lane.b32.xlu1 %v15346_v33, %s11657_s10  ;;  %v5414_v33 = vsel %vm731_vm3, %v4710_v14, %v15425_v47  ;;  %v4720_v28 = vld [vmem:[#allocation2 + $0x1e0] sm:$0xff] }
 0x4d0   :  { %10963 = vmatmul.mubr.msk.f32.gmra.mrb[22].mxu1 %vm863_vm5, %v5475_v40  ;;  %6426 = vrot.lane.b32.xlu0 %v6230_v5, %s11655_s22  ;;  %v5478_v17 = vsel %vm796_vm4, %v5414_v33, %v5249_v6  ;;  %v5424_v59 = vsel %vm731_vm3, %v4720_v28, %v15478_v1  ;;  %v4721_v40 = vld [vmem:[#allocation2 + $0x1e8] sm:$0xff]  ;;  %v4722_v1 = vld [vmem:[#allocation2 + $0x1f8] sm:$0xff]  ;;  %v4723_v14 = vld [vmem:[#allocation2 + $0x200] sm:$0xff] }
 0x4d1   :  { %v5253_v52 = vpop.permute.xlu1 %5252  ;;  %10965 = vmatprep.mubr.msk.f32.mxu1 %vm863_vm5, %v5476_v10  ;;  %v5425_v31 = vsel %vm731_vm3, %v4721_v40, %v15473_v41  ;;  %v17132_v41 = vld [vmem:[#allocation7_spill] sm:$0xff]  ;;  %v4724_v33 = vld [vmem:[#allocation2 + $0x210] sm:$0xff]  ;;  %v17145_v40 = vld [vmem:[#allocation28_spill] sm:$0xff] }
 0x4d2   :  { %v5247_v12 = vpop.permute.xlu0 %5246  ;;  %v4731_v28 = vld [vmem:[#allocation2 + $0x260] sm:$0xff] }
 0x4d3   :  { %v5477_v21 = vsel %vm796_vm4, %v5413_v48, %v5247_v12  ;;  %6432 = vrot.lane.b32.xlu1 %v6233_v34, %s11655_s22  ;;  %v5427_v34 = vsel %vm731_vm3, %v4723_v14, %v17132_v41 }
 0x4d4   :  { %10966 = vmatmul.mubr.msk.f32.gmra.mrb[24].mxu1 %vm863_vm5, %v5477_v21  ;;  %6682 = vrot.lane.b32.xlu0 %v15311_v38, %s11657_s10  ;;  %v5480_v38 = vsel %vm796_vm4, %v5416_v44, %v5253_v52  ;;  %v17133_v21 = vld [vmem:[#allocation9_spill] sm:$0xff]  ;;  %v17135_v44 = vld [vmem:[#allocation8_spill] sm:$0xff] }
 0x4d5   :  { %v5257_v27 = vpop.permute.xlu1 %5256  ;;  %10968 = vmatprep.mubr.msk.f32.mxu1 %vm863_vm5, %v5478_v17  ;;  %v5428_v17 = vsel %vm731_vm3, %v4724_v33, %v17133_v21  ;;  %v17148_v33 = vld [vmem:[#allocation30_spill] sm:$0xff] }
 0x4d6   :  { %v5251_v47 = vpop.permute.xlu0 %5250 }
 0x4d7   :  { %v5479_v8 = vsel %vm796_vm4, %v5415_v60, %v5251_v47  ;;  %6688 = vrot.lane.b32.xlu1 %v15360_v56, %s11657_s10  ;;  %v5418_v56 = vsel %vm731_vm3, %v4714_v42, %v15451_v29  ;;  %v6238_v60 = vld [vmem:[#allocation2 + $0xa9] sm:$0xff] }
 0x4d8   :  { %10969 = vmatmul.mubr.msk.f32.gmra.mrb[26].mxu1 %vm863_vm5, %v5479_v8  ;;  %6430 = vrot.lane.b32.xlu0 %v6232_v11, %s11655_s22  ;;  %v5482_v18 = vsel %vm796_vm4, %v5418_v56, %v5257_v27  ;;  %v17134_v27 = vld [vmem:[#allocation21_spill] sm:$0xff]  ;;  %v5429_v8 = vsel %vm731_vm3, %v4725_v24, %v17135_v44  ;;  %v4726_v11 = vld [vmem:[#allocation2 + $0x228] sm:$0xff] }
 0x4d9   :  { %v5261_v16 = vpop.permute.xlu1 %5260  ;;  %10971 = vmatprep.mubr.msk.f32.mxu1 %vm863_vm5, %v5480_v38  ;;  %v4727_v56 = vld [vmem:[#allocation2 + $0x230] sm:$0xff] }
 0x4da   :  { %v5255_v15 = vpop.permute.xlu0 %5254 }
 0x4db   :  { %v5481_v61 = vsel %vm796_vm4, %v5417_v25, %v5255_v15  ;;  %6436 = vrot.lane.b32.xlu1 %v6235_v22, %s11655_s22  ;;  %v17137_v22 = vld [vmem:[#allocation18_spill] sm:$0xff] }
 0x4dc   :  { %10972 = vmatmul.mubr.msk.f32.gmra.mrb[28].mxu1 %vm863_vm5, %v5481_v61  ;;  %6686 = vrot.lane.b32.xlu0 %v15325_v37, %s11657_s10  ;;  %v5484_v37 = vsel %vm796_vm4, %v5420_v63, %v5261_v16  ;;  %v17136_v16 = vld [vmem:[#allocation12_spill] sm:$0xff]  ;;  %v17140_v63 = vld [vmem:[#allocation22_spill] sm:$0xff] }
 0x4dd   :  { %v5265_v55 = vpop.permute.xlu1 %5264  ;;  %10974 = vmatprep.mubr.msk.f32.mxu1 %vm863_vm5, %v5482_v18  ;;  %v5430_v25 = vsel %vm731_vm3, %v4726_v11, %v17136_v16  ;;  %v5431_v18 = vsel %vm731_vm3, %v4727_v56, %v17138_v39  ;;  %v6244_v16 = vld [vmem:[#allocation2 + $0xf1] sm:$0xff] }
 0x4de   :  { %v5259_v29 = vpop.permute.xlu0 %5258  ;;  %v5486_v2 = vsel %vm796_vm4, %v5422_v58, %v5265_v55  ;;  %v6243_v58 = vld [vmem:[#allocation2 + $0xe1] sm:$0xff]  ;;  %v6247_v39 = vld [vmem:[#allocation2 + $0x111] sm:$0xff] }
 0x4df   :  { %v5483_v49 = vsel %vm796_vm4, %v5419_v7, %v5259_v29  ;;  %6692 = vrot.lane.b32.xlu1 %v15372_v45, %s11657_s10  ;;  %v17139_v7 = vld [vmem:[#allocation14_spill] sm:$0xff] }
 0x4e0   :  { %10975 = vmatmul.mubr.msk.f32.gmra.mrb[30].mxu1 %vm863_vm5, %v5483_v49  ;;  %6434 = vrot.lane.b32.xlu0 %v6234_v50, %s11655_s22  ;;  %v5432_v29 = vsel %vm731_vm3, %v4728_v54, %v17139_v7  ;;  %v6240_v49 = vld [vmem:[#allocation2 + $0xc1] sm:$0xff] }
 0x4e1   :  { %v5269_v43 = vpop.permute.xlu1 %5268  ;;  %10977 = vmatprep.mubr.msk.f32.mxu1 %vm863_vm5, %v5484_v37  ;;  %v4729_v37 = vld [vmem:[#allocation2 + $0x248] sm:$0xff]  ;;  %v17154_v54 = vld [vmem:[#allocation3_spill] sm:$0xff] }
 0x4e2   :  { %v5263_v20 = vpop.permute.xlu0 %5262 }
 0x4e3   :  { %v5485_v45 = vsel %vm796_vm4, %v5421_v3, %v5263_v20  ;;  %6440 = vrot.lane.b32.xlu1 %v6237_v35, %s11655_s22  ;;  %v17141_v3 = vld [vmem:[#allocation11_spill] sm:$0xff]  ;;  %v4730_v20 = vld [vmem:[#allocation2 + $0x258] sm:$0xff] }
 0x4e4   :  { %10978 = vmatmul.mubr.msk.f32.gmra.mrb[32].mxu1 %vm863_vm5, %v5485_v45  ;;  %6690 = vrot.lane.b32.xlu0 %v15339_v53, %s11657_s10  ;;  %v5488_v53 = vsel %vm796_vm4, %v5424_v59, %v5269_v43  ;;  %v5433_v32 = vsel %vm731_vm3, %v4729_v37, %v17141_v3  ;;  %v17142_v45 = vld [vmem:[#allocation16_spill] sm:$0xff]  ;;  %v17144_v59 = vld [vmem:[#allocation13_spill] sm:$0xff] }
 0x4e5   :  { %v5273_v6 = vpop.permute.xlu1 %5272  ;;  %10980 = vmatprep.mubr.msk.f32.mxu1 %vm863_vm5, %v5486_v2  ;;  %v5434_v2 = vsel %vm731_vm3, %v4730_v20, %v17142_v45  ;;  %v6246_v3 = vld [vmem:[#allocation2 + $0x109] sm:$0xff]  ;;  %v17157_v45 = vld [vmem:[#allocation23_spill] sm:$0xff] }
 0x4e6   :  { %v5267_v0 = vpop.permute.xlu0 %5266 }
 0x4e7   :  { %v5487_v23 = vsel %vm796_vm4, %v5423_v9, %v5267_v0  ;;  %6696 = vrot.lane.b32.xlu1 %v15386_v62, %s11657_s10  ;;  %v5426_v62 = vsel %vm731_vm3, %v4722_v1, %v15485_v46  ;;  %v17143_v9 = vld [vmem:[#allocation19_spill] sm:$0xff]  ;;  %v17146_v1 = vld [vmem:[#allocation24_spill] sm:$0xff] }
 0x4e8   :  { %10981 = vmatmul.mubr.msk.f32.gmra.mrb[34].mxu1 %vm863_vm5, %v5487_v23  ;;  %6438 = vrot.lane.b32.xlu0 %v6236_v30, %s11655_s22  ;;  %v5490_v48 = vsel %vm796_vm4, %v5426_v62, %v5273_v6  ;;  %v5435_v23 = vsel %vm731_vm3, %v4731_v28, %v17144_v59  ;;  %v4732_v30 = vld [vmem:[#allocation2 + $0x270] sm:$0xff]  ;;  %v4733_v62 = vld [vmem:[#allocation2 + $0x278] sm:$0xff] }
 0x4e9   :  { %v5277_v5 = vpop.permute.xlu1 %5276  ;;  %10983 = vmatprep.mubr.msk.f32.mxu1 %vm863_vm5, %v5488_v53 }
 0x4ea   :  { %v5271_v10 = vpop.permute.xlu0 %5270 }
 0x4eb   :  { %v5489_v52 = vsel %vm796_vm4, %v5425_v31, %v5271_v10  ;;  %6444 = vrot.lane.b32.xlu1 %v6239_v19, %s11655_s22  ;;  %v6242_v10 = vld [vmem:[#allocation2 + $0xd9] sm:$0xff] }
 0x4ec   :  { %10984 = vmatmul.mubr.msk.f32.gmra.mrb[36].mxu1 %vm863_vm5, %v5489_v52  ;;  %6694 = vrot.lane.b32.xlu0 %v15353_v26, %s11657_s10  ;;  %v5492_v26 = vsel %vm796_vm4, %v5428_v17, %v5277_v5  ;;  %v5436_v5 = vsel %vm731_vm3, %v4732_v30, %v17145_v40  ;;  %v6248_v30 = vld [vmem:[#allocation2 + $0x121] sm:$0xff] }
 0x4ed   :  { %v5281_v12 = vpop.permute.xlu1 %5280  ;;  %10986 = vmatprep.mubr.msk.f32.mxu1 %vm863_vm5, %v5490_v48  ;;  %v17147_v48 = vld [vmem:[#allocation15_spill] sm:$0xff] }
 0x4ee   :  { %v5275_v46 = vpop.permute.xlu0 %5274  ;;  %v5494_v15 = vsel %vm796_vm4, %v5430_v25, %v5281_v12  ;;  %v5437_v14 = vsel %vm731_vm3, %v4733_v62, %v17147_v48  ;;  %v4734_v12 = vld [vmem:[#allocation2 + $0x288] sm:$0xff]  ;;  %v4743_v62 = vld [vmem:[#allocation2 + $0x2f0] sm:$0xff] }
 0x4ef   :  { %v5491_v4 = vsel %vm796_vm4, %v5427_v34, %v5275_v46  ;;  %6700 = vrot.lane.b32.xlu1 %v17134_v27, %s11657_s10  ;;  %v6245_v34 = vld [vmem:[#allocation2 + $0xf9] sm:$0xff]  ;;  %v5438_v46 = vsel %vm731_vm3, %v4734_v12, %v17148_v33  ;;  %v4735_v27 = vld [vmem:[#allocation2 + $0x290] sm:$0xff] }
 0x4f0   :  { %10987 = vmatmul.mubr.msk.f32.gmra.mrb[38].mxu1 %vm863_vm5, %v5491_v4  ;;  %6442 = vrot.lane.b32.xlu0 %v6238_v60, %s11655_s22  ;;  %v17149_v4 = vld [vmem:[#allocation20_spill] sm:$0xff] }
 0x4f1   :  { %v5285_v47 = vpop.permute.xlu1 %5284  ;;  %10989 = vmatprep.mubr.msk.f32.mxu1 %vm863_vm5, %v5492_v26  ;;  %v17150_v26 = vld [vmem:[#allocation17_spill] sm:$0xff] }
 0x4f2   :  { %v5279_v38 = vpop.permute.xlu0 %5278  ;;  %v5496_v50 = vsel %vm796_vm4, %v5432_v29, %v5285_v47  ;;  %v5439_v24 = vsel %vm731_vm3, %v4735_v27, %v17150_v26  ;;  %v4736_v47 = vld [vmem:[#allocation2 + $0x2a0] sm:$0xff]  ;;  %v17155_v29 = vld [vmem:[#allocation32_spill] sm:$0xff] }
 0x4f3   :  { %v5493_v42 = vsel %vm796_vm4, %v5429_v8, %v5279_v38  ;;  %6448 = vrot.lane.b32.xlu1 %v6241_v13, %s11655_s22  ;;  %v17151_v8 = vld [vmem:[#allocation31_spill] sm:$0xff]  ;;  %v17152_v13 = vld [vmem:[#allocation26_spill] sm:$0xff]  ;;  %v4745_v26 = vld [vmem:[#allocation2 + $0x308] sm:$0xff] }
 0x4f4   :  { %10990 = vmatmul.mubr.msk.f32.gmra.mrb[40].mxu1 %vm863_vm5, %v5493_v42  ;;  %6698 = vrot.lane.b32.xlu0 %v17137_v22, %s11657_s10  ;;  %v5440_v11 = vsel %vm731_vm3, %v4736_v47, %v17151_v8  ;;  %v4737_v42 = vld [vmem:[#allocation2 + $0x2a8] sm:$0xff]  ;;  %v17153_v22 = vld [vmem:[#allocation29_spill] sm:$0xff]  ;;  %v4744_v27 = vld [vmem:[#allocation2 + $0x300] sm:$0xff] }
 0x4f5   :  { %v5289_v61 = vpop.permute.xlu1 %5288  ;;  %10992 = vmatprep.mubr.msk.f32.mxu1 %vm863_vm5, %v5494_v15  ;;  %v5441_v56 = vsel %vm731_vm3, %v4737_v42, %v17153_v22  ;;  %v6255_v42 = vld [vmem:[#allocation2 + $0x171] sm:$0xff] }
 0x4f6   :  { %v5283_v55 = vpop.permute.xlu0 %5282  ;;  %v5498_v6 = vsel %vm796_vm4, %v5434_v2, %v5289_v61  ;;  %v4740_v2 = vld [vmem:[#allocation2 + $0x2d0] sm:$0xff]  ;;  %v4746_v22 = vld [vmem:[#allocation2 + $0x318] sm:$0xff] }
 0x4f7   :  { %v5495_v36 = vsel %vm796_vm4, %v5431_v18, %v5283_v55  ;;  %6704 = vrot.lane.b32.xlu1 %v17140_v63, %s11657_s10  ;;  %v4738_v55 = vld [vmem:[#allocation2 + $0x2b8] sm:$0xff]  ;;  %v4739_v63 = vld [vmem:[#allocation2 + $0x2c0] sm:$0xff] }
 0x4f8   :  { %10993 = vmatmul.mubr.msk.f32.gmra.mrb[42].mxu1 %vm863_vm5, %v5495_v36  ;;  %6446 = vrot.lane.b32.xlu0 %v6240_v49, %s11655_s22  ;;  %v5442_v36 = vsel %vm731_vm3, %v4738_v55, %v17155_v29  ;;  %v6254_v29 = vld [vmem:[#allocation2 + $0x169] sm:$0xff] }
 0x4f9   :  { %v5293_v43 = vpop.permute.xlu1 %5292  ;;  %10995 = vmatprep.mubr.msk.f32.mxu1 %vm863_vm5, %v5496_v50 }
 0x4fa   :  { %v5287_v35 = vpop.permute.xlu0 %5286  ;;  %v5500_v19 = vsel %vm796_vm4, %v5436_v5, %v5293_v43  ;;  %v17156_v43 = vld [vmem:[#allocation27_spill] sm:$0xff] }
 0x4fb   :  { %v5497_v51 = vsel %vm796_vm4, %v5433_v32, %v5287_v35  ;;  %6452 = vrot.lane.b32.xlu1 %v6243_v58, %s11655_s22  ;;  %v6249_v58 = vld [vmem:[#allocation2 + $0x129] sm:$0xff] }
 0x4fc   :  { %10996 = vmatmul.mubr.msk.f32.gmra.mrb[44].mxu1 %vm863_vm5, %v5497_v51  ;;  %6702 = vrot.lane.b32.xlu0 %v17143_v9, %s11657_s10 }
 0x4fd   :  { %v5297_v0 = vpop.permute.xlu1 %5296  ;;  %10998 = vmatprep.mubr.msk.f32.mxu1 %vm863_vm5, %v5498_v6  ;;  %v4741_v6 = vld [vmem:[#allocation2 + $0x2d8] sm:$0xff] }
 0x4fe   :  { %v5291_v53 = vpop.permute.xlu0 %5290  ;;  %v5502_v17 = vsel %vm796_vm4, %v5438_v46, %v5297_v0 }
 0x4ff   :  { %v5499_v31 = vsel %vm796_vm4, %v5435_v23, %v5291_v53  ;;  %6708 = vrot.lane.b32.xlu1 %v17146_v1, %s11657_s10  ;;  %v17158_v23 = vld [vmem:[#allocation4_spill] sm:$0xff]  ;;  %v17159_v1 = vld [vmem:[#allocation25_spill] sm:$0xff] }
 0x500   :  { %10999 = vmatmul.mubr.msk.f32.gmra.mrb[46].mxu1 %vm863_vm5, %v5499_v31  ;;  %6450 = vrot.lane.b32.xlu0 %v6242_v10, %s11655_s22  ;;  %v6251_v31 = vld [vmem:[#allocation2 + $0x141] sm:$0xff] }
 0x501   :  { %v5301_v52 = vpop.permute.xlu1 %5300  ;;  %11001 = vmatprep.mubr.msk.f32.mxu1 %vm863_vm5, %v5500_v19  ;;  %v4742_v10 = vld [vmem:[#allocation2 + $0x2e8] sm:$0xff] }
 0x502   :  { %v5295_v41 = vpop.permute.xlu0 %5294  ;;  %v5504_v25 = vsel %vm796_vm4, %v5440_v11, %v5301_v52  ;;  %v17161_v11 = vld [vmem:[#allocation6_spill] sm:$0xff] }
 0x503   :  { %v5501_v21 = vsel %vm796_vm4, %v5437_v14, %v5295_v41  ;;  %6456 = vrot.lane.b32.xlu1 %v6245_v34, %s11655_s22  ;;  %v17160_v41 = vld [vmem:[#allocation5_spill] sm:$0xff]  ;;  %v6250_v34 = vld [vmem:[#allocation2 + $0x139] sm:$0xff] }
 0x504   :  { %11002 = vmatmul.mubr.msk.f32.gmra.mrb[48].mxu1 %vm863_vm5, %v5501_v21  ;;  %6706 = vrot.lane.b32.xlu0 %v17149_v4, %s11657_s10  ;;  %v11649_v4 = vld [vmem:[#allocation2 + $0x13a] sm:$0xff] }
 0x505   :  { %v5051_v60 = vpop.permute.xlu1 %5050  ;;  %11004 = vmatprep.mubr.msk.f32.mxu1 %vm863_vm5, %v5502_v17  ;;  %v6253_v17 = vld [vmem:[#allocation2 + $0x159] sm:$0xff] }
 0x506   :  { %v5299_v44 = vpop.permute.xlu0 %5298  ;;  %v5443_v50 = vsel %vm731_vm3, %v4739_v63, %v5051_v60 }
 0x507   :  { %v5503_v38 = vsel %vm796_vm4, %v5439_v24, %v5299_v44  ;;  %6712 = vrot.lane.b32.xlu1 %v17152_v13, %s11657_s10 }
 0x508   :  { %11005 = vmatmul.mubr.msk.f32.gmra.mrb[50].mxu1 %vm863_vm5, %v5503_v38  ;;  %6454 = vrot.lane.b32.xlu0 %v6244_v16, %s11655_s22  ;;  %v6252_v38 = vld [vmem:[#allocation2 + $0x151] sm:$0xff] }
 0x509   :  { %v5307_v15 = vpop.permute.xlu1 %5306  ;;  %11007 = vmatprep.mubr.msk.f32.mxu1 %vm863_vm5, %v5504_v25 }
 0x50a   :  { %v5303_v61 = vpop.permute.xlu0 %5302  ;;  %v5507_v32 = vsel %vm796_vm4, %v5443_v50, %v5307_v15  ;;  %v11650_v15 = vld [vmem:[#allocation2 + $0x152] sm:$0xff]  ;;  %v6257_v50 = vld [vmem:[#allocation2 + $0x189] sm:$0xff] }
 0x50b   :  { %v5505_v18 = vsel %vm796_vm4, %v5441_v56, %v5303_v61  ;;  %6460 = vrot.lane.b32.xlu1 %v6247_v39, %s11655_s22  ;;  %v4747_v61 = vld [vmem:[#allocation2 + $0x320] sm:$0xff] }
 0x50c   :  { %11008 = vmatmul.mubr.msk.f32.gmra.mrb[52].mxu1 %vm863_vm5, %v5505_v18  ;;  %6710 = vrot.lane.b32.xlu0 %v17154_v54, %s11657_s10 }
 0x50d   :  { %v5055_v7 = vpop.permute.xlu1 %5054 }
 0x50e   :  { %v5305_v49 = vpop.permute.xlu0 %5304  ;;  %v5445_v0 = vsel %vm731_vm3, %v4741_v6, %v5055_v7  ;;  %v11651_v7 = vld [vmem:[#allocation2 + $0x172] sm:$0xff] }
 0x50f   :  { %v5506_v37 = vsel %vm796_vm4, %v5442_v36, %v5305_v49  ;;  %6716 = vrot.lane.b32.xlu1 %v17156_v43, %s11657_s10  ;;  %v6162_v43 = vld [vmem:[#allocation2 + $0x18] sm:$0xff] }
 0x510   :  { %11010 = vmatprep.mubr.msk.f32.mxu1 %vm863_vm5, %v5506_v37  ;;  %6458 = vrot.lane.b32.xlu0 %v6246_v3, %s11655_s22  ;;  %v11652_v37 = vld [vmem:[#allocation2 + $0x16a] sm:$0xff] }
 0x511   :  { %11011 = vmatmul.mubr.msk.f32.gmra.mrb[54].mxu1 %vm863_vm5, %v5507_v32  ;;  %v5311_v20 = vpop.permute.xlu1 %5310  ;;  %v6163_v32 = vld [vmem:[#allocation2 + $0x20] sm:$0xff] }
 0x512   :  { %v5053_v35 = vpop.permute.xlu0 %5052  ;;  %v5509_v53 = vsel %vm796_vm4, %v5445_v0, %v5311_v20  ;;  %v6259_v0 = vld [vmem:[#allocation2 + $0x1d1] sm:$0xff] }
 0x513   :  { %6464 = vrot.lane.b32.xlu1 %v6249_v58, %s11655_s22  ;;  %v5444_v9 = vsel %vm731_vm3, %v4740_v2, %v5053_v35  ;;  %v6321_v58 = vld [vmem:[#allocation2 + $0x18a] sm:$0xff] }
 0x514   :  { %6714 = vrot.lane.b32.xlu0 %v17157_v45, %s11657_s10 }
 0x515   :  { %v5059_v51 = vpop.permute.xlu1 %5058 }
 0x516   :  { %v5309_v28 = vpop.permute.xlu0 %5308  ;;  %v5447_v14 = vsel %vm731_vm3, %v4743_v62, %v5059_v51  ;;  %v6256_v51 = vld [vmem:[#allocation2 + $0x181] sm:$0xff] }
 0x517   :  { %v5508_v59 = vsel %vm796_vm4, %v5444_v9, %v5309_v28  ;;  %6720 = vrot.lane.b32.xlu1 %v17158_v23, %s11657_s10  ;;  %v6164_v23 = vld [vmem:[#allocation2 + $0x30] sm:$0xff] }
 0x518   :  { %11013 = vmatprep.mubr.msk.f32.mxu1 %vm863_vm5, %v5508_v59  ;;  %6462 = vrot.lane.b32.xlu0 %v6248_v30, %s11655_s22  ;;  %v6320_v59 = vld [vmem:[#allocation2 + $0x182] sm:$0xff] }
 0x519   :  { %11014 = vmatmul.mubr.msk.f32.gmra.mrb[56].mxu1 %vm863_vm5, %v5509_v53  ;;  %v5315_v40 = vpop.permute.xlu1 %5314  ;;  %v6165_v53 = vld [vmem:[#allocation2 + $0x38] sm:$0xff] }
 0x51a   :  { %v5057_v5 = vpop.permute.xlu0 %5056  ;;  %v5511_v33 = vsel %vm796_vm4, %v5447_v14, %v5315_v40  ;;  %v6261_v14 = vld [vmem:[#allocation2 + $0x1e9] sm:$0xff] }
 0x51b   :  { %6468 = vrot.lane.b32.xlu1 %v6251_v31, %s11655_s22  ;;  %v5446_v52 = vsel %vm731_vm3, %v4742_v10, %v5057_v5  ;;  %v11653_v10 = vld [vmem:[#allocation2 + $0x1d2] sm:$0xff] }
 0x51c   :  { %6718 = vrot.lane.b32.xlu0 %v17159_v1, %s11657_s10 }
 0x51d   :  { %v5063_v19 = vpop.permute.xlu1 %5062 }
 0x51e   :  { %v5313_v48 = vpop.permute.xlu0 %5312  ;;  %v5449_v44 = vsel %vm731_vm3, %v4745_v26, %v5063_v19  ;;  %v6258_v19 = vld [vmem:[#allocation2 + $0x1c9] sm:$0xff] }
 0x51f   :  { %v5510_v12 = vsel %vm796_vm4, %v5446_v52, %v5313_v48  ;;  %6724 = vrot.lane.b32.xlu1 %v17160_v41, %s11657_s10  ;;  %v6166_v41 = vld [vmem:[#allocation2 + $0x48] sm:$0xff] }
 0x520   :  { %11016 = vmatprep.mubr.msk.f32.mxu1 %vm863_vm5, %v5510_v12  ;;  %6466 = vrot.lane.b32.xlu0 %v6250_v34, %s11655_s22  ;;  %v6322_v12 = vld [vmem:[#allocation2 + $0x1ca] sm:$0xff] }
 0x521   :  { %11017 = vmatmul.mubr.msk.f32.gmra.mrb[58].mxu1 %vm863_vm5, %v5511_v33  ;;  %v5319_v46 = vpop.permute.xlu1 %5318  ;;  %v6167_v33 = vld [vmem:[#allocation2 + $0x50] sm:$0xff] }
 0x522   :  { %v5061_v21 = vpop.permute.xlu0 %5060  ;;  %v5513_v13 = vsel %vm796_vm4, %v5449_v44, %v5319_v46  ;;  %v6263_v44 = vld [vmem:[#allocation2 + $0x201] sm:$0xff] }
 0x523   :  { %6472 = vrot.lane.b32.xlu1 %v6253_v17, %s11655_s22  ;;  %v5448_v24 = vsel %vm731_vm3, %v4744_v27, %v5061_v21  ;;  %v11654_v27 = vld [vmem:[#allocation2 + $0x1ea] sm:$0xff] }
 0x524   :  { %6722 = vrot.lane.b32.xlu0 %v11649_v4, %s11657_s10 }
 0x525   :  { %v5067_v60 = vpop.permute.xlu1 %5066 }
 0x526   :  { %v5317_v47 = vpop.permute.xlu0 %5316  ;;  %v5451_v54 = vsel %vm731_vm3, %v4747_v61, %v5067_v60  ;;  %v6260_v60 = vld [vmem:[#allocation2 + $0x1e1] sm:$0xff] }
 0x527   :  { %v5512_v8 = vsel %vm796_vm4, %v5448_v24, %v5317_v47  ;;  %6728 = vrot.lane.b32.xlu1 %v17161_v11, %s11657_s10  ;;  %v6168_v11 = vld [vmem:[#allocation2 + $0x60] sm:$0xff] }
 0x528   :  { %11019 = vmatprep.mubr.msk.f32.mxu1 %vm863_vm5, %v5512_v8  ;;  %6470 = vrot.lane.b32.xlu0 %v6252_v38, %s11655_s22  ;;  %v6324_v8 = vld [vmem:[#allocation2 + $0x1e2] sm:$0xff] }
 0x529   :  { %11020 = vmatmul.mubr.msk.f32.gmra.mrb[60].mxu1 %vm863_vm5, %v5513_v13  ;;  %v5323_v16 = vpop.permute.xlu1 %5322  ;;  %v6169_v13 = vld [vmem:[#allocation2 + $0x68] sm:$0xff] }
 0x52a   :  { %v5065_v25 = vpop.permute.xlu0 %5064  ;;  %v5515_v36 = vsel %vm796_vm4, %v5451_v54, %v5323_v16  ;;  %v6265_v54 = vld [vmem:[#allocation2 + $0x219] sm:$0xff] }
 0x52b   :  { %6476 = vrot.lane.b32.xlu1 %v6255_v42, %s11655_s22  ;;  %v5450_v39 = vsel %vm731_vm3, %v4746_v22, %v5065_v25  ;;  %v6327_v42 = vld [vmem:[#allocation2 + $0x202] sm:$0xff] }
 0x52c   :  { %6726 = vrot.lane.b32.xlu0 %v11650_v15, %s11657_s10 }
 0x52d   :  { %v6421_v56 = vpop.permute.xlu1 %6420 }
 0x52e   :  { %v5321_v18 = vpop.permute.xlu0 %5320  ;;  %v6867_v45 = vsel %vm731_vm3, %v6163_v32, %v6421_v56  ;;  %v6262_v56 = vld [vmem:[#allocation2 + $0x1f9] sm:$0xff] }
 0x52f   :  { %v5514_v55 = vsel %vm796_vm4, %v5450_v39, %v5321_v18  ;;  %6732 = vrot.lane.b32.xlu1 %v11651_v7, %s11657_s10  ;;  %v6170_v7 = vld [vmem:[#allocation2 + $0x78] sm:$0xff] }
 0x530   :  { %6474 = vrot.lane.b32.xlu0 %v6254_v29, %s11655_s22  ;;  %11022 = vmatprep.mubr.msk.f32.mxu1 %vm863_vm5, %v5514_v55  ;;  %v6326_v55 = vld [vmem:[#allocation2 + $0x1fa] sm:$0xff] }
 0x531   :  { %v6677_v63 = vpop.permute.xlu1 %6676  ;;  %11023 = vmatmul.mubr.msk.f32.gmra.mrb[62].mxu1 %vm863_vm5, %v5515_v36  ;;  %v6171_v36 = vld [vmem:[#allocation2 + $0x80] sm:$0xff] }
 0x532   :  { %v6419_v49 = vpop.permute.xlu0 %6418  ;;  %v6931_v6 = vsel %vm796_vm4, %v6867_v45, %v6677_v63  ;;  %v6328_v45 = vld [vmem:[#allocation2 + $0x212] sm:$0xff] }
 0x533   :  { %6480 = vrot.lane.b32.xlu1 %v6257_v50, %s11655_s22  ;;  %v6866_v20 = vsel %vm731_vm3, %v6162_v43, %v6419_v49  ;;  %v6329_v50 = vld [vmem:[#allocation2 + $0x21a] sm:$0xff] }
 0x534   :  { %6730 = vrot.lane.b32.xlu0 %v11652_v37, %s11657_s10 }
 0x535   :  { %v6425_v3 = vpop.permute.xlu1 %6424 }
 0x536   :  { %v6675_v35 = vpop.permute.xlu0 %6674  ;;  %v6869_v31 = vsel %vm731_vm3, %v6165_v53, %v6425_v3  ;;  %v6264_v3 = vld [vmem:[#allocation2 + $0x211] sm:$0xff] }
 0x537   :  { %v6930_v2 = vsel %vm796_vm4, %v6866_v20, %v6675_v35  ;;  %6736 = vrot.lane.b32.xlu1 %v6321_v58, %s11657_s10  ;;  %v6267_v58 = vld [vmem:[#allocation2 + $0x231] sm:$0xff] }
 0x538   :  { %6478 = vrot.lane.b32.xlu0 %v6256_v51, %s11655_s22  ;;  %11029 = vmatprep.mubr.msk.f32.mxu1 %vm863_vm5, %v6930_v2  ;;  %v6172_v2 = vld [vmem:[#allocation2 + $0x90] sm:$0xff] }
 0x539   :  { %v6681_v9 = vpop.permute.xlu1 %6680  ;;  %11030 = vmatmul.mubr.msk.f32.vlgmr.msra.gmra.mrb[0].mxu1 %vm863_vm5, %v6931_v6  ;;  %v6173_v6 = vld [vmem:[#allocation2 + $0x98] sm:$0xff] }
 0x53a   :  { %v6423_v28 = vpop.permute.xlu0 %6422  ;;  %v6933_v62 = vsel %vm796_vm4, %v6869_v31, %v6681_v9  ;;  %v6269_v31 = vld [vmem:[#allocation2 + $0x249] sm:$0xff] }
 0x53b   :  { %6484 = vrot.lane.b32.xlu1 %v6259_v0, %s11655_s22  ;;  %v6868_v40 = vsel %vm731_vm3, %v6164_v23, %v6423_v28  ;;  %v6331_v0 = vld [vmem:[#allocation2 + $0x232] sm:$0xff] }
 0x53c   :  { %6734 = vrot.lane.b32.xlu0 %v6320_v59, %s11657_s10 }
 0x53d   :  { %v6429_v30 = vpop.permute.xlu1 %6428 }
 0x53e   :  { %v6679_v5 = vpop.permute.xlu0 %6678  ;;  %v6871_v17 = vsel %vm731_vm3, %v6167_v33, %v6429_v30  ;;  %v6266_v30 = vld [vmem:[#allocation2 + $0x229] sm:$0xff] }
 0x53f   :  { %v6932_v1 = vsel %vm796_vm4, %v6868_v40, %v6679_v5  ;;  %6740 = vrot.lane.b32.xlu1 %v11653_v10, %s11657_s10  ;;  %v6174_v10 = vld [vmem:[#allocation2 + $0xa8] sm:$0xff] }
 0x540   :  { %6482 = vrot.lane.b32.xlu0 %v6258_v19, %s11655_s22  ;;  %11032 = vmatprep.mubr.msk.f32.mxu1 %vm863_vm5, %v6932_v1  ;;  %v6330_v1 = vld [vmem:[#allocation2 + $0x22a] sm:$0xff] }
 0x541   :  { %v6685_v52 = vpop.permute.xlu1 %6684  ;;  %11033 = vmatmul.mubr.msk.f32.gmra.mrb[2].mxu1 %vm863_vm5, %v6933_v62  ;;  %v6175_v62 = vld [vmem:[#allocation2 + $0xb0] sm:$0xff] }
 0x542   :  { %v6427_v48 = vpop.permute.xlu0 %6426  ;;  %v6935_v26 = vsel %vm796_vm4, %v6871_v17, %v6685_v52  ;;  %v6271_v17 = vld [vmem:[#allocation2 + $0x261] sm:$0xff] }
 0x543   :  { %6488 = vrot.lane.b32.xlu1 %v6261_v14, %s11655_s22  ;;  %v6870_v46 = vsel %vm731_vm3, %v6166_v41, %v6427_v48  ;;  %v6333_v14 = vld [vmem:[#allocation2 + $0x24a] sm:$0xff] }
 0x544   :  { %6738 = vrot.lane.b32.xlu0 %v6322_v12, %s11657_s10 }
 0x545   :  { %v6433_v34 = vpop.permute.xlu1 %6432 }
 0x546   :  { %v6683_v21 = vpop.permute.xlu0 %6682  ;;  %v6873_v15 = vsel %vm731_vm3, %v6169_v13, %v6433_v34  ;;  %v6268_v34 = vld [vmem:[#allocation2 + $0x241] sm:$0xff] }
 0x547   :  { %v6934_v4 = vsel %vm796_vm4, %v6870_v46, %v6683_v21  ;;  %6744 = vrot.lane.b32.xlu1 %v11654_v27, %s11657_s10  ;;  %v6176_v27 = vld [vmem:[#allocation2 + $0xc0] sm:$0xff] }
 0x548   :  { %6486 = vrot.lane.b32.xlu0 %v6260_v60, %s11655_s22  ;;  %11035 = vmatprep.mubr.msk.f32.mxu1 %vm863_vm5, %v6934_v4  ;;  %v6332_v4 = vld [vmem:[#allocation2 + $0x242] sm:$0xff] }
 0x549   :  { %v6689_v24 = vpop.permute.xlu1 %6688  ;;  %11036 = vmatmul.mubr.msk.f32.gmra.mrb[4].mxu1 %vm863_vm5, %v6935_v26  ;;  %v6177_v26 = vld [vmem:[#allocation2 + $0xc8] sm:$0xff] }
 0x54a   :  { %v6431_v47 = vpop.permute.xlu0 %6430  ;;  %v6937_v61 = vsel %vm796_vm4, %v6873_v15, %v6689_v24  ;;  %v6334_v15 = vld [vmem:[#allocation2 + $0x25a] sm:$0xff] }
 0x54b   :  { %6492 = vrot.lane.b32.xlu1 %v6263_v44, %s11655_s22  ;;  %v6872_v16 = vsel %vm731_vm3, %v6168_v11, %v6431_v47  ;;  %v6335_v44 = vld [vmem:[#allocation2 + $0x262] sm:$0xff] }
 0x54c   :  { %6742 = vrot.lane.b32.xlu0 %v6324_v8, %s11657_s10 }
 0x54d   :  { %v6437_v38 = vpop.permute.xlu1 %6436 }
 0x54e   :  { %v6687_v25 = vpop.permute.xlu0 %6686  ;;  %v6875_v37 = vsel %vm731_vm3, %v6171_v36, %v6437_v38  ;;  %v6270_v38 = vld [vmem:[#allocation2 + $0x259] sm:$0xff] }
 0x54f   :  { %v6936_v22 = vsel %vm796_vm4, %v6872_v16, %v6687_v25  ;;  %6748 = vrot.lane.b32.xlu1 %v6327_v42, %s11657_s10  ;;  %v6273_v42 = vld [vmem:[#allocation2 + $0x279] sm:$0xff] }
 0x550   :  { %6490 = vrot.lane.b32.xlu0 %v6262_v56, %s11655_s22  ;;  %11038 = vmatprep.mubr.msk.f32.mxu1 %vm863_vm5, %v6936_v22  ;;  %v6178_v22 = vld [vmem:[#allocation2 + $0xd8] sm:$0xff] }
 0x551   :  { %v6693_v39 = vpop.permute.xlu1 %6692  ;;  %11039 = vmatmul.mubr.msk.f32.gmra.mrb[6].mxu1 %vm863_vm5, %v6937_v61  ;;  %v6179_v61 = vld [vmem:[#allocation2 + $0xe0] sm:$0xff] }
 0x552   :  { %v6435_v18 = vpop.permute.xlu0 %6434  ;;  %v6939_v32 = vsel %vm796_vm4, %v6875_v37, %v6693_v39  ;;  %v6336_v37 = vld [vmem:[#allocation2 + $0x272] sm:$0xff] }
 0x553   :  { %6496 = vrot.lane.b32.xlu1 %v6265_v54, %s11655_s22  ;;  %v6874_v63 = vsel %vm731_vm3, %v6170_v7, %v6435_v18  ;;  %v6337_v54 = vld [vmem:[#allocation2 + $0x27a] sm:$0xff] }
 0x554   :  { %6746 = vrot.lane.b32.xlu0 %v6326_v55, %s11657_s10 }
 0x555   :  { %v6441_v29 = vpop.permute.xlu1 %6440 }
 0x556   :  { %v6691_v49 = vpop.permute.xlu0 %6690  ;;  %v6877_v59 = vsel %vm731_vm3, %v6173_v6, %v6441_v29  ;;  %v6272_v29 = vld [vmem:[#allocation2 + $0x271] sm:$0xff] }
 0x557   :  { %v6938_v43 = vsel %vm796_vm4, %v6874_v63, %v6691_v49  ;;  %6752 = vrot.lane.b32.xlu1 %v6329_v50, %s11657_s10  ;;  %v6275_v50 = vld [vmem:[#allocation2 + $0x291] sm:$0xff] }
 0x558   :  { %6494 = vrot.lane.b32.xlu0 %v6264_v3, %s11655_s22  ;;  %11041 = vmatprep.mubr.msk.f32.mxu1 %vm863_vm5, %v6938_v43  ;;  %v6180_v43 = vld [vmem:[#allocation2 + $0xf0] sm:$0xff] }
 0x559   :  { %v6697_v20 = vpop.permute.xlu1 %6696  ;;  %11042 = vmatmul.mubr.msk.f32.gmra.mrb[8].mxu1 %vm863_vm5, %v6939_v32  ;;  %v6181_v32 = vld [vmem:[#allocation2 + $0xf8] sm:$0xff] }
 0x55a   :  { %v6439_v35 = vpop.permute.xlu0 %6438  ;;  %v6941_v53 = vsel %vm796_vm4, %v6877_v59, %v6697_v20  ;;  %v6338_v59 = vld [vmem:[#allocation2 + $0x28a] sm:$0xff] }
 0x55b   :  { %6500 = vrot.lane.b32.xlu1 %v6267_v58, %s11655_s22  ;;  %v6876_v9 = vsel %vm731_vm3, %v6172_v2, %v6439_v35  ;;  %v6339_v58 = vld [vmem:[#allocation2 + $0x292] sm:$0xff] }
 0x55c   :  { %6750 = vrot.lane.b32.xlu0 %v6328_v45, %s11657_s10 }
 0x55d   :  { %v6445_v51 = vpop.permute.xlu1 %6444 }
 0x55e   :  { %v6695_v28 = vpop.permute.xlu0 %6694  ;;  %v6879_v12 = vsel %vm731_vm3, %v6175_v62, %v6445_v51  ;;  %v6274_v51 = vld [vmem:[#allocation2 + $0x289] sm:$0xff] }
 0x55f   :  { %v6940_v23 = vsel %vm796_vm4, %v6876_v9, %v6695_v28  ;;  %6756 = vrot.lane.b32.xlu1 %v6331_v0, %s11657_s10  ;;  %v6277_v0 = vld [vmem:[#allocation2 + $0x2a9] sm:$0xff] }
 0x560   :  { %6498 = vrot.lane.b32.xlu0 %v6266_v30, %s11655_s22  ;;  %11044 = vmatprep.mubr.msk.f32.mxu1 %vm863_vm5, %v6940_v23  ;;  %v6182_v23 = vld [vmem:[#allocation2 + $0x108] sm:$0xff] }
 0x561   :  { %v6701_v40 = vpop.permute.xlu1 %6700  ;;  %11045 = vmatmul.mubr.msk.f32.gmra.mrb[10].mxu1 %vm863_vm5, %v6941_v53  ;;  %v6183_v53 = vld [vmem:[#allocation2 + $0x110] sm:$0xff] }
 0x562   :  { %v6443_v5 = vpop.permute.xlu0 %6442  ;;  %v6943_v33 = vsel %vm796_vm4, %v6879_v12, %v6701_v40  ;;  %v6340_v12 = vld [vmem:[#allocation2 + $0x2a2] sm:$0xff] }
 0x563   :  { %6504 = vrot.lane.b32.xlu1 %v6269_v31, %s11655_s22  ;;  %v6878_v52 = vsel %vm731_vm3, %v6174_v10, %v6443_v5  ;;  %v6341_v31 = vld [vmem:[#allocation2 + $0x2aa] sm:$0xff] }
 0x564   :  { %6754 = vrot.lane.b32.xlu0 %v6330_v1, %s11657_s10 }
 0x565   :  { %v6449_v19 = vpop.permute.xlu1 %6448 }
 0x566   :  { %v6699_v48 = vpop.permute.xlu0 %6698  ;;  %v6881_v8 = vsel %vm731_vm3, %v6177_v26, %v6449_v19  ;;  %v6276_v19 = vld [vmem:[#allocation2 + $0x2a1] sm:$0xff] }
 0x567   :  { %v6942_v41 = vsel %vm796_vm4, %v6878_v52, %v6699_v48  ;;  %6760 = vrot.lane.b32.xlu1 %v6333_v14, %s11657_s10  ;;  %v6279_v14 = vld [vmem:[#allocation2 + $0x2c1] sm:$0xff] }
 0x568   :  { %6502 = vrot.lane.b32.xlu0 %v6268_v34, %s11655_s22  ;;  %11047 = vmatprep.mubr.msk.f32.mxu1 %vm863_vm5, %v6942_v41  ;;  %v6184_v41 = vld [vmem:[#allocation2 + $0x120] sm:$0xff] }
 0x569   :  { %v6705_v46 = vpop.permute.xlu1 %6704  ;;  %11048 = vmatmul.mubr.msk.f32.gmra.mrb[12].mxu1 %vm863_vm5, %v6943_v33  ;;  %v6185_v33 = vld [vmem:[#allocation2 + $0x128] sm:$0xff] }
 0x56a   :  { %v6447_v21 = vpop.permute.xlu0 %6446  ;;  %v6945_v13 = vsel %vm796_vm4, %v6881_v8, %v6705_v46  ;;  %v6342_v8 = vld [vmem:[#allocation2 + $0x2ba] sm:$0xff] }
 0x56b   :  { %6508 = vrot.lane.b32.xlu1 %v6271_v17, %s11655_s22  ;;  %v6880_v24 = vsel %vm731_vm3, %v6176_v27, %v6447_v21  ;;  %v6343_v17 = vld [vmem:[#allocation2 + $0x2c2] sm:$0xff] }
 0x56c   :  { %6758 = vrot.lane.b32.xlu0 %v6332_v4, %s11657_s10 }
 0x56d   :  { %v6453_v60 = vpop.permute.xlu1 %6452 }
 0x56e   :  { %v6703_v47 = vpop.permute.xlu0 %6702  ;;  %v6883_v55 = vsel %vm731_vm3, %v6179_v61, %v6453_v60  ;;  %v6278_v60 = vld [vmem:[#allocation2 + $0x2b9] sm:$0xff] }
 0x56f   :  { %v6944_v11 = vsel %vm796_vm4, %v6880_v24, %v6703_v47  ;;  %6764 = vrot.lane.b32.xlu1 %v6335_v44, %s11657_s10  ;;  %v6281_v44 = vld [vmem:[#allocation2 + $0x2d9] sm:$0xff] }
 0x570   :  { %6506 = vrot.lane.b32.xlu0 %v6270_v38, %s11655_s22  ;;  %11050 = vmatprep.mubr.msk.f32.mxu1 %vm863_vm5, %v6944_v11  ;;  %v6186_v11 = vld [vmem:[#allocation2 + $0x138] sm:$0xff] }
 0x571   :  { %v6709_v16 = vpop.permute.xlu1 %6708  ;;  %11051 = vmatmul.mubr.msk.f32.gmra.mrb[14].mxu1 %vm863_vm5, %v6945_v13  ;;  %v6187_v13 = vld [vmem:[#allocation2 + $0x140] sm:$0xff] }
 0x572   :  { %v6451_v25 = vpop.permute.xlu0 %6450  ;;  %v6947_v36 = vsel %vm796_vm4, %v6883_v55, %v6709_v16  ;;  %v6344_v55 = vld [vmem:[#allocation2 + $0x2d2] sm:$0xff] }
 0x573   :  { %6512 = vrot.lane.b32.xlu1 %v6273_v42, %s11655_s22  ;;  %v6882_v39 = vsel %vm731_vm3, %v6178_v22, %v6451_v25  ;;  %v6345_v42 = vld [vmem:[#allocation2 + $0x2da] sm:$0xff] }
 0x574   :  { %6762 = vrot.lane.b32.xlu0 %v6334_v15, %s11657_s10 }
 0x575   :  { %v6457_v56 = vpop.permute.xlu1 %6456 }
 0x576   :  { %v6707_v18 = vpop.permute.xlu0 %6706  ;;  %v6885_v45 = vsel %vm731_vm3, %v6181_v32, %v6457_v56  ;;  %v6280_v56 = vld [vmem:[#allocation2 + $0x2d1] sm:$0xff] }
 0x577   :  { %v6946_v7 = vsel %vm796_vm4, %v6882_v39, %v6707_v18  ;;  %6768 = vrot.lane.b32.xlu1 %v6337_v54, %s11657_s10  ;;  %v6283_v54 = vld [vmem:[#allocation2 + $0x2f1] sm:$0xff] }
 0x578   :  { %6510 = vrot.lane.b32.xlu0 %v6272_v29, %s11655_s22  ;;  %11053 = vmatprep.mubr.msk.f32.mxu1 %vm863_vm5, %v6946_v7  ;;  %v6188_v7 = vld [vmem:[#allocation2 + $0x150] sm:$0xff] }
 0x579   :  { %v6713_v63 = vpop.permute.xlu1 %6712  ;;  %11054 = vmatmul.mubr.msk.f32.gmra.mrb[16].mxu1 %vm863_vm5, %v6947_v36  ;;  %v6189_v36 = vld [vmem:[#allocation2 + $0x158] sm:$0xff] }
 0x57a   :  { %v6455_v49 = vpop.permute.xlu0 %6454  ;;  %v6949_v6 = vsel %vm796_vm4, %v6885_v45, %v6713_v63  ;;  %v6346_v45 = vld [vmem:[#allocation2 + $0x2ea] sm:$0xff] }
 0x57b   :  { %6516 = vrot.lane.b32.xlu1 %v6275_v50, %s11655_s22  ;;  %v6884_v20 = vsel %vm731_vm3, %v6180_v43, %v6455_v49  ;;  %v6347_v50 = vld [vmem:[#allocation2 + $0x2f2] sm:$0xff] }
 0x57c   :  { %6766 = vrot.lane.b32.xlu0 %v6336_v37, %s11657_s10 }
 0x57d   :  { %v6461_v3 = vpop.permute.xlu1 %6460 }
 0x57e   :  { %v6711_v35 = vpop.permute.xlu0 %6710  ;;  %v6887_v1 = vsel %vm731_vm3, %v6183_v53, %v6461_v3  ;;  %v6282_v3 = vld [vmem:[#allocation2 + $0x2e9] sm:$0xff] }
 0x57f   :  { %v6948_v2 = vsel %vm796_vm4, %v6884_v20, %v6711_v35  ;;  %6772 = vrot.lane.b32.xlu1 %v6339_v58, %s11657_s10  ;;  %v6285_v58 = vld [vmem:[#allocation2 + $0x309] sm:$0xff] }
 0x580   :  { %6514 = vrot.lane.b32.xlu0 %v6274_v51, %s11655_s22  ;;  %11056 = vmatprep.mubr.msk.f32.mxu1 %vm863_vm5, %v6948_v2  ;;  %v6190_v2 = vld [vmem:[#allocation2 + $0x168] sm:$0xff] }
 0x581   :  { %v6717_v9 = vpop.permute.xlu1 %6716  ;;  %11057 = vmatmul.mubr.msk.f32.gmra.mrb[18].mxu1 %vm863_vm5, %v6949_v6  ;;  %v6191_v6 = vld [vmem:[#allocation2 + $0x170] sm:$0xff] }
 0x582   :  { %v6459_v28 = vpop.permute.xlu0 %6458  ;;  %v6951_v62 = vsel %vm796_vm4, %v6887_v1, %v6717_v9  ;;  %v6348_v1 = vld [vmem:[#allocation2 + $0x302] sm:$0xff] }
 0x583   :  { %6520 = vrot.lane.b32.xlu1 %v6277_v0, %s11655_s22  ;;  %v6886_v40 = vsel %vm731_vm3, %v6182_v23, %v6459_v28  ;;  %v6349_v0 = vld [vmem:[#allocation2 + $0x30a] sm:$0xff] }
 0x584   :  { %6770 = vrot.lane.b32.xlu0 %v6338_v59, %s11657_s10 }
 0x585   :  { %v6465_v30 = vpop.permute.xlu1 %6464 }
 0x586   :  { %v6715_v5 = vpop.permute.xlu0 %6714  ;;  %v6889_v4 = vsel %vm731_vm3, %v6185_v33, %v6465_v30  ;;  %v6284_v30 = vld [vmem:[#allocation2 + $0x301] sm:$0xff] }
 0x587   :  { %v6950_v10 = vsel %vm796_vm4, %v6886_v40, %v6715_v5  ;;  %6776 = vrot.lane.b32.xlu1 %v6341_v31, %s11657_s10  ;;  %v6287_v31 = vld [vmem:[#allocation2 + $0x321] sm:$0xff] }
 0x588   :  { %6518 = vrot.lane.b32.xlu0 %v6276_v19, %s11655_s22  ;;  %11059 = vmatprep.mubr.msk.f32.mxu1 %vm863_vm5, %v6950_v10  ;;  %v6192_v10 = vld [vmem:[#allocation2 + $0x180] sm:$0xff] }
 0x589   :  { %v6721_v52 = vpop.permute.xlu1 %6720  ;;  %11060 = vmatmul.mubr.msk.f32.gmra.mrb[20].mxu1 %vm863_vm5, %v6951_v62  ;;  %v6193_v62 = vld [vmem:[#allocation2 + $0x188] sm:$0xff] }
 0x58a   :  { %v6463_v48 = vpop.permute.xlu0 %6462  ;;  %v6953_v26 = vsel %vm796_vm4, %v6889_v4, %v6721_v52  ;;  %v6350_v4 = vld [vmem:[#allocation2 + $0x31a] sm:$0xff] }
 0x58b   :  { %6524 = vrot.lane.b32.xlu1 %v6279_v14, %s11655_s22  ;;  %v6888_v46 = vsel %vm731_vm3, %v6184_v41, %v6463_v48  ;;  %v6351_v14 = vld [vmem:[#allocation2 + $0x322] sm:$0xff] }
 0x58c   :  { %6774 = vrot.lane.b32.xlu0 %v6340_v12, %s11657_s10 }
 0x58d   :  { %v6469_v34 = vpop.permute.xlu1 %6468 }
 0x58e   :  { %v6719_v21 = vpop.permute.xlu0 %6718  ;;  %v6891_v15 = vsel %vm731_vm3, %v6187_v13, %v6469_v34  ;;  %v6286_v34 = vld [vmem:[#allocation2 + $0x319] sm:$0xff] }
 0x58f   :  { %v6952_v27 = vsel %vm796_vm4, %v6888_v46, %v6719_v21  ;;  %6780 = vrot.lane.b32.xlu1 %v6343_v17, %s11657_s10  ;;  %v6289_v17 = vld [vmem:[#allocation2 + $0x339] sm:$0xff] }
 0x590   :  { %6522 = vrot.lane.b32.xlu0 %v6278_v60, %s11655_s22  ;;  %11062 = vmatprep.mubr.msk.f32.mxu1 %vm863_vm5, %v6952_v27  ;;  %v10098_v27 = vld [vmem:[%s17003_s2 + $0x20] sm:$0xff]  ;;  %v10099_v60 = vld [vmem:[%s17003_s2 + $0x28] sm:$0xf] }
 0x591   :  { %v6725_v24 = vpop.permute.xlu1 %6724  ;;  %11063 = vmatmul.mubr.msk.f32.gmra.mrb[22].mxu1 %vm863_vm5, %v6953_v26  ;;  %v11255_v26 = vpack.c.bf16 %v10099_v60, %v10098_v27  ;;  %v7777_v27 = vld [vmem:[#allocation2 + $0x82] sm:$0xff] }
 0x592   :  { %v6467_v47 = vpop.permute.xlu0 %6466  ;;  %v6955_v61 = vsel %vm796_vm4, %v6891_v15, %v6725_v24  ;;  %v6194_v24 = vld [vmem:[#allocation2 + $0x1c8] sm:$0xff] }
 0x593   :  { %6528 = vrot.lane.b32.xlu1 %v6281_v44, %s11655_s22  ;;  %v6890_v16 = vsel %vm731_vm3, %v6186_v11, %v6467_v47  ;;  %v6195_v44 = vld [vmem:[#allocation2 + $0x1d0] sm:$0xff]  ;;  %11257 = vmatprep.subr.msk.bf16.mxu1 %vm11963_vm2, %v11255_v26 }
 0x594   :  { %6778 = vrot.lane.b32.xlu0 %v6342_v8, %s11657_s10  ;;  %11260 = vmatpush3.bf16.msk.msra.mxu1 %vm11963_vm2, %v11255_v26 }
 0x595   :  { %v6473_v38 = vpop.permute.xlu1 %6472 }
 0x596   :  { %v6723_v25 = vpop.permute.xlu0 %6722  ;;  %v6893_v37 = vsel %vm731_vm3, %v6189_v36, %v6473_v38  ;;  %v6353_v38 = vld [vmem:[#allocation2 + $0x33a] sm:$0xff] }
 0x597   :  { %v6954_v22 = vsel %vm796_vm4, %v6890_v16, %v6723_v25  ;;  %6784 = vrot.lane.b32.xlu1 %v6345_v42, %s11657_s10  ;;  %v6288_v25 = vld [vmem:[#allocation2 + $0x331] sm:$0xff] }
 0x598   :  { %6526 = vrot.lane.b32.xlu0 %v6280_v56, %s11655_s22  ;;  %11065 = vmatprep.mubr.msk.f32.mxu1 %vm863_vm5, %v6954_v22  ;;  %v7707_v56 = vld [vmem:[#allocation2 + $0x39] sm:$0xff] }
 0x599   :  { %v6729_v39 = vpop.permute.xlu1 %6728  ;;  %11066 = vmatmul.mubr.msk.f32.gmra.mrb[24].mxu1 %vm863_vm5, %v6955_v61  ;;  %v6352_v61 = vld [vmem:[#allocation2 + $0x332] sm:$0xff] }
 0x59a   :  { %v6471_v18 = vpop.permute.xlu0 %6470  ;;  %v6957_v32 = vsel %vm796_vm4, %v6893_v37, %v6729_v39  ;;  %v6196_v39 = vld [vmem:[#allocation2 + $0x1e0] sm:$0xff] }
 0x59b   :  { %6532 = vrot.lane.b32.xlu1 %v6283_v54, %s11655_s22  ;;  %v6892_v63 = vsel %vm731_vm3, %v6188_v7, %v6471_v18  ;;  %v7771_v7 = vld [vmem:[#allocation2 + $0x3a] sm:$0xff] }
 0x59c   :  { %6782 = vrot.lane.b32.xlu0 %v6344_v55, %s11657_s10 }
 0x59d   :  { %v6477_v29 = vpop.permute.xlu1 %6476 }
 0x59e   :  { %v6727_v49 = vpop.permute.xlu0 %6726  ;;  %v6895_v59 = vsel %vm731_vm3, %v6191_v6, %v6477_v29 }
 0x59f   :  { %v6956_v43 = vsel %vm796_vm4, %v6892_v63, %v6727_v49  ;;  %6788 = vrot.lane.b32.xlu1 %v6347_v50, %s11657_s10  ;;  %v7706_v63 = vld [vmem:[#allocation2 + $0x31] sm:$0xff] }
 0x5a0   :  { %6530 = vrot.lane.b32.xlu0 %v6282_v3, %s11655_s22  ;;  %11068 = vmatprep.mubr.msk.f32.mxu1 %vm863_vm5, %v6956_v43  ;;  %v7709_v43 = vld [vmem:[#allocation2 + $0x51] sm:$0xff] }
 0x5a1   :  { %v6733_v20 = vpop.permute.xlu1 %6732  ;;  %11069 = vmatmul.mubr.msk.f32.gmra.mrb[26].mxu1 %vm863_vm5, %v6957_v32  ;;  %v7770_v3 = vld [vmem:[#allocation2 + $0x32] sm:$0xff] }
 0x5a2   :  { %v6475_v35 = vpop.permute.xlu0 %6474  ;;  %v6959_v53 = vsel %vm796_vm4, %v6895_v59, %v6733_v20  ;;  %v6198_v32 = vld [vmem:[#allocation2 + $0x1f8] sm:$0xff] }
 0x5a3   :  { %6536 = vrot.lane.b32.xlu1 %v6285_v58, %s11655_s22  ;;  %v6894_v9 = vsel %vm731_vm3, %v6190_v2, %v6475_v35  ;;  %v6199_v35 = vld [vmem:[#allocation2 + $0x200] sm:$0xff]  ;;  %v7773_v2 = vld [vmem:[#allocation2 + $0x52] sm:$0xff] }
 0x5a4   :  { %6786 = vrot.lane.b32.xlu0 %v6346_v45, %s11657_s10 }
 0x5a5   :  { %v6481_v51 = vpop.permute.xlu1 %6480 }
 0x5a6   :  { %v6731_v28 = vpop.permute.xlu0 %6730  ;;  %v6897_v12 = vsel %vm731_vm3, %v6193_v62, %v6481_v51 }
 0x5a7   :  { %v6958_v23 = vsel %vm796_vm4, %v6894_v9, %v6731_v28  ;;  %6792 = vrot.lane.b32.xlu1 %v6349_v0, %s11657_s10  ;;  %v7708_v9 = vld [vmem:[#allocation2 + $0x49] sm:$0xff] }
 0x5a8   :  { %6534 = vrot.lane.b32.xlu0 %v6284_v30, %s11655_s22  ;;  %11071 = vmatprep.mubr.msk.f32.mxu1 %vm863_vm5, %v6958_v23  ;;  %v7711_v23 = vld [vmem:[#allocation2 + $0x69] sm:$0xff] }
 0x5a9   :  { %v6737_v40 = vpop.permute.xlu1 %6736  ;;  %11072 = vmatmul.mubr.msk.f32.gmra.mrb[28].mxu1 %vm863_vm5, %v6959_v53  ;;  %v7772_v30 = vld [vmem:[#allocation2 + $0x4a] sm:$0xff] }
 0x5aa   :  { %v6479_v5 = vpop.permute.xlu0 %6478  ;;  %v6961_v33 = vsel %vm796_vm4, %v6897_v12, %v6737_v40  ;;  %v6200_v53 = vld [vmem:[#allocation2 + $0x210] sm:$0xff] }
 0x5ab   :  { %6540 = vrot.lane.b32.xlu1 %v6287_v31, %s11655_s22  ;;  %v6896_v52 = vsel %vm731_vm3, %v6192_v10, %v6479_v5  ;;  %v6201_v5 = vld [vmem:[#allocation2 + $0x218] sm:$0xff]  ;;  %v7775_v10 = vld [vmem:[#allocation2 + $0x6a] sm:$0xff] }
 0x5ac   :  { %6790 = vrot.lane.b32.xlu0 %v6348_v1, %s11657_s10 }
 0x5ad   :  { %v6485_v19 = vpop.permute.xlu1 %6484 }
 0x5ae   :  { %v6735_v48 = vpop.permute.xlu0 %6734  ;;  %v6899_v13 = vsel %vm731_vm3, %v6195_v44, %v6485_v19 }
 0x5af   :  { %v6960_v41 = vsel %vm796_vm4, %v6896_v52, %v6735_v48  ;;  %6796 = vrot.lane.b32.xlu1 %v6351_v14, %s11657_s10  ;;  %v7710_v52 = vld [vmem:[#allocation2 + $0x61] sm:$0xff] }
 0x5b0   :  { %6538 = vrot.lane.b32.xlu0 %v6286_v34, %s11655_s22  ;;  %11074 = vmatprep.mubr.msk.f32.mxu1 %vm863_vm5, %v6960_v41  ;;  %v7713_v41 = vld [vmem:[#allocation2 + $0x81] sm:$0xff] }
 0x5b1   :  { %v6741_v46 = vpop.permute.xlu1 %6740  ;;  %11075 = vmatmul.mubr.msk.f32.gmra.mrb[30].mxu1 %vm863_vm5, %v6961_v33  ;;  %v7774_v34 = vld [vmem:[#allocation2 + $0x62] sm:$0xff] }
 0x5b2   :  { %v6483_v21 = vpop.permute.xlu0 %6482  ;;  %v6963_v42 = vsel %vm796_vm4, %v6899_v13, %v6741_v46  ;;  %v6202_v33 = vld [vmem:[#allocation2 + $0x228] sm:$0xff]  ;;  %v6204_v13 = vld [vmem:[#allocation2 + $0x240] sm:$0xff] }
 0x5b3   :  { %6544 = vrot.lane.b32.xlu1 %v6289_v17, %s11655_s22  ;;  %v6898_v8 = vsel %vm731_vm3, %v6194_v24, %v6483_v21  ;;  %v6203_v21 = vld [vmem:[#allocation2 + $0x230] sm:$0xff]  ;;  %v7712_v24 = vld [vmem:[#allocation2 + $0x79] sm:$0xff] }
 0x5b4   :  { %6794 = vrot.lane.b32.xlu0 %v6350_v4, %s11657_s10 }
 0x5b5   :  { %v6489_v47 = vpop.permute.xlu1 %6488 }
 0x5b6   :  { %v6739_v11 = vpop.permute.xlu0 %6738  ;;  %v6901_v29 = vsel %vm731_vm3, %v6197_v57, %v6489_v47 }
 0x5b7   :  { %v6962_v16 = vsel %vm796_vm4, %v6898_v8, %v6739_v11  ;;  %6800 = vrot.lane.b32.xlu1 %v6353_v38, %s11657_s10  ;;  %v7715_v11 = vld [vmem:[#allocation2 + $0x99] sm:$0xff] }
 0x5b8   :  { %11077 = vmatprep.mubr.msk.f32.mxu1 %vm863_vm5, %v6962_v16  ;;  %6542 = vrot.lane.b32.xlu0 %v6288_v25, %s11655_s22  ;;  %v7776_v38 = vld [vmem:[#allocation2 + $0x7a] sm:$0xff]  ;;  %v6205_v25 = vld [vmem:[#allocation2 + $0x248] sm:$0xff] }
 0x5b9   :  { %v6745_v15 = vpop.permute.xlu1 %6744  ;;  %11078 = vmatmul.mubr.msk.f32.gmra.mrb[32].mxu1 %vm863_vm5, %v6963_v42 }
 0x5ba   :  { %v6487_v22 = vpop.permute.xlu0 %6486  ;;  %v6965_v49 = vsel %vm796_vm4, %v6901_v29, %v6745_v15  ;;  %v6206_v29 = vld [vmem:[#allocation2 + $0x258] sm:$0xff] }
 0x5bb   :  { %7900 = vrot.lane.b32.xlu1 %v7707_v56, %s11655_s22  ;;  %v6900_v54 = vsel %vm731_vm3, %v6196_v39, %v6487_v22  ;;  %v7779_v22 = vld [vmem:[#allocation2 + $0x9a] sm:$0xff]  ;;  %v7714_v39 = vld [vmem:[#allocation2 + $0x91] sm:$0xff] }
 0x5bc   :  { %6798 = vrot.lane.b32.xlu0 %v6352_v61, %s11657_s10 }
 0x5bd   :  { %v6493_v18 = vpop.permute.xlu1 %6492 }
 0x5be   :  { %v6743_v55 = vpop.permute.xlu0 %6742  ;;  %v6903_v51 = vsel %vm731_vm3, %v6199_v35, %v6493_v18 }
 0x5bf   :  { %v6964_v36 = vsel %vm796_vm4, %v6900_v54, %v6743_v55  ;;  %8156 = vrot.lane.b32.xlu1 %v7771_v7, %s11657_s10  ;;  %v7717_v55 = vld [vmem:[#allocation2 + $0xb1] sm:$0xff] }
 0x5c0   :  { %11080 = vmatprep.mubr.msk.f32.mxu1 %vm863_vm5, %v6964_v36  ;;  %7898 = vrot.lane.b32.xlu0 %v7706_v63, %s11655_s22  ;;  %v7778_v7 = vld [vmem:[#allocation2 + $0x92] sm:$0xff]  ;;  %v6207_v63 = vld [vmem:[#allocation2 + $0x260] sm:$0xff] }
 0x5c1   :  { %v6749_v50 = vpop.permute.xlu1 %6748  ;;  %11081 = vmatmul.mubr.msk.f32.gmra.mrb[34].mxu1 %vm863_vm5, %v6965_v49 }
 0x5c2   :  { %v6491_v37 = vpop.permute.xlu0 %6490  ;;  %v6967_v28 = vsel %vm796_vm4, %v6903_v51, %v6749_v50  ;;  %v6208_v51 = vld [vmem:[#allocation2 + $0x270] sm:$0xff] }
 0x5c3   :  { %7904 = vrot.lane.b32.xlu1 %v7709_v43, %s11655_s22  ;;  %v6902_v58 = vsel %vm731_vm3, %v6198_v32, %v6491_v37  ;;  %v7781_v37 = vld [vmem:[#allocation2 + $0xb2] sm:$0xff]  ;;  %v7716_v32 = vld [vmem:[#allocation2 + $0xa9] sm:$0xff] }
 0x5c4   :  { %8154 = vrot.lane.b32.xlu0 %v7770_v3, %s11657_s10 }
 0x5c5   :  { %v6497_v20 = vpop.permute.xlu1 %6496 }
 0x5c6   :  { %v6747_v45 = vpop.permute.xlu0 %6746  ;;  %v6905_v19 = vsel %vm731_vm3, %v6201_v5, %v6497_v20 }
 0x5c7   :  { %v6966_v6 = vsel %vm796_vm4, %v6902_v58, %v6747_v45  ;;  %8160 = vrot.lane.b32.xlu1 %v7773_v2, %s11657_s10  ;;  %v7719_v45 = vld [vmem:[#allocation2 + $0xc9] sm:$0xff] }
 0x5c8   :  { %11083 = vmatprep.mubr.msk.f32.mxu1 %vm863_vm5, %v6966_v6  ;;  %7902 = vrot.lane.b32.xlu0 %v7708_v9, %s11655_s22  ;;  %v7780_v2 = vld [vmem:[#allocation2 + $0xaa] sm:$0xff]  ;;  %v6209_v9 = vld [vmem:[#allocation2 + $0x278] sm:$0xff] }
 0x5c9   :  { %v6753_v0 = vpop.permute.xlu1 %6752  ;;  %11084 = vmatmul.mubr.msk.f32.gmra.mrb[36].mxu1 %vm863_vm5, %v6967_v28 }
 0x5ca   :  { %v6495_v59 = vpop.permute.xlu0 %6494  ;;  %v6969_v48 = vsel %vm796_vm4, %v6905_v19, %v6753_v0  ;;  %v6210_v19 = vld [vmem:[#allocation2 + $0x288] sm:$0xff] }
 0x5cb   :  { %7908 = vrot.lane.b32.xlu1 %v7711_v23, %s11655_s22  ;;  %v6904_v31 = vsel %vm731_vm3, %v6200_v53, %v6495_v59  ;;  %v7783_v59 = vld [vmem:[#allocation2 + $0xca] sm:$0xff]  ;;  %v7718_v53 = vld [vmem:[#allocation2 + $0xc1] sm:$0xff] }
 0x5cc   :  { %8158 = vrot.lane.b32.xlu0 %v7772_v30, %s11657_s10 }
 0x5cd   :  { %v6501_v40 = vpop.permute.xlu1 %6500 }
 0x5ce   :  { %v6751_v1 = vpop.permute.xlu0 %6750  ;;  %v6907_v60 = vsel %vm731_vm3, %v6203_v21, %v6501_v40 }
 0x5cf   :  { %v6968_v62 = vsel %vm796_vm4, %v6904_v31, %v6751_v1  ;;  %8164 = vrot.lane.b32.xlu1 %v7775_v10, %s11657_s10  ;;  %v7721_v1 = vld [vmem:[#allocation2 + $0xe1] sm:$0xff] }
 0x5d0   :  { %11086 = vmatprep.mubr.msk.f32.mxu1 %vm863_vm5, %v6968_v62  ;;  %7906 = vrot.lane.b32.xlu0 %v7710_v52, %s11655_s22  ;;  %v7782_v10 = vld [vmem:[#allocation2 + $0xc2] sm:$0xff]  ;;  %v6211_v52 = vld [vmem:[#allocation2 + $0x290] sm:$0xff] }
 0x5d1   :  { %v6757_v14 = vpop.permute.xlu1 %6756  ;;  %11087 = vmatmul.mubr.msk.f32.gmra.mrb[38].mxu1 %vm863_vm5, %v6969_v48 }
 0x5d2   :  { %v6499_v12 = vpop.permute.xlu0 %6498  ;;  %v6971_v47 = vsel %vm796_vm4, %v6907_v60, %v6757_v14  ;;  %v6212_v60 = vld [vmem:[#allocation2 + $0x2a0] sm:$0xff] }
 0x5d3   :  { %7912 = vrot.lane.b32.xlu1 %v7713_v41, %s11655_s22  ;;  %v6906_v17 = vsel %vm731_vm3, %v6202_v33, %v6499_v12  ;;  %v7785_v12 = vld [vmem:[#allocation2 + $0xe2] sm:$0xff]  ;;  %v7720_v33 = vld [vmem:[#allocation2 + $0xd9] sm:$0xff] }
 0x5d4   :  { %8162 = vrot.lane.b32.xlu0 %v7774_v34, %s11657_s10 }
 0x5d5   :  { %v6505_v46 = vpop.permute.xlu1 %6504 }
 0x5d6   :  { %v6755_v4 = vpop.permute.xlu0 %6754  ;;  %v6909_v56 = vsel %vm731_vm3, %v6205_v25, %v6505_v46 }
 0x5d7   :  { %v6970_v26 = vsel %vm796_vm4, %v6906_v17, %v6755_v4  ;;  %8168 = vrot.lane.b32.xlu1 %v7777_v27, %s11657_s10  ;;  %v7723_v4 = vld [vmem:[#allocation2 + $0xf9] sm:$0xff] }
 0x5d8   :  { %11089 = vmatprep.mubr.msk.f32.mxu1 %vm863_vm5, %v6970_v26  ;;  %7910 = vrot.lane.b32.xlu0 %v7712_v24, %s11655_s22  ;;  %v7784_v27 = vld [vmem:[#allocation2 + $0xda] sm:$0xff]  ;;  %v6213_v24 = vld [vmem:[#allocation2 + $0x2a8] sm:$0xff] }
 0x5d9   :  { %v6761_v44 = vpop.permute.xlu1 %6760  ;;  %11090 = vmatmul.mubr.msk.f32.gmra.mrb[40].mxu1 %vm863_vm5, %v6971_v47 }
 0x5da   :  { %v6503_v8 = vpop.permute.xlu0 %6502  ;;  %v6973_v18 = vsel %vm796_vm4, %v6909_v56, %v6761_v44  ;;  %v6214_v56 = vld [vmem:[#allocation2 + $0x2b8] sm:$0xff] }
 0x5db   :  { %7916 = vrot.lane.b32.xlu1 %v7715_v11, %s11655_s22  ;;  %v6908_v42 = vsel %vm731_vm3, %v6204_v13, %v6503_v8  ;;  %v7787_v8 = vld [vmem:[#allocation2 + $0xfa] sm:$0xff]  ;;  %v7722_v13 = vld [vmem:[#allocation2 + $0xf1] sm:$0xff] }
 0x5dc   :  { %8166 = vrot.lane.b32.xlu0 %v7776_v38, %s11657_s10 }
 0x5dd   :  { %v6509_v16 = vpop.permute.xlu1 %6508 }
 0x5de   :  { %v6759_v15 = vpop.permute.xlu0 %6758  ;;  %v6911_v43 = vsel %vm731_vm3, %v6207_v63, %v6509_v16 }
 0x5df   :  { %v6972_v61 = vsel %vm796_vm4, %v6908_v42, %v6759_v15  ;;  %8172 = vrot.lane.b32.xlu1 %v7779_v22, %s11657_s10  ;;  %v7725_v15 = vld [vmem:[#allocation2 + $0x111] sm:$0xff] }
 0x5e0   :  { %11092 = vmatprep.mubr.msk.f32.mxu1 %vm863_vm5, %v6972_v61  ;;  %7914 = vrot.lane.b32.xlu0 %v7714_v39, %s11655_s22  ;;  %v7786_v22 = vld [vmem:[#allocation2 + $0xf2] sm:$0xff]  ;;  %v6215_v39 = vld [vmem:[#allocation2 + $0x2c0] sm:$0xff] }
 0x5e1   :  { %v6765_v57 = vpop.permute.xlu1 %6764  ;;  %11093 = vmatmul.mubr.msk.f32.gmra.mrb[42].mxu1 %vm863_vm5, %v6973_v18 }
 0x5e2   :  { %v6507_v54 = vpop.permute.xlu0 %6506  ;;  %v6975_v20 = vsel %vm796_vm4, %v6911_v43, %v6765_v57  ;;  %v6216_v43 = vld [vmem:[#allocation2 + $0x2d0] sm:$0xff] }
 0x5e3   :  { %7920 = vrot.lane.b32.xlu1 %v7717_v55, %s11655_s22  ;;  %v6910_v49 = vsel %vm731_vm3, %v6206_v29, %v6507_v54  ;;  %v7789_v54 = vld [vmem:[#allocation2 + $0x112] sm:$0xff]  ;;  %v7724_v29 = vld [vmem:[#allocation2 + $0x109] sm:$0xff] }
 0x5e4   :  { %8170 = vrot.lane.b32.xlu0 %v7778_v7, %s11657_s10 }
 0x5e5   :  { %v6513_v36 = vpop.permute.xlu1 %6512 }
 0x5e6   :  { %v6763_v50 = vpop.permute.xlu0 %6762  ;;  %v6913_v23 = vsel %vm731_vm3, %v6209_v9, %v6513_v36 }
 0x5e7   :  { %v6974_v3 = vsel %vm796_vm4, %v6910_v49, %v6763_v50  ;;  %8176 = vrot.lane.b32.xlu1 %v7781_v37, %s11657_s10  ;;  %v7727_v50 = vld [vmem:[#allocation2 + $0x129] sm:$0xff] }
 0x5e8   :  { %11095 = vmatprep.mubr.msk.f32.mxu1 %vm863_vm5, %v6974_v3  ;;  %7918 = vrot.lane.b32.xlu0 %v7716_v32, %s11655_s22  ;;  %v7788_v37 = vld [vmem:[#allocation2 + $0x10a] sm:$0xff]  ;;  %v6217_v32 = vld [vmem:[#allocation2 + $0x2d8] sm:$0xff] }
 0x5e9   :  { %v6769_v35 = vpop.permute.xlu1 %6768  ;;  %11096 = vmatmul.mubr.msk.f32.gmra.mrb[44].mxu1 %vm863_vm5, %v6975_v20 }
 0x5ea   :  { %v6511_v58 = vpop.permute.xlu0 %6510  ;;  %v6977_v40 = vsel %vm796_vm4, %v6913_v23, %v6769_v35  ;;  %v6218_v23 = vld [vmem:[#allocation2 + $0x2e8] sm:$0xff] }
 0x5eb   :  { %7924 = vrot.lane.b32.xlu1 %v7719_v45, %s11655_s22  ;;  %v6912_v28 = vsel %vm731_vm3, %v6208_v51, %v6511_v58  ;;  %v7791_v58 = vld [vmem:[#allocation2 + $0x12a] sm:$0xff]  ;;  %v7726_v51 = vld [vmem:[#allocation2 + $0x121] sm:$0xff] }
 0x5ec   :  { %8174 = vrot.lane.b32.xlu0 %v7780_v2, %s11657_s10 }
 0x5ed   :  { %v6517_v6 = vpop.permute.xlu1 %6516 }
 0x5ee   :  { %v6767_v0 = vpop.permute.xlu0 %6766  ;;  %v6915_v41 = vsel %vm731_vm3, %v6211_v52, %v6517_v6 }
 0x5ef   :  { %v6976_v30 = vsel %vm796_vm4, %v6912_v28, %v6767_v0  ;;  %8180 = vrot.lane.b32.xlu1 %v7783_v59, %s11657_s10  ;;  %v7729_v0 = vld [vmem:[#allocation2 + $0x141] sm:$0xff] }
 0x5f0   :  { %11098 = vmatprep.mubr.msk.f32.mxu1 %vm863_vm5, %v6976_v30  ;;  %7922 = vrot.lane.b32.xlu0 %v7718_v53, %s11655_s22  ;;  %v7790_v59 = vld [vmem:[#allocation2 + $0x122] sm:$0xff]  ;;  %v6219_v53 = vld [vmem:[#allocation2 + $0x2f0] sm:$0xff] }
 0x5f1   :  { %v6773_v5 = vpop.permute.xlu1 %6772  ;;  %11099 = vmatmul.mubr.msk.f32.gmra.mrb[46].mxu1 %vm863_vm5, %v6977_v40 }
 0x5f2   :  { %v6515_v31 = vpop.permute.xlu0 %6514  ;;  %v6979_v46 = vsel %vm796_vm4, %v6915_v41, %v6773_v5  ;;  %v6220_v41 = vld [vmem:[#allocation2 + $0x300] sm:$0xff] }
 0x5f3   :  { %7928 = vrot.lane.b32.xlu1 %v7721_v1, %s11655_s22  ;;  %v6914_v48 = vsel %vm731_vm3, %v6210_v19, %v6515_v31  ;;  %v7793_v31 = vld [vmem:[#allocation2 + $0x142] sm:$0xff]  ;;  %v7728_v19 = vld [vmem:[#allocation2 + $0x139] sm:$0xff] }
 0x5f4   :  { %8178 = vrot.lane.b32.xlu0 %v7782_v10, %s11657_s10 }
 0x5f5   :  { %v6521_v62 = vpop.permute.xlu1 %6520 }
 0x5f6   :  { %v6771_v14 = vpop.permute.xlu0 %6770  ;;  %v6917_v11 = vsel %vm731_vm3, %v6213_v24, %v6521_v62 }
 0x5f7   :  { %v6978_v34 = vsel %vm796_vm4, %v6914_v48, %v6771_v14  ;;  %8184 = vrot.lane.b32.xlu1 %v7785_v12, %s11657_s10  ;;  %v7731_v14 = vld [vmem:[#allocation2 + $0x159] sm:$0xff] }
 0x5f8   :  { %11101 = vmatprep.mubr.msk.f32.mxu1 %vm863_vm5, %v6978_v34  ;;  %7926 = vrot.lane.b32.xlu0 %v7720_v33, %s11655_s22  ;;  %v7792_v12 = vld [vmem:[#allocation2 + $0x13a] sm:$0xff]  ;;  %v6221_v33 = vld [vmem:[#allocation2 + $0x308] sm:$0xff] }
 0x5f9   :  { %v6777_v21 = vpop.permute.xlu1 %6776  ;;  %11102 = vmatmul.mubr.msk.f32.gmra.mrb[48].mxu1 %vm863_vm5, %v6979_v46 }
 0x5fa   :  { %v6519_v17 = vpop.permute.xlu0 %6518  ;;  %v6981_v16 = vsel %vm796_vm4, %v6917_v11, %v6777_v21  ;;  %v6222_v11 = vld [vmem:[#allocation2 + $0x318] sm:$0xff] }
 0x5fb   :  { %7932 = vrot.lane.b32.xlu1 %v7723_v4, %s11655_s22  ;;  %v6916_v47 = vsel %vm731_vm3, %v6212_v60, %v6519_v17  ;;  %v7795_v17 = vld [vmem:[#allocation2 + $0x15a] sm:$0xff]  ;;  %v7730_v60 = vld [vmem:[#allocation2 + $0x151] sm:$0xff] }
 0x5fc   :  { %8182 = vrot.lane.b32.xlu0 %v7784_v27, %s11657_s10 }
 0x5fd   :  { %v6525_v26 = vpop.permute.xlu1 %6524 }
 0x5fe   :  { %v6775_v44 = vpop.permute.xlu0 %6774  ;;  %v6919_v55 = vsel %vm731_vm3, %v6215_v39, %v6525_v26 }
 0x5ff   :  { %v6980_v38 = vsel %vm796_vm4, %v6916_v47, %v6775_v44  ;;  %8188 = vrot.lane.b32.xlu1 %v7787_v8, %s11657_s10  ;;  %v7733_v44 = vld [vmem:[#allocation2 + $0x171] sm:$0xff] }
 0x600   :  { %11104 = vmatprep.mubr.msk.f32.mxu1 %vm863_vm5, %v6980_v38  ;;  %7930 = vrot.lane.b32.xlu0 %v7722_v13, %s11655_s22  ;;  %v7794_v8 = vld [vmem:[#allocation2 + $0x152] sm:$0xff]  ;;  %v6223_v13 = vld [vmem:[#allocation2 + $0x320] sm:$0xff] }
 0x601   :  { %v6781_v25 = vpop.permute.xlu1 %6780  ;;  %11105 = vmatmul.mubr.msk.f32.gmra.mrb[50].mxu1 %vm863_vm5, %v6981_v16 }
 0x602   :  { %v6523_v42 = vpop.permute.xlu0 %6522  ;;  %v6983_v36 = vsel %vm796_vm4, %v6919_v55, %v6781_v25  ;;  %v6224_v55 = vld [vmem:[#allocation2 + $0x330] sm:$0xff] }
 0x603   :  { %7936 = vrot.lane.b32.xlu1 %v7725_v15, %s11655_s22  ;;  %v6918_v18 = vsel %vm731_vm3, %v6214_v56, %v6523_v42  ;;  %v7797_v42 = vld [vmem:[#allocation2 + $0x172] sm:$0xff]  ;;  %v7732_v56 = vld [vmem:[#allocation2 + $0x169] sm:$0xff] }
 0x604   :  { %8186 = vrot.lane.b32.xlu0 %v7786_v22, %s11657_s10 }
 0x605   :  { %v6529_v61 = vpop.permute.xlu1 %6528 }
 0x606   :  { %v6779_v57 = vpop.permute.xlu0 %6778  ;;  %v6921_v45 = vsel %vm731_vm3, %v6217_v32, %v6529_v61  ;;  %v7737_v32 = vld [vmem:[#allocation2 + $0x1a1] sm:$0xff] }
 0x607   :  { %v6982_v7 = vsel %vm796_vm4, %v6918_v18, %v6779_v57  ;;  %8192 = vrot.lane.b32.xlu1 %v7789_v54, %s11657_s10  ;;  %v7735_v57 = vld [vmem:[#allocation2 + $0x189] sm:$0xff] }
 0x608   :  { %11107 = vmatprep.mubr.msk.f32.mxu1 %vm863_vm5, %v6982_v7  ;;  %7934 = vrot.lane.b32.xlu0 %v7724_v29, %s11655_s22  ;;  %v7796_v54 = vld [vmem:[#allocation2 + $0x16a] sm:$0xff]  ;;  %v6225_v29 = vld [vmem:[#allocation2 + $0x338] sm:$0xff] }
 0x609   :  { %v6785_v63 = vpop.permute.xlu1 %6784  ;;  %11108 = vmatmul.mubr.msk.f32.gmra.mrb[52].mxu1 %vm863_vm5, %v6983_v36 }
 0x60a   :  { %v6527_v49 = vpop.permute.xlu0 %6526  ;;  %v6985_v6 = vsel %vm796_vm4, %v6921_v45, %v6785_v63  ;;  %v7801_v45 = vld [vmem:[#allocation2 + $0x1a2] sm:$0xff] }
 0x60b   :  { %7940 = vrot.lane.b32.xlu1 %v7727_v50, %s11655_s22  ;;  %v6920_v20 = vsel %vm731_vm3, %v6216_v43, %v6527_v49  ;;  %v7799_v49 = vld [vmem:[#allocation2 + $0x18a] sm:$0xff]  ;;  %v7734_v43 = vld [vmem:[#allocation2 + $0x181] sm:$0xff] }
 0x60c   :  { %8190 = vrot.lane.b32.xlu0 %v7788_v37, %s11657_s10 }
 0x60d   :  { %v6533_v3 = vpop.permute.xlu1 %6532 }
 0x60e   :  { %v6783_v35 = vpop.permute.xlu0 %6782  ;;  %v6923_v1 = vsel %vm731_vm3, %v6219_v53, %v6533_v3 }
 0x60f   :  { %v6984_v2 = vsel %vm796_vm4, %v6920_v20, %v6783_v35  ;;  %8196 = vrot.lane.b32.xlu1 %v7791_v58, %s11657_s10  ;;  %v7798_v58 = vld [vmem:[#allocation2 + $0x182] sm:$0xff] }
 0x610   :  { %11110 = vmatprep.mubr.msk.f32.mxu1 %vm863_vm5, %v6984_v2  ;;  %7938 = vrot.lane.b32.xlu0 %v7726_v51, %s11655_s22  ;;  %v7642_v2 = vld [vmem:[#allocation2 + $0x30] sm:$0xff] }
 0x611   :  { %v6789_v9 = vpop.permute.xlu1 %6788  ;;  %11111 = vmatmul.mubr.msk.f32.gmra.mrb[54].mxu1 %vm863_vm5, %v6985_v6  ;;  %v7736_v6 = vld [vmem:[#allocation2 + $0x199] sm:$0xff] }
 0x612   :  { %v6531_v28 = vpop.permute.xlu0 %6530  ;;  %v6987_v62 = vsel %vm796_vm4, %v6923_v1, %v6789_v9  ;;  %v7643_v9 = vld [vmem:[#allocation2 + $0x38] sm:$0xff]  ;;  %v7644_v1 = vld [vmem:[#allocation2 + $0x48] sm:$0xff] }
 0x613   :  { %7944 = vrot.lane.b32.xlu1 %v7729_v0, %s11655_s22  ;;  %v6922_v40 = vsel %vm731_vm3, %v6218_v23, %v6531_v28 }
 0x614   :  { %8194 = vrot.lane.b32.xlu0 %v7790_v59, %s11657_s10 }
 0x615   :  { %v6537_v30 = vpop.permute.xlu1 %6536 }
 0x616   :  { %v6787_v5 = vpop.permute.xlu0 %6786  ;;  %v6925_v4 = vsel %vm731_vm3, %v6221_v33, %v6537_v30 }
 0x617   :  { %v6986_v10 = vsel %vm796_vm4, %v6922_v40, %v6787_v5  ;;  %8200 = vrot.lane.b32.xlu1 %v7793_v31, %s11657_s10  ;;  %v7800_v40 = vld [vmem:[#allocation2 + $0x19a] sm:$0xff]  ;;  %v7739_v31 = vld [vmem:[#allocation2 + $0x1e9] sm:$0xff] }
 0x618   :  { %11113 = vmatprep.mubr.msk.f32.mxu1 %vm863_vm5, %v6986_v10  ;;  %7942 = vrot.lane.b32.xlu0 %v7728_v19, %s11655_s22  ;;  %v7645_v19 = vld [vmem:[#allocation2 + $0x50] sm:$0xff] }
 0x619   :  { %v6793_v52 = vpop.permute.xlu1 %6792  ;;  %11114 = vmatmul.mubr.msk.f32.gmra.mrb[56].mxu1 %vm863_vm5, %v6987_v62 }
 0x61a   :  { %v6535_v48 = vpop.permute.xlu0 %6534  ;;  %v6989_v26 = vsel %vm796_vm4, %v6925_v4, %v6793_v52  ;;  %v7646_v4 = vld [vmem:[#allocation2 + $0x60] sm:$0xff] }
 0x61b   :  { %7948 = vrot.lane.b32.xlu1 %v7731_v14, %s11655_s22  ;;  %v6924_v46 = vsel %vm731_vm3, %v6220_v41, %v6535_v48  ;;  %v7803_v48 = vld [vmem:[#allocation2 + $0x1ea] sm:$0xff]  ;;  %v7738_v41 = vld [vmem:[#allocation2 + $0x1e1] sm:$0xff] }
 0x61c   :  { %8198 = vrot.lane.b32.xlu0 %v7792_v12, %s11657_s10 }
 0x61d   :  { %v6541_v34 = vpop.permute.xlu1 %6540 }
 0x61e   :  { %v6791_v21 = vpop.permute.xlu0 %6790  ;;  %v6927_v15 = vsel %vm731_vm3, %v6223_v13, %v6541_v34 }
 0x61f   :  { %v6988_v27 = vsel %vm796_vm4, %v6924_v46, %v6791_v21  ;;  %8204 = vrot.lane.b32.xlu1 %v7795_v17, %s11657_s10  ;;  %v7741_v21 = vld [vmem:[#allocation2 + $0x201] sm:$0xff] }
 0x620   :  { %11116 = vmatprep.mubr.msk.f32.mxu1 %vm863_vm5, %v6988_v27  ;;  %7946 = vrot.lane.b32.xlu0 %v7730_v60, %s11655_s22  ;;  %v7802_v17 = vld [vmem:[#allocation2 + $0x1e2] sm:$0xff] }
 0x621   :  { %v6797_v24 = vpop.permute.xlu1 %6796  ;;  %11117 = vmatmul.mubr.msk.f32.gmra.mrb[58].mxu1 %vm863_vm5, %v6989_v26  ;;  %v7647_v60 = vld [vmem:[#allocation2 + $0x68] sm:$0xff] }
 0x622   :  { %v6539_v47 = vpop.permute.xlu0 %6538  ;;  %v6991_v61 = vsel %vm796_vm4, %v6927_v15, %v6797_v24  ;;  %v7648_v15 = vld [vmem:[#allocation2 + $0x78] sm:$0xff] }
 0x623   :  { %7952 = vrot.lane.b32.xlu1 %v7733_v44, %s11655_s22  ;;  %v6926_v16 = vsel %vm731_vm3, %v6222_v11, %v6539_v47  ;;  %v7805_v47 = vld [vmem:[#allocation2 + $0x202] sm:$0xff]  ;;  %v7740_v11 = vld [vmem:[#allocation2 + $0x1f9] sm:$0xff] }
 0x624   :  { %8202 = vrot.lane.b32.xlu0 %v7794_v8, %s11657_s10 }
 0x625   :  { %v6545_v38 = vpop.permute.xlu1 %6544 }
 0x626   :  { %v6795_v25 = vpop.permute.xlu0 %6794  ;;  %v6929_v50 = vsel %vm731_vm3, %v6225_v29, %v6545_v38 }
 0x627   :  { %v6990_v22 = vsel %vm796_vm4, %v6926_v16, %v6795_v25  ;;  %8208 = vrot.lane.b32.xlu1 %v7797_v42, %s11657_s10  ;;  %v7743_v25 = vld [vmem:[#allocation2 + $0x219] sm:$0xff] }
 0x628   :  { %11119 = vmatprep.mubr.msk.f32.mxu1 %vm863_vm5, %v6990_v22  ;;  %7950 = vrot.lane.b32.xlu0 %v7732_v56, %s11655_s22  ;;  %v7804_v42 = vld [vmem:[#allocation2 + $0x1fa] sm:$0xff] }
 0x629   :  { %11120 = vmatmul.mubr.msk.f32.gmra.mrb[60].mxu1 %vm863_vm5, %v6991_v61  ;;  %v6801_v39 = vpop.permute.xlu1 %6800  ;;  %v7649_v56 = vld [vmem:[#allocation2 + $0x80] sm:$0xff] }
 0x62a   :  { %v6543_v18 = vpop.permute.xlu0 %6542  ;;  %v6993_v3 = vsel %vm796_vm4, %v6929_v50, %v6801_v39  ;;  %v7650_v50 = vld [vmem:[#allocation2 + $0x90] sm:$0xff] }
 0x62b   :  { %7956 = vrot.lane.b32.xlu1 %v7735_v57, %s11655_s22  ;;  %v6928_v36 = vsel %vm731_vm3, %v6224_v55, %v6543_v18  ;;  %v7807_v18 = vld [vmem:[#allocation2 + $0x21a] sm:$0xff]  ;;  %v7742_v55 = vld [vmem:[#allocation2 + $0x211] sm:$0xff] }
 0x62c   :  { %8206 = vrot.lane.b32.xlu0 %v7796_v54, %s11657_s10 }
 0x62d   :  { %v7901_v7 = vpop.permute.xlu1 %7900 }
 0x62e   :  { %v6799_v63 = vpop.permute.xlu0 %6798  ;;  %v8347_v59 = vsel %vm731_vm3, %v7643_v9, %v7901_v7  ;;  %v7747_v9 = vld [vmem:[#allocation2 + $0x249] sm:$0xff] }
 0x62f   :  { %v6992_v37 = vsel %vm796_vm4, %v6928_v36, %v6799_v63  ;;  %8212 = vrot.lane.b32.xlu1 %v7799_v49, %s11657_s10  ;;  %v7745_v63 = vld [vmem:[#allocation2 + $0x231] sm:$0xff] }
 0x630   :  { %7954 = vrot.lane.b32.xlu0 %v7734_v43, %s11655_s22  ;;  %11122 = vmatprep.mubr.msk.f32.mxu1 %vm863_vm5, %v6992_v37  ;;  %v7806_v49 = vld [vmem:[#allocation2 + $0x212] sm:$0xff] }
 0x631   :  { %v8157_v20 = vpop.permute.xlu1 %8156  ;;  %11123 = vmatmul.mubr.msk.f32.gmra.mrb[62].mxu1 %vm863_vm5, %v6993_v3  ;;  %v7651_v43 = vld [vmem:[#allocation2 + $0x98] sm:$0xff] }
 0x632   :  { %v7899_v35 = vpop.permute.xlu0 %7898  ;;  %v8411_v30 = vsel %vm796_vm4, %v8347_v59, %v8157_v20  ;;  %v7809_v20 = vld [vmem:[#allocation2 + $0x232] sm:$0xff] }
 0x633   :  { %7960 = vrot.lane.b32.xlu1 %v7737_v32, %s11655_s22  ;;  %v8346_v28 = vsel %vm731_vm3, %v7642_v2, %v7899_v35 }
 0x634   :  { %8210 = vrot.lane.b32.xlu0 %v7798_v58, %s11657_s10 }
 0x635   :  { %v7905_v51 = vpop.permute.xlu1 %7904 }
 0x636   :  { %v8155_v0 = vpop.permute.xlu0 %8154  ;;  %v8349_v14 = vsel %vm731_vm3, %v7645_v19, %v7905_v51 }
 0x637   :  { %v8410_v23 = vsel %vm796_vm4, %v8346_v28, %v8155_v0  ;;  %8216 = vrot.lane.b32.xlu1 %v7801_v45, %s11657_s10  ;;  %v7744_v45 = vld [vmem:[#allocation2 + $0x229] sm:$0xff] }
 0x638   :  { %7958 = vrot.lane.b32.xlu0 %v7736_v6, %s11655_s22  ;;  %11129 = vmatprep.mubr.msk.f32.mxu1 %vm863_vm5, %v8410_v23  ;;  %v7808_v28 = vld [vmem:[#allocation2 + $0x22a] sm:$0xff] }
 0x639   :  { %v8161_v53 = vpop.permute.xlu1 %8160  ;;  %11130 = vmatmul.mubr.msk.f32.vlgmr.msra.gmra.mrb[0].mxu1 %vm863_vm5, %v8411_v30  ;;  %v7652_v0 = vld [vmem:[#allocation2 + $0xa8] sm:$0xff]  ;;  %v7653_v23 = vld [vmem:[#allocation2 + $0xb0] sm:$0xff] }
 0x63a   :  { %v7903_v5 = vpop.permute.xlu0 %7902  ;;  %v8413_v34 = vsel %vm796_vm4, %v8349_v14, %v8161_v53  ;;  %v7654_v14 = vld [vmem:[#allocation2 + $0xc0] sm:$0xff] }
 0x63b   :  { %7964 = vrot.lane.b32.xlu1 %v7739_v31, %s11655_s22  ;;  %v8348_v62 = vsel %vm731_vm3, %v7644_v1, %v7903_v5  ;;  %v7746_v1 = vld [vmem:[#allocation2 + $0x241] sm:$0xff] }
 0x63c   :  { %8214 = vrot.lane.b32.xlu0 %v7800_v40, %s11657_s10  ;;  %v7811_v40 = vld [vmem:[#allocation2 + $0x24a] sm:$0xff] }
 0x63d   :  { %v7909_v10 = vpop.permute.xlu1 %7908 }
 0x63e   :  { %v8159_v52 = vpop.permute.xlu0 %8158  ;;  %v8351_v44 = vsel %vm731_vm3, %v7647_v60, %v7909_v10 }
 0x63f   :  { %v8412_v12 = vsel %vm796_vm4, %v8348_v62, %v8159_v52  ;;  %8220 = vrot.lane.b32.xlu1 %v7803_v48, %s11657_s10  ;;  %v7749_v52 = vld [vmem:[#allocation2 + $0x261] sm:$0xff] }
 0x640   :  { %7962 = vrot.lane.b32.xlu0 %v7738_v41, %s11655_s22  ;;  %11132 = vmatprep.mubr.msk.f32.mxu1 %vm863_vm5, %v8412_v12  ;;  %v7810_v48 = vld [vmem:[#allocation2 + $0x242] sm:$0xff] }
 0x641   :  { %v8165_v33 = vpop.permute.xlu1 %8164  ;;  %11133 = vmatmul.mubr.msk.f32.gmra.mrb[2].mxu1 %vm863_vm5, %v8413_v34  ;;  %v7655_v41 = vld [vmem:[#allocation2 + $0xc8] sm:$0xff] }
 0x642   :  { %v7907_v46 = vpop.permute.xlu0 %7906  ;;  %v8415_v38 = vsel %vm796_vm4, %v8351_v44, %v8165_v33  ;;  %v7656_v44 = vld [vmem:[#allocation2 + $0xd8] sm:$0xff] }
 0x643   :  { %7968 = vrot.lane.b32.xlu1 %v7741_v21, %s11655_s22  ;;  %v8350_v26 = vsel %vm731_vm3, %v7646_v4, %v7907_v46  ;;  %v7813_v46 = vld [vmem:[#allocation2 + $0x262] sm:$0xff]  ;;  %v7748_v4 = vld [vmem:[#allocation2 + $0x259] sm:$0xff] }
 0x644   :  { %8218 = vrot.lane.b32.xlu0 %v7802_v17, %s11657_s10 }
 0x645   :  { %v7913_v27 = vpop.permute.xlu1 %7912 }
 0x646   :  { %v8163_v24 = vpop.permute.xlu0 %8162  ;;  %v8353_v57 = vsel %vm731_vm3, %v7649_v56, %v7913_v27 }
 0x647   :  { %v8414_v8 = vsel %vm796_vm4, %v8350_v26, %v8163_v24  ;;  %8224 = vrot.lane.b32.xlu1 %v7805_v47, %s11657_s10  ;;  %v7751_v24 = vld [vmem:[#allocation2 + $0x279] sm:$0xff] }
 0x648   :  { %7966 = vrot.lane.b32.xlu0 %v7740_v11, %s11655_s22  ;;  %11135 = vmatprep.mubr.msk.f32.mxu1 %vm863_vm5, %v8414_v8  ;;  %v7812_v47 = vld [vmem:[#allocation2 + $0x25a] sm:$0xff] }
 0x649   :  { %v8169_v13 = vpop.permute.xlu1 %8168  ;;  %11136 = vmatmul.mubr.msk.f32.gmra.mrb[4].mxu1 %vm863_vm5, %v8415_v38  ;;  %v7657_v11 = vld [vmem:[#allocation2 + $0xe0] sm:$0xff] }
 0x64a   :  { %v7911_v16 = vpop.permute.xlu0 %7910  ;;  %v8417_v7 = vsel %vm796_vm4, %v8353_v57, %v8169_v13  ;;  %v7658_v57 = vld [vmem:[#allocation2 + $0xf0] sm:$0xff] }
 0x64b   :  { %7972 = vrot.lane.b32.xlu1 %v7743_v25, %s11655_s22  ;;  %v8352_v61 = vsel %vm731_vm3, %v7648_v15, %v7911_v16  ;;  %v7815_v16 = vld [vmem:[#allocation2 + $0x27a] sm:$0xff]  ;;  %v7750_v15 = vld [vmem:[#allocation2 + $0x271] sm:$0xff] }
 0x64c   :  { %8222 = vrot.lane.b32.xlu0 %v7804_v42, %s11657_s10 }
 0x64d   :  { %v7917_v22 = vpop.permute.xlu1 %7916 }
 0x64e   :  { %v8167_v39 = vpop.permute.xlu0 %8166  ;;  %v8355_v35 = vsel %vm731_vm3, %v7651_v43, %v7917_v22 }
 0x64f   :  { %v8416_v54 = vsel %vm796_vm4, %v8352_v61, %v8167_v39  ;;  %8228 = vrot.lane.b32.xlu1 %v7807_v18, %s11657_s10  ;;  %v7753_v39 = vld [vmem:[#allocation2 + $0x291] sm:$0xff] }
 0x650   :  { %7970 = vrot.lane.b32.xlu0 %v7742_v55, %s11655_s22  ;;  %11138 = vmatprep.mubr.msk.f32.mxu1 %vm863_vm5, %v8416_v54  ;;  %v7814_v18 = vld [vmem:[#allocation2 + $0x272] sm:$0xff] }
 0x651   :  { %v8173_v29 = vpop.permute.xlu1 %8172  ;;  %11139 = vmatmul.mubr.msk.f32.gmra.mrb[6].mxu1 %vm863_vm5, %v8417_v7  ;;  %v7659_v55 = vld [vmem:[#allocation2 + $0xf8] sm:$0xff] }
 0x652   :  { %v7915_v36 = vpop.permute.xlu0 %7914  ;;  %v8419_v2 = vsel %vm796_vm4, %v8355_v35, %v8173_v29  ;;  %v7660_v35 = vld [vmem:[#allocation2 + $0x108] sm:$0xff] }
 0x653   :  { %7976 = vrot.lane.b32.xlu1 %v7745_v63, %s11655_s22  ;;  %v8354_v3 = vsel %vm731_vm3, %v7650_v50, %v7915_v36  ;;  %v7817_v36 = vld [vmem:[#allocation2 + $0x292] sm:$0xff]  ;;  %v7752_v50 = vld [vmem:[#allocation2 + $0x289] sm:$0xff] }
 0x654   :  { %8226 = vrot.lane.b32.xlu0 %v7806_v49, %s11657_s10 }
 0x655   :  { %v7921_v37 = vpop.permute.xlu1 %7920 }
 0x656   :  { %v8171_v32 = vpop.permute.xlu0 %8170  ;;  %v8357_v5 = vsel %vm731_vm3, %v7653_v23, %v7921_v37 }
 0x657   :  { %v8418_v58 = vsel %vm796_vm4, %v8354_v3, %v8171_v32  ;;  %8232 = vrot.lane.b32.xlu1 %v7809_v20, %s11657_s10  ;;  %v7755_v32 = vld [vmem:[#allocation2 + $0x2a9] sm:$0xff] }
 0x658   :  { %7974 = vrot.lane.b32.xlu0 %v7744_v45, %s11655_s22  ;;  %11141 = vmatprep.mubr.msk.f32.mxu1 %vm863_vm5, %v8418_v58  ;;  %v7816_v20 = vld [vmem:[#allocation2 + $0x28a] sm:$0xff] }
 0x659   :  { %v8177_v51 = vpop.permute.xlu1 %8176  ;;  %11142 = vmatmul.mubr.msk.f32.gmra.mrb[8].mxu1 %vm863_vm5, %v8419_v2  ;;  %v7661_v45 = vld [vmem:[#allocation2 + $0x110] sm:$0xff] }
 0x65a   :  { %v7919_v6 = vpop.permute.xlu0 %7918  ;;  %v8421_v10 = vsel %vm796_vm4, %v8357_v5, %v8177_v51  ;;  %v7662_v5 = vld [vmem:[#allocation2 + $0x120] sm:$0xff] }
 0x65b   :  { %7980 = vrot.lane.b32.xlu1 %v7747_v9, %s11655_s22  ;;  %v8356_v30 = vsel %vm731_vm3, %v7652_v0, %v7919_v6  ;;  %v7819_v6 = vld [vmem:[#allocation2 + $0x2aa] sm:$0xff]  ;;  %v7754_v0 = vld [vmem:[#allocation2 + $0x2a1] sm:$0xff] }
 0x65c   :  { %8230 = vrot.lane.b32.xlu0 %v7808_v28, %s11657_s10 }
 0x65d   :  { %v7925_v59 = vpop.permute.xlu1 %7924 }
 0x65e   :  { %v8175_v53 = vpop.permute.xlu0 %8174  ;;  %v8359_v21 = vsel %vm731_vm3, %v7655_v41, %v7925_v59 }
 0x65f   :  { %v8420_v31 = vsel %vm796_vm4, %v8356_v30, %v8175_v53  ;;  %8236 = vrot.lane.b32.xlu1 %v7811_v40, %s11657_s10  ;;  %v7757_v53 = vld [vmem:[#allocation2 + $0x2c1] sm:$0xff] }
 0x660   :  { %7978 = vrot.lane.b32.xlu0 %v7746_v1, %s11655_s22  ;;  %11144 = vmatprep.mubr.msk.f32.mxu1 %vm863_vm5, %v8420_v31  ;;  %v7818_v40 = vld [vmem:[#allocation2 + $0x2a2] sm:$0xff] }
 0x661   :  { %v8181_v19 = vpop.permute.xlu1 %8180  ;;  %11145 = vmatmul.mubr.msk.f32.gmra.mrb[10].mxu1 %vm863_vm5, %v8421_v10  ;;  %v7663_v1 = vld [vmem:[#allocation2 + $0x128] sm:$0xff] }
 0x662   :  { %v7923_v62 = vpop.permute.xlu0 %7922  ;;  %v8423_v27 = vsel %vm796_vm4, %v8359_v21, %v8181_v19  ;;  %v7664_v21 = vld [vmem:[#allocation2 + $0x138] sm:$0xff] }
 0x663   :  { %7984 = vrot.lane.b32.xlu1 %v7749_v52, %s11655_s22  ;;  %v8358_v34 = vsel %vm731_vm3, %v7654_v14, %v7923_v62  ;;  %v7821_v62 = vld [vmem:[#allocation2 + $0x2c2] sm:$0xff]  ;;  %v7756_v14 = vld [vmem:[#allocation2 + $0x2b9] sm:$0xff] }
 0x664   :  { %8234 = vrot.lane.b32.xlu0 %v7810_v48, %s11657_s10 }
 0x665   :  { %v7929_v12 = vpop.permute.xlu1 %7928 }
 0x666   :  { %v8179_v33 = vpop.permute.xlu0 %8178  ;;  %v8361_v25 = vsel %vm731_vm3, %v7657_v11, %v7929_v12 }
 0x667   :  { %v8422_v17 = vsel %vm796_vm4, %v8358_v34, %v8179_v33  ;;  %8240 = vrot.lane.b32.xlu1 %v7813_v46, %s11657_s10  ;;  %v7759_v33 = vld [vmem:[#allocation2 + $0x2d9] sm:$0xff] }
 0x668   :  { %7982 = vrot.lane.b32.xlu0 %v7748_v4, %s11655_s22  ;;  %11147 = vmatprep.mubr.msk.f32.mxu1 %vm863_vm5, %v8422_v17  ;;  %v7820_v46 = vld [vmem:[#allocation2 + $0x2ba] sm:$0xff] }
 0x669   :  { %v8185_v60 = vpop.permute.xlu1 %8184  ;;  %11148 = vmatmul.mubr.msk.f32.gmra.mrb[12].mxu1 %vm863_vm5, %v8423_v27  ;;  %v7665_v4 = vld [vmem:[#allocation2 + $0x140] sm:$0xff] }
 0x66a   :  { %v7927_v26 = vpop.permute.xlu0 %7926  ;;  %v8425_v22 = vsel %vm796_vm4, %v8361_v25, %v8185_v60  ;;  %v7666_v25 = vld [vmem:[#allocation2 + $0x150] sm:$0xff] }
 0x66b   :  { %7988 = vrot.lane.b32.xlu1 %v7751_v24, %s11655_s22  ;;  %v8360_v38 = vsel %vm731_vm3, %v7656_v44, %v7927_v26  ;;  %v7823_v26 = vld [vmem:[#allocation2 + $0x2da] sm:$0xff]  ;;  %v7758_v44 = vld [vmem:[#allocation2 + $0x2d1] sm:$0xff] }
 0x66c   :  { %8238 = vrot.lane.b32.xlu0 %v7812_v47, %s11657_s10 }
 0x66d   :  { %v7933_v8 = vpop.permute.xlu1 %7932 }
 0x66e   :  { %v8183_v13 = vpop.permute.xlu0 %8182  ;;  %v8363_v63 = vsel %vm731_vm3, %v7659_v55, %v7933_v8 }
 0x66f   :  { %v8424_v42 = vsel %vm796_vm4, %v8360_v38, %v8183_v13  ;;  %8244 = vrot.lane.b32.xlu1 %v7815_v16, %s11657_s10  ;;  %v7761_v13 = vld [vmem:[#allocation2 + $0x2f1] sm:$0xff] }
 0x670   :  { %7986 = vrot.lane.b32.xlu0 %v7750_v15, %s11655_s22  ;;  %11150 = vmatprep.mubr.msk.f32.mxu1 %vm863_vm5, %v8424_v42  ;;  %v7822_v16 = vld [vmem:[#allocation2 + $0x2d2] sm:$0xff] }
 0x671   :  { %v8189_v56 = vpop.permute.xlu1 %8188  ;;  %11151 = vmatmul.mubr.msk.f32.gmra.mrb[14].mxu1 %vm863_vm5, %v8425_v22  ;;  %v7667_v15 = vld [vmem:[#allocation2 + $0x158] sm:$0xff] }
 0x672   :  { %v7931_v61 = vpop.permute.xlu0 %7930  ;;  %v8427_v37 = vsel %vm796_vm4, %v8363_v63, %v8189_v56  ;;  %v7668_v63 = vld [vmem:[#allocation2 + $0x168] sm:$0xff] }
 0x673   :  { %7992 = vrot.lane.b32.xlu1 %v7753_v39, %s11655_s22  ;;  %v8362_v7 = vsel %vm731_vm3, %v7658_v57, %v7931_v61  ;;  %v7825_v61 = vld [vmem:[#allocation2 + $0x2f2] sm:$0xff]  ;;  %v7760_v57 = vld [vmem:[#allocation2 + $0x2e9] sm:$0xff] }
 0x674   :  { %8242 = vrot.lane.b32.xlu0 %v7814_v18, %s11657_s10 }
 0x675   :  { %v7937_v54 = vpop.permute.xlu1 %7936 }
 0x676   :  { %v8187_v29 = vpop.permute.xlu0 %8186  ;;  %v8365_v9 = vsel %vm731_vm3, %v7661_v45, %v7937_v54 }
 0x677   :  { %v8426_v49 = vsel %vm796_vm4, %v8362_v7, %v8187_v29  ;;  %8248 = vrot.lane.b32.xlu1 %v7817_v36, %s11657_s10  ;;  %v7763_v29 = vld [vmem:[#allocation2 + $0x309] sm:$0xff] }
 0x678   :  { %7990 = vrot.lane.b32.xlu0 %v7752_v50, %s11655_s22  ;;  %11153 = vmatprep.mubr.msk.f32.mxu1 %vm863_vm5, %v8426_v49  ;;  %v7824_v36 = vld [vmem:[#allocation2 + $0x2ea] sm:$0xff] }
 0x679   :  { %v8193_v43 = vpop.permute.xlu1 %8192  ;;  %11154 = vmatmul.mubr.msk.f32.gmra.mrb[16].mxu1 %vm863_vm5, %v8427_v37  ;;  %v7669_v50 = vld [vmem:[#allocation2 + $0x170] sm:$0xff] }
 0x67a   :  { %v7935_v3 = vpop.permute.xlu0 %7934  ;;  %v8429_v59 = vsel %vm796_vm4, %v8365_v9, %v8193_v43  ;;  %v7670_v9 = vld [vmem:[#allocation2 + $0x180] sm:$0xff] }
 0x67b   :  { %7996 = vrot.lane.b32.xlu1 %v7755_v32, %s11655_s22  ;;  %v8364_v2 = vsel %vm731_vm3, %v7660_v35, %v7935_v3  ;;  %v7827_v3 = vld [vmem:[#allocation2 + $0x30a] sm:$0xff]  ;;  %v7762_v35 = vld [vmem:[#allocation2 + $0x301] sm:$0xff] }
 0x67c   :  { %8246 = vrot.lane.b32.xlu0 %v7816_v20, %s11657_s10 }
 0x67d   :  { %v7941_v58 = vpop.permute.xlu1 %7940 }
 0x67e   :  { %v8191_v51 = vpop.permute.xlu0 %8190  ;;  %v8367_v52 = vsel %vm731_vm3, %v7663_v1, %v7941_v58 }
 0x67f   :  { %v8428_v28 = vsel %vm796_vm4, %v8364_v2, %v8191_v51  ;;  %8252 = vrot.lane.b32.xlu1 %v7819_v6, %s11657_s10  ;;  %v7765_v51 = vld [vmem:[#allocation2 + $0x321] sm:$0xff] }
 0x680   :  { %7994 = vrot.lane.b32.xlu0 %v7754_v0, %s11655_s22  ;;  %11156 = vmatprep.mubr.msk.f32.mxu1 %vm863_vm5, %v8428_v28  ;;  %v7826_v6 = vld [vmem:[#allocation2 + $0x302] sm:$0xff] }
 0x681   :  { %v8197_v23 = vpop.permute.xlu1 %8196  ;;  %11157 = vmatmul.mubr.msk.f32.gmra.mrb[18].mxu1 %vm863_vm5, %v8429_v59  ;;  %v7671_v0 = vld [vmem:[#allocation2 + $0x188] sm:$0xff] }
 0x682   :  { %v7939_v30 = vpop.permute.xlu0 %7938  ;;  %v8431_v12 = vsel %vm796_vm4, %v8367_v52, %v8197_v23  ;;  %v7672_v52 = vld [vmem:[#allocation2 + $0x198] sm:$0xff] }
 0x683   :  { %8000 = vrot.lane.b32.xlu1 %v7757_v53, %s11655_s22  ;;  %v8366_v10 = vsel %vm731_vm3, %v7662_v5, %v7939_v30  ;;  %v7829_v30 = vld [vmem:[#allocation2 + $0x322] sm:$0xff]  ;;  %v7764_v5 = vld [vmem:[#allocation2 + $0x319] sm:$0xff] }
 0x684   :  { %8250 = vrot.lane.b32.xlu0 %v7818_v40, %s11657_s10 }
 0x685   :  { %v7945_v31 = vpop.permute.xlu1 %7944 }
 0x686   :  { %v8195_v19 = vpop.permute.xlu0 %8194  ;;  %v8369_v24 = vsel %vm731_vm3, %v7665_v4, %v7945_v31  ;;  %v7769_v4 = vld [vmem:[#allocation2 + $0x351] sm:$0xff] }
 0x687   :  { %v8430_v48 = vsel %vm796_vm4, %v8366_v10, %v8195_v19  ;;  %8256 = vrot.lane.b32.xlu1 %v7821_v62, %s11657_s10  ;;  %v7673_v10 = vld [vmem:[#allocation2 + $0x1a0] sm:$0xff] }
 0x688   :  { %7998 = vrot.lane.b32.xlu0 %v7756_v14, %s11655_s22  ;;  %11159 = vmatprep.mubr.msk.f32.mxu1 %vm863_vm5, %v8430_v48  ;;  %v7767_v62 = vld [vmem:[#allocation2 + $0x339] sm:$0xff] }
 0x689   :  { %v8201_v41 = vpop.permute.xlu1 %8200  ;;  %11160 = vmatmul.mubr.msk.f32.gmra.mrb[20].mxu1 %vm863_vm5, %v8431_v12  ;;  %v7828_v48 = vld [vmem:[#allocation2 + $0x31a] sm:$0xff] }
 0x68a   :  { %v7943_v34 = vpop.permute.xlu0 %7942  ;;  %v8433_v8 = vsel %vm796_vm4, %v8369_v24, %v8201_v41  ;;  %v7833_v24 = vld [vmem:[#allocation2 + $0x352] sm:$0xff] }
 0x68b   :  { %8004 = vrot.lane.b32.xlu1 %v7759_v33, %s11655_s22  ;;  %v8368_v27 = vsel %vm731_vm3, %v7664_v21, %v7943_v34  ;;  %v7831_v33 = vld [vmem:[#allocation2 + $0x33a] sm:$0xff]  ;;  %v7766_v21 = vld [vmem:[#allocation2 + $0x331] sm:$0xff] }
 0x68c   :  { %8254 = vrot.lane.b32.xlu0 %v7820_v46, %s11657_s10 }
 0x68d   :  { %v7949_v17 = vpop.permute.xlu1 %7948 }
 0x68e   :  { %v8199_v60 = vpop.permute.xlu0 %8198  ;;  %v8371_v39 = vsel %vm731_vm3, %v7667_v15, %v7949_v17 }
 0x68f   :  { %v8432_v47 = vsel %vm796_vm4, %v8368_v27, %v8199_v60  ;;  %8260 = vrot.lane.b32.xlu1 %v7823_v26, %s11657_s10  ;;  %v7830_v26 = vld [vmem:[#allocation2 + $0x332] sm:$0xff] }
 0x690   :  { %8002 = vrot.lane.b32.xlu0 %v7758_v44, %s11655_s22  ;;  %11162 = vmatprep.mubr.msk.f32.mxu1 %vm863_vm5, %v8432_v47  ;;  %v7674_v47 = vld [vmem:[#allocation2 + $0x1e0] sm:$0xff] }
 0x691   :  { %v8205_v11 = vpop.permute.xlu1 %8204  ;;  %11163 = vmatmul.mubr.msk.f32.gmra.mrb[22].mxu1 %vm863_vm5, %v8433_v8  ;;  %v7768_v8 = vld [vmem:[#allocation2 + $0x349] sm:$0xff] }
 0x692   :  { %v7947_v38 = vpop.permute.xlu0 %7946  ;;  %v8435_v54 = vsel %vm796_vm4, %v8371_v39, %v8205_v11  ;;  %v7675_v11 = vld [vmem:[#allocation2 + $0x1e8] sm:$0xff] }
 0x693   :  { %8008 = vrot.lane.b32.xlu1 %v7761_v13, %s11655_s22  ;;  %v8370_v22 = vsel %vm731_vm3, %v7666_v25, %v7947_v38 }
 0x694   :  { %8258 = vrot.lane.b32.xlu0 %v7822_v16, %s11657_s10 }
 0x695   :  { %v7953_v42 = vpop.permute.xlu1 %7952 }
 0x696   :  { %v8203_v56 = vpop.permute.xlu0 %8202  ;;  %v8373_v32 = vsel %vm731_vm3, %v7669_v50, %v7953_v42 }
 0x697   :  { %v8434_v18 = vsel %vm796_vm4, %v8370_v22, %v8203_v56  ;;  %8264 = vrot.lane.b32.xlu1 %v7825_v61, %s11657_s10  ;;  %v7832_v22 = vld [vmem:[#allocation2 + $0x34a] sm:$0xff]  ;;  %v7676_v61 = vld [vmem:[#allocation2 + $0x1f8] sm:$0xff] }
 0x698   :  { %8006 = vrot.lane.b32.xlu0 %v7760_v57, %s11655_s22  ;;  %11165 = vmatprep.mubr.msk.f32.mxu1 %vm863_vm5, %v8434_v18  ;;  %v7677_v18 = vld [vmem:[#allocation2 + $0x200] sm:$0xff] }
 0x699   :  { %v8209_v55 = vpop.permute.xlu1 %8208  ;;  %11166 = vmatmul.mubr.msk.f32.gmra.mrb[24].mxu1 %vm863_vm5, %v8435_v54 }
 0x69a   :  { %v7951_v7 = vpop.permute.xlu0 %7950  ;;  %v8437_v58 = vsel %vm796_vm4, %v8373_v32, %v8209_v55 }
 0x69b   :  { %8012 = vrot.lane.b32.xlu1 %v7763_v29, %s11655_s22  ;;  %v8372_v37 = vsel %vm731_vm3, %v7668_v63, %v7951_v7 }
 0x69c   :  { %8262 = vrot.lane.b32.xlu0 %v7824_v36, %s11657_s10 }
 0x69d   :  { %v7957_v49 = vpop.permute.xlu1 %7956 }
 0x69e   :  { %v8207_v43 = vpop.permute.xlu0 %8206  ;;  %v8375_v53 = vsel %vm731_vm3, %v7671_v0, %v7957_v49  ;;  %v7678_v49 = vld [vmem:[#allocation2 + $0x210] sm:$0xff] }
 0x69f   :  { %v8436_v20 = vsel %vm796_vm4, %v8372_v37, %v8207_v43  ;;  %8268 = vrot.lane.b32.xlu1 %v7827_v3, %s11657_s10  ;;  %v7679_v37 = vld [vmem:[#allocation2 + $0x218] sm:$0xff] }
 0x6a0   :  { %8010 = vrot.lane.b32.xlu0 %v7762_v35, %s11655_s22  ;;  %11168 = vmatprep.mubr.msk.f32.mxu1 %vm863_vm5, %v8436_v20 }
 0x6a1   :  { %v8213_v45 = vpop.permute.xlu1 %8212  ;;  %11169 = vmatmul.mubr.msk.f32.gmra.mrb[26].mxu1 %vm863_vm5, %v8437_v58 }
 0x6a2   :  { %v7955_v2 = vpop.permute.xlu0 %7954  ;;  %v8439_v31 = vsel %vm796_vm4, %v8375_v53, %v8213_v45 }
 0x6a3   :  { %8016 = vrot.lane.b32.xlu1 %v7765_v51, %s11655_s22  ;;  %v8374_v59 = vsel %vm731_vm3, %v7670_v9, %v7955_v2  ;;  %v7680_v2 = vld [vmem:[#allocation2 + $0x228] sm:$0xff] }
 0x6a4   :  { %8266 = vrot.lane.b32.xlu0 %v7826_v6, %s11657_s10  ;;  %v7681_v6 = vld [vmem:[#allocation2 + $0x230] sm:$0xff] }
 0x6a5   :  { %v7961_v28 = vpop.permute.xlu1 %7960 }
 0x6a6   :  { %v8211_v23 = vpop.permute.xlu0 %8210  ;;  %v8377_v14 = vsel %vm731_vm3, %v7673_v10, %v7961_v28 }
 0x6a7   :  { %v8438_v40 = vsel %vm796_vm4, %v8374_v59, %v8211_v23  ;;  %8272 = vrot.lane.b32.xlu1 %v7829_v30, %s11657_s10 }
 0x6a8   :  { %8014 = vrot.lane.b32.xlu0 %v7764_v5, %s11655_s22  ;;  %11171 = vmatprep.mubr.msk.f32.mxu1 %vm863_vm5, %v8438_v40  ;;  %v7682_v40 = vld [vmem:[#allocation2 + $0x240] sm:$0xff] }
 0x6a9   :  { %v8217_v1 = vpop.permute.xlu1 %8216  ;;  %11172 = vmatmul.mubr.msk.f32.gmra.mrb[28].mxu1 %vm863_vm5, %v8439_v31  ;;  %v7683_v31 = vld [vmem:[#allocation2 + $0x248] sm:$0xff] }
 0x6aa   :  { %v7959_v19 = vpop.permute.xlu0 %7958  ;;  %v8441_v17 = vsel %vm796_vm4, %v8377_v14, %v8217_v1 }
 0x6ab   :  { %8020 = vrot.lane.b32.xlu1 %v7767_v62, %s11655_s22  ;;  %v8376_v41 = vsel %vm731_vm3, %v7672_v52, %v7959_v19 }
 0x6ac   :  { %8270 = vrot.lane.b32.xlu0 %v7828_v48, %s11657_s10 }
 0x6ad   :  { %v7965_v12 = vpop.permute.xlu1 %7964 }
 0x6ae   :  { %v8215_v34 = vpop.permute.xlu0 %8214  ;;  %v8379_v16 = vsel %vm731_vm3, %v7675_v11, %v7965_v12  ;;  %v7684_v12 = vld [vmem:[#allocation2 + $0x258] sm:$0xff] }
 0x6af   :  { %v8440_v46 = vsel %vm796_vm4, %v8376_v41, %v8215_v34  ;;  %8276 = vrot.lane.b32.xlu1 %v7831_v33, %s11657_s10  ;;  %v7685_v34 = vld [vmem:[#allocation2 + $0x260] sm:$0xff] }
 0x6b0   :  { %8018 = vrot.lane.b32.xlu0 %v7766_v21, %s11655_s22  ;;  %11174 = vmatprep.mubr.msk.f32.mxu1 %vm863_vm5, %v8440_v46 }
 0x6b1   :  { %v8221_v27 = vpop.permute.xlu1 %8220  ;;  %11175 = vmatmul.mubr.msk.f32.gmra.mrb[30].mxu1 %vm863_vm5, %v8441_v17 }
 0x6b2   :  { %v7963_v60 = vpop.permute.xlu0 %7962  ;;  %v8443_v42 = vsel %vm796_vm4, %v8379_v16, %v8221_v27 }
 0x6b3   :  { %8024 = vrot.lane.b32.xlu1 %v7769_v4, %s11655_s22  ;;  %v8378_v38 = vsel %vm731_vm3, %v7674_v47, %v7963_v60  ;;  %v7687_v47 = vld [vmem:[#allocation2 + $0x278] sm:$0xff] }
 0x6b4   :  { %8274 = vrot.lane.b32.xlu0 %v7830_v26, %s11657_s10  ;;  %v7686_v26 = vld [vmem:[#allocation2 + $0x270] sm:$0xff] }
 0x6b5   :  { %v7969_v44 = vpop.permute.xlu1 %7968 }
 0x6b6   :  { %v8219_v13 = vpop.permute.xlu0 %8218  ;;  %v8381_v55 = vsel %vm731_vm3, %v7677_v18, %v7969_v44 }
 0x6b7   :  { %v8442_v25 = vsel %vm796_vm4, %v8378_v38, %v8219_v13  ;;  %8280 = vrot.lane.b32.xlu1 %v7833_v24, %s11657_s10 }
 0x6b8   :  { %8022 = vrot.lane.b32.xlu0 %v7768_v8, %s11655_s22  ;;  %11177 = vmatprep.mubr.msk.f32.mxu1 %vm863_vm5, %v8442_v25 }
 0x6b9   :  { %v8225_v15 = vpop.permute.xlu1 %8224  ;;  %11178 = vmatmul.mubr.msk.f32.gmra.mrb[32].mxu1 %vm863_vm5, %v8443_v42  ;;  %v7688_v42 = vld [vmem:[#allocation2 + $0x288] sm:$0xff] }
 0x6ba   :  { %v7967_v56 = vpop.permute.xlu0 %7966  ;;  %v8445_v29 = vsel %vm796_vm4, %v8381_v55, %v8225_v15 }
 0x6bb   :  { %v8380_v57 = vsel %vm731_vm3, %v7676_v61, %v7967_v56 }
 0x6bc   :  { %8278 = vrot.lane.b32.xlu0 %v7832_v22, %s11657_s10  ;;  %v7689_v22 = vld [vmem:[#allocation2 + $0x290] sm:$0xff] }
 0x6bd   :  { %v7973_v39 = vpop.permute.xlu1 %7972 }
 0x6be   :  { %v8223_v54 = vpop.permute.xlu0 %8222  ;;  %v8383_v32 = vsel %vm731_vm3, %v7679_v37, %v7973_v39 }
 0x6bf   :  { %v8444_v7 = vsel %vm796_vm4, %v8380_v57, %v8223_v54 }
 0x6c0   :  { %11180 = vmatprep.mubr.msk.f32.mxu1 %vm863_vm5, %v8444_v7  ;;  %v7690_v7 = vld [vmem:[#allocation2 + $0x2a0] sm:$0xff] }
 0x6c1   :  { %v8229_v36 = vpop.permute.xlu1 %8228  ;;  %11181 = vmatmul.mubr.msk.f32.gmra.mrb[34].mxu1 %vm863_vm5, %v8445_v29 }
 0x6c2   :  { %v7971_v63 = vpop.permute.xlu0 %7970  ;;  %v8447_v35 = vsel %vm796_vm4, %v8383_v32, %v8229_v36  ;;  %v7691_v36 = vld [vmem:[#allocation2 + $0x2a8] sm:$0xff] }
 0x6c3   :  { %v8382_v43 = vsel %vm731_vm3, %v7678_v49, %v7971_v63 }
 0x6c5   :  { %v7977_v50 = vpop.permute.xlu1 %7976 }
 0x6c6   :  { %v8227_v3 = vpop.permute.xlu0 %8226  ;;  %v8385_v0 = vsel %vm731_vm3, %v7681_v6, %v7977_v50 }
 0x6c7   :  { %v8446_v20 = vsel %vm796_vm4, %v8382_v43, %v8227_v3 }
 0x6c8   :  { %11183 = vmatprep.mubr.msk.f32.mxu1 %vm863_vm5, %v8446_v20  ;;  %v7692_v20 = vld [vmem:[#allocation2 + $0x2b8] sm:$0xff] }
 0x6c9   :  { %v8233_v58 = vpop.permute.xlu1 %8232  ;;  %11184 = vmatmul.mubr.msk.f32.gmra.mrb[36].mxu1 %vm863_vm5, %v8447_v35 }
 0x6ca   :  { %v7975_v45 = vpop.permute.xlu0 %7974  ;;  %v8449_v23 = vsel %vm796_vm4, %v8385_v0, %v8233_v58  ;;  %v7693_v58 = vld [vmem:[#allocation2 + $0x2c0] sm:$0xff] }
 0x6cb   :  { %v8384_v9 = vsel %vm731_vm3, %v7680_v2, %v7975_v45 }
 0x6cd   :  { %v7981_v51 = vpop.permute.xlu1 %7980 }
 0x6ce   :  { %v8231_v28 = vpop.permute.xlu0 %8230  ;;  %v8387_v19 = vsel %vm731_vm3, %v7683_v31, %v7981_v51 }
 0x6cf   :  { %v8448_v59 = vsel %vm796_vm4, %v8384_v9, %v8231_v28 }
 0x6d0   :  { %11186 = vmatprep.mubr.msk.f32.mxu1 %vm863_vm5, %v8448_v59  ;;  %v7694_v59 = vld [vmem:[#allocation2 + $0x2d0] sm:$0xff] }
 0x6d1   :  { %v8237_v30 = vpop.permute.xlu1 %8236  ;;  %11187 = vmatmul.mubr.msk.f32.gmra.mrb[38].mxu1 %vm863_vm5, %v8449_v23 }
 0x6d2   :  { %v7979_v53 = vpop.permute.xlu0 %7978  ;;  %v8451_v52 = vsel %vm796_vm4, %v8387_v19, %v8237_v30  ;;  %v7695_v30 = vld [vmem:[#allocation2 + $0x2d8] sm:$0xff] }
 0x6d3   :  { %v8386_v1 = vsel %vm731_vm3, %v7682_v40, %v7979_v53 }
 0x6d5   :  { %v7985_v5 = vpop.permute.xlu1 %7984 }
 0x6d6   :  { %v8235_v10 = vpop.permute.xlu0 %8234  ;;  %v8389_v21 = vsel %vm731_vm3, %v7685_v34, %v7985_v5 }
 0x6d7   :  { %v8450_v62 = vsel %vm796_vm4, %v8386_v1, %v8235_v10 }
 0x6d8   :  { %11189 = vmatprep.mubr.msk.f32.mxu1 %vm863_vm5, %v8450_v62  ;;  %v16456_v62 = vld [vmem:[%s17004_s4] ss:$0 sm:$0xff] }
 0x6d9   :  { %v8241_v48 = vpop.permute.xlu1 %8240  ;;  %11190 = vmatmul.mubr.msk.f32.gmra.mrb[40].mxu1 %vm863_vm5, %v8451_v52 }
 0x6da   :  { %v7983_v14 = vpop.permute.xlu0 %7982  ;;  %v8453_v4 = vsel %vm796_vm4, %v8389_v21, %v8241_v48  ;;  %v10166_v48 = vld [vmem:[%s17000_s0 + $0x21] sm:$0xff] }
 0x6db   :  { %v8388_v33 = vsel %vm731_vm3, %v7684_v12, %v7983_v14  ;;  %v7696_v14 = vld [vmem:[#allocation2 + $0x2e8] sm:$0xff] }
 0x6dd   :  { %v7989_v41 = vpop.permute.xlu1 %7988 }
 0x6de   :  { %v8239_v46 = vpop.permute.xlu0 %8238  ;;  %v8391_v11 = vsel %vm731_vm3, %v7687_v47, %v7989_v41 }
 0x6df   :  { %v8452_v17 = vsel %vm796_vm4, %v8388_v33, %v8239_v46  ;;  %v10165_v33 = vld [vmem:[%s17000_s0 + $0x19] sm:$0xff]  ;;  %v7697_v46 = vld [vmem:[#allocation2 + $0x2f0] sm:$0xff] }
 0x6e0   :  { %11192 = vmatprep.mubr.msk.f32.mxu1 %vm863_vm5, %v8452_v17 }
 0x6e1   :  { %v8245_v27 = vpop.permute.xlu1 %8244  ;;  %11193 = vmatmul.mubr.msk.f32.gmra.mrb[42].mxu1 %vm863_vm5, %v8453_v4 }
 0x6e2   :  { %v7987_v60 = vpop.permute.xlu0 %7986  ;;  %v8455_v13 = vsel %vm796_vm4, %v8391_v11, %v8245_v27 }
 0x6e3   :  { %v8390_v44 = vsel %vm731_vm3, %v7686_v26, %v7987_v60 }
 0x6e5   :  { %v7993_v24 = vpop.permute.xlu1 %7992 }
 0x6e6   :  { %v8243_v8 = vpop.permute.xlu0 %8242  ;;  %v8393_v39 = vsel %vm731_vm3, %v7689_v22, %v7993_v24 }
 0x6e7   :  { %v8454_v38 = vsel %vm796_vm4, %v8390_v44, %v8243_v8 }
 0x6e8   :  { %11195 = vmatprep.mubr.msk.f32.mxu1 %vm863_vm5, %v8454_v38 }
 0x6e9   :  { %v8249_v16 = vpop.permute.xlu1 %8248  ;;  %11196 = vmatmul.mubr.msk.f32.gmra.mrb[44].mxu1 %vm863_vm5, %v8455_v13 }
 0x6ea   :  { %v7991_v25 = vpop.permute.xlu0 %7990  ;;  %v8457_v57 = vsel %vm796_vm4, %v8393_v39, %v8249_v16  ;;  %v10168_v16 = vld [vmem:[%s17000_s0 + $0x39] sm:$0xff] }
 0x6eb   :  { %v8392_v56 = vsel %vm731_vm3, %v7688_v42, %v7991_v25  ;;  %v7698_v25 = vld [vmem:[#allocation2 + $0x300] sm:$0xff] }
 0x6ed   :  { %v7997_v15 = vpop.permute.xlu1 %7996 }
 0x6ee   :  { %v8247_v61 = vpop.permute.xlu0 %8246  ;;  %v8395_v50 = vsel %vm731_vm3, %v7691_v36, %v7997_v15 }
 0x6ef   :  { %v8456_v18 = vsel %vm796_vm4, %v8392_v56, %v8247_v61  ;;  %v10167_v56 = vld [vmem:[%s17000_s0 + $0x31] sm:$0xff]  ;;  %v7699_v61 = vld [vmem:[#allocation2 + $0x308] sm:$0xff] }
 0x6f0   :  { %11198 = vmatprep.mubr.msk.f32.mxu1 %vm863_vm5, %v8456_v18 }
 0x6f1   :  { %v8253_v54 = vpop.permute.xlu1 %8252  ;;  %11199 = vmatmul.mubr.msk.f32.gmra.mrb[46].mxu1 %vm863_vm5, %v8457_v57 }
 0x6f2   :  { %v7995_v55 = vpop.permute.xlu0 %7994  ;;  %v8459_v43 = vsel %vm796_vm4, %v8395_v50, %v8253_v54 }
 0x6f3   :  { %v8394_v63 = vsel %vm731_vm3, %v7690_v7, %v7995_v55 }
 0x6f5   :  { %v8001_v29 = vpop.permute.xlu1 %8000 }
 0x6f6   :  { %v8251_v49 = vpop.permute.xlu0 %8250  ;;  %v8397_v51 = vsel %vm731_vm3, %v7693_v58, %v8001_v29 }
 0x6f7   :  { %v8458_v37 = vsel %vm796_vm4, %v8394_v63, %v8251_v49 }
 0x6f8   :  { %11201 = vmatprep.mubr.msk.f32.mxu1 %vm863_vm5, %v8458_v37 }
 0x6f9   :  { %v8257_v3 = vpop.permute.xlu1 %8256  ;;  %11202 = vmatmul.mubr.msk.f32.gmra.mrb[48].mxu1 %vm863_vm5, %v8459_v43 }
 0x6fa   :  { %v7999_v32 = vpop.permute.xlu0 %7998  ;;  %v8461_v9 = vsel %vm796_vm4, %v8397_v51, %v8257_v3  ;;  %v10170_v3 = vld [vmem:[%s17000_s0 + $0x51] sm:$0xff] }
 0x6fb   :  { %v8396_v45 = vsel %vm731_vm3, %v7692_v20, %v7999_v32  ;;  %v7700_v32 = vld [vmem:[#allocation2 + $0x318] sm:$0xff] }
 0x6fd   :  { %v8005_v35 = vpop.permute.xlu1 %8004 }
 0x6fe   :  { %v8255_v2 = vpop.permute.xlu0 %8254  ;;  %v8399_v5 = vsel %vm731_vm3, %v7695_v30, %v8005_v35 }
 0x6ff   :  { %v8460_v6 = vsel %vm796_vm4, %v8396_v45, %v8255_v2  ;;  %v10169_v45 = vld [vmem:[%s17000_s0 + $0x49] sm:$0xff]  ;;  %v7701_v2 = vld [vmem:[#allocation2 + $0x320] sm:$0xff] }
 0x700   :  { %11204 = vmatprep.mubr.msk.f32.mxu1 %vm863_vm5, %v8460_v6 }
 0x701   :  { %v8261_v28 = vpop.permute.xlu1 %8260  ;;  %11205 = vmatmul.mubr.msk.f32.gmra.mrb[50].mxu1 %vm863_vm5, %v8461_v9 }
 0x702   :  { %v8003_v0 = vpop.permute.xlu0 %8002  ;;  %v8463_v1 = vsel %vm796_vm4, %v8399_v5, %v8261_v28 }
 0x703   :  { %v8398_v53 = vsel %vm731_vm3, %v7694_v59, %v8003_v0 }
 0x705   :  { %v8009_v23 = vpop.permute.xlu1 %8008 }
 0x706   :  { %v8259_v40 = vpop.permute.xlu0 %8258  ;;  %v8401_v27 = vsel %vm731_vm3, %v7697_v46, %v8009_v23 }
 0x707   :  { %v8462_v31 = vsel %vm796_vm4, %v8398_v53, %v8259_v40 }
 0x708   :  { %11207 = vmatprep.mubr.msk.f32.mxu1 %vm863_vm5, %v8462_v31 }
 0x709   :  { %v8265_v10 = vpop.permute.xlu1 %8264  ;;  %11208 = vmatmul.mubr.msk.f32.gmra.mrb[52].mxu1 %vm863_vm5, %v8463_v1 }
 0x70a   :  { %v8007_v19 = vpop.permute.xlu0 %8006  ;;  %v8465_v24 = vsel %vm796_vm4, %v8401_v27, %v8265_v10  ;;  %v10172_v10 = vld [vmem:[%s17000_s0 + $0x69] sm:$0xff] }
 0x70b   :  { %v8400_v21 = vsel %vm731_vm3, %v7696_v14, %v8007_v19  ;;  %v7702_v19 = vld [vmem:[#allocation2 + $0x330] sm:$0xff]  ;;  %v10171_v14 = vld [vmem:[%s17000_s0 + $0x61] sm:$0xff] }
 0x70c   :  { %v11131_v52 = vpop.f32.mrb[0].mxu1 }
 0x70d   :  { %v11325_v12 = vadd.f32 %v11131_v52, %v16456_v62  ;;  %v8013_v41 = vpop.permute.xlu1 %8012  ;;  %v8738_v34 = vpop.f32.mrb[1].mxu1 }
 0x70e   :  { %v11326_v17 = vadd.f32 %v16456_v62, %v8738_v34  ;;  %v8263_v4 = vpop.permute.xlu0 %8262  ;;  %v8403_v54 = vsel %vm731_vm3, %v7699_v61, %v8013_v41 }
 0x70f   :  { %v9186_v60 = vadd.f32 %v11325_v12, %v10166_v48  ;;  %v8464_v26 = vsel %vm796_vm4, %v8400_v21, %v8263_v4  ;;  %v7703_v12 = vld [vmem:[#allocation2 + $0x338] sm:$0xff] }
 0x710   :  { %v9185_v47 = vadd.f32 %v11326_v17, %v10165_v33  ;;  %11210 = vmatprep.mubr.msk.f32.mxu1 %vm863_vm5, %v8464_v26 }
 0x711   :  { %v9250_v44 = vmax.f32 %v9186_v60, 0.0  ;;  %v8269_v8 = vpop.permute.xlu1 %8268  ;;  %11211 = vmatmul.mubr.msk.f32.gmra.mrb[54].mxu1 %vm863_vm5, %v8465_v24 }
 0x712   :  { %v9249_v11 = vmax.f32 %v9185_v47, 0.0  ;;  %v8011_v38 = vpop.permute.xlu0 %8010  ;;  %v8467_v29 = vsel %vm796_vm4, %v8403_v54, %v8269_v8  ;;  %v7705_v47 = vld [vmem:[#allocation2 + $0x350] sm:$0xff]  ;;  %v7704_v8 = vld [vmem:[#allocation2 + $0x348] sm:$0xff] }
 0x713   :  { %9314 = vst.msk [vmem:[%s17005_s5 + $0x8] sm:$0xff] %vm731_vm3, %v9250_v44  ;;  %v8402_v39 = vsel %vm731_vm3, %v7698_v25, %v8011_v38  ;;  %v10174_v38 = vld [vmem:[%s17000_s0 + $0x81] sm:$0xff] }
 0x714   :  { %9313 = vst.msk [vmem:[%s17005_s5] sm:$0xff] %vm731_vm3, %v9249_v11  ;;  %v11134_v13 = vpop.f32.mrb[2].mxu1 }
 0x715   :  { %v11327_v42 = vadd.f32 %v11134_v13, %v16456_v62  ;;  %v8017_v15 = vpop.permute.xlu1 %8016  ;;  %v8748_v22 = vpop.f32.mrb[3].mxu1 }
 0x716   :  { %v11328_v18 = vadd.f32 %v16456_v62, %v8748_v22  ;;  %v8267_v57 = vpop.permute.xlu0 %8266  ;;  %v8405_v28 = vsel %vm731_vm3, %v7701_v2, %v8017_v15  ;;  %v10173_v15 = vld [vmem:[%s17000_s0 + $0x79] sm:$0xff] }
 0x717   :  { %v9188_v55 = vadd.f32 %v11327_v42, %v10168_v16  ;;  %v8466_v7 = vsel %vm796_vm4, %v8402_v39, %v8267_v57 }
 0x718   :  { %v9187_v36 = vadd.f32 %v11328_v18, %v10167_v56  ;;  %11213 = vmatprep.mubr.msk.f32.mxu1 %vm863_vm5, %v8466_v7 }
 0x719   :  { %v9252_v63 = vmax.f32 %v9188_v55, 0.0  ;;  %v8273_v49 = vpop.permute.xlu1 %8272  ;;  %11214 = vmatmul.mubr.msk.f32.gmra.mrb[56].mxu1 %vm863_vm5, %v8467_v29 }
 0x71a   :  { %v9251_v50 = vmax.f32 %v9187_v36, 0.0  ;;  %v8015_v37 = vpop.permute.xlu0 %8014  ;;  %v8469_v23 = vsel %vm796_vm4, %v8405_v28, %v8273_v49  ;;  %v10176_v36 = vld [vmem:[%s17000_s0 + $0x99] sm:$0xff] }
 0x71b   :  { %9316 = vst.msk [vmem:[%s17005_s5 + $0x18] sm:$0xff] %vm731_vm3, %v9252_v63  ;;  %v8404_v51 = vsel %vm731_vm3, %v7700_v32, %v8015_v37 }
 0x71c   :  { %9315 = vst.msk [vmem:[%s17005_s5 + $0x10] sm:$0xff] %vm731_vm3, %v9251_v50  ;;  %v11137_v43 = vpop.f32.mrb[4].mxu1  ;;  %v10175_v50 = vld [vmem:[%s17000_s0 + $0x91] sm:$0xff] }
 0x71d   :  { %v11329_v20 = vadd.f32 %v11137_v43, %v16456_v62  ;;  %v8021_v35 = vpop.permute.xlu1 %8020  ;;  %v8758_v58 = vpop.f32.mrb[5].mxu1 }
 0x71e   :  { %v11330_v6 = vadd.f32 %v16456_v62, %v8758_v58  ;;  %v8271_v9 = vpop.permute.xlu0 %8270  ;;  %v8407_v46 = vsel %vm731_vm3, %v7703_v12, %v8021_v35  ;;  %v10178_v58 = vld [vmem:[%s17000_s0 + $0xb1] sm:$0xff] }
 0x71f   :  { %v9190_v0 = vadd.f32 %v11329_v20, %v10170_v3  ;;  %v8468_v59 = vsel %vm796_vm4, %v8404_v51, %v8271_v9  ;;  %v10177_v51 = vld [vmem:[%s17000_s0 + $0xa9] sm:$0xff] }
 0x720   :  { %v9189_v30 = vadd.f32 %v11330_v6, %v10169_v45  ;;  %11216 = vmatprep.mubr.msk.f32.mxu1 %vm863_vm5, %v8468_v59 }
 0x721   :  { %v9254_v53 = vmax.f32 %v9190_v0, 0.0  ;;  %11217 = vmatmul.mubr.msk.f32.gmra.mrb[58].mxu1 %vm863_vm5, %v8469_v23  ;;  %v8277_v31 = vpop.permute.xlu1 %8276 }
 0x722   :  { %v9253_v40 = vmax.f32 %v9189_v30, 0.0  ;;  %v8019_v5 = vpop.permute.xlu0 %8018  ;;  %v8471_v27 = vsel %vm796_vm4, %v8407_v46, %v8277_v31  ;;  %v10180_v30 = vld [vmem:[%s17000_s0 + $0xc9] sm:$0xff] }
 0x723   :  { %9318 = vst.msk [vmem:[%s17005_s5 + $0x28] sm:$0xff] %vm731_vm3, %v9254_v53  ;;  %v8406_v41 = vsel %vm731_vm3, %v7702_v19, %v8019_v5  ;;  %v10179_v5 = vld [vmem:[%s17000_s0 + $0xc1] sm:$0xff] }
 0x724   :  { %9317 = vst.msk [vmem:[%s17005_s5 + $0x20] sm:$0xff] %vm731_vm3, %v9253_v40  ;;  %v11140_v1 = vpop.f32.mrb[6].mxu1 }
 0x725   :  { %v11331_v52 = vadd.f32 %v11140_v1, %v16456_v62  ;;  %v8768_v48 = vpop.f32.mrb[7].mxu1  ;;  %v8025_v4 = vpop.permute.xlu1 %8024 }
 0x726   :  { %v11332_v34 = vadd.f32 %v16456_v62, %v8768_v48  ;;  %v8275_v33 = vpop.permute.xlu0 %8274  ;;  %v8409_v13 = vsel %vm731_vm3, %v7705_v47, %v8025_v4  ;;  %v10183_v47 = vld [vmem:[%s17000_s0 + $0xf1] sm:$0xff] }
 0x727   :  { %v9192_v21 = vadd.f32 %v11331_v52, %v10172_v10  ;;  %v8470_v17 = vsel %vm796_vm4, %v8406_v41, %v8275_v33 }
 0x728   :  { %v9191_v60 = vadd.f32 %v11332_v34, %v10171_v14  ;;  %11219 = vmatprep.mubr.msk.f32.mxu1 %vm863_vm5, %v8470_v17  ;;  %v10182_v14 = vld [vmem:[%s17000_s0 + $0xe1] sm:$0xff]  ;;  %v10181_v34 = vld [vmem:[%s17000_s0 + $0xd9] sm:$0xff] }
 0x729   :  { %v9256_v26 = vmax.f32 %v9192_v21, 0.0  ;;  %11220 = vmatmul.mubr.msk.f32.gmra.mrb[60].mxu1 %vm863_vm5, %v8471_v27  ;;  %v8281_v16 = vpop.permute.xlu1 %8280 }
 0x72a   :  { %v9255_v24 = vmax.f32 %v9191_v60, 0.0  ;;  %v8023_v44 = vpop.permute.xlu0 %8022  ;;  %v8473_v57 = vsel %vm796_vm4, %v8409_v13, %v8281_v16  ;;  %v10184_v60 = vld [vmem:[%s17000_s0 + $0xf9] sm:$0xff] }
 0x72b   :  { %9320 = vst.msk [vmem:[%s17005_s5 + $0x38] sm:$0xff] %vm731_vm3, %v9256_v26  ;;  %v8408_v22 = vsel %vm731_vm3, %v7704_v8, %v8023_v44 }
 0x72c   :  { %9319 = vst.msk [vmem:[%s17005_s5 + $0x30] sm:$0xff] %vm731_vm3, %v9255_v24  ;;  %v11143_v11 = vpop.f32.mrb[8].mxu1 }
 0x72d   :  { %v11333_v25 = vadd.f32 %v11143_v11, %v16456_v62  ;;  %v8778_v42 = vpop.f32.mrb[9].mxu1 }
 0x72e   :  { %v11334_v56 = vadd.f32 %v16456_v62, %v8778_v42  ;;  %v8279_v61 = vpop.permute.xlu0 %8278 }
 0x72f   :  { %v9194_v39 = vadd.f32 %v11333_v25, %v10174_v38  ;;  %v8472_v18 = vsel %vm796_vm4, %v8408_v22, %v8279_v61  ;;  %v10186_v25 = vld [vmem:[%s17000_s0 + $0x111] sm:$0xff]  ;;  %v10185_v22 = vld [vmem:[%s17000_s0 + $0x109] sm:$0xff] }
 0x730   :  { %v9193_v54 = vadd.f32 %v11334_v56, %v10173_v15  ;;  %11222 = vmatprep.mubr.msk.f32.mxu1 %vm863_vm5, %v8472_v18 }
 0x731   :  { %v9258_v55 = vmax.f32 %v9194_v39, 0.0  ;;  %11223 = vmatmul.mubr.msk.f32.gmra.mrb[62].mxu1 %vm863_vm5, %v8473_v57 }
 0x732   :  { %v9257_v7 = vmax.f32 %v9193_v54, 0.0 }
 0x733   :  { %9322 = vst.msk [vmem:[%s17005_s5 + $0x48] sm:$0xff] %vm731_vm3, %v9258_v55  ;;  %v10188_v55 = vld [vmem:[%s17000_s0 + $0x129] sm:$0xff] }
 0x734   :  { %9321 = vst.msk [vmem:[%s17005_s5 + $0x40] sm:$0xff] %vm731_vm3, %v9257_v7  ;;  %v11146_v29 = vpop.f32.mrb[10].mxu1 }
 0x735   :  { %v11335_v63 = vadd.f32 %v11146_v29, %v16456_v62  ;;  %v8788_v49 = vpop.f32.mrb[11].mxu1 }
 0x736   :  { %v11336_v37 = vadd.f32 %v16456_v62, %v8788_v49 }
 0x737   :  { %v9196_v43 = vadd.f32 %v11335_v63, %v10176_v36  ;;  %v10187_v36 = vld [vmem:[%s17000_s0 + $0x121] sm:$0xff] }
 0x738   :  { %v9195_v3 = vadd.f32 %v11336_v37, %v10175_v50 }
 0x739   :  { %v9260_v32 = vmax.f32 %v9196_v43, 0.0 }
 0x73a   :  { %v9259_v20 = vmax.f32 %v9195_v3, 0.0 }
 0x73b   :  { %9324 = vst.msk [vmem:[%s17005_s5 + $0x58] sm:$0xff] %vm731_vm3, %v9260_v32  ;;  %v10190_v32 = vld [vmem:[%s17000_s0 + $0x141] sm:$0xff] }
 0x73c   :  { %9323 = vst.msk [vmem:[%s17005_s5 + $0x50] sm:$0xff] %vm731_vm3, %v9259_v20  ;;  %v11149_v35 = vpop.f32.mrb[12].mxu1 }
 0x73d   :  { %v11337_v45 = vadd.f32 %v11149_v35, %v16456_v62  ;;  %v8798_v2 = vpop.f32.mrb[13].mxu1 }
 0x73e   :  { %v11338_v6 = vadd.f32 %v16456_v62, %v8798_v2 }
 0x73f   :  { %v9198_v9 = vadd.f32 %v11337_v45, %v10178_v58  ;;  %v10189_v58 = vld [vmem:[%s17000_s0 + $0x139] sm:$0xff] }
 0x740   :  { %v9197_v28 = vadd.f32 %v11338_v6, %v10177_v51 }
 0x741   :  { %v9262_v0 = vmax.f32 %v9198_v9, 0.0 }
 0x742   :  { %v9261_v59 = vmax.f32 %v9197_v28, 0.0 }
 0x743   :  { %9326 = vst.msk [vmem:[%s17005_s5 + $0x68] sm:$0xff] %vm731_vm3, %v9262_v0  ;;  %v10192_v0 = vld [vmem:[%s17000_s0 + $0x159] sm:$0xff] }
 0x744   :  { %9325 = vst.msk [vmem:[%s17005_s5 + $0x60] sm:$0xff] %vm731_vm3, %v9261_v59  ;;  %v11152_v23 = vpop.f32.mrb[14].mxu1 }
 0x745   :  { %v11339_v53 = vadd.f32 %v11152_v23, %v16456_v62  ;;  %v8808_v40 = vpop.f32.mrb[15].mxu1 }
 0x746   :  { %v11340_v31 = vadd.f32 %v16456_v62, %v8808_v40 }
 0x747   :  { %v9200_v1 = vadd.f32 %v11339_v53, %v10180_v30  ;;  %v10191_v30 = vld [vmem:[%s17000_s0 + $0x151] sm:$0xff] }
 0x748   :  { %v9199_v10 = vadd.f32 %v11340_v31, %v10179_v5 }
 0x749   :  { %v9264_v19 = vmax.f32 %v9200_v1, 0.0 }
 0x74a   :  { %v9263_v52 = vmax.f32 %v9199_v10, 0.0 }
 0x74b   :  { %9328 = vst.msk [vmem:[%s17005_s5 + $0x78] sm:$0xff] %vm731_vm3, %v9264_v19  ;;  %v10194_v19 = vld [vmem:[%s17000_s0 + $0x171] sm:$0xff] }
 0x74c   :  { %9327 = vst.msk [vmem:[%s17005_s5 + $0x70] sm:$0xff] %vm731_vm3, %v9263_v52  ;;  %v11155_v48 = vpop.f32.mrb[16].mxu1 }
 0x74d   :  { %v11341_v12 = vadd.f32 %v11155_v48, %v16456_v62  ;;  %v8818_v41 = vpop.f32.mrb[17].mxu1 }
 0x74e   :  { %v11342_v33 = vadd.f32 %v16456_v62, %v8818_v41 }
 0x74f   :  { %v9202_v46 = vadd.f32 %v11341_v12, %v10182_v14  ;;  %v10193_v14 = vld [vmem:[%s17000_s0 + $0x169] sm:$0xff] }
 0x750   :  { %v9201_v21 = vadd.f32 %v11342_v33, %v10181_v34 }
 0x751   :  { %v9266_v17 = vmax.f32 %v9202_v46, 0.0 }
 0x752   :  { %v9265_v4 = vmax.f32 %v9201_v21, 0.0 }
 0x753   :  { %9330 = vst.msk [vmem:[%s17005_s5 + $0x88] sm:$0xff] %vm731_vm3, %v9266_v17  ;;  %v10196_v17 = vld [vmem:[%s17000_s0 + $0x189] sm:$0xff] }
 0x754   :  { %9329 = vst.msk [vmem:[%s17005_s5 + $0x80] sm:$0xff] %vm731_vm3, %v9265_v4  ;;  %v11158_v27 = vpop.f32.mrb[18].mxu1 }
 0x755   :  { %v11343_v26 = vadd.f32 %v11158_v27, %v16456_v62  ;;  %v8828_v24 = vpop.f32.mrb[19].mxu1 }
 0x756   :  { %v11344_v44 = vadd.f32 %v16456_v62, %v8828_v24 }
 0x757   :  { %v9204_v8 = vadd.f32 %v11343_v26, %v10184_v60  ;;  %v10195_v60 = vld [vmem:[%s17000_s0 + $0x181] sm:$0xff] }
 0x758   :  { %v9203_v11 = vadd.f32 %v11344_v44, %v10183_v47 }
 0x759   :  { %v9268_v38 = vmax.f32 %v9204_v8, 0.0 }
 0x75a   :  { %v9267_v13 = vmax.f32 %v9203_v11, 0.0 }
 0x75b   :  { %9332 = vst.msk [vmem:[%s17005_s5 + $0x98] sm:$0xff] %vm731_vm3, %v9268_v38  ;;  %v10198_v38 = vld [vmem:[%s17000_s0 + $0x1d1] sm:$0xff] }
 0x75c   :  { %9331 = vst.msk [vmem:[%s17005_s5 + $0x90] sm:$0xff] %vm731_vm3, %v9267_v13  ;;  %v11161_v16 = vpop.f32.mrb[20].mxu1 }
 0x75d   :  { %v11345_v42 = vadd.f32 %v11161_v16, %v16456_v62  ;;  %v8838_v15 = vpop.f32.mrb[21].mxu1 }
 0x75e   :  { %v11346_v56 = vadd.f32 %v16456_v62, %v8838_v15 }
 0x75f   :  { %v9206_v61 = vadd.f32 %v11345_v42, %v10186_v25  ;;  %v10197_v25 = vld [vmem:[%s17000_s0 + $0x1c9] sm:$0xff] }
 0x760   :  { %v9205_v39 = vadd.f32 %v11346_v56, %v10185_v22 }
 0x761   :  { %v9270_v18 = vmax.f32 %v9206_v61, 0.0 }
 0x762   :  { %v9269_v57 = vmax.f32 %v9205_v39, 0.0 }
 0x763   :  { %9334 = vst.msk [vmem:[%s17005_s5 + $0xa8] sm:$0xff] %vm731_vm3, %v9270_v18  ;;  %v10200_v18 = vld [vmem:[%s17000_s0 + $0x1e9] sm:$0xff] }
 0x764   :  { %9333 = vst.msk [vmem:[%s17005_s5 + $0xa0] sm:$0xff] %vm731_vm3, %v9269_v57  ;;  %v11164_v54 = vpop.f32.mrb[22].mxu1 }
 0x765   :  { %v11347_v7 = vadd.f32 %v11164_v54, %v16456_v62  ;;  %v8848_v29 = vpop.f32.mrb[23].mxu1 }
 0x766   :  { %v11348_v63 = vadd.f32 %v16456_v62, %v8848_v29 }
 0x767   :  { %v9208_v49 = vadd.f32 %v11347_v7, %v10188_v55  ;;  %v10199_v55 = vld [vmem:[%s17000_s0 + $0x1e1] sm:$0xff] }
 0x768   :  { %v9207_v50 = vadd.f32 %v11348_v63, %v10187_v36 }
 0x769   :  { %v9272_v37 = vmax.f32 %v9208_v49, 0.0 }
 0x76a   :  { %v9271_v43 = vmax.f32 %v9207_v50, 0.0 }
 0x76b   :  { %9336 = vst.msk [vmem:[%s17005_s5 + $0xb8] sm:$0xff] %vm731_vm3, %v9272_v37  ;;  %v10202_v37 = vld [vmem:[%s17000_s0 + $0x201] sm:$0xff] }
 0x76c   :  { %9335 = vst.msk [vmem:[%s17005_s5 + $0xb0] sm:$0xff] %vm731_vm3, %v9271_v43  ;;  %v11167_v3 = vpop.f32.mrb[24].mxu1 }
 0x76d   :  { %v11349_v20 = vadd.f32 %v11167_v3, %v16456_v62  ;;  %v8858_v35 = vpop.f32.mrb[25].mxu1 }
 0x76e   :  { %v11350_v45 = vadd.f32 %v16456_v62, %v8858_v35 }
 0x76f   :  { %v9210_v2 = vadd.f32 %v11349_v20, %v10190_v32  ;;  %v10201_v32 = vld [vmem:[%s17000_s0 + $0x1f9] sm:$0xff] }
 0x770   :  { %v9209_v51 = vadd.f32 %v11350_v45, %v10189_v58 }
 0x771   :  { %v9274_v6 = vmax.f32 %v9210_v2, 0.0 }
 0x772   :  { %v9273_v9 = vmax.f32 %v9209_v51, 0.0 }
 0x773   :  { %9338 = vst.msk [vmem:[%s17005_s5 + $0xc8] sm:$0xff] %vm731_vm3, %v9274_v6  ;;  %v10204_v6 = vld [vmem:[%s17000_s0 + $0x219] sm:$0xff] }
 0x774   :  { %9337 = vst.msk [vmem:[%s17005_s5 + $0xc0] sm:$0xff] %vm731_vm3, %v9273_v9  ;;  %v11170_v28 = vpop.f32.mrb[26].mxu1 }
 0x775   :  { %v11351_v59 = vadd.f32 %v11170_v28, %v16456_v62  ;;  %v8868_v23 = vpop.f32.mrb[27].mxu1 }
 0x776   :  { %v11352_v53 = vadd.f32 %v16456_v62, %v8868_v23 }
 0x777   :  { %v9212_v40 = vadd.f32 %v11351_v59, %v10192_v0  ;;  %v10203_v0 = vld [vmem:[%s17000_s0 + $0x211] sm:$0xff] }
 0x778   :  { %v9211_v5 = vadd.f32 %v11352_v53, %v10191_v30 }
 0x779   :  { %v9276_v31 = vmax.f32 %v9212_v40, 0.0 }
 0x77a   :  { %v9275_v1 = vmax.f32 %v9211_v5, 0.0 }
 0x77b   :  { %9340 = vst.msk [vmem:[%s17005_s5 + $0xd8] sm:$0xff] %vm731_vm3, %v9276_v31  ;;  %v10206_v31 = vld [vmem:[%s17000_s0 + $0x231] sm:$0xff] }
 0x77c   :  { %9339 = vst.msk [vmem:[%s17005_s5 + $0xd0] sm:$0xff] %vm731_vm3, %v9275_v1  ;;  %v11173_v10 = vpop.f32.mrb[28].mxu1 }
 0x77d   :  { %v11353_v52 = vadd.f32 %v11173_v10, %v16456_v62  ;;  %v8878_v48 = vpop.f32.mrb[29].mxu1 }
 0x77e   :  { %v11354_v12 = vadd.f32 %v16456_v62, %v8878_v48 }
 0x77f   :  { %v9214_v41 = vadd.f32 %v11353_v52, %v10194_v19  ;;  %v10205_v19 = vld [vmem:[%s17000_s0 + $0x229] sm:$0xff] }
 0x780   :  { %v9213_v34 = vadd.f32 %v11354_v12, %v10193_v14 }
 0x781   :  { %v9278_v33 = vmax.f32 %v9214_v41, 0.0 }
 0x782   :  { %v9277_v46 = vmax.f32 %v9213_v34, 0.0 }
 0x783   :  { %9342 = vst.msk [vmem:[%s17005_s5 + $0xe8] sm:$0xff] %vm731_vm3, %v9278_v33  ;;  %v10208_v33 = vld [vmem:[%s17000_s0 + $0x249] sm:$0xff] }
 0x784   :  { %9341 = vst.msk [vmem:[%s17005_s5 + $0xe0] sm:$0xff] %vm731_vm3, %v9277_v46  ;;  %v11176_v21 = vpop.f32.mrb[30].mxu1 }
 0x785   :  { %v11355_v4 = vadd.f32 %v11176_v21, %v16456_v62  ;;  %v8888_v27 = vpop.f32.mrb[31].mxu1 }
 0x786   :  { %v11356_v26 = vadd.f32 %v16456_v62, %v8888_v27 }
 0x787   :  { %v9216_v24 = vadd.f32 %v11355_v4, %v10196_v17  ;;  %v10207_v17 = vld [vmem:[%s17000_s0 + $0x241] sm:$0xff] }
 0x788   :  { %v9215_v47 = vadd.f32 %v11356_v26, %v10195_v60 }
 0x789   :  { %v9280_v44 = vmax.f32 %v9216_v24, 0.0 }
 0x78a   :  { %v9279_v8 = vmax.f32 %v9215_v47, 0.0 }
 0x78b   :  { %9344 = vst.msk [vmem:[%s17005_s5 + $0xf8] sm:$0xff] %vm731_vm3, %v9280_v44  ;;  %v10210_v44 = vld [vmem:[%s17000_s0 + $0x261] sm:$0xff] }
 0x78c   :  { %9343 = vst.msk [vmem:[%s17005_s5 + $0xf0] sm:$0xff] %vm731_vm3, %v9279_v8  ;;  %v11179_v11 = vpop.f32.mrb[32].mxu1 }
 0x78d   :  { %v11357_v13 = vadd.f32 %v11179_v11, %v16456_v62  ;;  %v8898_v16 = vpop.f32.mrb[33].mxu1 }
 0x78e   :  { %v11358_v42 = vadd.f32 %v16456_v62, %v8898_v16 }
 0x78f   :  { %v9218_v15 = vadd.f32 %v11357_v13, %v10198_v38  ;;  %v10209_v38 = vld [vmem:[%s17000_s0 + $0x259] sm:$0xff] }
 0x790   :  { %v9217_v22 = vadd.f32 %v11358_v42, %v10197_v25 }
 0x791   :  { %v9282_v56 = vmax.f32 %v9218_v15, 0.0 }
 0x792   :  { %v9281_v61 = vmax.f32 %v9217_v22, 0.0 }
 0x793   :  { %9346 = vst.msk [vmem:[%s17005_s5 + $0x108] sm:$0xff] %vm731_vm3, %v9282_v56  ;;  %v10212_v56 = vld [vmem:[%s17000_s0 + $0x279] sm:$0xff] }
 0x794   :  { %9345 = vst.msk [vmem:[%s17005_s5 + $0x100] sm:$0xff] %vm731_vm3, %v9281_v61  ;;  %v11182_v39 = vpop.f32.mrb[34].mxu1 }
 0x795   :  { %v11359_v57 = vadd.f32 %v11182_v39, %v16456_v62  ;;  %v8908_v54 = vpop.f32.mrb[35].mxu1 }
 0x796   :  { %v11360_v7 = vadd.f32 %v16456_v62, %v8908_v54 }
 0x797   :  { %v9220_v29 = vadd.f32 %v11359_v57, %v10200_v18  ;;  %v10211_v18 = vld [vmem:[%s17000_s0 + $0x271] sm:$0xff] }
 0x798   :  { %v9219_v36 = vadd.f32 %v11360_v7, %v10199_v55 }
 0x799   :  { %v9284_v63 = vmax.f32 %v9220_v29, 0.0 }
 0x79a   :  { %v9283_v49 = vmax.f32 %v9219_v36, 0.0 }
 0x79b   :  { %9348 = vst.msk [vmem:[%s17005_s5 + $0x118] sm:$0xff] %vm731_vm3, %v9284_v63  ;;  %v10214_v63 = vld [vmem:[%s17000_s0 + $0x291] sm:$0xff] }
 0x79c   :  { %9347 = vst.msk [vmem:[%s17005_s5 + $0x110] sm:$0xff] %vm731_vm3, %v9283_v49  ;;  %v11185_v50 = vpop.f32.mrb[36].mxu1 }
 0x79d   :  { %v11361_v43 = vadd.f32 %v11185_v50, %v16456_v62  ;;  %v8918_v3 = vpop.f32.mrb[37].mxu1 }
 0x79e   :  { %v11362_v20 = vadd.f32 %v16456_v62, %v8918_v3 }
 0x79f   :  { %v9222_v35 = vadd.f32 %v11361_v43, %v10202_v37  ;;  %v10213_v37 = vld [vmem:[%s17000_s0 + $0x289] sm:$0xff] }
 0x7a0   :  { %v9221_v58 = vadd.f32 %v11362_v20, %v10201_v32 }
 0x7a1   :  { %v9286_v45 = vmax.f32 %v9222_v35, 0.0 }
 0x7a2   :  { %v9285_v2 = vmax.f32 %v9221_v58, 0.0 }
 0x7a3   :  { %9350 = vst.msk [vmem:[%s17005_s5 + $0x128] sm:$0xff] %vm731_vm3, %v9286_v45  ;;  %v10216_v45 = vld [vmem:[%s17000_s0 + $0x2a9] sm:$0xff] }
 0x7a4   :  { %9349 = vst.msk [vmem:[%s17005_s5 + $0x120] sm:$0xff] %vm731_vm3, %v9285_v2  ;;  %v11188_v51 = vpop.f32.mrb[38].mxu1 }
 0x7a5   :  { %v11363_v9 = vadd.f32 %v11188_v51, %v16456_v62  ;;  %v8928_v28 = vpop.f32.mrb[39].mxu1 }
 0x7a6   :  { %v11364_v59 = vadd.f32 %v16456_v62, %v8928_v28 }
 0x7a7   :  { %v9224_v23 = vadd.f32 %v11363_v9, %v10204_v6  ;;  %v10215_v6 = vld [vmem:[%s17000_s0 + $0x2a1] sm:$0xff] }
 0x7a8   :  { %v9223_v30 = vadd.f32 %v11364_v59, %v10203_v0 }
 0x7a9   :  { %v9288_v53 = vmax.f32 %v9224_v23, 0.0 }
 0x7aa   :  { %v9287_v40 = vmax.f32 %v9223_v30, 0.0 }
 0x7ab   :  { %9352 = vst.msk [vmem:[%s17005_s5 + $0x138] sm:$0xff] %vm731_vm3, %v9288_v53  ;;  %v10218_v53 = vld [vmem:[%s17000_s0 + $0x2c1] sm:$0xff] }
 0x7ac   :  { %9351 = vst.msk [vmem:[%s17005_s5 + $0x130] sm:$0xff] %vm731_vm3, %v9287_v40  ;;  %v11191_v5 = vpop.f32.mrb[40].mxu1 }
 0x7ad   :  { %v11365_v1 = vadd.f32 %v11191_v5, %v16456_v62  ;;  %v8938_v10 = vpop.f32.mrb[41].mxu1 }
 0x7ae   :  { %v11366_v52 = vadd.f32 %v16456_v62, %v8938_v10 }
 0x7af   :  { %v9226_v48 = vadd.f32 %v11365_v1, %v10206_v31  ;;  %v10217_v31 = vld [vmem:[%s17000_s0 + $0x2b9] sm:$0xff] }
 0x7b0   :  { %v9225_v14 = vadd.f32 %v11366_v52, %v10205_v19 }
 0x7b1   :  { %v9290_v12 = vmax.f32 %v9226_v48, 0.0 }
 0x7b2   :  { %v9289_v41 = vmax.f32 %v9225_v14, 0.0 }
 0x7b3   :  { %9354 = vst.msk [vmem:[%s17005_s5 + $0x148] sm:$0xff] %vm731_vm3, %v9290_v12  ;;  %v10220_v12 = vld [vmem:[%s17000_s0 + $0x2d9] sm:$0xff] }
 0x7b4   :  { %9353 = vst.msk [vmem:[%s17005_s5 + $0x140] sm:$0xff] %vm731_vm3, %v9289_v41  ;;  %v11194_v34 = vpop.f32.mrb[42].mxu1 }
 0x7b5   :  { %v11367_v46 = vadd.f32 %v11194_v34, %v16456_v62  ;;  %v8948_v21 = vpop.f32.mrb[43].mxu1 }
 0x7b6   :  { %v11368_v4 = vadd.f32 %v16456_v62, %v8948_v21 }
 0x7b7   :  { %v9228_v27 = vadd.f32 %v11367_v46, %v10208_v33  ;;  %v10219_v33 = vld [vmem:[%s17000_s0 + $0x2d1] sm:$0xff] }
 0x7b8   :  { %v9227_v60 = vadd.f32 %v11368_v4, %v10207_v17 }
 0x7b9   :  { %v9292_v26 = vmax.f32 %v9228_v27, 0.0 }
 0x7ba   :  { %v9291_v24 = vmax.f32 %v9227_v60, 0.0 }
 0x7bb   :  { %9356 = vst.msk [vmem:[%s17005_s5 + $0x158] sm:$0xff] %vm731_vm3, %v9292_v26  ;;  %v10222_v26 = vld [vmem:[%s17000_s0 + $0x2f1] sm:$0xff] }
 0x7bc   :  { %9355 = vst.msk [vmem:[%s17005_s5 + $0x150] sm:$0xff] %vm731_vm3, %v9291_v24  ;;  %v11197_v47 = vpop.f32.mrb[44].mxu1 }
 0x7bd   :  { %v11369_v8 = vadd.f32 %v11197_v47, %v16456_v62  ;;  %v8958_v11 = vpop.f32.mrb[45].mxu1 }
 0x7be   :  { %v11370_v13 = vadd.f32 %v16456_v62, %v8958_v11 }
 0x7bf   :  { %v9230_v16 = vadd.f32 %v11369_v8, %v10210_v44  ;;  %v10221_v44 = vld [vmem:[%s17000_s0 + $0x2e9] sm:$0xff] }
 0x7c0   :  { %v9229_v25 = vadd.f32 %v11370_v13, %v10209_v38 }
 0x7c1   :  { %v9294_v42 = vmax.f32 %v9230_v16, 0.0 }
 0x7c2   :  { %v9293_v15 = vmax.f32 %v9229_v25, 0.0 }
 0x7c3   :  { %9358 = vst.msk [vmem:[%s17005_s5 + $0x168] sm:$0xff] %vm731_vm3, %v9294_v42  ;;  %v10224_v42 = vld [vmem:[%s17000_s0 + $0x309] sm:$0xff] }
 0x7c4   :  { %9357 = vst.msk [vmem:[%s17005_s5 + $0x160] sm:$0xff] %vm731_vm3, %v9293_v15  ;;  %v11200_v22 = vpop.f32.mrb[46].mxu1 }
 0x7c5   :  { %v11371_v61 = vadd.f32 %v11200_v22, %v16456_v62  ;;  %v8968_v39 = vpop.f32.mrb[47].mxu1 }
 0x7c6   :  { %v11372_v57 = vadd.f32 %v16456_v62, %v8968_v39 }
 0x7c7   :  { %v9232_v54 = vadd.f32 %v11371_v61, %v10212_v56  ;;  %v10223_v56 = vld [vmem:[%s17000_s0 + $0x301] sm:$0xff] }
 0x7c8   :  { %v9231_v55 = vadd.f32 %v11372_v57, %v10211_v18 }
 0x7c9   :  { %v9296_v7 = vmax.f32 %v9232_v54, 0.0 }
 0x7ca   :  { %v9295_v29 = vmax.f32 %v9231_v55, 0.0 }
 0x7cb   :  { %9360 = vst.msk [vmem:[%s17005_s5 + $0x178] sm:$0xff] %vm731_vm3, %v9296_v7  ;;  %v10226_v7 = vld [vmem:[%s17000_s0 + $0x321] sm:$0xff] }
 0x7cc   :  { %9359 = vst.msk [vmem:[%s17005_s5 + $0x170] sm:$0xff] %vm731_vm3, %v9295_v29  ;;  %v11203_v36 = vpop.f32.mrb[48].mxu1 }
 0x7cd   :  { %v11373_v49 = vadd.f32 %v11203_v36, %v16456_v62  ;;  %v8978_v50 = vpop.f32.mrb[49].mxu1 }
 0x7ce   :  { %v11374_v43 = vadd.f32 %v16456_v62, %v8978_v50 }
 0x7cf   :  { %v9234_v3 = vadd.f32 %v11373_v49, %v10214_v63  ;;  %v10225_v63 = vld [vmem:[%s17000_s0 + $0x319] sm:$0xff] }
 0x7d0   :  { %v9233_v32 = vadd.f32 %v11374_v43, %v10213_v37 }
 0x7d1   :  { %v9298_v20 = vmax.f32 %v9234_v3, 0.0 }
 0x7d2   :  { %v9297_v35 = vmax.f32 %v9233_v32, 0.0 }
 0x7d3   :  { %9362 = vst.msk [vmem:[%s17005_s5 + $0x188] sm:$0xff] %vm731_vm3, %v9298_v20  ;;  %v10228_v20 = vld [vmem:[%s17000_s0 + $0x339] sm:$0xff] }
 0x7d4   :  { %9361 = vst.msk [vmem:[%s17005_s5 + $0x180] sm:$0xff] %vm731_vm3, %v9297_v35  ;;  %v11206_v58 = vpop.f32.mrb[50].mxu1 }
 0x7d5   :  { %v11375_v2 = vadd.f32 %v11206_v58, %v16456_v62  ;;  %v8988_v51 = vpop.f32.mrb[51].mxu1 }
 0x7d6   :  { %v11376_v9 = vadd.f32 %v16456_v62, %v8988_v51 }
 0x7d7   :  { %v9236_v28 = vadd.f32 %v11375_v2, %v10216_v45  ;;  %v10227_v45 = vld [vmem:[%s17000_s0 + $0x331] sm:$0xff] }
 0x7d8   :  { %v9235_v0 = vadd.f32 %v11376_v9, %v10215_v6 }
 0x7d9   :  { %v9300_v59 = vmax.f32 %v9236_v28, 0.0 }
 0x7da   :  { %v9299_v23 = vmax.f32 %v9235_v0, 0.0 }
 0x7db   :  { %9364 = vst.msk [vmem:[%s17005_s5 + $0x198] sm:$0xff] %vm731_vm3, %v9300_v59 }
 0x7dc   :  { %9363 = vst.msk [vmem:[%s17005_s5 + $0x190] sm:$0xff] %vm731_vm3, %v9299_v23  ;;  %v11209_v30 = vpop.f32.mrb[52].mxu1 }
 0x7dd   :  { %v11377_v40 = vadd.f32 %v11209_v30, %v16456_v62  ;;  %v8998_v5 = vpop.f32.mrb[53].mxu1 }
 0x7de   :  { %v11378_v1 = vadd.f32 %v16456_v62, %v8998_v5 }
 0x7df   :  { %v9238_v10 = vadd.f32 %v11377_v40, %v10218_v53 }
 0x7e0   :  { %v9237_v19 = vadd.f32 %v11378_v1, %v10217_v31 }
 0x7e1   :  { %v9302_v52 = vmax.f32 %v9238_v10, 0.0 }
 0x7e2   :  { %v9301_v48 = vmax.f32 %v9237_v19, 0.0 }
 0x7e3   :  { %9366 = vst.msk [vmem:[%s17005_s5 + $0x1a8] sm:$0xff] %vm731_vm3, %v9302_v52 }
 0x7e4   :  { %9365 = vst.msk [vmem:[%s17005_s5 + $0x1a0] sm:$0xff] %vm731_vm3, %v9301_v48  ;;  %v11212_v14 = vpop.f32.mrb[54].mxu1 }
 0x7e5   :  { %v11379_v41 = vadd.f32 %v11212_v14, %v16456_v62  ;;  %v9008_v34 = vpop.f32.mrb[55].mxu1 }
 0x7e6   :  { %v11380_v46 = vadd.f32 %v16456_v62, %v9008_v34 }
 0x7e7   :  { %v9240_v21 = vadd.f32 %v11379_v41, %v10220_v12 }
 0x7e8   :  { %v9239_v17 = vadd.f32 %v11380_v46, %v10219_v33 }
 0x7e9   :  { %v9304_v4 = vmax.f32 %v9240_v21, 0.0 }
 0x7ea   :  { %v9303_v27 = vmax.f32 %v9239_v17, 0.0 }
 0x7eb   :  { %9368 = vst.msk [vmem:[%s17005_s5 + $0x1b8] sm:$0xff] %vm731_vm3, %v9304_v4 }
 0x7ec   :  { %9367 = vst.msk [vmem:[%s17005_s5 + $0x1b0] sm:$0xff] %vm731_vm3, %v9303_v27  ;;  %v11215_v60 = vpop.f32.mrb[56].mxu1 }
 0x7ed   :  { %v11381_v24 = vadd.f32 %v11215_v60, %v16456_v62  ;;  %v9018_v47 = vpop.f32.mrb[57].mxu1 }
 0x7ee   :  { %v11382_v8 = vadd.f32 %v16456_v62, %v9018_v47 }
 0x7ef   :  { %v9242_v11 = vadd.f32 %v11381_v24, %v10222_v26 }
 0x7f0   :  { %v9241_v38 = vadd.f32 %v11382_v8, %v10221_v44 }
 0x7f1   :  { %v9306_v13 = vmax.f32 %v9242_v11, 0.0 }
 0x7f2   :  { %v9305_v16 = vmax.f32 %v9241_v38, 0.0 }
 0x7f3   :  { %9370 = vst.msk [vmem:[%s17005_s5 + $0x1c8] sm:$0xff] %vm731_vm3, %v9306_v13 }
 0x7f4   :  { %9369 = vst.msk [vmem:[%s17005_s5 + $0x1c0] sm:$0xff] %vm731_vm3, %v9305_v16  ;;  %v11218_v25 = vpop.f32.mrb[58].mxu1 }
 0x7f5   :  { %v11383_v15 = vadd.f32 %v11218_v25, %v16456_v62  ;;  %v9028_v22 = vpop.f32.mrb[59].mxu1 }
 0x7f6   :  { %v11384_v61 = vadd.f32 %v16456_v62, %v9028_v22 }
 0x7f7   :  { %v9244_v39 = vadd.f32 %v11383_v15, %v10224_v42 }
 0x7f8   :  { %v9243_v18 = vadd.f32 %v11384_v61, %v10223_v56 }
 0x7f9   :  { %v9308_v57 = vmax.f32 %v9244_v39, 0.0 }
 0x7fa   :  { %v9307_v54 = vmax.f32 %v9243_v18, 0.0 }
 0x7fb   :  { %9372 = vst.msk [vmem:[%s17005_s5 + $0x1d8] sm:$0xff] %vm731_vm3, %v9308_v57 }
 0x7fc   :  { %9371 = vst.msk [vmem:[%s17005_s5 + $0x1d0] sm:$0xff] %vm731_vm3, %v9307_v54  ;;  %v11221_v55 = vpop.f32.mrb[60].mxu1 }
 0x7fd   :  { %v11385_v29 = vadd.f32 %v11221_v55, %v16456_v62  ;;  %v9038_v36 = vpop.f32.mrb[61].mxu1 }
 0x7fe   :  { %v11386_v49 = vadd.f32 %v16456_v62, %v9038_v36 }
 0x7ff   :  { %v9246_v50 = vadd.f32 %v11385_v29, %v10226_v7 }
 0x800   :  { %v9245_v37 = vadd.f32 %v11386_v49, %v10225_v63 }
 0x801   :  { %v9310_v43 = vmax.f32 %v9246_v50, 0.0 }
 0x802   :  { %v9309_v3 = vmax.f32 %v9245_v37, 0.0 }
 0x803   :  { %9374 = vst.msk [vmem:[%s17005_s5 + $0x1e8] sm:$0xff] %vm731_vm3, %v9310_v43 }
 0x804   :  { %9373 = vst.msk [vmem:[%s17005_s5 + $0x1e0] sm:$0xff] %vm731_vm3, %v9309_v3  ;;  %v11224_v32 = vpop.f32.mrb[62].mxu1 }
 0x805   :  { %v11387_v35 = vadd.f32 %v11224_v32, %v16456_v62  ;;  %v9048_v58 = vpop.f32.mrb[63].mxu1 }
 0x806   :  { %v11388_v2 = vadd.f32 %v16456_v62, %v9048_v58 }
 0x807   :  { %v9248_v51 = vadd.f32 %v11387_v35, %v10228_v20 }
 0x808   :  { %v9247_v6 = vadd.f32 %v11388_v2, %v10227_v45 }
 0x809   :  { %v9312_v9 = vmax.f32 %v9248_v51, 0.0 }
 0x80a   :  { %v9311_v28 = vmax.f32 %v9247_v6, 0.0 }
 0x80b   :  { %9376 = vst.msk [vmem:[%s17005_s5 + $0x1f8] sm:$0xff] %vm731_vm3, %v9312_v9 }
 0x80c   :  { %9375 = vst.msk [vmem:[%s17005_s5 + $0x1f0] sm:$0xff] %vm731_vm3, %v9311_v28 }

</bundles_post_ra>
